<compile_context>
chip_gen: v7x
topology: tpu7x:2x2x1
jax: 0.10.0
libtpu: 0.0.40
codegen_flags: <defaults>
</compile_context>

<pallas_src>
import jax
import jax.numpy as jnp
from jax.experimental import pallas as pl
from jax.experimental.pallas import tpu as pltpu


HIDDEN = 32          # 'n_neurons': 32
N_HIDDEN_LAYERS = 2  # 'n_hidden_layers': 2
IN_DIM = 2           # tcnn.Network(2, ...)


def siren_kernel(xT_ref, w1t_ref, w2t_ref, w3_ref, o_ref):
    """Feature-major fused SIREN MLP.

    xT_ref : (IN_DIM, T)  f32   coordinates, lane axis = points
    w1t_ref: (HIDDEN, IN_DIM)   layer-1 weight, transposed
    w2t_ref: (HIDDEN, HIDDEN)   layer-2 weight, transposed (out, in)
    w3_ref : (HIDDEN, n_out)    layer-3 weight
    o_ref  : (n_out, T)   f32   output, lane axis = points
    """
    x0 = xT_ref[0:1, :]                       # (1, T)
    x1 = xT_ref[1:2, :]                       # (1, T)
    w1t = w1t_ref[...]                        # (HIDDEN, IN_DIM)

    # Layer 1 (K=2): VPU outer-product MAC instead of a degenerate MXU matmul.
    h = jnp.sin(w1t[:, 0:1] * x0 + w1t[:, 1:2] * x1)           # (HIDDEN, T)

    # Layer 2: 32x32 MXU matmul with a lane-dense (HIDDEN, T) result.
    h = jnp.sin(jnp.dot(w2t_ref[...], h,
                        preferred_element_type=jnp.float32))   # (HIDDEN, T)

    # Layer 3: for n_out == 1, broadcast-multiply + sublane reduce (VPU+XLU)
    # instead of an N=1 MXU matmul; otherwise a small dot_general.
    n_out = o_ref.shape[0]
    if n_out == 1:
        o_ref[...] = jnp.sum(w3_ref[...] * h, axis=0, keepdims=True)
    else:
        o_ref[...] = jax.lax.dot_general(
            w3_ref[...], h, (((0,), (0,)), ((), ())),
            preferred_element_type=jnp.float32)


def siren_forward(x, w1, w2, w3, *, tile=8192):
    """Fused MLP forward. x: [N, 2] f32 -> [N, n_out] f32."""
    N, in_dim = x.shape
    assert in_dim == IN_DIM
    n_out = w3.shape[1]

    # Lane tile: multiple of 128, large for pipeline efficiency, but no larger
    # than the (128-rounded) problem size so small inputs are not over-padded.
    tile = max(128, (tile // 128) * 128)
    tile = min(tile, pl.cdiv(N, 128) * 128)
    n_pad = pl.cdiv(N, tile) * tile
    grid = (n_pad // tile,)

    # Feature-major layout: one transpose + zero pad in the wrapper so the
    # kernel only ever touches lane-dense [features, points] blocks.
    xT = jnp.pad(x, ((0, n_pad - N), (0, 0))).T        # (IN_DIM, n_pad)
    w1t = w1.T                                         # (HIDDEN, IN_DIM)
    w2t = w2.T                                         # (HIDDEN, HIDDEN)

    cost = pl.CostEstimate(
        flops=2 * n_pad * (IN_DIM * HIDDEN + HIDDEN * HIDDEN + HIDDEN * n_out),
        transcendentals=2 * HIDDEN * n_pad,
        bytes_accessed=4 * (n_pad * (IN_DIM + n_out)
                            + IN_DIM * HIDDEN + HIDDEN * HIDDEN
                            + HIDDEN * n_out),
    )

    outT = pl.pallas_call(
        siren_kernel,
        out_shape=jax.ShapeDtypeStruct((n_out, n_pad), jnp.float32),
        grid_spec=pltpu.PrefetchScalarGridSpec(
            num_scalar_prefetch=0,
            grid=grid,
            in_specs=[
                pl.BlockSpec((IN_DIM, tile), lambda i: (0, i)),    # x (lane-dense)
                pl.BlockSpec((HIDDEN, IN_DIM), lambda i: (0, 0)),  # w1^T (full)
                pl.BlockSpec((HIDDEN, HIDDEN), lambda i: (0, 0)),  # w2^T (full)
                pl.BlockSpec((HIDDEN, n_out), lambda i: (0, 0)),   # w3   (full)
            ],
            out_specs=pl.BlockSpec((n_out, tile), lambda i: (0, i)),
        ),
        compiler_params=pltpu.CompilerParams(
            dimension_semantics=("parallel",),   # shards grid across TCs on v7x
        ),
        cost_estimate=cost,
    )(xT, w1t, w2t, w3)

    # Back to the PyTorch forward's [N, n_channels] float32 layout.
    return outT[:, :N].T


def init_params(key, n_channels=1):
    """Deterministic SIREN-style init (uniform; no biases, matching tcnn CutlassMLP)."""
    k1, k2, k3 = jax.random.split(key, 3)
    w1 = jax.random.uniform(k1, (IN_DIM, HIDDEN), jnp.float32,
                            minval=-1.0 / IN_DIM, maxval=1.0 / IN_DIM)
    bound = (6.0 / HIDDEN) ** 0.5
    w2 = jax.random.uniform(k2, (HIDDEN, HIDDEN), jnp.float32,
                            minval=-bound, maxval=bound)
    w3 = jax.random.uniform(k3, (HIDDEN, n_channels), jnp.float32,
                            minval=-bound, maxval=bound)
    return w1, w2, w3


def reference_forward(x, w1, w2, w3):
    p = jax.lax.Precision.HIGHEST
    h = jnp.sin(jnp.dot(x, w1, precision=p))
    h = jnp.sin(jnp.dot(h, w2, precision=p))
    return jnp.dot(h, w3, precision=p)


if __name__ == "__main__":
    key = jax.random.PRNGKey(0)
    kx, kp = jax.random.split(key)

    # Small, non-128-divisible batch of 2-D coordinates exercises the
    # pl.cdiv + padding path.
    N = 1000
    x = jax.random.uniform(kx, (N, IN_DIM), jnp.float32, minval=-1.0, maxval=1.0)

    # n_channels=1 exercises the VPU+XLU output path, n_channels=3 the dot path.
    for n_channels in (1, 3):
        w1, w2, w3 = init_params(jax.random.fold_in(kp, n_channels),
                                 n_channels=n_channels)
        out = jax.block_until_ready(siren_forward(x, w1, w2, w3))
        ref = reference_forward(x, w1, w2, w3)
        assert out.shape == (N, n_channels)
        assert out.dtype == jnp.float32
        assert jnp.allclose(out, ref, atol=1e-4, rtol=1e-4)

    # TODO(synk): optimizer / loss (Adam, mse_loss) are training-side utilities,
    # not part of the forward pass, so they are not implemented as kernels.
    print("KERNEL_OK")
</pallas_src>

<mosaic_0001>
module attributes {stable_mosaic.version = 11 : i64} {
  func.func @siren_kernel(%arg0: i32, %arg1: memref<2x1024xf32, #tpu.memory_space<vmem>>, %arg2: memref<32x2xf32, #tpu.memory_space<vmem>>, %arg3: memref<32x32xf32, #tpu.memory_space<vmem>>, %arg4: memref<32x1xf32, #tpu.memory_space<vmem>>, %arg5: memref<1x1024xf32, #tpu.memory_space<vmem>>) attributes {dimension_semantics = [#tpu.dimension_semantics<parallel>], iteration_bounds = array<i64: 1>, scalar_prefetch = 0 : i64, scratch_operands = 0 : i64, tpu.core_type = #tpu.core_type<tc>, window_params = [{transform_indices = @transform_0, window_bounds = array<i64: 2, 1024>}, {pipeline_mode = #tpu.pipeline_mode<synchronous>, transform_indices = @transform_1, window_bounds = array<i64: 32, 2>}, {pipeline_mode = #tpu.pipeline_mode<synchronous>, transform_indices = @transform_2, window_bounds = array<i64: 32, 32>}, {pipeline_mode = #tpu.pipeline_mode<synchronous>, transform_indices = @transform_3, window_bounds = array<i64: 32, 1>}, {transform_indices = @transform_4, window_bounds = array<i64: 1, 1024>}]} {
    %c0 = arith.constant 0 : index
    %c0_0 = arith.constant 0 : index
    %0 = vector.load %arg1[%c0, %c0_0] : memref<2x1024xf32, #tpu.memory_space<vmem>>, vector<1x1024xf32>
    %c1 = arith.constant 1 : index
    %c0_1 = arith.constant 0 : index
    %1 = vector.load %arg1[%c1, %c0_1] : memref<2x1024xf32, #tpu.memory_space<vmem>>, vector<1x1024xf32>
    %c0_2 = arith.constant 0 : index
    %c0_3 = arith.constant 0 : index
    %2 = vector.load %arg2[%c0_2, %c0_3] : memref<32x2xf32, #tpu.memory_space<vmem>>, vector<32x2xf32>
    %3 = vector.extract_strided_slice %2 {offsets = [0, 0], sizes = [32, 1], strides = [1, 1]} : vector<32x2xf32> to vector<32x1xf32>
    %4 = vector.broadcast %3 : vector<32x1xf32> to vector<32x1024xf32>
    %5 = vector.broadcast %0 : vector<1x1024xf32> to vector<32x1024xf32>
    %6 = arith.mulf %4, %5 : vector<32x1024xf32>
    %7 = vector.extract_strided_slice %2 {offsets = [0, 1], sizes = [32, 1], strides = [1, 1]} : vector<32x2xf32> to vector<32x1xf32>
    %8 = vector.broadcast %7 : vector<32x1xf32> to vector<32x1024xf32>
    %9 = vector.broadcast %1 : vector<1x1024xf32> to vector<32x1024xf32>
    %10 = arith.mulf %8, %9 : vector<32x1024xf32>
    %11 = arith.addf %6, %10 : vector<32x1024xf32>
    %12 = math.sin %11 : vector<32x1024xf32>
    %c0_4 = arith.constant 0 : index
    %c0_5 = arith.constant 0 : index
    %13 = vector.load %arg3[%c0_4, %c0_5] : memref<32x32xf32, #tpu.memory_space<vmem>>, vector<32x32xf32>
    %cst = arith.constant dense<0.000000e+00> : vector<32x1024xf32>
    %14 = tpu.matmul %13, %12, %cst {dimension_numbers = #tpu.dot_dimension_numbers<[1], [0], [0], [1], [0, 0, 1, 1], [], []>} : vector<32x32xf32>, vector<32x1024xf32>, vector<32x1024xf32> -> vector<32x1024xf32>
    %15 = math.sin %14 : vector<32x1024xf32>
    %c0_6 = arith.constant 0 : index
    %c0_7 = arith.constant 0 : index
    %16 = vector.load %arg4[%c0_6, %c0_7] : memref<32x1xf32, #tpu.memory_space<vmem>>, vector<32x1xf32>
    %17 = vector.broadcast %16 : vector<32x1xf32> to vector<32x1024xf32>
    %18 = arith.mulf %17, %15 : vector<32x1024xf32>
    %cst_8 = arith.constant dense<0.000000e+00> : vector<1024xf32>
    %19 = vector.multi_reduction <add>, %18, %cst_8 [0] : vector<32x1024xf32> to vector<1024xf32>
    %20 = vector.shape_cast %19 : vector<1024xf32> to vector<1x1024xf32>
    %c0_9 = arith.constant 0 : index
    %c0_10 = arith.constant 0 : index
    %21 = vector.load %arg5[%c0_9, %c0_10] : memref<1x1024xf32, #tpu.memory_space<vmem>>, vector<1x1024xf32>
    tpu.vector_store %arg5[%c0_9, %c0_10], %20 {strides = array<i32>} : memref<1x1024xf32, #tpu.memory_space<vmem>>, vector<1x1024xf32>,
    return
  }
  func.func @transform_0(%arg0: i32) -> (i32, i32) {
    %c0_i32 = arith.constant 0 : i32
    %c0_i32_0 = arith.constant 0 : i32
    return %c0_i32, %arg0 : i32, i32
  }
  func.func @transform_1(%arg0: i32) -> (i32, i32) {
    %c0_i32 = arith.constant 0 : i32
    %c0_i32_0 = arith.constant 0 : i32
    %c0_i32_1 = arith.constant 0 : i32
    return %c0_i32, %c0_i32_0 : i32, i32
  }
  func.func @transform_2(%arg0: i32) -> (i32, i32) {
    %c0_i32 = arith.constant 0 : i32
    %c0_i32_0 = arith.constant 0 : i32
    %c0_i32_1 = arith.constant 0 : i32
    return %c0_i32, %c0_i32_0 : i32, i32
  }
  func.func @transform_3(%arg0: i32) -> (i32, i32) {
    %c0_i32 = arith.constant 0 : i32
    %c0_i32_0 = arith.constant 0 : i32
    %c0_i32_1 = arith.constant 0 : i32
    return %c0_i32, %c0_i32_0 : i32, i32
  }
  func.func @transform_4(%arg0: i32) -> (i32, i32) {
    %c0_i32 = arith.constant 0 : i32
    %c0_i32_0 = arith.constant 0 : i32
    return %c0_i32, %arg0 : i32, i32
  }
}

</mosaic_0001>

<bundles_post_ra>
// kernel: tpu_custom_call.1
= control target key start
LH: loop header
LB: loop body
LE: loop exit
PB: predicated region body
PF: predicated region fallthrough
CT: control target
= control target key end

     0   :  { %v8333_v1 = vmov 1   ;;  %v8334_v2 = vmov 0   ;;  %s15384_s0 = inlined_call_operand.vmem [shape: f32[2,1024], index: 0, kind: input, shape index: {}]   ;;  %s15385_s1 = inlined_call_operand.vmem [shape: f32[32,2], index: 1, kind: input, shape index: {}]   ;;  %s15386_s2 = inlined_call_operand.vmem [shape: f32[32,32], index: 2, kind: input, shape index: {}]   ;;  %s15387_s3 = inlined_call_operand.vmem [shape: f32[32,1], index: 3, kind: input, shape index: {}]   ;;  %s15388_s4 = inlined_call_operand.hbm [shape: f32[1,1024], index: 4, kind: output, shape index: {}]  }
   0x1   :  { %v21_v0 = vld [vmem:[%s15385_s1] sm:$0xff]  ;;  %8042 = vset.pattern.permute.xlu1 %v8333_v1  ;;  %8041 = vset.pattern.permute.xlu0 %v8334_v2 }
   0x2   :  { %119 = vperm.xlu1 %8042, %v21_v0   ;;  %27 = vperm.xlu0 %8041, %v21_v0  }
   0x3   :  { %9 = vsyncpa [#allocation3], 0  ;;  %v22_v3 = vld [vmem:[%s15385_s1 + $0x8] sm:$0xff]  ;;  %v23_v4 = vld [vmem:[%s15385_s1 + $0x10] sm:$0xff]  ;;  %v46_v6 = vlaneseq }
   0x4   :  { %v24_v5 = vld [vmem:[%s15385_s1 + $0x18] sm:$0xff]  ;;  %v8388_v10 = vld [vmem:[%s15384_s0 + $0x1] ss:$2 sm:$0xff]  ;;  %v8393_v11 = vld [vmem:[%s15384_s0] ss:$2 sm:$0xff] }
   0x5   :  { %v8381_v7 = vshrl.u32 %v46_v6, 7 }
   0x6   :  { %123 = vperm.xlu1 %8042, %v22_v3   ;;  %32 = vperm.xlu0 %8041, %v22_v3  }
   0x7   :  { %15494 = vst [vmem:[#allocation5_spill] sm:$0xff] %v8381_v7  ;;  %v64_v8 = vsub.s32 4, %v8381_v7  ;;  %v72_v9 = vsub.s32 6, %v8381_v7  ;;  %v15390_v26 = vsub.s32 5, %v8381_v7  ;;  %v15389_v29 = vsub.s32 7, %v8381_v7 }
   0x8   :  { %v52_v36 = vsub.s32 1, %v8381_v7 }
   0x9   :  { %v154_v12 = vrot.slane %v8388_v10, %v64_v8  ;;  %v162_v13 = vrot.slane %v8388_v10, %v72_v9  ;;  %v65_v14 = vrot.slane %v8393_v11, %v64_v8  ;;  %v73_v15 = vrot.slane %v8393_v11, %v72_v9 }
   0xa   :  { %8043 = vset.pattern.permute.xlu1 %v8334_v2  ;;  %37 = vperm.xlu0 %8041, %v23_v4   ;;  %v8428_v34 = vrot.slane %v8393_v11, %v15390_v26  ;;  %v8436_v37 = vrot.slane %v8393_v11, %v15389_v29  ;;  %v8451_v43 = vrot.slane %v8393_v11, %v52_v36  ;;  %v60_v8 = vsub.s32 3, %v8381_v7 }
   0xb   :  { %42 = vperm.xlu1 %8043, %v24_v5   ;;  %v8454_v44 = vrot.slane %v8388_v10, %v52_v36 }
   0xe   :  { %8044 = vset.pattern.permute.xlu0 %v8333_v1 }
   0xf   :  { %8045 = vset.pattern.permute.xlu1 %v8333_v1  ;;  %127 = vperm.xlu0 %8044, %v23_v4  }
  0x10   :  { %131 = vperm.xlu1 %8045, %v24_v5  }
  0x13   :  { %8047 = vset.pattern.permute.xlu0 %v8334_v2 }
  0x14   :  { %8046 = vset.pattern.permute.xlu1 %v8334_v2 }
  0x81   :  { %v8399_v16 = vpop.permute.xlu1 %119  ;;  %v8401_v17 = vpop.permute.xlu0 %27 }
  0x82   :  { %v179_v18 = vmul.f32 %v154_v12, %v8399_v16  ;;  %v181_v19 = vmul.f32 %v162_v13, %v8399_v16  ;;  %v90_v20 = vmul.f32 %v65_v14, %v8401_v17  ;;  %v92_v21 = vmul.f32 %v73_v15, %v8401_v17 }
  0x83   :  { %v87_v50 = vmul.f32 %v8451_v43, %v8401_v17  ;;  %v176_v51 = vmul.f32 %v8454_v44, %v8399_v16 }
  0x84   :  { %v8407_v22 = vadd.f32 %v179_v18, %v90_v20  ;;  %v8409_v23 = vadd.f32 %v181_v19, %v92_v21  ;;  %v8504_v19 = vrot.slane %v8393_v11, %v60_v8  ;;  %v8507_v21 = vrot.slane %v8388_v10, %v60_v8 }
  0x85   :  { %v8411_v24 = vpop.permute.xlu1 %123  ;;  %v8413_v25 = vpop.permute.xlu0 %32  ;;  %v8482_v58 = vadd.f32 %v176_v51, %v87_v50  ;;  %v15395_v50 = vmov 2131351028  }
  0x86   :  { %15495 = vst [vmem:[#allocation6_spill] sm:$0xff] %v8407_v22  ;;  %15496 = vst [vmem:[#allocation7_spill] sm:$0xff] %v8409_v23  ;;  %v187_v27 = vmul.f32 %v154_v12, %v8411_v24  ;;  %v189_v28 = vmul.f32 %v162_v13, %v8411_v24  ;;  %v98_v30 = vmul.f32 %v65_v14, %v8413_v25 }
  0x87   :  { %v100_v31 = vmul.f32 %v73_v15, %v8413_v25  ;;  %v95_v56 = vmul.f32 %v8451_v43, %v8413_v25  ;;  %v184_v57 = vmul.f32 %v8454_v44, %v8411_v24  ;;  %v15392_v1 = vand.u32 2147483647, %v8482_v58  ;;  %15509 = vst [vmem:[#allocation20_spill] sm:$0xff] %v8504_v19 }
  0x88   :  { %v8421_v32 = vadd.f32 %v187_v27, %v98_v30  ;;  %v346_v2 = vand.u32 2139095040, %v8482_v58  ;;  %vm345_vm12 = vcmp.lt.s32.totalorder %v8482_v58, 0 }
  0x89   :  { %v8423_v33 = vpop.permute.xlu0 %37  ;;  %v8430_v35 = vadd.f32 %v189_v28, %v100_v31  ;;  %v8492_v0 = vadd.f32 %v184_v57, %v95_v56  ;;  %v350_v5 = vand.u32 8388607, %v15392_v1 }
  0x8a   :  { %15497 = vst [vmem:[#allocation8_spill] sm:$0xff] %v8421_v32  ;;  %v106_v38 = vmul.f32 %v65_v14, %v8423_v33  ;;  %v8441_v39 = vmul.f32 %v8428_v34, %v8423_v33  ;;  %v108_v40 = vmul.f32 %v73_v15, %v8423_v33  ;;  %v8446_v41 = vmul.f32 %v8436_v37, %v8423_v33  ;;  %v8448_v42 = vpop.permute.xlu1 %42 }
  0x8b   :  { %15498 = vst [vmem:[#allocation9_spill] sm:$0xff] %v8430_v35  ;;  %v114_v45 = vmul.f32 %v65_v14, %v8448_v42  ;;  %v8459_v46 = vmul.f32 %v8428_v34, %v8448_v42  ;;  %v116_v48 = vmul.f32 %v73_v15, %v8448_v42  ;;  %v8466_v49 = vmul.f32 %v8436_v37, %v8448_v42 }
  0x8c   :  { %15499 = vst [vmem:[#allocation10_spill] sm:$0xff] %v8441_v39  ;;  %15500 = vst [vmem:[#allocation11_spill] sm:$0xff] %v8446_v41  ;;  %v347_v3 = vshrl.u32 %v346_v2, 23  ;;  %v15391_v6 = vand.u32 2147483647, %v8492_v0 }
  0x8d   :  { %15501 = vst [vmem:[#allocation12_spill] sm:$0xff] %v8459_v46  ;;  %15503 = vst [vmem:[#allocation14_spill] sm:$0xff] %v8466_v49 }
  0x8e   :  { %v8461_v47 = vpop.permute.xlu0 %127  ;;  %v7474_v4 = vadd.s32 4294967169, %v347_v3  ;;  %v1182_v14 = vand.u32 8388607, %v15391_v6 }
  0x8f   :  { %15502 = vst [vmem:[#allocation13_spill] sm:$0xff] %v8461_v47  ;;  %v195_v52 = vmul.f32 %v154_v12, %v8461_v47  ;;  %v8473_v53 = vpop.permute.xlu1 %131  ;;  %v197_v54 = vmul.f32 %v162_v13, %v8461_v47 }
  0x90   :  { %15504 = vst [vmem:[#allocation15_spill] sm:$0xff] %v8473_v53  ;;  %v203_v60 = vmul.f32 %v154_v12, %v8473_v53  ;;  %v205_v61 = vmul.f32 %v162_v13, %v8473_v53  ;;  %v353_v9 = vadd.s32 1, %v7474_v4  ;;  %v1178_v12 = vand.u32 2139095040, %v8492_v0 }
  0x91   :  { %v8476_v55 = vadd.f32 %v195_v52, %v106_v38  ;;  %v8484_v59 = vadd.f32 %v197_v54, %v108_v40  ;;  %v351_v13 = vor.u32 8388608, %v350_v5  ;;  %v1183_v36 = vor.u32 8388608, %v1182_v14 }
  0x92   :  { %v8488_v62 = vadd.f32 %v203_v60, %v114_v45  ;;  %v8490_v63 = vadd.f32 %v205_v61, %v116_v48  ;;  %vm354_vm0 = vcmp.gt.s32.totalorder %v353_v9, 0  ;;  %v1179_v18 = vshrl.u32 %v1178_v12, 23 }
  0x93   :  { %15505 = vst [vmem:[#allocation16_spill] sm:$0xff] %v8476_v55  ;;  %15506 = vst [vmem:[#allocation17_spill] sm:$0xff] %v8484_v59  ;;  %v355_v15 = vsel %vm354_vm0, %v353_v9, 0  ;;  %v8509_v30 = vshll.u32 %v351_v13, 8  ;;  %v15403_v38 = vmov 683565275  }
  0x94   :  { %15507 = vst [vmem:[#allocation18_spill] sm:$0xff] %v8488_v62  ;;  %15508 = vst [vmem:[#allocation19_spill] sm:$0xff] %v8490_v63  ;;  %v357_v20 = vand.u32 31, %v355_v15  ;;  %v356_v27 = vshrl.u32 %v355_v15, 5  ;;  %v7506_v31 = vadd.s32 4294967169, %v1179_v18  ;;  %vm1177_vm0 = vcmp.lt.s32.totalorder %v8492_v0, 0 }
  0x95   :  { %v15401_v45 = vmov 2475754826   ;;  %v15393_v52 = vmov 2102212464   ;;  %v15397_v61 = vmov 920167782  }
  0x96   :  { %v358_v28 = vsub.s32 32, %v357_v20  ;;  %v360_v40 = vshll.u32 %v15403_v38, %v357_v20  ;;  %v363_v48 = vshll.u32 %v15401_v45, %v357_v20  ;;  %v366_v51 = vshll.u32 %v15395_v50, %v357_v20 }
  0x97   :  { %v369_v54 = vshll.u32 %v15393_v52, %v357_v20  ;;  %v372_v2 = vshll.u32 %v15397_v61, %v357_v20  ;;  %v15399_v5 = vmov 1326507024   ;;  %vm375_vm1 = vcmp.lt.s32.totalorder %v356_v27, 1 }
  0x98   :  { %v361_v56 = vshrl.u32 %v15401_v45, %v358_v28  ;;  %v364_v57 = vshrl.u32 %v15395_v50, %v358_v28  ;;  %v367_v60 = vshrl.u32 %v15393_v52, %v358_v28  ;;  %v359_v3 = vshrl.u32 %v15403_v38, %v358_v28 }
  0x99   :  { %v370_v4 = vshrl.u32 %v15397_v61, %v358_v28  ;;  %v373_v8 = vshrl.u32 %v15399_v5, %v358_v28  ;;  %vm377_vm2 = vcmp.lt.s32.totalorder %v356_v27, 3  ;;  %vm378_vm3 = vcmp.lt.s32.totalorder %v356_v27, 4 }
  0x9a   :  { %v362_v9 = vor.u32 %v361_v56, %v360_v40  ;;  %v365_v12 = vor.u32 %v364_v57, %v363_v48  ;;  %v368_v13 = vor.u32 %v367_v60, %v366_v51  ;;  %v1185_v18 = vadd.s32 1, %v7506_v31 }
  0x9b   :  { %v371_v14 = vor.u32 %v370_v4, %v369_v54  ;;  %v374_v15 = vor.u32 %v373_v8, %v372_v2  ;;  %vm376_vm5 = vcmp.lt.s32.totalorder %v356_v27, 2  ;;  %v8532_v27 = vshll.u32 %v1183_v36, 8 }
  0x9c   :  { %v379_v29 = vsel %vm375_vm1, %v359_v3, %v362_v9  ;;  %v380_v26 = vsel %vm378_vm3, %v368_v13, 2102212464  ;;  %v383_v6 = vsel %vm375_vm1, %v362_v9, %v365_v12  ;;  %v387_v20 = vsel %vm375_vm1, %v365_v12, %v368_v13 }
  0x9d   :  { %v381_v1 = vsel %vm377_vm2, %v365_v12, %v380_v26  ;;  %v384_v52 = vsel %vm378_vm3, %v371_v14, 920167782  ;;  %v388_v50 = vsel %vm378_vm3, %v374_v15, 1326507024  ;;  %vm1186_vm4 = vcmp.gt.s32.totalorder %v1185_v18, 0 }
  0x9e   :  { %v385_v61 = vsel %vm377_vm2, %v368_v13, %v384_v52  ;;  %v389_v28 = vsel %vm377_vm2, %v371_v14, %v388_v50  ;;  %v1187_v5 = vsel %vm1186_vm4, %v1185_v18, 0  ;;  %v382_v40 = vsel %vm376_vm5, %v379_v29, %v381_v1 }
  0x9f   :  { %v386_v48 = vsel %vm376_vm5, %v383_v6, %v385_v61  ;;  %v390_v51 = vsel %vm376_vm5, %v387_v20, %v389_v28  ;;  %v1188_v56 = vshrl.u32 %v1187_v5, 5  ;;  %v1189_v26 = vand.u32 31, %v1187_v5 }
  0xa0   :  { %v8523_v54 = vmul.u32.u64.low %v8509_v30, %v390_v51  ;;  %v8524_v57 = vmul.u32.u64.high %v8509_v30, %v390_v51, %v8523_v54  ;;  %v8527_v31 = vmul.u32.u64.low %v8509_v30, %v386_v48  ;;  %v8528_v60 = vmul.u32.u64.high %v8509_v30, %v386_v48, %v8527_v31 }
  0xa1   :  { %v398_v2 = vmul.u32 %v8509_v30, %v382_v40  ;;  %v89_v29 = vmul.f32 %v8504_v19, %v8401_v17  ;;  %v178_v1 = vmul.f32 %v8507_v21, %v8399_v16  ;;  %v1190_v6 = vsub.s32 32, %v1189_v26 }
  0xa2   :  { %v1192_v50 = vshll.u32 %v15403_v38, %v1189_v26  ;;  %vm1207_vm6 = vcmp.lt.s32.totalorder %v1188_v56, 1  ;;  %vm1208_vm7 = vcmp.lt.s32.totalorder %v1188_v56, 2  ;;  %vm400_vm8 = vc.u32 %v8524_v57, %v8527_v31 }
  0xa3   :  { %v401_v52 = vadd.s32 1, %v8528_v60  ;;  %v1195_v30 = vshll.u32 %v15401_v45, %v1189_v26  ;;  %v15510_v36 = vmov 2131351028   ;;  %v1193_v3 = vshrl.u32 %v15401_v45, %v1190_v6 }
  0xa4   :  { %v1198_v61 = vshll.u32 %v15510_v36, %v1189_v26  ;;  %v1196_v4 = vshrl.u32 %v15510_v36, %v1190_v6  ;;  %v15511_v5 = vmov 2102212464   ;;  %v15512_v13 = vmov 920167782  }
  0xa5   :  { %v1199_v8 = vshrl.u32 %v15511_v5, %v1190_v6  ;;  %v1201_v9 = vshll.u32 %v15511_v5, %v1189_v26  ;;  %v402_v12 = vsel %vm400_vm8, %v401_v52, %v8528_v60  ;;  %v1202_v14 = vshrl.u32 %v15512_v13, %v1190_v6 }
  0xa6   :  { %v1204_v15 = vshll.u32 %v15512_v13, %v1189_v26  ;;  %v15513_v18 = vmov 1326507024   ;;  %v403_v28 = vadd.s32 %v402_v12, %v398_v2  ;;  %v1194_v40 = vor.u32 %v1193_v3, %v1192_v50 }
  0xa7   :  { %v1205_v20 = vshrl.u32 %v15513_v18, %v1190_v6  ;;  %v1197_v48 = vor.u32 %v1196_v4, %v1195_v30  ;;  %v1200_v51 = vor.u32 %v1199_v8, %v1198_v61  ;;  %v1203_v54 = vor.u32 %v1202_v14, %v1201_v9 }
  0xa8   :  { %vm1209_vm9 = vcmp.lt.s32.totalorder %v1188_v56, 3  ;;  %vm1210_vm10 = vcmp.lt.s32.totalorder %v1188_v56, 4  ;;  %v404_v38 = vadd.s32 536870912, %v403_v28  ;;  %v15514_v63 = vmov 683565275  }
  0xa9   :  { %v1206_v45 = vor.u32 %v1205_v20, %v1204_v15  ;;  %v1191_v49 = vshrl.u32 %v15514_v63, %v1190_v6  ;;  %v1215_v41 = vsel %vm1207_vm6, %v1194_v40, %v1197_v48  ;;  %v97_v60 = vmul.f32 %v8504_v19, %v8413_v25 }
  0xaa   :  { %v1212_v52 = vsel %vm1210_vm10, %v1200_v51, 2102212464  ;;  %v1216_v26 = vsel %vm1210_vm10, %v1203_v54, 920167782  ;;  %v1219_v46 = vsel %vm1207_vm6, %v1197_v48, %v1200_v51  ;;  %v405_v50 = vshrl.u32 %v404_v38, 30 }
  0xab   :  { %v1220_v2 = vsel %vm1210_vm10, %v1206_v45, 1326507024  ;;  %v1217_v30 = vsel %vm1209_vm9, %v1200_v51, %v1216_v26  ;;  %v8559_v3 = vadd.f32 %v178_v1, %v89_v29  ;;  %v1211_v4 = vsel %vm1207_vm6, %v1191_v49, %v1194_v40 }
  0xac   :  { %v1221_v61 = vsel %vm1209_vm9, %v1203_v54, %v1220_v2  ;;  %v1218_v6 = vsel %vm1208_vm7, %v1215_v41, %v1217_v30  ;;  %v186_v9 = vmul.f32 %v8507_v21, %v8411_v24  ;;  %v406_v12 = vshll.u32 %v405_v50, 30 }
  0xad   :  { %v1222_v8 = vsel %vm1208_vm7, %v1219_v46, %v1221_v61  ;;  %v1213_v14 = vsel %vm1209_vm9, %v1197_v48, %v1212_v52  ;;  %v8572_v15 = vmul.u32.u64.low %v8532_v27, %v1218_v6  ;;  %v8573_v29 = vmul.u32.u64.high %v8532_v27, %v1218_v6, %v8572_v15 }
  0xae   :  { %v8568_v38 = vmul.u32.u64.low %v8532_v27, %v1222_v8  ;;  %v8569_v45 = vmul.u32.u64.high %v8532_v27, %v1222_v8, %v8568_v38  ;;  %v48_v49 = vsub.s32 0, %v8381_v7  ;;  %v407_v1 = vsub.s32 %v403_v28, %v406_v12 }
  0xaf   :  { %v554_v41 = vand.u32 2139095040, %v8559_v3  ;;  %v1214_v46 = vsel %vm1208_vm7, %v1211_v4, %v1213_v14  ;;  %v8578_v20 = vadd.f32 %v186_v9, %v97_v60  ;;  %v429_v51 = vsub.s32 4, %v405_v50 }
  0xb0   :  { %v409_v40 = vsub.s32 0, %v407_v1  ;;  %vm1232_vm11 = vc.u32 %v8569_v45, %v8572_v15  ;;  %v15407_v48 = vand.u32 2147483647, %v8559_v3  ;;  %v1233_v54 = vadd.s32 1, %v8573_v29 }
  0xb1   :  { %v555_v52 = vshrl.u32 %v554_v41, 23  ;;  %v8584_v26 = vrot.slane %v8393_v11, %v48_v49  ;;  %v1230_v56 = vmul.u32 %v8532_v27, %v1214_v46  ;;  %v430_v61 = vsel %vm345_vm12, %v429_v51, %v405_v50 }
  0xb2   :  { %v7475_v2 = vmin.u32 %v409_v40, %v407_v1  ;;  %v1234_v28 = vsel %vm1232_vm11, %v1233_v54, %v8573_v29  ;;  %v558_v4 = vand.u32 8388607, %v15407_v48  ;;  %v15406_v6 = vand.u32 2147483647, %v8578_v20 }
  0xb3   :  { %15515 = vst [vmem:[#allocation21_spill] sm:$0xff] %v8584_v26  ;;  %v7482_v60 = vadd.s32 4294967169, %v555_v52  ;;  %v1235_v8 = vadd.s32 %v1234_v28, %v1230_v56  ;;  %v1386_v12 = vand.u32 2139095040, %v8578_v20  ;;  %v8597_v27 = vrot.slane %v8388_v10, %v48_v49 }
  0xb4   :  { %v411_v30 = vclz %v7475_v2  ;;  %v15517_v38 = vand.u32 2147483647, %v8482_v58  ;;  %v8609_v40 = vmul.f32 %v8584_v26, %v8401_v17  ;;  %v559_v51 = vor.u32 8388608, %v558_v4 }
  0xb5   :  { %v561_v9 = vadd.s32 1, %v7482_v60  ;;  %15516 = vst [vmem:[#allocation22_spill] sm:$0xff] %v8597_v27  ;;  %v1236_v46 = vadd.s32 536870912, %v1235_v8  ;;  %v8613_v54 = vand.u32 8388607, %v15406_v6  ;;  %v1387_v28 = vshrl.u32 %v1386_v12, 23 }
  0xb6   :  { %vm8601_vm13 = vcmp.le.f32.partialorder %v15517_v38, 0.7853982  ;;  %v7476_v50 = vadd.s32 4294967294, %v411_v30  ;;  %v399_v60 = vadd.s32 %v8527_v31, %v8524_v57  ;;  %v8621_v38 = vmul.f32 %v8597_v27, %v8399_v16 }
  0xb7   :  { %v432_v41 = vsel %vm8601_vm13, 0, %v430_v61  ;;  %vm562_vm14 = vcmp.gt.s32.totalorder %v561_v9, 0  ;;  %v8615_v2 = vshrl.u32 %v1236_v46, 30  ;;  %v8629_v14 = vshll.u32 %v559_v51, 8 }
  0xb8   :  { %vm7477_vm15 = vcmp.lt.s32.totalorder %v7476_v50, 0  ;;  %v563_v49 = vsel %vm562_vm14, %v561_v9, 0  ;;  %v8623_v4 = vadd.s32 3, %v432_v41  ;;  %v8626_v9 = vadd.s32 %v8572_v15, %v8569_v45 }
  0xb9   :  { %v414_v52 = vsel %vm7477_vm15, 0, %v7476_v50  ;;  %v565_v56 = vand.u32 31, %v563_v49  ;;  %v1238_v50 = vshll.u32 %v8615_v2, 30  ;;  %v15520_v31 = vmov 2475754826  }
  0xba   :  { %v415_v30 = vsub.s32 32, %v414_v52  ;;  %v419_v61 = vsub.s32 4294967266, %v414_v52  ;;  %v416_v6 = vshll.u32 %v407_v1, %v414_v52  ;;  %v7514_v62 = vadd.s32 4294967169, %v1387_v28 }
  0xbb   :  { %v566_v46 = vsub.s32 32, %v565_v56  ;;  %v8631_v57 = vsub.s32 %v1235_v8, %v1238_v50  ;;  %v568_v45 = vshll.u32 %v15514_v63, %v565_v56  ;;  %v564_v1 = vshrl.u32 %v563_v49, 5 }
  0xbc   :  { %v417_v48 = vshrl.u32 %v399_v60, %v415_v30  ;;  %v420_v12 = vadd.s32 127, %v419_v61  ;;  %v571_v52 = vshll.u32 %v15520_v31, %v565_v56  ;;  %v574_v28 = vshll.u32 %v15510_v36, %v565_v56 }
  0xbd   :  { %v569_v39 = vshrl.u32 %v15520_v31, %v566_v46  ;;  %v572_v15 = vshrl.u32 %v15510_v36, %v566_v46  ;;  %v1241_v35 = vsub.s32 0, %v8631_v57  ;;  %v575_v51 = vshrl.u32 %v15511_v5, %v566_v46 }
  0xbe   :  { %v418_v41 = vor.u32 %v417_v48, %v416_v6  ;;  %v421_v55 = vshll.u32 %v420_v12, 23  ;;  %v577_v6 = vshll.u32 %v15511_v5, %v565_v56  ;;  %v578_v50 = vshrl.u32 %v15512_v13, %v566_v46 }
  0xbf   :  { %v570_v30 = vor.u32 %v569_v39, %v568_v45  ;;  %v7507_v61 = vmin.u32 %v1241_v35, %v8631_v57  ;;  %v573_v48 = vor.u32 %v572_v15, %v571_v52  ;;  %v576_v59 = vor.u32 %v575_v51, %v574_v28 }
  0xc0   :  { %v422_v8 = vor.u32 4788187, %v421_v55  ;;  %v425_v60 = vcvt.s32.f32 %v418_v41  ;;  %v580_v49 = vshll.u32 %v15512_v13, %v565_v56  ;;  %v581_v32 = vshrl.u32 %v15513_v18, %v566_v46 }
  0xc1   :  { %v1243_v55 = vclz %v7507_v61  ;;  %v1261_v39 = vsub.s32 4, %v8615_v2  ;;  %v567_v41 = vshrl.u32 %v15514_v63, %v566_v46  ;;  %v1393_v45 = vadd.s32 1, %v7514_v62 }
  0xc2   :  { %v423_v12 = vand.u32 2147483647, %v422_v8  ;;  %v579_v15 = vor.u32 %v578_v50, %v577_v6  ;;  %v582_v52 = vor.u32 %v581_v32, %v580_v49  ;;  %vm583_vm1 = vcmp.lt.s32.totalorder %v564_v1, 1 }
  0xc3   :  { %v7508_v23 = vadd.s32 4294967294, %v1243_v55  ;;  %vm584_vm2 = vcmp.lt.s32.totalorder %v564_v1, 2  ;;  %vm585_vm3 = vcmp.lt.s32.totalorder %v564_v1, 3  ;;  %vm586_vm4 = vcmp.lt.s32.totalorder %v564_v1, 4 }
  0xc4   :  { %v426_v35 = vmul.f32 %v425_v60, %v423_v12  ;;  %v588_v56 = vsel %vm586_vm4, %v576_v59, 2102212464  ;;  %v591_v8 = vsel %vm583_vm1, %v570_v30, %v573_v48  ;;  %v592_v28 = vsel %vm586_vm4, %v579_v15, 920167782 }
  0xc5   :  { %vm7509_vm5 = vcmp.lt.s32.totalorder %v7508_v23, 0  ;;  %v587_v61 = vsel %vm583_vm1, %v567_v41, %v570_v30  ;;  %v589_v62 = vsel %vm585_vm3, %v573_v48, %v588_v56  ;;  %v593_v46 = vsel %vm585_vm3, %v576_v59, %v592_v28 }
  0xc6   :  { %v427_v51 = vxor.u32 2147483648, %v426_v35  ;;  %v1246_v60 = vsel %vm7509_vm5, 0, %v7508_v23  ;;  %v594_v6 = vsel %vm584_vm2, %v591_v8, %v593_v46  ;;  %v595_v50 = vsel %vm583_vm1, %v573_v48, %v576_v59 }
  0xc7   :  { %v1247_v49 = vsub.s32 32, %v1246_v60  ;;  %v1248_v55 = vshll.u32 %v8631_v57, %v1246_v60  ;;  %v1251_v30 = vsub.s32 4294967266, %v1246_v60  ;;  %v596_v41 = vsel %vm586_vm4, %v582_v52, 1326507024 }
  0xc8   :  { %v428_v32 = vsel %vm345_vm12, %v427_v51, %v426_v35  ;;  %v8665_v56 = vmul.u32.u64.low %v8629_v14, %v594_v6  ;;  %v8666_v28 = vmul.u32.u64.high %v8629_v14, %v594_v6, %v8665_v56  ;;  %v597_v48 = vsel %vm585_vm3, %v579_v15, %v596_v41 }
  0xc9   :  { %v431_v12 = vsel %vm8601_vm13, %v8482_v58, %v428_v32  ;;  %v1249_v23 = vshrl.u32 %v8626_v9, %v1247_v49  ;;  %v1252_v59 = vadd.s32 127, %v1251_v30  ;;  %v1262_v29 = vsel %vm1177_vm0, %v1261_v39, %v8615_v2 }
  0xca   :  { %8048 = vcosq.f32 %v431_v12  ;;  %v590_v57 = vsel %vm584_vm2, %v587_v61, %v589_v62  ;;  %v598_v35 = vsel %vm584_vm2, %v595_v50, %v597_v48  ;;  %vm1394_vm6 = vcmp.gt.s32.totalorder %v1393_v45, 0 }
  0xcb   :  { %8050 = vsinq.f32 %v431_v12  ;;  %v1250_v52 = vor.u32 %v1249_v23, %v1248_v55  ;;  %v1253_v51 = vshll.u32 %v1252_v59, 23  ;;  %v609_v9 = vadd.s32 1, %v8666_v28 }
  0xcc   :  { %v8677_v8 = vmul.u32.u64.low %v8629_v14, %v598_v35  ;;  %v8678_v46 = vmul.u32.u64.high %v8629_v14, %v598_v35, %v8677_v8  ;;  %v1395_v32 = vsel %vm1394_vm6, %v1393_v45, 0  ;;  %v94_v15 = vmul.f32 %v8584_v26, %v8413_v25 }
  0xcd   :  { %v183_v2 = vmul.f32 %v8597_v27, %v8411_v24  ;;  %v8686_v39 = vand.u32 3, %v8623_v4  ;;  %v15521_v1 = vand.u32 2147483647, %v8492_v0  ;;  %v1254_v62 = vor.u32 4788187, %v1253_v51 }
  0xce   :  { %v1397_v60 = vand.u32 31, %v1395_v32  ;;  %v606_v6 = vmul.u32 %v8629_v14, %v590_v57  ;;  %v8699_v50 = vadd.f32 %v8621_v38, %v8609_v40  ;;  %v1257_v4 = vcvt.s32.f32 %v1250_v52 }
  0xcf   :  { %vm8690_vm7 = vcmp.le.f32.partialorder %v15521_v1, 0.7853982  ;;  %v1255_v12 = vand.u32 2147483647, %v1254_v62  ;;  %vm608_vm8 = vc.u32 %v8678_v46, %v8665_v56  ;;  %v15524_v55 = vsub.s32 2, %v8381_v7 }
  0xd0   :  { %v1264_v45 = vsel %vm8690_vm7, 0, %v1262_v29  ;;  %v1398_v49 = vsub.s32 32, %v1397_v60  ;;  %v610_v41 = vsel %vm608_vm8, %v609_v9, %v8666_v28  ;;  %v15525_v23 = vor.u32 8388608, %v8613_v54 }
  0xd1   :  { %v8706_v30 = vrot.slane %v8393_v11, %v15524_v55  ;;  %v8713_v59 = vadd.f32 %v183_v2, %v94_v15  ;;  %vm439_vm9 = vcmp.eq.s32.totalorder %v8686_v39, 0  ;;  %vm442_vm10 = vcmp.eq.s32.totalorder %v8686_v39, 2 }
  0xd2   :  { %v8711_v14 = vshll.u32 %v15525_v23, 8  ;;  %v1258_v40 = vmul.f32 %v1257_v4, %v1255_v12  ;;  %v1268_v38 = vadd.s32 3, %v1264_v45  ;;  %v611_v48 = vadd.s32 %v610_v41, %v606_v6 }
  0xd3   :  { %v1401_v29 = vshrl.u32 %v15520_v31, %v1398_v49  ;;  %v8718_v11 = vshrl.u32 %v1395_v32, 5  ;;  %v1400_v28 = vshll.u32 %v15514_v63, %v1397_v60  ;;  %v1404_v54 = vshrl.u32 %v15510_v36, %v1398_v49 }
  0xd4   :  { %v8049_v57 = vpop.eup %8048  ;;  %v242_v35 = vand.u32 2139095040, %v8699_v50  ;;  %v1259_v51 = vxor.u32 2147483648, %v1258_v40  ;;  %v612_v8 = vadd.s32 536870912, %v611_v48  ;;  %v1407_v9 = vshrl.u32 %v15511_v5, %v1398_v49 }
  0xd5   :  { %v8051_v52 = vpop.eup %8050  ;;  %v1410_v15 = vshrl.u32 %v15512_v13, %v1398_v49  ;;  %v443_v2 = vxor.u32 2147483648, %v8049_v57  ;;  %v1403_v1 = vshll.u32 %v15520_v31, %v1397_v60  ;;  %v1406_v62 = vshll.u32 %v15510_v36, %v1397_v60 }
  0xd6   :  { %v1409_v32 = vshll.u32 %v15511_v5, %v1397_v60  ;;  %v440_v45 = vxor.u32 2147483648, %v8051_v52  ;;  %v1260_v6 = vsel %vm1177_vm0, %v1259_v51, %v1258_v40  ;;  %v8730_v12 = vshrl.u32 %v612_v8, 30 }
  0xd7   :  { %v1402_v4 = vor.u32 %v1401_v29, %v1400_v28  ;;  %v1263_v55 = vsel %vm8690_vm7, %v8492_v0, %v1260_v6  ;;  %v1405_v41 = vor.u32 %v1404_v54, %v1403_v1  ;;  %v1412_v23 = vshll.u32 %v15512_v13, %v1397_v60 }
  0xd8   :  { %v1413_v27 = vshrl.u32 %v15513_v18, %v1398_v49  ;;  %vm438_vm11 = vcmp.lt.s32.totalorder %v8686_v39, 2  ;;  %8052 = vcosq.f32 %v1263_v55  ;;  %v614_v26 = vshll.u32 %v8730_v12, 30 }
  0xd9   :  { %v1408_v22 = vor.u32 %v1407_v9, %v1406_v62  ;;  %v1411_v19 = vor.u32 %v1410_v15, %v1409_v32  ;;  %8054 = vsinq.f32 %v1263_v55  ;;  %v8739_v40 = vand.u32 3, %v1268_v38 }
  0xda   :  { %v1414_v29 = vor.u32 %v1413_v27, %v1412_v23  ;;  %v239_v28 = vand.u32 2147483647, %v8699_v50  ;;  %v8742_v61 = vsub.s32 %v611_v48, %v614_v26  ;;  %v1399_v54 = vshrl.u32 %v15514_v63, %v1398_v49 }
  0xdb   :  { %vm1415_vm12 = vcmp.lt.s32.totalorder %v8718_v11, 1  ;;  %v243_v60 = vshrl.u32 %v242_v35, 23  ;;  %vm435_vm13 = vweird.f32 %v8482_v58  ;;  %v441_v51 = vsel %vm439_vm9, %v8049_v57, %v440_v45 }
  0xdc   :  { %v444_v8 = vsel %vm442_vm10, %v443_v2, %v8051_v52  ;;  %vm553_vm14 = vcmp.lt.s32.totalorder %v8559_v3, 0  ;;  %vm1418_vm15 = vcmp.lt.s32.totalorder %v8718_v11, 4  ;;  %v1423_v26 = vsel %vm1415_vm12, %v1402_v4, %v1405_v41 }
  0xdd   :  { %v617_v27 = vsub.s32 0, %v8742_v61  ;;  %vm1417_vm0 = vcmp.lt.s32.totalorder %v8718_v11, 3  ;;  %v1420_v49 = vsel %vm1418_vm15, %v1408_v22, 2102212464  ;;  %v1424_v38 = vsel %vm1418_vm15, %v1411_v19, 920167782 }
  0xde   :  { %vm1271_vm1 = vcmp.eq.s32.totalorder %v8739_v40, 0  ;;  %vm1416_vm2 = vcmp.lt.s32.totalorder %v8718_v11, 2  ;;  %v1425_v48 = vsel %vm1417_vm0, %v1408_v22, %v1424_v38  ;;  %v1427_v57 = vsel %vm1415_vm12, %v1405_v41, %v1408_v22 }
  0xdf   :  { %v1428_v35 = vsel %vm1418_vm15, %v1414_v29, 1326507024  ;;  %vm1270_vm3 = vcmp.lt.s32.totalorder %v8739_v40, 2  ;;  %v7483_v52 = vmin.u32 %v617_v27, %v8742_v61  ;;  %v1419_v9 = vsel %vm1415_vm12, %v1399_v54, %v1402_v4 }
  0xe0   :  { %v1426_v15 = vsel %vm1416_vm2, %v1423_v26, %v1425_v48  ;;  %v1429_v2 = vsel %vm1417_vm0, %v1411_v19, %v1428_v35  ;;  %vm1267_vm4 = vweird.f32 %v8492_v0  ;;  %v1421_v1 = vsel %vm1417_vm0, %v1405_v41, %v1420_v49 }
  0xe1   :  { %v1430_v62 = vsel %vm1416_vm2, %v1427_v57, %v1429_v2  ;;  %v8771_v22 = vmul.u32.u64.low %v8711_v14, %v1426_v15  ;;  %v8772_v32 = vmul.u32.u64.high %v8711_v14, %v1426_v15, %v8771_v22  ;;  %vm1274_vm5 = vcmp.eq.s32.totalorder %v8739_v40, 2 }
  0xe2   :  { %v15526_v45 = vand.u32 2147483647, %v8559_v3  ;;  %v619_v4 = vclz %v7483_v52  ;;  %v637_v19 = vsub.s32 4, %v8730_v12  ;;  %v246_v55 = vand.u32 8388607, %v239_v28  ;;  %v8053_v26 = vpop.eup %8052 }
  0xe3   :  { %v445_v41 = vsel %vm438_vm11, %v441_v51, %v444_v8  ;;  %v8787_v23 = vmul.u32.u64.low %v8711_v14, %v1430_v62  ;;  %v8788_v29 = vmul.u32.u64.high %v8711_v14, %v1430_v62, %v8787_v23  ;;  %v7470_v54 = vadd.s32 4294967169, %v243_v60  ;;  %v8055_v57 = vpop.eup %8054 }
  0xe4   :  { %vm8777_vm6 = vcmp.le.f32.partialorder %v15526_v45, 0.7853982  ;;  %v7484_v27 = vadd.s32 4294967294, %v619_v4  ;;  %v1422_v49 = vsel %vm1416_vm2, %v1419_v9, %v1421_v1  ;;  %v15421_v38 = vand.u32 2147483647, %v8713_v59 }
  0xe5   :  { %v1074_v48 = vand.u32 2139095040, %v8713_v59  ;;  %v1275_v35 = vxor.u32 2147483648, %v8053_v26  ;;  %v607_v39 = vadd.s32 %v8665_v56, %v8678_v46  ;;  %v1441_v51 = vadd.s32 1, %v8772_v32 }
  0xe6   :  { %v249_v8 = vadd.s32 1, %v7470_v54  ;;  %v446_v60 = vsel %vm435_vm13, nan, %v445_v41  ;;  %v1272_v52 = vxor.u32 2147483648, %v8055_v57  ;;  %vm7485_vm7 = vcmp.lt.s32.totalorder %v7484_v27, 0 }
  0xe7   :  { %v638_v11 = vsel %vm553_vm14, %v637_v19, %v8730_v12  ;;  %v1276_v9 = vsel %vm1274_vm5, %v1275_v35, %v8055_v57  ;;  %v622_v15 = vsel %vm7485_vm7, 0, %v7484_v27  ;;  %v1438_v2 = vmul.u32 %v8711_v14, %v1422_v49 }
  0xe8   :  { %vm1440_vm8 = vc.u32 %v8788_v29, %v8771_v22  ;;  %v1273_v56 = vsel %vm1271_vm1, %v8053_v26, %v1272_v52  ;;  %v623_v46 = vsub.s32 32, %v622_v15  ;;  %v627_v58 = vsub.s32 4294967266, %v622_v15 }
  0xe9   :  { %v1075_v1 = vshrl.u32 %v1074_v48, 23  ;;  %v1277_v62 = vsel %vm1270_vm3, %v1273_v56, %v1276_v9  ;;  %v624_v45 = vshll.u32 %v8742_v61, %v622_v15  ;;  %v1442_v12 = vsel %vm1440_vm8, %v1441_v51, %v8772_v32 }
  0xea   :  { %vm250_vm9 = vcmp.gt.s32.totalorder %v249_v8, 0  ;;  %v1278_v4 = vsel %vm1267_vm4, nan, %v1277_v62  ;;  %v625_v14 = vshrl.u32 %v607_v39, %v623_v46  ;;  %v628_v19 = vadd.s32 127, %v627_v58 }
  0xeb   :  { %v1443_v41 = vadd.s32 %v1442_v12, %v1438_v2  ;;  %v7742_v23 = vpack.c.bf16 %v1278_v4, %v446_v60  ;;  %v640_v54 = vsel %vm8777_vm6, 0, %v638_v11  ;;  %v247_v26 = vor.u32 8388608, %v246_v55 }
  0xec   :  { %v251_v27 = vsel %vm250_vm9, %v249_v8, 0  ;;  %v626_v49 = vor.u32 %v625_v14, %v624_v45  ;;  %v629_v40 = vshll.u32 %v628_v19, 23  ;;  %v8818_v61 = vand.u32 8388607, %v15421_v38 }
  0xed   :  { %v1444_v48 = vadd.s32 536870912, %v1443_v41  ;;  %v8822_v0 = vmul.f32 %v8451_v43, %v8423_v33  ;;  %v15529_v32 = vsub.s32 2, %v8381_v7  ;;  %7743 = vmatprep.subr.bf16.mxu0 %v7742_v23  ;;  %v253_v35 = vand.u32 31, %v251_v27 }
  0xee   :  { %v7502_v55 = vadd.s32 4294967169, %v1075_v1  ;;  %v8831_v39 = vmul.f32 %v8451_v43, %v8448_v42  ;;  %v8835_v51 = vmul.f32 %v8454_v44, %v8461_v47  ;;  %v630_v8 = vor.u32 4788187, %v629_v40 }
  0xef   :  { %v8827_v57 = vrot.slane %v8388_v10, %v15529_v32  ;;  %v1445_v60 = vshrl.u32 %v1444_v48, 30  ;;  %v8837_v52 = vadd.s32 3, %v640_v54  ;;  %vm1385_vm10 = vcmp.lt.s32.totalorder %v8578_v20, 0 }
  0xf0   :  { %v8841_v10 = vadd.s32 %v8771_v22, %v8788_v29  ;;  %v254_v11 = vsub.s32 32, %v253_v35  ;;  %v8843_v9 = vshll.u32 %v247_v26, 8  ;;  %v631_v15 = vand.u32 2147483647, %v630_v8 }
  0xf1   :  { %v633_v2 = vcvt.s32.f32 %v626_v49  ;;  %v1446_v43 = vshll.u32 %v1445_v60, 30  ;;  %v1079_v56 = vor.u32 8388608, %v8818_v61  ;;  %v1081_v62 = vadd.s32 1, %v7502_v55 }
  0xf2   :  { %v257_v46 = vshrl.u32 %v15520_v31, %v254_v11  ;;  %v260_v58 = vshrl.u32 %v15510_v36, %v254_v11  ;;  %v263_v1 = vshrl.u32 %v15511_v5, %v254_v11  ;;  %v256_v22 = vshll.u32 %v15514_v63, %v253_v35 }
  0xf3   :  { %v634_v45 = vmul.f32 %v633_v2, %v631_v15  ;;  %v8849_v12 = vsub.s32 %v1443_v41, %v1446_v43  ;;  %v266_v29 = vshrl.u32 %v15512_v13, %v254_v11  ;;  %v1469_v4 = vsub.s32 4, %v1445_v60 }
  0xf4   :  { %v252_v14 = vshrl.u32 %v251_v27, 5  ;;  %v259_v19 = vshll.u32 %v15520_v31, %v253_v35  ;;  %v262_v23 = vshll.u32 %v15510_v36, %v253_v35  ;;  %v258_v49 = vor.u32 %v257_v46, %v256_v22 }
  0xf5   :  { %v635_v54 = vxor.u32 2147483648, %v634_v45  ;;  %v1449_v26 = vsub.s32 0, %v8849_v12  ;;  %v265_v40 = vshll.u32 %v15511_v5, %v253_v35  ;;  %v15530_v48 = vand.u32 2147483647, %v8578_v20 }
  0xf6   :  { %v261_v32 = vor.u32 %v260_v58, %v259_v19  ;;  %v264_v55 = vor.u32 %v263_v1, %v262_v23  ;;  %v268_v27 = vshll.u32 %v15512_v13, %v253_v35  ;;  %v269_v8 = vshrl.u32 %v15513_v18, %v254_v11 }
  0xf7   :  { %vm8859_vm11 = vcmp.le.f32.partialorder %v15530_v48, 0.7853982  ;;  %v636_v15 = vsel %vm553_vm14, %v635_v54, %v634_v45  ;;  %v7515_v2 = vmin.u32 %v1449_v26, %v8849_v12  ;;  %v267_v43 = vor.u32 %v266_v29, %v265_v40 }
  0xf8   :  { %vm1082_vm12 = vcmp.gt.s32.totalorder %v1081_v62, 0  ;;  %v639_v46 = vsel %vm8777_vm6, %v8559_v3, %v636_v15  ;;  %v255_v22 = vshrl.u32 %v15514_v63, %v254_v11  ;;  %v270_v48 = vor.u32 %v269_v8, %v268_v27 }
  0xf9   :  { %vm271_vm13 = vcmp.lt.s32.totalorder %v252_v14, 1  ;;  %v1451_v58 = vclz %v7515_v2  ;;  %v1470_v35 = vsel %vm1385_vm10, %v1469_v4, %v1445_v60  ;;  %vm272_vm15 = vcmp.lt.s32.totalorder %v252_v14, 2 }
  0xfa   :  { %vm274_vm0 = vcmp.lt.s32.totalorder %v252_v14, 4  ;;  %vm273_vm1 = vcmp.lt.s32.totalorder %v252_v14, 3  ;;  %v275_v1 = vsel %vm271_vm13, %v255_v22, %v258_v49  ;;  %v279_v19 = vsel %vm271_vm13, %v258_v49, %v261_v32 }
  0xfb   :  { %v276_v45 = vsel %vm274_vm0, %v264_v55, 2102212464  ;;  %8056 = vcosq.f32 %v639_v46  ;;  %v7516_v29 = vadd.s32 4294967294, %v1451_v58  ;;  %v280_v23 = vsel %vm274_vm0, %v267_v43, 920167782 }
  0xfc   :  { %v283_v54 = vsel %vm271_vm13, %v261_v32, %v264_v55  ;;  %8058 = vsinq.f32 %v639_v46  ;;  %v281_v6 = vsel %vm273_vm1, %v264_v55, %v280_v23  ;;  %v284_v26 = vsel %vm274_vm0, %v270_v48, 1326507024 }
  0xfd   :  { %v1083_v11 = vsel %vm1082_vm12, %v1081_v62, 0  ;;  %vm7517_vm14 = vcmp.lt.s32.totalorder %v7516_v29, 0  ;;  %v277_v40 = vsel %vm273_vm1, %v261_v32, %v276_v45  ;;  %v282_v27 = vsel %vm272_vm15, %v279_v19, %v281_v6 }
  0xfe   :  { %v285_v60 = vsel %vm273_vm1, %v267_v43, %v284_v26  ;;  %v1454_v4 = vsel %vm7517_vm14, 0, %v7516_v29  ;;  %v8878_v15 = vmul.u32.u64.low %v8843_v9, %v282_v27  ;;  %v8879_v49 = vmul.u32.u64.high %v8843_v9, %v282_v27, %v8878_v15 }
  0xff   :  { %v286_v8 = vsel %vm272_vm15, %v283_v54, %v285_v60  ;;  %v1455_v2 = vsub.s32 32, %v1454_v4  ;;  %v1459_v22 = vsub.s32 4294967266, %v1454_v4  ;;  %v1472_v55 = vsel %vm8859_vm11, 0, %v1470_v35 }
 0x100   :  { %v1085_v46 = vand.u32 31, %v1083_v11  ;;  %v8885_v62 = vand.u32 3, %v8837_v52  ;;  %v278_v32 = vsel %vm272_vm15, %v275_v1, %v277_v40  ;;  %v1456_v58 = vshll.u32 %v8849_v12, %v1454_v4 }
 0x101   :  { %v8889_v43 = vmul.u32.u64.low %v8843_v9, %v286_v8  ;;  %v8890_v48 = vmul.u32.u64.high %v8843_v9, %v286_v8, %v8889_v43  ;;  %v1457_v45 = vshrl.u32 %v8841_v10, %v1455_v2  ;;  %v1460_v19 = vadd.s32 127, %v1459_v22 }
 0x102   :  { %v1086_v29 = vsub.s32 32, %v1085_v46  ;;  %v8896_v23 = vmul.f32 %v8454_v44, %v8473_v53  ;;  %v1476_v35 = vadd.s32 3, %v1472_v55  ;;  %v297_v52 = vadd.s32 1, %v8879_v49 }
 0x103   :  { %v8901_v14 = vshll.u32 %v1079_v56, 8  ;;  %v1458_v1 = vor.u32 %v1457_v45, %v1456_v58  ;;  %v1461_v54 = vshll.u32 %v1460_v19, 23  ;;  %v294_v6 = vmul.u32 %v8843_v9, %v278_v32 }
 0x104   :  { %v1089_v12 = vshrl.u32 %v15520_v31, %v1086_v29  ;;  %vm650_vm2 = vcmp.eq.s32.totalorder %v8885_v62, 2  ;;  %vm296_vm3 = vc.u32 %v8890_v48, %v8878_v15  ;;  %v8908_v44 = vshrl.u32 %v1083_v11, 5 }
 0x105   :  { %v1088_v10 = vshll.u32 %v15514_v63, %v1085_v46  ;;  %v1092_v26 = vshrl.u32 %v15510_v36, %v1086_v29  ;;  %v8057_v61 = vpop.eup %8056  ;;  %v1462_v56 = vor.u32 4788187, %v1461_v54  ;;  %v298_v40 = vsel %vm296_vm3, %v297_v52, %v8879_v49 }
 0x106   :  { %v1091_v27 = vshll.u32 %v15520_v31, %v1085_v46  ;;  %v1094_v9 = vshll.u32 %v15510_v36, %v1085_v46  ;;  %v8059_v60 = vpop.eup %8058  ;;  %vm647_vm4 = vcmp.eq.s32.totalorder %v8885_v62, 0  ;;  %v1465_v4 = vcvt.s32.f32 %v1458_v1 }
 0x107   :  { %v299_v8 = vadd.s32 %v298_v40, %v294_v6  ;;  %v1090_v2 = vor.u32 %v1089_v12, %v1088_v10  ;;  %v1097_v11 = vshll.u32 %v15511_v5, %v1085_v46  ;;  %v1463_v22 = vand.u32 2147483647, %v1462_v56 }
 0x108   :  { %v1093_v55 = vor.u32 %v1092_v26, %v1091_v27  ;;  %v1095_v32 = vshrl.u32 %v15511_v5, %v1086_v29  ;;  %v1098_v43 = vshrl.u32 %v15512_v13, %v1086_v29  ;;  %v651_v58 = vxor.u32 2147483648, %v8057_v61 }
 0x109   :  { %v8919_v49 = vand.u32 3, %v1476_v35  ;;  %v300_v45 = vadd.s32 536870912, %v299_v8  ;;  %v1101_v19 = vshrl.u32 %v15513_v18, %v1086_v29  ;;  %v1466_v52 = vmul.f32 %v1465_v4, %v1463_v22 }
 0x10a   :  { %v1096_v54 = vor.u32 %v1095_v32, %v1094_v9  ;;  %v1099_v38 = vor.u32 %v1098_v43, %v1097_v11  ;;  %v1100_v1 = vshll.u32 %v15512_v13, %v1085_v46  ;;  %v648_v6 = vxor.u32 2147483648, %v8059_v60 }
 0x10b   :  { %v8923_v12 = vshrl.u32 %v300_v45, 30  ;;  %vm1103_vm5 = vcmp.lt.s32.totalorder %v8908_v44, 1  ;;  %vm1104_vm6 = vcmp.lt.s32.totalorder %v8908_v44, 2  ;;  %v1467_v10 = vxor.u32 2147483648, %v1466_v52 }
 0x10c   :  { %v1102_v26 = vor.u32 %v1101_v19, %v1100_v1  ;;  %vm1106_vm7 = vcmp.lt.s32.totalorder %v8908_v44, 4  ;;  %v1111_v35 = vsel %vm1103_vm5, %v1090_v2, %v1093_v55  ;;  %v1087_v40 = vshrl.u32 %v15514_v63, %v1086_v29 }
 0x10d   :  { %v302_v56 = vshll.u32 %v8923_v12, 30  ;;  %vm1105_vm8 = vcmp.lt.s32.totalorder %v8908_v44, 3  ;;  %v1112_v46 = vsel %vm1106_vm7, %v1099_v38, 920167782  ;;  %v652_v27 = vsel %vm650_vm2, %v651_v58, %v8059_v60 }
 0x10e   :  { %v1468_v9 = vsel %vm1385_vm10, %v1467_v10, %v1466_v52  ;;  %v1108_v4 = vsel %vm1106_vm7, %v1096_v54, 2102212464  ;;  %v1113_v11 = vsel %vm1105_vm8, %v1096_v54, %v1112_v46  ;;  %v1115_v60 = vsel %vm1103_vm5, %v1093_v55, %v1096_v54 }
 0x10f   :  { %v1471_v29 = vsel %vm8859_vm11, %v8578_v20, %v1468_v9  ;;  %v8946_v22 = vsub.s32 %v299_v8, %v302_v56  ;;  %v1114_v32 = vsel %vm1104_vm6, %v1111_v35, %v1113_v11  ;;  %v649_v43 = vsel %vm647_vm4, %v8057_v61, %v648_v6 }
 0x110   :  { %8060 = vcosq.f32 %v1471_v29  ;;  %v1107_v58 = vsel %vm1103_vm5, %v1087_v40, %v1090_v2  ;;  %v1116_v45 = vsel %vm1106_vm7, %v1102_v26, 1326507024  ;;  %v1109_v8 = vsel %vm1105_vm8, %v1093_v55, %v1108_v4 }
 0x111   :  { %8062 = vsinq.f32 %v1471_v29  ;;  %v305_v41 = vsub.s32 0, %v8946_v22  ;;  %v1117_v19 = vsel %vm1105_vm8, %v1099_v38, %v1116_v45  ;;  %v88_v2 = vmul.f32 %v8706_v30, %v8401_v17 }
 0x112   :  { %v1118_v52 = vsel %vm1104_vm6, %v1115_v60, %v1117_v19  ;;  %v8966_v61 = vmul.u32.u64.low %v8901_v14, %v1114_v32  ;;  %v8967_v54 = vmul.u32.u64.high %v8901_v14, %v1114_v32, %v8966_v61  ;;  %vm643_vm9 = vweird.f32 %v8559_v3 }
 0x113   :  { %v7471_v1 = vmin.u32 %v305_v41, %v8946_v22  ;;  %v8975_v55 = vmul.u32.u64.low %v8901_v14, %v1118_v52  ;;  %v8976_v6 = vmul.u32.u64.high %v8901_v14, %v1118_v52, %v8975_v55  ;;  %vm646_vm10 = vcmp.lt.s32.totalorder %v8885_v62, 2 }
 0x114   :  { %v1110_v38 = vsel %vm1104_vm6, %v1107_v58, %v1109_v8  ;;  %v177_v10 = vmul.f32 %v8827_v57, %v8399_v16  ;;  %v8985_v26 = vadd.f32 %v8835_v51, %v8822_v0  ;;  %v653_v35 = vsel %vm646_vm10, %v649_v43, %v652_v27 }
 0x115   :  { %vm8989_vm11 = vcmp.le.f32.partialorder %v239_v28, 0.7853982  ;;  %vm241_vm12 = vcmp.lt.s32.totalorder %v8699_v50, 0  ;;  %v307_v62 = vclz %v7471_v1  ;;  %vm1478_vm13 = vcmp.lt.s32.totalorder %v8919_v49, 2 }
 0x116   :  { %v325_v44 = vsub.s32 4, %v8923_v12  ;;  %v1129_v40 = vadd.s32 1, %v8967_v54  ;;  %v8997_v46 = vadd.f32 %v177_v10, %v88_v2  ;;  %v9001_v0 = vadd.f32 %v8896_v23, %v8831_v39 }
 0x117   :  { %vm1475_vm15 = vweird.f32 %v8578_v20  ;;  %vm1479_vm0 = vcmp.eq.s32.totalorder %v8919_v49, 0  ;;  %v7472_v28 = vadd.s32 4294967294, %v307_v62  ;;  %v1126_v51 = vmul.u32 %v8901_v14, %v1110_v38 }
 0x118   :  { %vm1128_vm1 = vc.u32 %v8976_v6, %v8966_v61  ;;  %vm1482_vm14 = vcmp.eq.s32.totalorder %v8919_v49, 2  ;;  %v15423_v9 = vand.u32 2147483647, %v8997_v46  ;;  %v450_v4 = vand.u32 2139095040, %v8997_v46 }
 0x119   :  { %v1130_v27 = vsel %vm1128_vm1, %v1129_v40, %v8967_v54  ;;  %v654_v39 = vsel %vm643_vm9, nan, %v653_v35  ;;  %v295_v23 = vadd.s32 %v8878_v15, %v8890_v48  ;;  %vm7473_vm2 = vcmp.lt.s32.totalorder %v7472_v28, 0 }
 0x11a   :  { %v1131_v11 = vadd.s32 %v1130_v27, %v1126_v51  ;;  %v8061_v14 = vpop.eup %8060  ;;  %v310_v29 = vsel %vm7473_vm2, 0, %v7472_v28  ;;  %v326_v32 = vsel %vm241_vm12, %v325_v44, %v8923_v12  ;;  %v96_v60 = vmul.f32 %v8706_v30, %v8413_v25 }
 0x11b   :  { %v451_v43 = vshrl.u32 %v450_v4, 23  ;;  %v8063_v58 = vpop.eup %8062  ;;  %v1483_v45 = vxor.u32 2147483648, %v8061_v14  ;;  %v311_v41 = vsub.s32 32, %v310_v29  ;;  %v315_v3 = vsub.s32 4294967266, %v310_v29 }
 0x11c   :  { %v185_v8 = vmul.f32 %v8827_v57, %v8411_v24  ;;  %v1480_v15 = vxor.u32 2147483648, %v8063_v58  ;;  %v1132_v48 = vadd.s32 536870912, %v1131_v11  ;;  %v454_v52 = vand.u32 8388607, %v15423_v9 }
 0x11d   :  { %v7478_v19 = vadd.s32 4294967169, %v451_v43  ;;  %v1484_v12 = vsel %vm1482_vm14, %v1483_v45, %v8063_v58  ;;  %v312_v54 = vshll.u32 %v8946_v22, %v310_v29  ;;  %v313_v2 = vshrl.u32 %v295_v23, %v311_v41 }
 0x11e   :  { %v316_v1 = vadd.s32 127, %v315_v3  ;;  %v1481_v55 = vsel %vm1479_vm0, %v8061_v14, %v1480_v15  ;;  %v328_v38 = vsel %vm8989_vm11, 0, %v326_v32  ;;  %v1133_v10 = vshrl.u32 %v1132_v48, 30  ;;  %v8304_v32 = vld [vmem:[%s15384_s0 + $0x1] ss:$2 sm:$0xff] }
 0x11f   :  { %v457_v35 = vadd.s32 1, %v7478_v19  ;;  %v1485_v62 = vsel %vm1478_vm13, %v1481_v55, %v1484_v12  ;;  %v314_v44 = vor.u32 %v313_v2, %v312_v54  ;;  %v9034_v28 = vadd.f32 %v185_v8, %v96_v60 }
 0x120   :  { %v317_v40 = vshll.u32 %v316_v1, 23  ;;  %v1486_v22 = vsel %vm1475_vm15, nan, %v1485_v62  ;;  %v1134_v51 = vshll.u32 %v1133_v10, 30  ;;  %v455_v27 = vor.u32 8388608, %v454_v52 }
 0x121   :  { %vm458_vm3 = vcmp.gt.s32.totalorder %v457_v35, 0  ;;  %v7750_v4 = vpack.c.bf16 %v1486_v22, %v654_v39  ;;  %v1157_v14 = vsub.s32 4, %v1133_v10  ;;  %v15535_v49 = vsub.s32 5, %v8381_v7 }
 0x122   :  { %v318_v23 = vor.u32 4788187, %v317_v40  ;;  %v459_v29 = vsel %vm458_vm3, %v457_v35, 0  ;;  %v9045_v60 = vsub.s32 %v1131_v11, %v1134_v51  ;;  %v15537_v20 = vsub.s32 7, %v8381_v7 }
 0x123   :  { %v9043_v43 = vrot.slane %v8304_v32, %v15535_v49  ;;  %v461_v58 = vand.u32 31, %v459_v29  ;;  %7751 = vmatprep.subr.bf16.mxu1 %v7750_v4  ;;  %v321_v41 = vcvt.s32.f32 %v314_v44  ;;  %vm1073_vm4 = vcmp.lt.s32.totalorder %v8713_v59, 0 }
 0x124   :  { %v9049_v45 = vrot.slane %v8304_v32, %v15537_v20  ;;  %v319_v39 = vand.u32 2147483647, %v318_v23  ;;  %v9052_v3 = vadd.s32 3, %v328_v38  ;;  %v1137_v8 = vsub.s32 0, %v9045_v60 }
 0x125   :  { %15536 = vst [vmem:[#allocation23_spill] sm:$0xff] %v9043_v43  ;;  %v462_v15 = vsub.s32 32, %v461_v58  ;;  %v15422_v48 = vand.u32 2147483647, %v9034_v28  ;;  %v1127_v11 = vadd.s32 %v8966_v61, %v8976_v6  ;;  %v9060_v52 = vsel %vm1073_vm4, %v1157_v14, %v1133_v10 }
 0x126   :  { %15538 = vst [vmem:[#allocation24_spill] sm:$0xff] %v9049_v45  ;;  %v322_v19 = vmul.f32 %v321_v41, %v319_v39  ;;  %v9062_v12 = vshll.u32 %v455_v27, 8  ;;  %v7503_v54 = vmin.u32 %v1137_v8, %v9045_v60  ;;  %v9065_v2 = vshrl.u32 %v459_v29, 5 }
 0x127   :  { %v465_v1 = vshrl.u32 %v15520_v31, %v462_v15  ;;  %v1282_v55 = vand.u32 2139095040, %v9034_v28  ;;  %v468_v35 = vshrl.u32 %v15510_v36, %v462_v15  ;;  %v471_v62 = vshrl.u32 %v15511_v5, %v462_v15 }
 0x128   :  { %v323_v38 = vxor.u32 2147483648, %v322_v19  ;;  %v474_v61 = vshrl.u32 %v15512_v13, %v462_v15  ;;  %v1139_v6 = vclz %v7503_v54  ;;  %v464_v10 = vshll.u32 %v15514_v63, %v461_v58 }
 0x129   :  { %v470_v44 = vshll.u32 %v15510_v36, %v461_v58  ;;  %v9076_v40 = vand.u32 8388607, %v15422_v48  ;;  %v463_v51 = vshrl.u32 %v15514_v63, %v462_v15  ;;  %v467_v27 = vshll.u32 %v15520_v31, %v461_v58 }
 0x12a   :  { %v324_v22 = vsel %vm241_vm12, %v323_v38, %v322_v19  ;;  %v473_v4 = vshll.u32 %v15511_v5, %v461_v58  ;;  %v7504_v14 = vadd.s32 4294967294, %v1139_v6  ;;  %v466_v29 = vor.u32 %v465_v1, %v464_v10 }
 0x12b   :  { %v327_v23 = vsel %vm8989_vm11, %v8699_v50, %v324_v22  ;;  %v472_v32 = vor.u32 %v471_v62, %v470_v44  ;;  %v15539_v49 = vand.u32 2147483647, %v8713_v59  ;;  %v469_v39 = vor.u32 %v468_v35, %v467_v27 }
 0x12c   :  { %v475_v41 = vor.u32 %v474_v61, %v473_v4  ;;  %v476_v8 = vshll.u32 %v15512_v13, %v461_v58  ;;  %v477_v19 = vshrl.u32 %v15513_v18, %v462_v15  ;;  %8064 = vcosq.f32 %v327_v23 }
 0x12d   :  { %vm9088_vm5 = vcmp.le.f32.partialorder %v15539_v49, 0.7853982  ;;  %vm7505_vm6 = vcmp.lt.s32.totalorder %v7504_v14, 0  ;;  %vm479_vm7 = vcmp.lt.s32.totalorder %v9065_v2, 1  ;;  %vm480_vm8 = vcmp.lt.s32.totalorder %v9065_v2, 2 }
 0x12e   :  { %8066 = vsinq.f32 %v327_v23  ;;  %v1142_v56 = vsel %vm7505_vm6, 0, %v7504_v14  ;;  %v478_v54 = vor.u32 %v477_v19, %v476_v8  ;;  %vm482_vm9 = vcmp.lt.s32.totalorder %v9065_v2, 4 }
 0x12f   :  { %v1143_v1 = vsub.s32 32, %v1142_v56  ;;  %v1147_v38 = vsub.s32 4294967266, %v1142_v56  ;;  %vm481_vm10 = vcmp.lt.s32.totalorder %v9065_v2, 3  ;;  %v484_v35 = vsel %vm482_vm9, %v472_v32, 2102212464 }
 0x130   :  { %v1144_v58 = vshll.u32 %v9045_v60, %v1142_v56  ;;  %v487_v15 = vsel %vm479_vm7, %v466_v29, %v469_v39  ;;  %v488_v62 = vsel %vm482_vm9, %v475_v41, 920167782  ;;  %v491_v61 = vsel %vm479_vm7, %v469_v39, %v472_v32 }
 0x131   :  { %v1145_v6 = vshrl.u32 %v1127_v11, %v1143_v1  ;;  %v1148_v10 = vadd.s32 127, %v1147_v38  ;;  %v489_v44 = vsel %vm481_vm10, %v472_v32, %v488_v62  ;;  %v492_v22 = vsel %vm482_vm9, %v478_v54, 1326507024 }
 0x132   :  { %v483_v27 = vsel %vm479_vm7, %v463_v51, %v466_v29  ;;  %v490_v4 = vsel %vm480_vm8, %v487_v15, %v489_v44  ;;  %v493_v60 = vsel %vm481_vm10, %v475_v41, %v492_v22  ;;  %v1283_v23 = vshrl.u32 %v1282_v55, 23 }
 0x133   :  { %v1146_v14 = vor.u32 %v1145_v6, %v1144_v58  ;;  %v1149_v49 = vshll.u32 %v1148_v10, 23  ;;  %v485_v11 = vsel %vm481_vm10, %v469_v39, %v484_v35  ;;  %v494_v8 = vsel %vm480_vm8, %v491_v61, %v493_v60 }
 0x134   :  { %v9116_v32 = vmul.u32.u64.low %v9062_v12, %v494_v8  ;;  %v9117_v19 = vmul.u32.u64.high %v9062_v12, %v494_v8, %v9116_v32  ;;  %v9120_v51 = vmul.u32.u64.low %v9062_v12, %v490_v4  ;;  %v9121_v29 = vmul.u32.u64.high %v9062_v12, %v490_v4, %v9120_v51 }
 0x135   :  { %v9126_v55 = vmul.f32 %v9043_v43, %v8399_v16  ;;  %v1150_v41 = vor.u32 4788187, %v1149_v49  ;;  %v1160_v39 = vsel %vm9088_vm5, 0, %v9060_v52  ;;  %v7510_v56 = vadd.s32 4294967169, %v1283_v23 }
 0x136   :  { %v9133_v54 = vmul.f32 %v9049_v45, %v8399_v16  ;;  %v9137_v1 = vmul.f32 %v8428_v34, %v8401_v17  ;;  %v9141_v38 = vmul.f32 %v8436_v37, %v8401_v17  ;;  %v486_v35 = vsel %vm480_vm8, %v483_v27, %v485_v11  ;;  %v9145_v58 = vpop.eup %8064 }
 0x137   :  { %v9148_v52 = vand.u32 3, %v9052_v3  ;;  %v1151_v15 = vand.u32 2147483647, %v1150_v41  ;;  %v1153_v62 = vcvt.s32.f32 %v1146_v14  ;;  %v1289_v16 = vadd.s32 1, %v7510_v56 }
 0x138   :  { %v8067_v61 = vpop.eup %8066  ;;  %v1164_v6 = vadd.s32 3, %v1160_v39  ;;  %vm504_vm11 = vc.u32 %v9117_v19, %v9120_v51  ;;  %v505_v10 = vadd.s32 1, %v9121_v29  ;;  %v1287_v17 = vor.u32 8388608, %v9076_v40 }
 0x139   :  { %v9156_v2 = vmul.f32 %v9043_v43, %v8411_v24  ;;  %v1154_v44 = vmul.f32 %v1153_v62, %v1151_v15  ;;  %v502_v3 = vmul.u32 %v9062_v12, %v486_v35  ;;  %vm1290_vm12 = vcmp.gt.s32.totalorder %v1289_v16, 0 }
 0x13a   :  { %v9161_v22 = vmul.f32 %v9049_v45, %v8411_v24  ;;  %v506_v27 = vsel %vm504_vm11, %v505_v10, %v9121_v29  ;;  %v1291_v4 = vsel %vm1290_vm12, %v1289_v16, 0  ;;  %v2010_v60 = vand.u32 2139095040, %v8985_v26 }
 0x13b   :  { %v9167_v40 = vmul.f32 %v8507_v21, %v8461_v47  ;;  %vm338_vm13 = vcmp.eq.s32.totalorder %v9148_v52, 2  ;;  %v1155_v23 = vxor.u32 2147483648, %v1154_v44  ;;  %v507_v14 = vadd.s32 %v506_v27, %v502_v3 }
 0x13c   :  { %vm335_vm15 = vcmp.eq.s32.totalorder %v9148_v52, 0  ;;  %v9171_v12 = vand.u32 3, %v1164_v6  ;;  %v1293_v49 = vand.u32 31, %v1291_v4  ;;  %v9173_v24 = vshll.u32 %v1287_v17, 8 }
 0x13d   :  { %v15428_v11 = vand.u32 2147483647, %v8985_v26  ;;  %v336_v8 = vxor.u32 2147483648, %v8067_v61  ;;  %v339_v32 = vxor.u32 2147483648, %v9145_v58  ;;  %v1156_v29 = vsel %vm1073_vm4, %v1155_v23, %v1154_v44 }
 0x13e   :  { %v508_v41 = vadd.s32 536870912, %v507_v14  ;;  %v1159_v39 = vsel %vm9088_vm5, %v8713_v59, %v1156_v29  ;;  %v9182_v56 = vshrl.u32 %v1291_v4, 5  ;;  %v1294_v35 = vsub.s32 32, %v1293_v49 }
 0x13f   :  { %v2011_v15 = vshrl.u32 %v2010_v60, 23  ;;  %8068 = vcosq.f32 %v1159_v39  ;;  %v1296_v16 = vshll.u32 %v15514_v63, %v1293_v49  ;;  %v1299_v6 = vshll.u32 %v15520_v31, %v1293_v49 }
 0x140   :  { %v9184_v62 = vshrl.u32 %v508_v41, 30  ;;  %vm334_vm0 = vcmp.lt.s32.totalorder %v9148_v52, 2  ;;  %8070 = vsinq.f32 %v1159_v39  ;;  %v1297_v10 = vshrl.u32 %v15520_v31, %v1294_v35 }
 0x141   :  { %v1300_v17 = vshrl.u32 %v15510_v36, %v1294_v35  ;;  %v1302_v20 = vshll.u32 %v15510_v36, %v1293_v49  ;;  %v1303_v3 = vshrl.u32 %v15511_v5, %v1294_v35  ;;  %v1305_v27 = vshll.u32 %v15511_v5, %v1293_v49 }
 0x142   :  { %v510_v44 = vshll.u32 %v9184_v62, 30  ;;  %v1306_v4 = vshrl.u32 %v15512_v13, %v1294_v35  ;;  %v1298_v60 = vor.u32 %v1297_v10, %v1296_v16  ;;  %v1308_v29 = vshll.u32 %v15512_v13, %v1293_v49 }
 0x143   :  { %v1301_v23 = vor.u32 %v1300_v17, %v1299_v6  ;;  %v1309_v41 = vshrl.u32 %v15513_v18, %v1294_v35  ;;  %vm1170_vm1 = vcmp.eq.s32.totalorder %v9171_v12, 2  ;;  %v1304_v48 = vor.u32 %v1303_v3, %v1302_v20 }
 0x144   :  { %v9199_v39 = vsub.s32 %v507_v14, %v510_v44  ;;  %v1307_v9 = vor.u32 %v1306_v4, %v1305_v27  ;;  %v9203_v7 = vand.u32 8388607, %v15428_v11  ;;  %v340_v45 = vsel %vm338_vm13, %v339_v32, %v8067_v61 }
 0x145   :  { %vm1167_vm14 = vcmp.eq.s32.totalorder %v9171_v12, 0  ;;  %v503_v49 = vadd.s32 %v9120_v51, %v9117_v19  ;;  %v1310_v16 = vor.u32 %v1309_v41, %v1308_v29  ;;  %v7538_v6 = vadd.s32 4294967169, %v2011_v15 }
 0x146   :  { %v337_v14 = vsel %vm335_vm15, %v9145_v58, %v336_v8  ;;  %vm1166_vm2 = vcmp.lt.s32.totalorder %v9171_v12, 2  ;;  %v513_v10 = vsub.s32 0, %v9199_v39  ;;  %vm1311_vm3 = vcmp.lt.s32.totalorder %v9182_v56, 1 }
 0x147   :  { %vm1314_vm4 = vcmp.lt.s32.totalorder %v9182_v56, 4  ;;  %vm331_vm5 = vweird.f32 %v8699_v50  ;;  %vm1163_vm6 = vweird.f32 %v8713_v59  ;;  %vm1313_vm7 = vcmp.lt.s32.totalorder %v9182_v56, 3 }
 0x148   :  { %v1316_v19 = vsel %vm1314_vm4, %v1304_v48, 2102212464  ;;  %v1319_v51 = vsel %vm1311_vm3, %v1298_v60, %v1301_v23  ;;  %v1320_v61 = vsel %vm1314_vm4, %v1307_v9, 920167782  ;;  %v7479_v58 = vmin.u32 %v513_v10, %v9199_v39 }
 0x149   :  { %v1295_v8 = vshrl.u32 %v15514_v63, %v1294_v35  ;;  %vm1312_vm8 = vcmp.lt.s32.totalorder %v9182_v56, 2  ;;  %v1321_v32 = vsel %vm1313_vm7, %v1304_v48, %v1320_v61  ;;  %v1323_v17 = vsel %vm1311_vm3, %v1301_v23, %v1304_v48  ;;  %v8069_v3 = vpop.eup %8068 }
 0x14a   :  { %v1322_v15 = vsel %vm1312_vm8, %v1319_v51, %v1321_v32  ;;  %v1324_v20 = vsel %vm1314_vm4, %v1310_v16, 1326507024  ;;  %v2017_v44 = vadd.s32 1, %v7538_v6  ;;  %v341_v27 = vsel %vm334_vm0, %v337_v14, %v340_v45  ;;  %v8071_v41 = vpop.eup %8070 }
 0x14b   :  { %v515_v4 = vclz %v7479_v58  ;;  %v1315_v35 = vsel %vm1311_vm3, %v1295_v8, %v1298_v60  ;;  %v1317_v29 = vsel %vm1313_vm7, %v1301_v23, %v1316_v19  ;;  %v1171_v10 = vxor.u32 2147483648, %v8069_v3 }
 0x14c   :  { %v1325_v51 = vsel %vm1313_vm7, %v1307_v9, %v1324_v20  ;;  %v9240_v48 = vmul.u32.u64.low %v9173_v24, %v1322_v15  ;;  %v9241_v16 = vmul.u32.u64.high %v9173_v24, %v1322_v15, %v9240_v48  ;;  %v1168_v6 = vxor.u32 2147483648, %v8071_v41 }
 0x14d   :  { %v7480_v52 = vadd.s32 4294967294, %v515_v4  ;;  %v1326_v45 = vsel %vm1312_vm8, %v1323_v17, %v1325_v51  ;;  %vm2018_vm9 = vcmp.gt.s32.totalorder %v2017_v44, 0  ;;  %v1172_v60 = vsel %vm1170_vm1, %v1171_v10, %v8071_v41 }
 0x14e   :  { %v9249_v23 = vmul.u32.u64.low %v9173_v24, %v1326_v45  ;;  %v9250_v14 = vmul.u32.u64.high %v9173_v24, %v1326_v45, %v9249_v23  ;;  %v2019_v19 = vsel %vm2018_vm9, %v2017_v44, 0  ;;  %v1169_v9 = vsel %vm1167_vm14, %v8069_v3, %v1168_v6 }
 0x14f   :  { %vm7481_vm10 = vcmp.lt.s32.totalorder %v7480_v52, 0  ;;  %v1318_v61 = vsel %vm1312_vm8, %v1315_v35, %v1317_v29  ;;  %v2021_v58 = vand.u32 31, %v2019_v19  ;;  %v1173_v8 = vsel %vm1166_vm2, %v1169_v9, %v1172_v60 }
 0x150   :  { %v518_v32 = vsel %vm7481_vm10, 0, %v7480_v52  ;;  %v1337_v15 = vadd.s32 1, %v9241_v16  ;;  %v2015_v17 = vor.u32 8388608, %v9203_v7  ;;  %v342_v20 = vsel %vm331_vm5, nan, %v341_v27 }
 0x151   :  { %v1174_v44 = vsel %vm1163_vm6, nan, %v1173_v8  ;;  %v519_v3 = vsub.s32 32, %v518_v32  ;;  %v523_v4 = vsub.s32 4294967266, %v518_v32  ;;  %v1334_v56 = vmul.u32 %v9173_v24, %v1318_v61 }
 0x152   :  { %v7744_v41 = vpack.c.bf16 %v1174_v44, %v342_v20  ;;  %vm1336_vm11 = vc.u32 %v9250_v14, %v9240_v48  ;;  %v2022_v12 = vsub.s32 32, %v2021_v58  ;;  %v520_v35 = vshll.u32 %v9199_v39, %v518_v32 }
 0x153   :  { %v521_v29 = vshrl.u32 %v503_v49, %v519_v3  ;;  %v524_v10 = vadd.s32 127, %v523_v4  ;;  %v1338_v7 = vsel %vm1336_vm11, %v1337_v15, %v9241_v16  ;;  %v9269_v27 = vshrl.u32 %v2019_v19, 5 }
 0x154   :  { %7745 = vmatpush1.bf16.msra.mxu0 %v7744_v41  ;;  %v1339_v50 = vadd.s32 %v1338_v7, %v1334_v56  ;;  %v2024_v59 = vshll.u32 %v15514_v63, %v2021_v58  ;;  %v2025_v51 = vshrl.u32 %v15520_v31, %v2022_v12  ;;  %vm449_vm12 = vcmp.lt.s32.totalorder %v8997_v46, 0 }
 0x155   :  { %v522_v24 = vor.u32 %v521_v29, %v520_v35  ;;  %v525_v6 = vshll.u32 %v524_v10, 23  ;;  %v2027_v52 = vshll.u32 %v15520_v31, %v2021_v58  ;;  %v2028_v39 = vshrl.u32 %v15510_v36, %v2022_v12 }
 0x156   :  { %v1340_v49 = vadd.s32 536870912, %v1339_v50  ;;  %v2026_v45 = vor.u32 %v2025_v51, %v2024_v59  ;;  %v2030_v16 = vshll.u32 %v15510_v36, %v2021_v58  ;;  %v2031_v60 = vshrl.u32 %v15511_v5, %v2022_v12 }
 0x157   :  { %v526_v23 = vor.u32 4788187, %v525_v6  ;;  %v2029_v19 = vor.u32 %v2028_v39, %v2027_v52  ;;  %v2033_v9 = vshll.u32 %v15511_v5, %v2021_v58  ;;  %v2034_v61 = vshrl.u32 %v15512_v13, %v2022_v12 }
 0x158   :  { %v15542_v8 = vand.u32 2147483647, %v8997_v46  ;;  %v529_v15 = vcvt.s32.f32 %v522_v24  ;;  %v1341_v20 = vshrl.u32 %v1340_v49, 30  ;;  %v2037_v44 = vshrl.u32 %v15513_v18, %v2022_v12 }
 0x159   :  { %v527_v3 = vand.u32 2147483647, %v526_v23  ;;  %v2032_v4 = vor.u32 %v2031_v60, %v2030_v16  ;;  %v2035_v41 = vor.u32 %v2034_v61, %v2033_v9  ;;  %v2036_v56 = vshll.u32 %v15512_v13, %v2021_v58 }
 0x15a   :  { %vm9282_vm13 = vcmp.le.f32.partialorder %v15542_v8, 0.7853982  ;;  %v533_v35 = vsub.s32 4, %v9184_v62  ;;  %v1342_v29 = vshll.u32 %v1341_v20, 30  ;;  %vm2039_vm15 = vcmp.lt.s32.totalorder %v9269_v27, 1 }
 0x15b   :  { %v2055_v10 = vshll.u32 %v2015_v17, 8  ;;  %v530_v7 = vmul.f32 %v529_v15, %v527_v3  ;;  %v2038_v59 = vor.u32 %v2037_v44, %v2036_v56  ;;  %vm2042_vm0 = vcmp.lt.s32.totalorder %v9269_v27, 4  ;;  %v15545_v56 = vld [vmem:[#allocation20_spill] sm:$0xff] }
 0x15c   :  { %v2047_v51 = vsel %vm2039_vm15, %v2026_v45, %v2029_v19  ;;  %v9293_v24 = vsub.s32 %v1339_v50, %v1342_v29  ;;  %v2023_v6 = vshrl.u32 %v15514_v63, %v2022_v12  ;;  %vm2041_vm1 = vcmp.lt.s32.totalorder %v9269_v27, 3 }
 0x15d   :  { %v2048_v58 = vsel %vm2042_vm0, %v2035_v41, 920167782  ;;  %v531_v52 = vxor.u32 2147483648, %v530_v7  ;;  %vm2040_vm14 = vcmp.lt.s32.totalorder %v9269_v27, 2  ;;  %v2044_v17 = vsel %vm2042_vm0, %v2032_v4, 2102212464 }
 0x15e   :  { %v2049_v39 = vsel %vm2041_vm1, %v2032_v4, %v2048_v58  ;;  %v534_v50 = vsel %vm449_vm12, %v533_v35, %v9184_v62  ;;  %v1345_v12 = vsub.s32 0, %v9293_v24  ;;  %v1365_v49 = vsub.s32 4, %v1341_v20 }
 0x15f   :  { %v2050_v16 = vsel %vm2040_vm14, %v2047_v51, %v2049_v39  ;;  %v532_v60 = vsel %vm449_vm12, %v531_v52, %v530_v7  ;;  %v2043_v23 = vsel %vm2039_vm15, %v2023_v6, %v2026_v45  ;;  %v2051_v9 = vsel %vm2039_vm15, %v2029_v19, %v2032_v4 }
 0x160   :  { %v2052_v61 = vsel %vm2042_vm0, %v2038_v59, 1326507024  ;;  %v535_v62 = vsel %vm9282_vm13, %v8997_v46, %v532_v60  ;;  %v7511_v8 = vmin.u32 %v1345_v12, %v9293_v24  ;;  %v2045_v15 = vsel %vm2041_vm1, %v2029_v19, %v2044_v17 }
 0x161   :  { %v2053_v44 = vsel %vm2041_vm1, %v2035_v41, %v2052_v61  ;;  %8072 = vcosq.f32 %v535_v62  ;;  %v9328_v3 = vmul.u32.u64.low %v2055_v10, %v2050_v16  ;;  %v9329_v4 = vmul.u32.u64.high %v2055_v10, %v2050_v16, %v9328_v3 }
 0x162   :  { %v2054_v45 = vsel %vm2040_vm14, %v2051_v9, %v2053_v44  ;;  %v105_v35 = vmul.f32 %v15545_v56, %v8423_v33  ;;  %v202_v29 = vmul.f32 %v8507_v21, %v8473_v53  ;;  %8074 = vsinq.f32 %v535_v62  ;;  %v15549_v62 = vld [vmem:[#allocation6_spill] sm:$0xff] }
 0x163   :  { %v1347_v7 = vclz %v7511_v8  ;;  %v113_v19 = vmul.f32 %v15545_v56, %v8448_v42  ;;  %vm1281_vm2 = vcmp.lt.s32.totalorder %v9034_v28, 0  ;;  %v536_v51 = vsel %vm9282_vm13, 0, %v534_v50 }
 0x164   :  { %v9339_v41 = vmul.u32.u64.low %v2055_v10, %v2054_v45  ;;  %v9340_v59 = vmul.u32.u64.high %v2055_v10, %v2054_v45, %v9339_v41  ;;  %v2046_v58 = vsel %vm2040_vm14, %v2043_v23, %v2045_v15  ;;  %v2842_v52 = vand.u32 2139095040, %v9001_v0 }
 0x165   :  { %v7512_v6 = vadd.s32 4294967294, %v1347_v7  ;;  %v15546_v21 = vand.u32 2147483647, %v9034_v28  ;;  %v1366_v39 = vsel %vm1281_vm2, %v1365_v49, %v1341_v20  ;;  %v2065_v12 = vadd.s32 1, %v9329_v4 }
 0x166   :  { %v9357_v32 = vadd.f32 %v9167_v40, %v105_v35  ;;  %v15427_v27 = vand.u32 2147483647, %v9001_v0  ;;  %v2843_v50 = vshrl.u32 %v2842_v52, 23  ;;  %v9360_v16 = vadd.f32 %v202_v29, %v113_v19 }
 0x167   :  { %vm9349_vm3 = vcmp.le.f32.partialorder %v15546_v21, 0.7853982  ;;  %vm7513_vm4 = vcmp.lt.s32.totalorder %v7512_v6, 0  ;;  %v540_v60 = vadd.s32 3, %v536_v51  ;;  %v2062_v9 = vmul.u32 %v2055_v10, %v2046_v58 }
 0x168   :  { %v1350_v23 = vsel %vm7513_vm4, 0, %v7512_v6  ;;  %vm2064_vm5 = vc.u32 %v9340_v59, %v9328_v3  ;;  %v1335_v20 = vadd.s32 %v9240_v48, %v9250_v14  ;;  %v658_v8 = vand.u32 2139095040, %v15549_v62  ;;  %v15550_v48 = vld [vmem:[#allocation7_spill] sm:$0xff] }
 0x169   :  { %v1351_v49 = vsub.s32 32, %v1350_v23  ;;  %v1355_v61 = vsub.s32 4294967266, %v1350_v23  ;;  %v2066_v40 = vsel %vm2064_vm5, %v2065_v12, %v9329_v4  ;;  %v1368_v15 = vsel %vm9349_vm3, 0, %v1366_v39 }
 0x16a   :  { %v2067_v44 = vadd.s32 %v2066_v40, %v2062_v9  ;;  %v7570_v45 = vadd.s32 4294967169, %v2843_v50  ;;  %v1352_v56 = vshll.u32 %v9293_v24, %v1350_v23  ;;  %v2846_v29 = vand.u32 8388607, %v15427_v27 }
 0x16b   :  { %v1353_v10 = vshrl.u32 %v1335_v20, %v1351_v49  ;;  %v1356_v35 = vadd.s32 127, %v1355_v61  ;;  %v8073_v7 = vpop.eup %8072  ;;  %v9374_v19 = vand.u32 3, %v540_v60  ;;  %v9378_v6 = vmul.f32 %v8428_v34, %v8413_v25 }
 0x16c   :  { %v2068_v4 = vadd.s32 536870912, %v2067_v44  ;;  %v2849_v41 = vadd.s32 1, %v7570_v45  ;;  %v8075_v51 = vpop.eup %8074  ;;  %v2218_v24 = vand.u32 2139095040, %v9357_v32  ;;  %v9383_v21 = vmul.f32 %v8436_v37, %v8413_v25 }
 0x16d   :  { %v1354_v58 = vor.u32 %v1353_v10, %v1352_v56  ;;  %v1357_v52 = vshll.u32 %v1356_v35, 23  ;;  %v1372_v39 = vadd.s32 3, %v1368_v15  ;;  %v9387_v50 = vshrl.u32 %v658_v8, 23 }
 0x16e   :  { %v9385_v12 = vshrl.u32 %v2068_v4, 30  ;;  %vm2850_vm6 = vcmp.gt.s32.totalorder %v2849_v41, 0  ;;  %v2847_v23 = vor.u32 8388608, %v2846_v29  ;;  %vm543_vm7 = vcmp.eq.s32.totalorder %v9374_v19, 0 }
 0x16f   :  { %v1358_v60 = vor.u32 4788187, %v1357_v52  ;;  %v2851_v9 = vsel %vm2850_vm6, %v2849_v41, 0  ;;  %v544_v34 = vxor.u32 2147483648, %v8075_v51  ;;  %v547_v20 = vxor.u32 2147483648, %v8073_v7 }
 0x170   :  { %v2070_v49 = vshll.u32 %v9385_v12, 30  ;;  %v1361_v40 = vcvt.s32.f32 %v1354_v58  ;;  %v2853_v45 = vand.u32 31, %v2851_v9  ;;  %v2219_v25 = vshrl.u32 %v2218_v24, 23 }
 0x171   :  { %v1359_v61 = vand.u32 2147483647, %v1358_v60  ;;  %vm546_vm8 = vcmp.eq.s32.totalorder %v9374_v19, 2  ;;  %v9392_v37 = vand.u32 3, %v1372_v39  ;;  %v2063_v8 = vadd.s32 %v9328_v3, %v9340_v59 }
 0x172   :  { %v9396_v15 = vsub.s32 %v2067_v44, %v2070_v49  ;;  %v2854_v10 = vsub.s32 32, %v2853_v45  ;;  %v9398_v35 = vshll.u32 %v2847_v23, 8  ;;  %v9403_v4 = vsel %vm543_vm7, %v8073_v7, %v544_v34 }
 0x173   :  { %v1362_v56 = vmul.f32 %v1361_v40, %v1359_v61  ;;  %v9405_v41 = vsel %vm546_vm8, %v547_v20, %v8075_v51  ;;  %v2852_v52 = vshrl.u32 %v2851_v9, 5  ;;  %v7546_v44 = vadd.s32 4294967169, %v2219_v25 }
 0x174   :  { %v2073_v58 = vsub.s32 0, %v9396_v15  ;;  %v2857_v3 = vshrl.u32 %v15520_v31, %v2854_v10  ;;  %v2860_v59 = vshrl.u32 %v15510_v36, %v2854_v10  ;;  %v2856_v60 = vshll.u32 %v15514_v63, %v2853_v45 }
 0x175   :  { %v1363_v24 = vxor.u32 2147483648, %v1362_v56  ;;  %v2859_v23 = vshll.u32 %v15520_v31, %v2853_v45  ;;  %v2863_v7 = vshrl.u32 %v15511_v5, %v2854_v10  ;;  %v2862_v34 = vshll.u32 %v15510_v36, %v2853_v45 }
 0x176   :  { %v7539_v39 = vmin.u32 %v2073_v58, %v9396_v15  ;;  %v2865_v9 = vshll.u32 %v15511_v5, %v2853_v45  ;;  %v2866_v20 = vshrl.u32 %v15512_v13, %v2854_v10  ;;  %v2855_v40 = vshrl.u32 %v15514_v63, %v2854_v10 }
 0x177   :  { %v1364_v51 = vsel %vm1281_vm2, %v1363_v24, %v1362_v56  ;;  %v2858_v25 = vor.u32 %v2857_v3, %v2856_v60  ;;  %v2861_v58 = vor.u32 %v2860_v59, %v2859_v23  ;;  %v2864_v27 = vor.u32 %v2863_v7, %v2862_v34 }
 0x178   :  { %v1367_v49 = vsel %vm9349_vm3, %v9034_v28, %v1364_v51  ;;  %v2075_v61 = vclz %v7539_v39  ;;  %v2867_v11 = vor.u32 %v2866_v20, %v2865_v9  ;;  %v2868_v24 = vshll.u32 %v15512_v13, %v2853_v45 }
 0x179   :  { %8076 = vcosq.f32 %v1367_v49  ;;  %v2869_v14 = vshrl.u32 %v15513_v18, %v2854_v10  ;;  %vm2871_vm9 = vcmp.lt.s32.totalorder %v2852_v52, 1  ;;  %vm2872_vm10 = vcmp.lt.s32.totalorder %v2852_v52, 2 }
 0x17a   :  { %8078 = vsinq.f32 %v1367_v49  ;;  %v7540_v56 = vadd.s32 4294967294, %v2075_v61  ;;  %vm2873_vm11 = vcmp.lt.s32.totalorder %v2852_v52, 3  ;;  %vm2874_vm12 = vcmp.lt.s32.totalorder %v2852_v52, 4 }
 0x17b   :  { %v2870_v17 = vor.u32 %v2869_v14, %v2868_v24  ;;  %v2875_v39 = vsel %vm2871_vm9, %v2855_v40, %v2858_v25  ;;  %v2876_v51 = vsel %vm2874_vm12, %v2864_v27, 2102212464  ;;  %v2879_v59 = vsel %vm2871_vm9, %v2858_v25, %v2861_v58 }
 0x17c   :  { %vm7541_vm13 = vcmp.lt.s32.totalorder %v7540_v56, 0  ;;  %v2877_v3 = vsel %vm2873_vm11, %v2861_v58, %v2876_v51  ;;  %v2880_v60 = vsel %vm2874_vm12, %v2867_v11, 920167782  ;;  %v2883_v45 = vsel %vm2871_vm9, %v2861_v58, %v2864_v27 }
 0x17d   :  { %v2078_v29 = vsel %vm7541_vm13, 0, %v7540_v56  ;;  %v2878_v10 = vsel %vm2872_vm10, %v2875_v39, %v2877_v3  ;;  %v2881_v9 = vsel %vm2873_vm11, %v2864_v27, %v2880_v60  ;;  %v2884_v20 = vsel %vm2874_vm12, %v2870_v17, 1326507024 }
 0x17e   :  { %v2079_v23 = vsub.s32 32, %v2078_v29  ;;  %v2080_v7 = vshll.u32 %v9396_v15, %v2078_v29  ;;  %v2083_v34 = vsub.s32 4294967266, %v2078_v29  ;;  %v2225_v49 = vadd.s32 1, %v7546_v44 }
 0x17f   :  { %vm539_vm15 = vweird.f32 %v8997_v46  ;;  %vm1371_vm0 = vweird.f32 %v9034_v28  ;;  %v2882_v40 = vsel %vm2872_vm10, %v2879_v59, %v2881_v9  ;;  %v2885_v25 = vsel %vm2873_vm11, %v2867_v11, %v2884_v20 }
 0x180   :  { %v2081_v14 = vshrl.u32 %v2063_v8, %v2079_v23  ;;  %v2084_v61 = vadd.s32 127, %v2083_v34  ;;  %v2886_v15 = vsel %vm2872_vm10, %v2883_v45, %v2885_v25  ;;  %vm2226_vm1 = vcmp.gt.s32.totalorder %v2225_v49, 0 }
 0x181   :  { %v9435_v29 = vmul.u32.u64.low %v9398_v35, %v2882_v40  ;;  %v9436_v58 = vmul.u32.u64.high %v9398_v35, %v2882_v40, %v9435_v29  ;;  %v9440_v56 = vmul.u32.u64.low %v9398_v35, %v2886_v15  ;;  %v9441_v24 = vmul.u32.u64.high %v9398_v35, %v2886_v15, %v9440_v56 }
 0x182   :  { %v2082_v27 = vor.u32 %v2081_v14, %v2080_v7  ;;  %v2085_v44 = vshll.u32 %v2084_v61, 23  ;;  %vm542_vm14 = vcmp.lt.s32.totalorder %v9374_v19, 2  ;;  %vm1375_vm2 = vcmp.eq.s32.totalorder %v9392_v37, 0 }
 0x183   :  { %v8077_v8 = vpop.eup %8076  ;;  %vm1378_vm3 = vcmp.eq.s32.totalorder %v9392_v37, 2  ;;  %v2227_v11 = vsel %vm2226_vm1, %v2225_v49, 0  ;;  %v549_v17 = vsel %vm542_vm14, %v9403_v4, %v9405_v41  ;;  %v15551_v3 = vand.u32 2147483647, %v9357_v32 }
 0x184   :  { %v8079_v52 = vpop.eup %8078  ;;  %v1379_v39 = vxor.u32 2147483648, %v8077_v8  ;;  %v2086_v51 = vor.u32 4788187, %v2085_v44  ;;  %vm2009_vm4 = vcmp.lt.s32.totalorder %v8985_v26, 0  ;;  %v2894_v23 = vmul.u32 %v9398_v35, %v2878_v10 }
 0x185   :  { %v2222_v59 = vand.u32 8388607, %v15551_v3  ;;  %v1376_v60 = vxor.u32 2147483648, %v8079_v52  ;;  %v2897_v19 = vadd.s32 1, %v9436_v58  ;;  %v2229_v7 = vand.u32 31, %v2227_v11 }
 0x186   :  { %v1380_v34 = vsel %vm1378_vm3, %v1379_v39, %v8079_v52  ;;  %v2087_v45 = vand.u32 2147483647, %v2086_v51  ;;  %v2089_v9 = vcvt.s32.f32 %v2082_v27  ;;  %vm2896_vm5 = vc.u32 %v9441_v24, %v9435_v29 }
 0x187   :  { %vm1374_vm6 = vcmp.lt.s32.totalorder %v9392_v37, 2  ;;  %v1377_v4 = vsel %vm1375_vm2, %v8077_v8, %v1376_v60  ;;  %v2898_v41 = vsel %vm2896_vm5, %v2897_v19, %v9436_v58  ;;  %v2230_v20 = vsub.s32 32, %v2229_v7 }
 0x188   :  { %v1381_v49 = vsel %vm1374_vm6, %v1377_v4, %v1380_v34  ;;  %v2090_v14 = vmul.f32 %v2089_v9, %v2087_v45  ;;  %v2899_v35 = vadd.s32 %v2898_v41, %v2894_v23  ;;  %v2223_v10 = vor.u32 8388608, %v2222_v59  ;;  %v15553_v41 = vld [vmem:[#allocation21_spill] sm:$0xff] }
 0x189   :  { %v550_v61 = vsel %vm539_vm15, nan, %v549_v17  ;;  %v1382_v40 = vsel %vm1371_vm0, nan, %v1381_v49  ;;  %v2233_v25 = vshrl.u32 %v15520_v31, %v2230_v20  ;;  %v2236_v15 = vshrl.u32 %v15510_v36, %v2230_v20 }
 0x18a   :  { %v7752_v27 = vpack.c.bf16 %v1382_v40, %v550_v61  ;;  %v2091_v37 = vxor.u32 2147483648, %v2090_v14  ;;  %v2093_v44 = vsub.s32 4, %v9385_v12  ;;  %v2900_v58 = vadd.s32 536870912, %v2899_v35 }
 0x18b   :  { %v2228_v56 = vshrl.u32 %v2227_v11, 5  ;;  %v2232_v8 = vshll.u32 %v15514_v63, %v2229_v7  ;;  %v2235_v52 = vshll.u32 %v15520_v31, %v2229_v7  ;;  %v2239_v46 = vshrl.u32 %v15511_v5, %v2230_v20 }
 0x18c   :  { %7753 = vmatpush1.bf16.msra.mxu1 %v7752_v27  ;;  %v2901_v17 = vshrl.u32 %v2900_v58, 30  ;;  %v2238_v28 = vshll.u32 %v15510_v36, %v2229_v7  ;;  %v2241_v39 = vshll.u32 %v15511_v5, %v2229_v7  ;;  %v2242_v51 = vshrl.u32 %v15512_v13, %v2230_v20 }
 0x18d   :  { %v2234_v3 = vor.u32 %v2233_v25, %v2232_v8  ;;  %v2237_v59 = vor.u32 %v2236_v15, %v2235_v52  ;;  %v2244_v60 = vshll.u32 %v15512_v13, %v2229_v7  ;;  %v2245_v11 = vshrl.u32 %v15513_v18, %v2230_v20 }
 0x18e   :  { %v2092_v23 = vsel %vm2009_vm4, %v2091_v37, %v2090_v14  ;;  %v2902_v19 = vshll.u32 %v2901_v17, 30  ;;  %v2240_v34 = vor.u32 %v2239_v46, %v2238_v28  ;;  %v2243_v45 = vor.u32 %v2242_v51, %v2241_v39 }
 0x18f   :  { %v15552_v9 = vand.u32 2139095040, %v15550_v48  ;;  %v102_v49 = vmul.f32 %v15553_v41, %v8423_v33  ;;  %v15554_v61 = vand.u32 2147483647, %v8985_v26  ;;  %v2246_v7 = vor.u32 %v2245_v11, %v2244_v60 }
 0x190   :  { %v2094_v14 = vsel %vm2009_vm4, %v2093_v44, %v9385_v12  ;;  %v9491_v25 = vsub.s32 %v2899_v35, %v2902_v19  ;;  %vm2247_vm8 = vcmp.lt.s32.totalorder %v2228_v56, 1  ;;  %vm2250_vm9 = vcmp.lt.s32.totalorder %v2228_v56, 4 }
 0x191   :  { %v9478_v4 = vshrl.u32 %v15552_v9, 23  ;;  %vm9484_vm7 = vcmp.le.f32.partialorder %v15554_v61, 0.7853982  ;;  %vm2249_vm10 = vcmp.lt.s32.totalorder %v2228_v56, 3  ;;  %v2255_v27 = vsel %vm2247_vm8, %v2234_v3, %v2237_v59 }
 0x192   :  { %v2095_v15 = vsel %vm9484_vm7, %v8985_v26, %v2092_v23  ;;  %v2256_v37 = vsel %vm2250_vm9, %v2243_v45, 920167782  ;;  %v2905_v58 = vsub.s32 0, %v9491_v25  ;;  %vm2248_vm11 = vcmp.lt.s32.totalorder %v2228_v56, 2 }
 0x193   :  { %v2257_v8 = vsel %vm2249_vm10, %v2240_v34, %v2256_v37  ;;  %v2263_v52 = vshll.u32 %v2223_v10, 8  ;;  %v2252_v46 = vsel %vm2250_vm9, %v2240_v34, 2102212464  ;;  %v2259_v35 = vsel %vm2247_vm8, %v2237_v59, %v2240_v34 }
 0x194   :  { %v2258_v12 = vsel %vm2248_vm11, %v2255_v27, %v2257_v8  ;;  %v2260_v44 = vsel %vm2250_vm9, %v2246_v7, 1326507024  ;;  %8080 = vcosq.f32 %v2095_v15  ;;  %v7571_v28 = vmin.u32 %v2905_v58, %v9491_v25 }
 0x195   :  { %v2231_v39 = vshrl.u32 %v15514_v63, %v2230_v20  ;;  %v2261_v51 = vsel %vm2249_vm10, %v2243_v45, %v2260_v44  ;;  %v2925_v60 = vsub.s32 4, %v2901_v17  ;;  %v9511_v10 = vmul.f32 %v8706_v30, %v8423_v33  ;;  %v15557_v20 = vld [vmem:[#allocation22_spill] sm:$0xff] }
 0x196   :  { %v2262_v11 = vsel %vm2248_vm11, %v2259_v35, %v2261_v51  ;;  %v9505_v23 = vmul.u32.u64.low %v2263_v52, %v2258_v12  ;;  %v9506_v19 = vmul.u32.u64.high %v2263_v52, %v2258_v12, %v9505_v23  ;;  %v2907_v34 = vclz %v7571_v28 }
 0x197   :  { %v2251_v9 = vsel %vm2247_vm8, %v2231_v39, %v2234_v3  ;;  %v2253_v61 = vsel %vm2249_vm10, %v2237_v59, %v2252_v46  ;;  %v191_v7 = vmul.f32 %v15557_v20, %v8461_v47  ;;  %v3050_v37 = vand.u32 2139095040, %v9360_v16 }
 0x198   :  { %v9517_v45 = vmul.u32.u64.low %v2263_v52, %v2262_v11  ;;  %v9518_v27 = vmul.u32.u64.high %v2263_v52, %v2262_v11, %v9517_v45  ;;  %v2096_v58 = vsel %vm9484_vm7, 0, %v2094_v14  ;;  %8082 = vsinq.f32 %v2095_v15 }
 0x199   :  { %vm2841_vm12 = vcmp.lt.s32.totalorder %v9001_v0, 0  ;;  %v7572_v33 = vadd.s32 4294967294, %v2907_v34  ;;  %v2254_v59 = vsel %vm2248_vm11, %v2251_v9, %v2253_v61  ;;  %v2273_v8 = vadd.s32 1, %v9506_v19 }
 0x19a   :  { %v2926_v3 = vsel %vm2841_vm12, %v2925_v60, %v2901_v17  ;;  %v3051_v46 = vshrl.u32 %v3050_v37, 23  ;;  %v9529_v12 = vadd.s32 4294967169, %v9387_v50  ;;  %v9533_v35 = vmul.f32 %v15553_v41, %v8448_v42 }
 0x19b   :  { %v15558_v40 = vand.u32 2147483647, %v9001_v0  ;;  %vm7573_vm15 = vcmp.lt.s32.totalorder %v7572_v33, 0  ;;  %v2100_v17 = vadd.s32 3, %v2096_v58  ;;  %v2895_v56 = vadd.s32 %v9435_v29, %v9441_v24 }
 0x19c   :  { %v2910_v15 = vsel %vm7573_vm15, 0, %v7572_v33  ;;  %vm2272_vm0 = vc.u32 %v9518_v27, %v9505_v23  ;;  %v2270_v28 = vmul.u32 %v2263_v52, %v2254_v59  ;;  %v15429_v51 = vand.u32 2147483647, %v9360_v16 }
 0x19d   :  { %vm9537_vm13 = vcmp.le.f32.partialorder %v15558_v40, 0.7853982  ;;  %v2911_v50 = vsub.s32 32, %v2910_v15  ;;  %v2915_v44 = vsub.s32 4294967266, %v2910_v15  ;;  %v2274_v39 = vsel %vm2272_vm0, %v2273_v8, %v9506_v19 }
 0x19e   :  { %v2928_v41 = vsel %vm9537_vm13, 0, %v2926_v3  ;;  %v7578_v60 = vadd.s32 4294967169, %v3051_v46  ;;  %v9549_v11 = vadd.f32 %v191_v7, %v102_v49  ;;  %v8081_v34 = vpop.eup %8080  ;;  %v2912_v29 = vshll.u32 %v9491_v25, %v2910_v15 }
 0x19f   :  { %v2913_v24 = vshrl.u32 %v2895_v56, %v2911_v50  ;;  %v2916_v9 = vadd.s32 127, %v2915_v44  ;;  %v2275_v61 = vadd.s32 %v2274_v39, %v2270_v28  ;;  %v9554_v45 = vmul.f32 %v8827_v57, %v8461_v47 }
 0x1a0   :  { %v9556_v37 = vand.u32 3, %v2100_v17  ;;  %v2932_v52 = vadd.s32 3, %v2928_v41  ;;  %v3057_v58 = vadd.s32 1, %v7578_v60  ;;  %v9560_v19 = vmul.f32 %v15557_v20, %v8473_v53 }
 0x1a1   :  { %v2914_v49 = vor.u32 %v2913_v24, %v2912_v29  ;;  %v2917_v7 = vshll.u32 %v2916_v9, 23  ;;  %v2276_v33 = vadd.s32 536870912, %v2275_v61  ;;  %v9564_v25 = vmul.f32 %v8827_v57, %v8473_v53 }
 0x1a2   :  { %v2107_v3 = vxor.u32 2147483648, %v8081_v34  ;;  %v3054_v59 = vand.u32 8388607, %v15429_v51  ;;  %vm3058_vm1 = vcmp.gt.s32.totalorder %v3057_v58, 0  ;;  %v8083_v8 = vpop.eup %8082  ;;  %v1906_v20 = vand.u32 2139095040, %v9549_v11 }
 0x1a3   :  { %v2918_v46 = vor.u32 4788187, %v2917_v7  ;;  %v9568_v40 = vshrl.u32 %v2276_v33, 30  ;;  %v3059_v17 = vsel %vm3058_vm1, %v3057_v58, 0  ;;  %vm2103_vm14 = vcmp.eq.s32.totalorder %v9556_v37, 0 }
 0x1a4   :  { %vm2106_vm2 = vcmp.eq.s32.totalorder %v9556_v37, 2  ;;  %v9573_v56 = vand.u32 3, %v2932_v52  ;;  %v3061_v57 = vand.u32 31, %v3059_v17  ;;  %v2921_v50 = vcvt.s32.f32 %v2914_v49 }
 0x1a5   :  { %v2919_v15 = vand.u32 2147483647, %v2918_v46  ;;  %v2278_v44 = vshll.u32 %v9568_v40, 30  ;;  %v2104_v28 = vxor.u32 2147483648, %v8083_v8  ;;  %v9577_v39 = vsel %vm2106_vm2, %v2107_v3, %v8083_v8 }
 0x1a6   :  { %v3055_v60 = vor.u32 8388608, %v3054_v59  ;;  %v3062_v29 = vsub.s32 32, %v3061_v57  ;;  %v2271_v9 = vadd.s32 %v9505_v23, %v9518_v27  ;;  %v1907_v52 = vshrl.u32 %v1906_v20, 23 }
 0x1a7   :  { %v2922_v24 = vmul.f32 %v2921_v50, %v2919_v15  ;;  %v9581_v58 = vsub.s32 %v2275_v61, %v2278_v44  ;;  %v3060_v7 = vshrl.u32 %v3059_v17, 5  ;;  %v3064_v33 = vshll.u32 %v15514_v63, %v3061_v57 }
 0x1a8   :  { %v3065_v49 = vshrl.u32 %v15520_v31, %v3062_v29  ;;  %v3068_v46 = vshrl.u32 %v15510_v36, %v3062_v29  ;;  %v3067_v59 = vshll.u32 %v15520_v31, %v3061_v57  ;;  %v3071_v8 = vshrl.u32 %v15511_v5, %v3062_v29 }
 0x1a9   :  { %v2923_v51 = vxor.u32 2147483648, %v2922_v24  ;;  %v2281_v3 = vsub.s32 0, %v9581_v58  ;;  %v3070_v23 = vshll.u32 %v15510_v36, %v3061_v57  ;;  %v3073_v27 = vshll.u32 %v15511_v5, %v3061_v57 }
 0x1aa   :  { %v3066_v15 = vor.u32 %v3065_v49, %v3064_v33  ;;  %v3074_v61 = vshrl.u32 %v15512_v13, %v3062_v29  ;;  %v3069_v50 = vor.u32 %v3068_v46, %v3067_v59  ;;  %v3076_v44 = vshll.u32 %v15512_v13, %v3061_v57 }
 0x1ab   :  { %v2924_v17 = vsel %vm2841_vm12, %v2923_v51, %v2922_v24  ;;  %v7547_v20 = vmin.u32 %v2281_v3, %v9581_v58  ;;  %v3072_v48 = vor.u32 %v3071_v8, %v3070_v23  ;;  %v3077_v49 = vshrl.u32 %v15513_v18, %v3062_v29 }
 0x1ac   :  { %v2927_v41 = vsel %vm9537_vm13, %v9001_v0, %v2924_v17  ;;  %v3075_v33 = vor.u32 %v3074_v61, %v3073_v27  ;;  %v2105_v53 = vsel %vm2103_vm14, %v8081_v34, %v2104_v28  ;;  %v3095_v47 = vshll.u32 %v3055_v60, 8 }
 0x1ad   :  { %8084 = vcosq.f32 %v2927_v41  ;;  %v2283_v43 = vclz %v7547_v20  ;;  %vm2102_vm3 = vcmp.lt.s32.totalorder %v9556_v37, 2  ;;  %v3063_v51 = vshrl.u32 %v15514_v63, %v3062_v29 }
 0x1ae   :  { %8086 = vsinq.f32 %v2927_v41  ;;  %v3078_v57 = vor.u32 %v3077_v49, %v3076_v44  ;;  %v7534_v24 = vadd.s32 4294967169, %v1907_v52  ;;  %vm3079_vm4 = vcmp.lt.s32.totalorder %v3060_v7, 1 }
 0x1af   :  { %v7548_v46 = vadd.s32 4294967294, %v2283_v43  ;;  %vm3081_vm5 = vcmp.lt.s32.totalorder %v3060_v7, 3  ;;  %vm3082_vm6 = vcmp.lt.s32.totalorder %v3060_v7, 4  ;;  %v3087_v3 = vsel %vm3079_vm4, %v3066_v15, %v3069_v50 }
 0x1b0   :  { %v3084_v14 = vsel %vm3082_vm6, %v3072_v48, 2102212464  ;;  %v3088_v59 = vsel %vm3082_vm6, %v3075_v33, 920167782  ;;  %v3091_v8 = vsel %vm3079_vm4, %v3069_v50, %v3072_v48  ;;  %vm2099_vm7 = vweird.f32 %v8985_v26 }
 0x1b1   :  { %vm7549_vm8 = vcmp.lt.s32.totalorder %v7548_v46, 0  ;;  %vm3080_vm9 = vcmp.lt.s32.totalorder %v3060_v7, 2  ;;  %v3089_v34 = vsel %vm3081_vm5, %v3072_v48, %v3088_v59  ;;  %v3092_v28 = vsel %vm3082_vm6, %v3078_v57, 1326507024 }
 0x1b2   :  { %v2286_v41 = vsel %vm7549_vm8, 0, %v7548_v46  ;;  %v3083_v60 = vsel %vm3079_vm4, %v3063_v51, %v3066_v15  ;;  %v3090_v29 = vsel %vm3080_vm9, %v3087_v3, %v3089_v34  ;;  %v3093_v43 = vsel %vm3081_vm5, %v3075_v33, %v3092_v28 }
 0x1b3   :  { %vm2934_vm10 = vcmp.lt.s32.totalorder %v9573_v56, 2  ;;  %v2287_v52 = vsub.s32 32, %v2286_v41  ;;  %v2291_v23 = vsub.s32 4294967266, %v2286_v41  ;;  %v3085_v27 = vsel %vm3081_vm5, %v3069_v50, %v3084_v14 }
 0x1b4   :  { %v3094_v61 = vsel %vm3080_vm9, %v3091_v8, %v3093_v43  ;;  %v9614_v44 = vmul.u32.u64.low %v3095_v47, %v3090_v29  ;;  %v9615_v48 = vmul.u32.u64.high %v3095_v47, %v3090_v29, %v9614_v44  ;;  %v2288_v15 = vshll.u32 %v9581_v58, %v2286_v41 }
 0x1b5   :  { %v9611_v17 = vmul.u32.u64.low %v3095_v47, %v3094_v61  ;;  %v9612_v20 = vmul.u32.u64.high %v3095_v47, %v3094_v61, %v9611_v17  ;;  %v2289_v49 = vshrl.u32 %v2271_v9, %v2287_v52  ;;  %v2292_v51 = vadd.s32 127, %v2291_v23 }
 0x1b6   :  { %v1913_v33 = vadd.s32 1, %v7534_v24  ;;  %vm2935_vm11 = vcmp.eq.s32.totalorder %v9573_v56, 0  ;;  %vm2938_vm12 = vcmp.eq.s32.totalorder %v9573_v56, 2  ;;  %v3086_v50 = vsel %vm3080_vm9, %v3083_v60, %v3085_v27 }
 0x1b7   :  { %v9624_v57 = vadd.f32 %v9560_v19, %v9533_v35  ;;  %v8085_v46 = vpop.eup %8084  ;;  %v2109_v14 = vsel %vm2102_vm3, %v2105_v53, %v9577_v39  ;;  %v2290_v3 = vor.u32 %v2289_v49, %v2288_v15  ;;  %v2293_v58 = vshll.u32 %v2292_v51, 23 }
 0x1b8   :  { %vm1914_vm13 = vcmp.gt.s32.totalorder %v1913_v33, 0  ;;  %v8087_v9 = vpop.eup %8086  ;;  %v2939_v24 = vxor.u32 2147483648, %v8085_v46  ;;  %vm3104_vm15 = vc.u32 %v9612_v20, %v9614_v44  ;;  %v3105_v7 = vadd.s32 1, %v9615_v48 }
 0x1b9   :  { %v15561_v59 = vand.u32 2147483647, %v9549_v11  ;;  %v2936_v35 = vxor.u32 2147483648, %v8087_v9  ;;  %v2294_v19 = vor.u32 4788187, %v2293_v58  ;;  %v3102_v34 = vmul.u32 %v3095_v47, %v3086_v50 }
 0x1ba   :  { %v1915_v28 = vsel %vm1914_vm13, %v1913_v33, 0  ;;  %v2110_v53 = vsel %vm2099_vm7, nan, %v2109_v14  ;;  %v2940_v37 = vsel %vm2938_vm12, %v2939_v24, %v8087_v9  ;;  %v3106_v39 = vsel %vm3104_vm15, %v3105_v7, %v9615_v48 }
 0x1bb   :  { %v1910_v8 = vand.u32 8388607, %v15561_v59  ;;  %v1917_v41 = vand.u32 31, %v1915_v28  ;;  %v2937_v60 = vsel %vm2935_vm11, %v8085_v46, %v2936_v35  ;;  %v2295_v29 = vand.u32 2147483647, %v2294_v19 }
 0x1bc   :  { %v2297_v43 = vcvt.s32.f32 %v2290_v3  ;;  %v3107_v52 = vadd.s32 %v3106_v39, %v3102_v34  ;;  %vm2931_vm0 = vweird.f32 %v9001_v0  ;;  %v2941_v47 = vsel %vm2934_vm10, %v2937_v60, %v2940_v37 }
 0x1bd   :  { %vm2217_vm1 = vcmp.lt.s32.totalorder %v9357_v32, 0  ;;  %v1918_v26 = vsub.s32 32, %v1917_v41  ;;  %v2942_v23 = vsel %vm2931_vm0, nan, %v2941_v47  ;;  %v1911_v17 = vor.u32 8388608, %v1910_v8 }
 0x1be   :  { %v2298_v27 = vmul.f32 %v2297_v43, %v2295_v29  ;;  %v3108_v61 = vadd.s32 536870912, %v3107_v52  ;;  %v7746_v48 = vpack.c.bf16 %v2942_v23, %v2110_v53  ;;  %v2301_v15 = vsub.s32 4, %v9568_v40 }
 0x1bf   :  { %v1921_v49 = vshrl.u32 %v15520_v31, %v1918_v26  ;;  %v1924_v51 = vshrl.u32 %v15510_v36, %v1918_v26  ;;  %v1920_v0 = vshll.u32 %v15514_v63, %v1917_v41  ;;  %v1927_v56 = vshrl.u32 %v15511_v5, %v1918_v26 }
 0x1c0   :  { %v3109_v33 = vshrl.u32 %v3108_v61, 30  ;;  %v2738_v50 = vand.u32 2139095040, %v9624_v57  ;;  %7747 = vmatprep.subr.bf16.mxu0 %v7746_v48  ;;  %v15562_v46 = vand.u32 2147483647, %v9357_v32  ;;  %vm3049_vm2 = vcmp.lt.s32.totalorder %v9360_v16, 0 }
 0x1c1   :  { %v1916_v3 = vshrl.u32 %v1915_v28, 5  ;;  %v1923_v58 = vshll.u32 %v15520_v31, %v1917_v41  ;;  %v1929_v9 = vshll.u32 %v15511_v5, %v1917_v41  ;;  %v1930_v24 = vshrl.u32 %v15512_v13, %v1918_v26 }
 0x1c2   :  { %vm9653_vm14 = vcmp.le.f32.partialorder %v15562_v46, 0.7853982  ;;  %v2299_v7 = vxor.u32 2147483648, %v2298_v27  ;;  %v3110_v59 = vshll.u32 %v3109_v33, 30  ;;  %v1922_v8 = vor.u32 %v1921_v49, %v1920_v0 }
 0x1c3   :  { %v1926_v35 = vshll.u32 %v15510_v36, %v1917_v41  ;;  %v1925_v19 = vor.u32 %v1924_v51, %v1923_v58  ;;  %v1931_v34 = vor.u32 %v1930_v24, %v1929_v9  ;;  %v1932_v53 = vshll.u32 %v15512_v13, %v1917_v41 }
 0x1c4   :  { %v1933_v37 = vshrl.u32 %v15513_v18, %v1918_v26  ;;  %v9664_v39 = vsub.s32 %v3107_v52, %v3110_v59  ;;  %v1951_v60 = vshll.u32 %v1911_v17, 8  ;;  %v2735_v29 = vand.u32 2147483647, %v9624_v57 }
 0x1c5   :  { %v1928_v28 = vor.u32 %v1927_v56, %v1926_v35  ;;  %v2302_v43 = vsel %vm2217_vm1, %v2301_v15, %v9568_v40  ;;  %v1919_v47 = vshrl.u32 %v15514_v63, %v1918_v26  ;;  %v2739_v61 = vshrl.u32 %v2738_v50, 23 }
 0x1c6   :  { %v1934_v23 = vor.u32 %v1933_v37, %v1932_v53  ;;  %v3113_v48 = vsub.s32 0, %v9664_v39  ;;  %v3133_v49 = vsub.s32 4, %v3109_v33  ;;  %vm1935_vm3 = vcmp.lt.s32.totalorder %v1916_v3, 1 }
 0x1c7   :  { %vm1938_vm4 = vcmp.lt.s32.totalorder %v1916_v3, 4  ;;  %v2300_v41 = vsel %vm2217_vm1, %v2299_v7, %v2298_v27  ;;  %vm1937_vm5 = vcmp.lt.s32.totalorder %v1916_v3, 3  ;;  %v1943_v52 = vsel %vm1935_vm3, %v1922_v8, %v1925_v19 }
 0x1c8   :  { %v1944_v17 = vsel %vm1938_vm4, %v1931_v34, 920167782  ;;  %v7579_v51 = vmin.u32 %v3113_v48, %v9664_v39  ;;  %vm1936_vm6 = vcmp.lt.s32.totalorder %v1916_v3, 2  ;;  %v1940_v40 = vsel %vm1938_vm4, %v1928_v28, 2102212464 }
 0x1c9   :  { %v1945_v26 = vsel %vm1937_vm5, %v1928_v28, %v1944_v17  ;;  %v1947_v0 = vsel %vm1935_vm3, %v1925_v19, %v1928_v28  ;;  %v1948_v56 = vsel %vm1938_vm4, %v1934_v23, 1326507024  ;;  %v7566_v50 = vadd.s32 4294967169, %v2739_v61 }
 0x1ca   :  { %v1946_v15 = vsel %vm1936_vm6, %v1943_v52, %v1945_v26  ;;  %v2304_v46 = vsel %vm9653_vm14, 0, %v2302_v43  ;;  %v3115_v27 = vclz %v7579_v51  ;;  %v3134_v58 = vsel %vm3049_vm2, %v3133_v49, %v3109_v33 }
 0x1cb   :  { %v1939_v9 = vsel %vm1935_vm3, %v1919_v47, %v1922_v8  ;;  %v1941_v24 = vsel %vm1937_vm5, %v1925_v19, %v1940_v40  ;;  %v1949_v7 = vsel %vm1937_vm5, %v1931_v34, %v1948_v56  ;;  %v2303_v53 = vsel %vm9653_vm14, %v9357_v32, %v2300_v41 }
 0x1cc   :  { %v9686_v59 = vmul.u32.u64.low %v1951_v60, %v1946_v15  ;;  %v9687_v35 = vmul.u32.u64.high %v1951_v60, %v1946_v15, %v9686_v59  ;;  %v7580_v37 = vadd.s32 4294967294, %v3115_v27  ;;  %v1950_v28 = vsel %vm1936_vm6, %v1947_v0, %v1949_v7 }
 0x1cd   :  { %v2745_v43 = vadd.s32 1, %v7566_v50  ;;  %v15565_v33 = vand.u32 2147483647, %v9360_v16  ;;  %v9700_v19 = vmul.u32.u64.low %v1951_v60, %v1950_v28  ;;  %v9701_v34 = vmul.u32.u64.high %v1951_v60, %v1950_v28, %v9700_v19 }
 0x1ce   :  { %v2742_v47 = vand.u32 8388607, %v2735_v29  ;;  %vm7581_vm8 = vcmp.lt.s32.totalorder %v7580_v37, 0  ;;  %v1942_v23 = vsel %vm1936_vm6, %v1939_v9, %v1941_v24  ;;  %8088 = vcosq.f32 %v2303_v53 }
 0x1cf   :  { %vm9696_vm7 = vcmp.le.f32.partialorder %v15565_v33, 0.7853982  ;;  %vm2746_vm9 = vcmp.gt.s32.totalorder %v2745_v43, 0  ;;  %v2308_v61 = vadd.s32 3, %v2304_v46  ;;  %v3118_v48 = vsel %vm7581_vm8, 0, %v7580_v37 }
 0x1d0   :  { %v3136_v14 = vsel %vm9696_vm7, 0, %v3134_v58  ;;  %v1961_v49 = vadd.s32 1, %v9687_v35  ;;  %v3103_v41 = vadd.s32 %v9614_v44, %v9612_v20  ;;  %v3119_v52 = vsub.s32 32, %v3118_v48 }
 0x1d1   :  { %v3123_v17 = vsub.s32 4294967266, %v3118_v48  ;;  %v2747_v51 = vsel %vm2746_vm9, %v2745_v43, 0  ;;  %v3140_v40 = vadd.s32 3, %v3136_v14  ;;  %v1958_v26 = vmul.u32 %v1951_v60, %v1942_v23 }
 0x1d2   :  { %vm1960_vm10 = vc.u32 %v9701_v34, %v9686_v59  ;;  %v2743_v15 = vor.u32 8388608, %v2742_v47  ;;  %v3120_v3 = vshll.u32 %v9664_v39, %v3118_v48  ;;  %v3121_v0 = vshrl.u32 %v3103_v41, %v3119_v52 }
 0x1d3   :  { %v3124_v56 = vadd.s32 127, %v3123_v17  ;;  %v1962_v50 = vsel %vm1960_vm10, %v1961_v49, %v9687_v35  ;;  %v9716_v46 = vadd.s32 4294967169, %v9478_v4  ;;  %v112_v20 = vmul.f32 %v8706_v30, %v8448_v42 }
 0x1d4   :  { %v1963_v44 = vadd.s32 %v1962_v50, %v1958_v26  ;;  %v2749_v27 = vand.u32 31, %v2747_v51  ;;  %8090 = vsinq.f32 %v2303_v53  ;;  %v9720_v60 = vand.u32 3, %v2308_v61 }
 0x1d5   :  { %v3122_v58 = vor.u32 %v3121_v0, %v3120_v3  ;;  %v3125_v9 = vshll.u32 %v3124_v56, 23  ;;  %v9724_v39 = vadd.f32 %v9554_v45, %v9511_v10  ;;  %v9727_v35 = vadd.f32 %v9564_v25, %v112_v20 }
 0x1d6   :  { %v1964_v24 = vadd.s32 536870912, %v1963_v44  ;;  %v2750_v7 = vsub.s32 32, %v2749_v27  ;;  %v9729_v37 = vand.u32 3, %v3140_v40  ;;  %v9731_v42 = vshrl.u32 %v2747_v51, 5 }
 0x1d7   :  { %v3126_v4 = vor.u32 4788187, %v3125_v9  ;;  %v9733_v30 = vshll.u32 %v2743_v15, 8  ;;  %v3129_v53 = vcvt.s32.f32 %v3122_v58  ;;  %v2761_v45 = vshll.u32 %v15511_v5, %v2749_v27 }
 0x1d8   :  { %v1965_v28 = vshrl.u32 %v1964_v24, 30  ;;  %v2753_v43 = vshrl.u32 %v15520_v31, %v2750_v7  ;;  %v2756_v33 = vshrl.u32 %v15510_v36, %v2750_v7  ;;  %v2759_v10 = vshrl.u32 %v15511_v5, %v2750_v7  ;;  %v8089_v47 = vpop.eup %8088 }
 0x1d9   :  { %v3127_v19 = vand.u32 2147483647, %v3126_v4  ;;  %v2762_v25 = vshrl.u32 %v15512_v13, %v2750_v7  ;;  %v2752_v23 = vshll.u32 %v15514_v63, %v2749_v27  ;;  %v2755_v61 = vshll.u32 %v15520_v31, %v2749_v27 }
 0x1da   :  { %v1966_v14 = vshll.u32 %v1965_v28, 30  ;;  %v2758_v48 = vshll.u32 %v15510_v36, %v2749_v27  ;;  %v2764_v52 = vshll.u32 %v15512_v13, %v2749_v27  ;;  %v2765_v17 = vshrl.u32 %v15513_v18, %v2750_v7 }
 0x1db   :  { %v3130_v49 = vmul.f32 %v3129_v53, %v3127_v19  ;;  %v2763_v41 = vor.u32 %v2762_v25, %v2761_v45  ;;  %vm1905_vm11 = vcmp.lt.s32.totalorder %v9549_v11, 0  ;;  %v2754_v40 = vor.u32 %v2753_v43, %v2752_v23 }
 0x1dc   :  { %v9746_v51 = vsub.s32 %v1963_v44, %v1966_v14  ;;  %v2757_v26 = vor.u32 %v2756_v33, %v2755_v61  ;;  %v2760_v15 = vor.u32 %v2759_v10, %v2758_v48  ;;  %vm2314_vm12 = vcmp.eq.s32.totalorder %v9720_v60, 2 }
 0x1dd   :  { %v2315_v3 = vxor.u32 2147483648, %v8089_v47  ;;  %v3131_v0 = vxor.u32 2147483648, %v3130_v49  ;;  %v2766_v56 = vor.u32 %v2765_v17, %v2764_v52  ;;  %v2114_v50 = vand.u32 2139095040, %v9724_v39 }
 0x1de   :  { %vm2311_vm13 = vcmp.eq.s32.totalorder %v9720_v60, 0  ;;  %v1969_v20 = vsub.s32 0, %v9746_v51  ;;  %v2751_v27 = vshrl.u32 %v15514_v63, %v2750_v7  ;;  %vm2767_vm15 = vcmp.lt.s32.totalorder %v9731_v42, 1  ;;  %v8091_v44 = vpop.eup %8090 }
 0x1df   :  { %vm2770_vm0 = vcmp.lt.s32.totalorder %v9731_v42, 4  ;;  %v3132_v58 = vsel %vm3049_vm2, %v3131_v0, %v3130_v49  ;;  %v15568_v9 = vand.u32 2147483647, %v9549_v11  ;;  %v1989_v4 = vsub.s32 4, %v1965_v28 }
 0x1e0   :  { %vm2769_vm14 = vcmp.lt.s32.totalorder %v9731_v42, 3  ;;  %v2776_v53 = vsel %vm2770_vm0, %v2763_v41, 920167782  ;;  %v3135_v7 = vsel %vm9696_vm7, %v9360_v16, %v3132_v58  ;;  %v7535_v43 = vmin.u32 %v1969_v20, %v9746_v51 }
 0x1e1   :  { %vm9759_vm1 = vcmp.le.f32.partialorder %v15568_v9, 0.7853982  ;;  %v2772_v33 = vsel %vm2770_vm0, %v2760_v15, 2102212464  ;;  %v2775_v19 = vsel %vm2767_vm15, %v2754_v40, %v2757_v26  ;;  %8092 = vcosq.f32 %v3135_v7 }
 0x1e2   :  { %v2777_v10 = vsel %vm2769_vm14, %v2760_v15, %v2776_v53  ;;  %v2779_v45 = vsel %vm2767_vm15, %v2757_v26, %v2760_v15  ;;  %v2780_v25 = vsel %vm2770_vm0, %v2766_v56, 1326507024  ;;  %vm2310_vm2 = vcmp.lt.s32.totalorder %v9720_v60, 2 }
 0x1e3   :  { %v2312_v14 = vxor.u32 2147483648, %v8091_v44  ;;  %8094 = vsinq.f32 %v3135_v7  ;;  %v1971_v8 = vclz %v7535_v43  ;;  %vm2768_vm3 = vcmp.lt.s32.totalorder %v9731_v42, 2 }
 0x1e4   :  { %v2771_v23 = vsel %vm2767_vm15, %v2751_v27, %v2754_v40  ;;  %v2773_v61 = vsel %vm2769_vm14, %v2757_v26, %v2772_v33  ;;  %v2778_v48 = vsel %vm2768_vm3, %v2775_v19, %v2777_v10  ;;  %v2781_v49 = vsel %vm2769_vm14, %v2763_v41, %v2780_v25 }
 0x1e5   :  { %v7536_v52 = vadd.s32 4294967294, %v1971_v8  ;;  %v2782_v17 = vsel %vm2768_vm3, %v2779_v45, %v2781_v49  ;;  %v9783_v15 = vmul.u32.u64.low %v9733_v30, %v2778_v48  ;;  %v9784_v0 = vmul.u32.u64.high %v9733_v30, %v2778_v48, %v9783_v15 }
 0x1e6   :  { %vm2307_vm4 = vweird.f32 %v9357_v32  ;;  %v1990_v56 = vsel %vm1905_vm11, %v1989_v4, %v1965_v28  ;;  %v9791_v40 = vmul.u32.u64.low %v9733_v30, %v2782_v17  ;;  %v9792_v20 = vmul.u32.u64.high %v9733_v30, %v2782_v17, %v9791_v40 }
 0x1e7   :  { %v2115_v26 = vshrl.u32 %v2114_v50, 23  ;;  %v2316_v42 = vsel %vm2314_vm12, %v2315_v3, %v8091_v44  ;;  %vm3146_vm5 = vcmp.eq.s32.totalorder %v9729_v37, 2  ;;  %vm7537_vm6 = vcmp.lt.s32.totalorder %v7536_v52, 0 }
 0x1e8   :  { %v2774_v41 = vsel %vm2768_vm3, %v2771_v23, %v2773_v61  ;;  %v2313_v27 = vsel %vm2311_vm13, %v8089_v47, %v2312_v14  ;;  %vm3142_vm7 = vcmp.lt.s32.totalorder %v9729_v37, 2  ;;  %v1959_v28 = vadd.s32 %v9686_v59, %v9701_v34 }
 0x1e9   :  { %v1974_v58 = vsel %vm7537_vm6, 0, %v7536_v52  ;;  %v7542_v9 = vadd.s32 4294967169, %v2115_v26  ;;  %v1992_v50 = vsel %vm9759_vm1, 0, %v1990_v56  ;;  %v2793_v3 = vadd.s32 1, %v9784_v0 }
 0x1ea   :  { %v1975_v4 = vsub.s32 32, %v1974_v58  ;;  %v1979_v53 = vsub.s32 4294967266, %v1974_v58  ;;  %v2790_v44 = vmul.u32 %v9733_v30, %v2774_v41  ;;  %vm2792_vm8 = vc.u32 %v9792_v20, %v9783_v15 }
 0x1eb   :  { %v2111_v47 = vand.u32 2147483647, %v9724_v39  ;;  %v2121_v7 = vadd.s32 1, %v7542_v9  ;;  %v1976_v43 = vshll.u32 %v9746_v51, %v1974_v58  ;;  %v2794_v33 = vsel %vm2792_vm8, %v2793_v3, %v9784_v0  ;;  %v8093_v19 = vpop.eup %8092 }
 0x1ec   :  { %v1977_v59 = vshrl.u32 %v1959_v28, %v1975_v4  ;;  %v1980_v34 = vadd.s32 127, %v1979_v53  ;;  %v2317_v10 = vsel %vm2310_vm2, %v2313_v27, %v2316_v42  ;;  %v1996_v45 = vadd.s32 3, %v1992_v50 }
 0x1ed   :  { %v2795_v25 = vadd.s32 %v2794_v33, %v2790_v44  ;;  %vm2122_vm9 = vcmp.gt.s32.totalorder %v2121_v7, 0  ;;  %v8095_v30 = vpop.eup %8094  ;;  %v3147_v14 = vxor.u32 2147483648, %v8093_v19  ;;  %v2118_v51 = vand.u32 8388607, %v2111_v47 }
 0x1ee   :  { %v1978_v8 = vor.u32 %v1977_v59, %v1976_v43  ;;  %v1981_v23 = vshll.u32 %v1980_v34, 23  ;;  %v2123_v61 = vsel %vm2122_vm9, %v2121_v7, 0  ;;  %v3144_v48 = vxor.u32 2147483648, %v8095_v30 }
 0x1ef   :  { %v2796_v49 = vadd.s32 536870912, %v2795_v25  ;;  %v2125_v52 = vand.u32 31, %v2123_v61  ;;  %v2318_v17 = vsel %vm2307_vm4, nan, %v2317_v10  ;;  %vm3143_vm10 = vcmp.eq.s32.totalorder %v9729_v37, 0 }
 0x1f0   :  { %v3148_v60 = vsel %vm3146_vm5, %v3147_v14, %v8095_v30  ;;  %v1982_v0 = vor.u32 4788187, %v1981_v23  ;;  %v3145_v56 = vsel %vm3143_vm10, %v8093_v19, %v3144_v48  ;;  %v2946_v42 = vand.u32 2139095040, %v9727_v35 }
 0x1f1   :  { %v9820_v40 = vshrl.u32 %v2796_v49, 30  ;;  %v2126_v26 = vsub.s32 32, %v2125_v52  ;;  %vm3139_vm12 = vweird.f32 %v9360_v16  ;;  %v3149_v41 = vsel %vm3142_vm7, %v3145_v56, %v3148_v60 }
 0x1f2   :  { %v1983_v27 = vand.u32 2147483647, %v1982_v0  ;;  %v1985_v32 = vcvt.s32.f32 %v1978_v8  ;;  %v3150_v28 = vsel %vm3139_vm12, nan, %v3149_v41  ;;  %v9826_v58 = vand.u32 3, %v1996_v45 }
 0x1f3   :  { %v2798_v9 = vshll.u32 %v9820_v40, 30  ;;  %v2119_v4 = vor.u32 8388608, %v2118_v51  ;;  %v7754_v53 = vpack.c.bf16 %v3150_v28, %v2318_v17  ;;  %v2129_v3 = vshrl.u32 %v15520_v31, %v2126_v26 }
 0x1f4   :  { %v1986_v50 = vmul.f32 %v1985_v32, %v1983_v27  ;;  %v2132_v44 = vshrl.u32 %v15510_v36, %v2126_v26  ;;  %v2128_v16 = vshll.u32 %v15514_v63, %v2125_v52  ;;  %v2135_v37 = vshrl.u32 %v15511_v5, %v2126_v26 }
 0x1f5   :  { %v9831_v7 = vsub.s32 %v2795_v25, %v2798_v9  ;;  %v2947_v43 = vshrl.u32 %v2946_v42, 23  ;;  %7755 = vmatprep.subr.bf16.mxu1 %v7754_v53  ;;  %v2124_v34 = vshrl.u32 %v2123_v61, 5  ;;  %v2131_v33 = vshll.u32 %v15520_v31, %v2125_v52 }
 0x1f6   :  { %v1987_v59 = vxor.u32 2147483648, %v1986_v50  ;;  %v2134_v19 = vshll.u32 %v15510_v36, %v2125_v52  ;;  %v2130_v45 = vor.u32 %v2129_v3, %v2128_v16  ;;  %v2137_v30 = vshll.u32 %v15511_v5, %v2125_v52 }
 0x1f7   :  { %v2801_v10 = vsub.s32 0, %v9831_v7  ;;  %v2138_v25 = vshrl.u32 %v15512_v13, %v2126_v26  ;;  %vm2737_vm13 = vcmp.lt.s32.totalorder %v9624_v57, 0  ;;  %v2133_v8 = vor.u32 %v2132_v44, %v2131_v33 }
 0x1f8   :  { %v1988_v14 = vsel %vm1905_vm11, %v1987_v59, %v1986_v50  ;;  %v2140_v23 = vshll.u32 %v15512_v13, %v2125_v52  ;;  %v2141_v61 = vshrl.u32 %v15513_v18, %v2126_v26  ;;  %v2136_v51 = vor.u32 %v2135_v37, %v2134_v19 }
 0x1f9   :  { %v1991_v48 = vsel %vm9759_vm1, %v9549_v11, %v1988_v14  ;;  %v7567_v49 = vmin.u32 %v2801_v10, %v9831_v7  ;;  %v2139_v17 = vor.u32 %v2138_v25, %v2137_v30  ;;  %v2821_v60 = vsub.s32 4, %v9820_v40 }
 0x1fa   :  { %v2142_v0 = vor.u32 %v2141_v61, %v2140_v23  ;;  %v2159_v56 = vshll.u32 %v2119_v4, 8  ;;  %v7574_v42 = vadd.s32 4294967169, %v2947_v43  ;;  %8096 = vcosq.f32 %v1991_v48 }
 0x1fb   :  { %v2803_v41 = vclz %v7567_v49  ;;  %v2127_v27 = vshrl.u32 %v15514_v63, %v2126_v26  ;;  %vm2143_vm11 = vcmp.lt.s32.totalorder %v2124_v34, 1  ;;  %8098 = vsinq.f32 %v1991_v48 }
 0x1fc   :  { %vm2145_vm15 = vcmp.lt.s32.totalorder %v2124_v34, 3  ;;  %vm2146_vm0 = vcmp.lt.s32.totalorder %v2124_v34, 4  ;;  %v2151_v52 = vsel %vm2143_vm11, %v2130_v45, %v2133_v8  ;;  %vm9853_vm1 = vcmp.le.f32.partialorder %v2735_v29, 0.7853982 }
 0x1fd   :  { %v7568_v32 = vadd.s32 4294967294, %v2803_v41  ;;  %v2148_v28 = vsel %vm2146_vm0, %v2136_v51, 2102212464  ;;  %v2152_v9 = vsel %vm2146_vm0, %v2139_v17, 920167782  ;;  %v2155_v4 = vsel %vm2143_vm11, %v2133_v8, %v2136_v51 }
 0x1fe   :  { %vm2144_vm14 = vcmp.lt.s32.totalorder %v2124_v34, 2  ;;  %v2147_v53 = vsel %vm2143_vm11, %v2127_v27, %v2130_v45  ;;  %v2153_v50 = vsel %vm2145_vm15, %v2136_v51, %v2152_v9  ;;  %v2156_v3 = vsel %vm2146_vm0, %v2142_v0, 1326507024 }
 0x1ff   :  { %vm7569_vm2 = vcmp.lt.s32.totalorder %v7568_v32, 0  ;;  %v2149_v26 = vsel %vm2145_vm15, %v2133_v8, %v2148_v28  ;;  %v2154_v44 = vsel %vm2144_vm14, %v2151_v52, %v2153_v50  ;;  %v2157_v16 = vsel %vm2145_vm15, %v2139_v17, %v2156_v3 }
 0x200   :  { %v2806_v37 = vsel %vm7569_vm2, 0, %v7568_v32  ;;  %v2158_v43 = vsel %vm2144_vm14, %v2155_v4, %v2157_v16  ;;  %v9857_v59 = vmul.u32.u64.low %v2159_v56, %v2154_v44  ;;  %v9858_v33 = vmul.u32.u64.high %v2159_v56, %v2154_v44, %v9857_v59 }
 0x201   :  { %v2791_v29 = vadd.s32 %v9783_v15, %v9792_v20  ;;  %v2807_v19 = vsub.s32 32, %v2806_v37  ;;  %v2811_v10 = vsub.s32 4294967266, %v2806_v37  ;;  %v2822_v34 = vsel %vm2737_vm13, %v2821_v60, %v9820_v40 }
 0x202   :  { %v2150_v45 = vsel %vm2144_vm14, %v2147_v53, %v2149_v26  ;;  %v9866_v30 = vmul.u32.u64.low %v2159_v56, %v2158_v43  ;;  %v9867_v25 = vmul.u32.u64.high %v2159_v56, %v2158_v43, %v9866_v30  ;;  %v2953_v14 = vadd.s32 1, %v7574_v42 }
 0x203   :  { %v2808_v8 = vshll.u32 %v9831_v7, %v2806_v37  ;;  %v2809_v23 = vshrl.u32 %v2791_v29, %v2807_v19  ;;  %v2812_v61 = vadd.s32 127, %v2811_v10  ;;  %v9872_v48 = vadd.f32 %v9126_v55, %v9137_v1  ;;  %v15573_v55 = vld [vmem:[#allocation8_spill] sm:$0xff] }
 0x204   :  { %v2169_v15 = vadd.s32 1, %v9858_v33  ;;  %vm2954_vm3 = vcmp.gt.s32.totalorder %v2953_v14, 0  ;;  %v9877_v20 = vadd.f32 %v9156_v2, %v9378_v6  ;;  %v9881_v40 = vadd.f32 %v9133_v54, %v9141_v38  ;;  %v8097_v49 = vpop.eup %8096  ;;  %v15574_v54 = vld [vmem:[#allocation9_spill] sm:$0xff] }
 0x205   :  { %v2810_v51 = vor.u32 %v2809_v23, %v2808_v8  ;;  %v2813_v7 = vshll.u32 %v2812_v61, 23  ;;  %v2943_v17 = vand.u32 2147483647, %v9727_v35  ;;  %v2955_v60 = vsel %vm2954_vm3, %v2953_v14, 0  ;;  %v8099_v0 = vpop.eup %8098 }
 0x206   :  { %v1490_v1 = vand.u32 2139095040, %v15573_v55  ;;  %v2824_v42 = vsel %vm9853_vm1, 0, %v2822_v34  ;;  %v2166_v41 = vmul.u32 %v2159_v56, %v2150_v45  ;;  %vm2168_vm4 = vc.u32 %v9867_v25, %v9857_v59 }
 0x207   :  { %v9890_v2 = vadd.s32 1, %v9529_v12  ;;  %v1698_v38 = vand.u32 2139095040, %v15574_v54  ;;  %v2814_v6 = vor.u32 4788187, %v2813_v7  ;;  %v2170_v27 = vsel %vm2168_vm4, %v2169_v15, %v9858_v33 }
 0x208   :  { %vm1999_vm5 = vcmp.eq.s32.totalorder %v9826_v58, 0  ;;  %vm2002_vm6 = vcmp.eq.s32.totalorder %v9826_v58, 2  ;;  %v2171_v52 = vadd.s32 %v2170_v27, %v2166_v41  ;;  %v2957_v32 = vand.u32 31, %v2955_v60 }
 0x209   :  { %v2815_v28 = vand.u32 2147483647, %v2814_v6  ;;  %v2817_v9 = vcvt.s32.f32 %v2810_v51  ;;  %v2828_v56 = vadd.s32 3, %v2824_v42  ;;  %v2950_v4 = vand.u32 8388607, %v2943_v17 }
 0x20a   :  { %v2000_v53 = vxor.u32 2147483648, %v8099_v0  ;;  %v2003_v12 = vxor.u32 2147483648, %v8097_v49  ;;  %v2172_v50 = vadd.s32 536870912, %v2171_v52  ;;  %v2958_v3 = vsub.s32 32, %v2957_v32 }
 0x20b   :  { %v2818_v26 = vmul.f32 %v2817_v9, %v2815_v28  ;;  %v2956_v44 = vshrl.u32 %v2955_v60, 5  ;;  %v2960_v16 = vshll.u32 %v15514_v63, %v2957_v32  ;;  %v2963_v37 = vshll.u32 %v15520_v31, %v2957_v32 }
 0x20c   :  { %v9900_v43 = vshrl.u32 %v2172_v50, 30  ;;  %v2961_v33 = vshrl.u32 %v15520_v31, %v2958_v3  ;;  %v2964_v29 = vshrl.u32 %v15510_v36, %v2958_v3  ;;  %v2966_v19 = vshll.u32 %v15510_v36, %v2957_v32 }
 0x20d   :  { %vm1998_vm7 = vcmp.lt.s32.totalorder %v9826_v58, 2  ;;  %v2819_v10 = vxor.u32 2147483648, %v2818_v26  ;;  %v2967_v34 = vshrl.u32 %v15511_v5, %v2958_v3  ;;  %v2969_v45 = vshll.u32 %v15511_v5, %v2957_v32 }
 0x20e   :  { %v2970_v30 = vshrl.u32 %v15512_v13, %v2958_v3  ;;  %v2174_v14 = vshll.u32 %v9900_v43, 30  ;;  %v2962_v8 = vor.u32 %v2961_v33, %v2960_v16  ;;  %v2965_v23 = vor.u32 %v2964_v29, %v2963_v37 }
 0x20f   :  { %v2972_v61 = vshll.u32 %v15512_v13, %v2957_v32  ;;  %v2820_v15 = vsel %vm2737_vm13, %v2819_v10, %v2818_v26  ;;  %v2968_v51 = vor.u32 %v2967_v34, %v2966_v19  ;;  %v2973_v60 = vshrl.u32 %v15513_v18, %v2958_v3 }
 0x210   :  { %v2971_v7 = vor.u32 %v2970_v30, %v2969_v45  ;;  %v2823_v42 = vsel %vm9853_vm1, %v9624_v57, %v2820_v15  ;;  %v9917_v41 = vand.u32 3, %v2828_v56  ;;  %v9919_v6 = vsub.s32 %v2171_v52, %v2174_v14 }
 0x211   :  { %v2951_v27 = vor.u32 8388608, %v2950_v4  ;;  %vm1995_vm8 = vweird.f32 %v9549_v11  ;;  %v2001_v32 = vsel %vm1999_vm5, %v8097_v49, %v2000_v53  ;;  %v2004_v28 = vsel %vm2002_vm6, %v2003_v12, %v8099_v0 }
 0x212   :  { %8100 = vcosq.f32 %v2823_v42  ;;  %v2974_v9 = vor.u32 %v2973_v60, %v2972_v61  ;;  %vm2113_vm9 = vcmp.lt.s32.totalorder %v9724_v39, 0  ;;  %v2177_v24 = vsub.s32 0, %v9919_v6 }
 0x213   :  { %8102 = vsinq.f32 %v2823_v42  ;;  %vm2975_vm10 = vcmp.lt.s32.totalorder %v2956_v44, 1  ;;  %vm2978_vm12 = vcmp.lt.s32.totalorder %v2956_v44, 4  ;;  %vm2977_vm13 = vcmp.lt.s32.totalorder %v2956_v44, 3 }
 0x214   :  { %v2980_v52 = vsel %vm2978_vm12, %v2968_v51, 2102212464  ;;  %v2983_v56 = vsel %vm2975_vm10, %v2962_v8, %v2965_v23  ;;  %v2984_v4 = vsel %vm2978_vm12, %v2971_v7, 920167782  ;;  %v7543_v50 = vmin.u32 %v2177_v24, %v9919_v6 }
 0x215   :  { %v2959_v49 = vshrl.u32 %v15514_v63, %v2958_v3  ;;  %vm2976_vm11 = vcmp.lt.s32.totalorder %v2956_v44, 2  ;;  %v2985_v0 = vsel %vm2977_vm13, %v2968_v51, %v2984_v4  ;;  %v2987_v12 = vsel %vm2975_vm10, %v2965_v23, %v2968_v51 }
 0x216   :  { %v2986_v53 = vsel %vm2976_vm11, %v2983_v56, %v2985_v0  ;;  %v2988_v26 = vsel %vm2978_vm12, %v2974_v9, 1326507024  ;;  %v2991_v16 = vshll.u32 %v2951_v27, 8  ;;  %v2005_v37 = vsel %vm1998_vm7, %v2001_v32, %v2004_v28 }
 0x217   :  { %v2179_v33 = vclz %v7543_v50  ;;  %v2979_v29 = vsel %vm2975_vm10, %v2959_v49, %v2962_v8  ;;  %v2981_v19 = vsel %vm2977_vm13, %v2965_v23, %v2980_v52  ;;  %vm2830_vm15 = vcmp.lt.s32.totalorder %v9917_v41, 2 }
 0x218   :  { %v2197_v3 = vsub.s32 4, %v9900_v43  ;;  %v2989_v10 = vsel %vm2977_vm13, %v2971_v7, %v2988_v26  ;;  %v9941_v34 = vmul.u32.u64.low %v2991_v16, %v2986_v53  ;;  %v9942_v45 = vmul.u32.u64.high %v2991_v16, %v2986_v53, %v9941_v34 }
 0x219   :  { %vm2831_vm0 = vcmp.eq.s32.totalorder %v9917_v41, 0  ;;  %v7544_v30 = vadd.s32 4294967294, %v2179_v33  ;;  %v2990_v58 = vsel %vm2976_vm11, %v2987_v12, %v2989_v10  ;;  %v762_v14 = vand.u32 2139095040, %v9872_v48 }
 0x21a   :  { %vm2834_vm1 = vcmp.eq.s32.totalorder %v9917_v41, 2  ;;  %v2982_v8 = vsel %vm2976_vm11, %v2979_v29, %v2981_v19  ;;  %v9950_v23 = vmul.u32.u64.low %v2991_v16, %v2990_v58  ;;  %v9951_v61 = vmul.u32.u64.high %v2991_v16, %v2990_v58, %v9950_v23 }
 0x21b   :  { %v2006_v15 = vsel %vm1995_vm8, nan, %v2005_v37  ;;  %v2167_v51 = vadd.s32 %v9857_v59, %v9867_v25  ;;  %vm7545_vm14 = vcmp.lt.s32.totalorder %v7544_v30, 0  ;;  %v763_v7 = vshrl.u32 %v762_v14, 23 }
 0x21c   :  { %v8101_v60 = vpop.eup %8100  ;;  %v2182_v42 = vsel %vm7545_vm14, 0, %v7544_v30  ;;  %v2198_v27 = vsel %vm2113_vm9, %v2197_v3, %v9900_v43  ;;  %v3001_v44 = vadd.s32 1, %v9942_v45  ;;  %v759_v32 = vand.u32 2147483647, %v9872_v48 }
 0x21d   :  { %v8103_v28 = vpop.eup %8102  ;;  %v2835_v9 = vxor.u32 2147483648, %v8101_v60  ;;  %v2183_v24 = vsub.s32 32, %v2182_v42  ;;  %v2187_v11 = vsub.s32 4294967266, %v2182_v42  ;;  %v2998_v52 = vmul.u32 %v2991_v16, %v2982_v8 }
 0x21e   :  { %v2832_v56 = vxor.u32 2147483648, %v8103_v28  ;;  %v2184_v59 = vshll.u32 %v9919_v6, %v2182_v42  ;;  %vm3000_vm2 = vc.u32 %v9951_v61, %v9941_v34  ;;  %v7490_v25 = vadd.s32 4294967169, %v763_v7 }
 0x21f   :  { %v2836_v4 = vsel %vm2834_vm1, %v2835_v9, %v8103_v28  ;;  %v2185_v43 = vshrl.u32 %v2167_v51, %v2183_v24  ;;  %v2188_v50 = vadd.s32 127, %v2187_v11  ;;  %v3002_v49 = vsel %vm3000_vm2, %v3001_v44, %v9942_v45 }
 0x220   :  { %v2833_v0 = vsel %vm2831_vm0, %v8101_v60, %v2832_v56  ;;  %v3003_v53 = vadd.s32 %v3002_v49, %v2998_v52  ;;  %v766_v12 = vand.u32 8388607, %v759_v32  ;;  %v769_v26 = vadd.s32 1, %v7490_v25 }
 0x221   :  { %vm2827_vm3 = vweird.f32 %v9624_v57  ;;  %v2837_v6 = vsel %vm2830_vm15, %v2833_v0, %v2836_v4  ;;  %v2186_v16 = vor.u32 %v2185_v43, %v2184_v59  ;;  %v2189_v37 = vshll.u32 %v2188_v50, 23 }
 0x222   :  { %v2838_v33 = vsel %vm2827_vm3, nan, %v2837_v6  ;;  %vm9977_vm4 = vcmp.le.f32.partialorder %v2111_v47, 0.7853982  ;;  %v3004_v19 = vadd.s32 536870912, %v3003_v53  ;;  %vm770_vm5 = vcmp.gt.s32.totalorder %v769_v26, 0 }
 0x223   :  { %v7748_v3 = vpack.c.bf16 %v2838_v33, %v2006_v15  ;;  %v2190_v10 = vor.u32 4788187, %v2189_v37  ;;  %v2200_v45 = vsel %vm9977_vm4, 0, %v2198_v27  ;;  %v771_v57 = vsel %vm770_vm5, %v769_v26, 0 }
 0x224   :  { %v3005_v30 = vshrl.u32 %v3004_v19, 30  ;;  %v767_v41 = vor.u32 8388608, %v766_v12  ;;  %v773_v58 = vand.u32 31, %v771_v57  ;;  %v1594_v14 = vand.u32 2139095040, %v9877_v20 }
 0x225   :  { %v9985_v8 = vadd.s32 1, %v9716_v46  ;;  %7749 = vmatpush1.bf16.msra.mxu0 %v7748_v3  ;;  %v2191_v47 = vand.u32 2147483647, %v2190_v10  ;;  %v2193_v23 = vcvt.s32.f32 %v2186_v16  ;;  %v9989_v51 = vadd.f32 %v9161_v22, %v9383_v21 }
 0x226   :  { %v9993_v15 = vshrl.u32 %v1490_v1, 23  ;;  %v9997_v7 = vshrl.u32 %v1698_v38, 23  ;;  %v3006_v60 = vshll.u32 %v3005_v30, 30  ;;  %v774_v42 = vsub.s32 32, %v773_v58 }
 0x227   :  { %v2194_v27 = vmul.f32 %v2193_v23, %v2191_v47  ;;  %v9999_v46 = vadd.s32 3, %v2200_v45  ;;  %vm2945_vm6 = vcmp.lt.s32.totalorder %v9727_v35, 0  ;;  %v2999_v44 = vadd.s32 %v9941_v34, %v9951_v61 }
 0x228   :  { %v10004_v22 = vsub.s32 %v3003_v53, %v3006_v60  ;;  %v777_v21 = vshrl.u32 %v15520_v31, %v774_v42  ;;  %v10007_v1 = vshll.u32 %v767_v41, 8  ;;  %v1595_v28 = vshrl.u32 %v1594_v14, 23 }
 0x229   :  { %v2195_v9 = vxor.u32 2147483648, %v2194_v27  ;;  %v3029_v38 = vsub.s32 4, %v3005_v30  ;;  %v780_v24 = vshrl.u32 %v15510_v36, %v774_v42  ;;  %v783_v11 = vshrl.u32 %v15511_v5, %v774_v42 }
 0x22a   :  { %vm10013_vm7 = vcmp.le.f32.partialorder %v2943_v17, 0.7853982  ;;  %v3009_v34 = vsub.s32 0, %v10004_v22  ;;  %v776_v61 = vshll.u32 %v15514_v63, %v773_v58  ;;  %v779_v56 = vshll.u32 %v15520_v31, %v773_v58 }
 0x22b   :  { %v786_v59 = vshrl.u32 %v15512_v13, %v774_v42  ;;  %v2196_v25 = vsel %vm2113_vm9, %v2195_v9, %v2194_v27  ;;  %v772_v4 = vshrl.u32 %v771_v57, 5  ;;  %v782_v43 = vshll.u32 %v15510_v36, %v773_v58 }
 0x22c   :  { %v785_v50 = vshll.u32 %v15511_v5, %v773_v58  ;;  %v2199_v17 = vsel %vm9977_vm4, %v9724_v39, %v2196_v25  ;;  %v7575_v49 = vmin.u32 %v3009_v34, %v10004_v22  ;;  %v778_v0 = vor.u32 %v777_v21, %v776_v61 }
 0x22d   :  { %v781_v53 = vor.u32 %v780_v24, %v779_v56  ;;  %v784_v12 = vor.u32 %v783_v11, %v782_v43  ;;  %v788_v6 = vshll.u32 %v15512_v13, %v773_v58  ;;  %v789_v16 = vshrl.u32 %v15513_v18, %v774_v42 }
 0x22e   :  { %v787_v26 = vor.u32 %v786_v59, %v785_v50  ;;  %8104 = vcosq.f32 %v2199_v17  ;;  %v3011_v37 = vclz %v7575_v49  ;;  %v3030_v33 = vsel %vm2945_vm6, %v3029_v38, %v3005_v30 }
 0x22f   :  { %v7522_v19 = vadd.s32 4294967169, %v1595_v28  ;;  %8106 = vsinq.f32 %v2199_v17  ;;  %v775_v29 = vshrl.u32 %v15514_v63, %v774_v42  ;;  %v790_v3 = vor.u32 %v789_v16, %v788_v6 }
 0x230   :  { %vm791_vm8 = vcmp.lt.s32.totalorder %v772_v4, 1  ;;  %v7576_v10 = vadd.s32 4294967294, %v3011_v37  ;;  %vm793_vm9 = vcmp.lt.s32.totalorder %v772_v4, 3  ;;  %vm794_vm10 = vcmp.lt.s32.totalorder %v772_v4, 4 }
 0x231   :  { %v799_v45 = vsel %vm791_vm8, %v778_v0, %v781_v53  ;;  %v796_v57 = vsel %vm794_vm10, %v784_v12, 2102212464  ;;  %v800_v41 = vsel %vm794_vm10, %v787_v26, 920167782  ;;  %v803_v58 = vsel %vm791_vm8, %v781_v53, %v784_v12 }
 0x232   :  { %v804_v14 = vsel %vm794_vm10, %v790_v3, 1326507024  ;;  %vm7577_vm12 = vcmp.lt.s32.totalorder %v7576_v10, 0  ;;  %vm792_vm13 = vcmp.lt.s32.totalorder %v772_v4, 2  ;;  %v801_v30 = vsel %vm793_vm9, %v784_v12, %v800_v41 }
 0x233   :  { %v805_v47 = vsel %vm793_vm9, %v787_v26, %v804_v14  ;;  %v3014_v23 = vsel %vm7577_vm12, 0, %v7576_v10  ;;  %v3032_v60 = vsel %vm10013_vm7, 0, %v3030_v33  ;;  %v802_v42 = vsel %vm792_vm13, %v799_v45, %v801_v30 }
 0x234   :  { %v806_v27 = vsel %vm792_vm13, %v803_v58, %v805_v47  ;;  %v3015_v21 = vsub.s32 32, %v3014_v23  ;;  %v3019_v28 = vsub.s32 4294967266, %v3014_v23  ;;  %v795_v9 = vsel %vm791_vm8, %v775_v29, %v778_v0 }
 0x235   :  { %v797_v38 = vsel %vm793_vm9, %v781_v53, %v796_v57  ;;  %v10045_v24 = vmul.u32.u64.low %v10007_v1, %v806_v27  ;;  %v10046_v11 = vmul.u32.u64.high %v10007_v1, %v806_v27, %v10045_v24  ;;  %v3016_v56 = vshll.u32 %v10004_v22, %v3014_v23 }
 0x236   :  { %v10049_v34 = vmul.u32.u64.low %v10007_v1, %v802_v42  ;;  %v10050_v61 = vmul.u32.u64.high %v10007_v1, %v802_v42, %v10049_v34  ;;  %v3017_v59 = vshrl.u32 %v2999_v44, %v3015_v21  ;;  %v3020_v25 = vadd.s32 127, %v3019_v28 }
 0x237   :  { %v1601_v43 = vadd.s32 1, %v7522_v19  ;;  %vm666_vm11 = vcmp.gt.s32.totalorder %v9890_v2, 0  ;;  %vm874_vm15 = vcmp.gt.s32.totalorder %v9985_v8, 0  ;;  %v10057_v50 = vadd.s32 4294967169, %v9993_v15 }
 0x238   :  { %v798_v17 = vsel %vm792_vm13, %v795_v9, %v797_v38  ;;  %v8105_v49 = vpop.eup %8104  ;;  %v10061_v0 = vand.u32 3, %v9999_v46  ;;  %v3018_v53 = vor.u32 %v3017_v59, %v3016_v56  ;;  %v3021_v12 = vshll.u32 %v3020_v25, 23 }
 0x239   :  { %vm1602_vm0 = vcmp.gt.s32.totalorder %v1601_v43, 0  ;;  %v8107_v22 = vpop.eup %8106  ;;  %v3036_v44 = vadd.s32 3, %v3032_v60  ;;  %vm816_vm1 = vc.u32 %v10046_v11, %v10049_v34  ;;  %v817_v26 = vadd.s32 1, %v10050_v61 }
 0x23a   :  { %v1591_v6 = vand.u32 2147483647, %v9877_v20  ;;  %v10070_v15 = vsel %vm666_vm11, %v9890_v2, 0  ;;  %v3022_v4 = vor.u32 4788187, %v3021_v12  ;;  %v814_v46 = vmul.u32 %v10007_v1, %v798_v17 }
 0x23b   :  { %v1603_v16 = vsel %vm1602_vm0, %v1601_v43, 0  ;;  %v10076_v37 = vsel %vm874_vm15, %v9985_v8, 0  ;;  %v10079_v33 = vadd.s32 4294967169, %v9997_v7  ;;  %v818_v19 = vsel %vm816_vm1, %v817_v26, %v10050_v61 }
 0x23c   :  { %v1605_v29 = vand.u32 31, %v1603_v16  ;;  %vm2207_vm14 = vcmp.eq.s32.totalorder %v10061_v0, 0  ;;  %vm2210_vm2 = vcmp.eq.s32.totalorder %v10061_v0, 2  ;;  %v3023_v2 = vand.u32 2147483647, %v3022_v4 }
 0x23d   :  { %v3025_v3 = vcvt.s32.f32 %v3018_v53  ;;  %v819_v10 = vadd.s32 %v818_v19, %v814_v46  ;;  %v2211_v1 = vxor.u32 2147483648, %v8105_v49  ;;  %v10084_v45 = vand.u32 3, %v3036_v44 }
 0x23e   :  { %v1598_v8 = vand.u32 8388607, %v1591_v6  ;;  %v1606_v57 = vsub.s32 32, %v1605_v29  ;;  %v2208_v41 = vxor.u32 2147483648, %v8107_v22  ;;  %v10088_v14 = vshrl.u32 %v1603_v16, 5 }
 0x23f   :  { %v3026_v7 = vmul.f32 %v3025_v3, %v3023_v2  ;;  %v820_v58 = vadd.s32 536870912, %v819_v10  ;;  %v1608_v30 = vshll.u32 %v15514_v63, %v1605_v29  ;;  %v1611_v21 = vshll.u32 %v15520_v31, %v1605_v29 }
 0x240   :  { %v1609_v47 = vshrl.u32 %v15520_v31, %v1606_v57  ;;  %v1612_v23 = vshrl.u32 %v15510_v36, %v1606_v57  ;;  %v1615_v60 = vshrl.u32 %v15511_v5, %v1606_v57  ;;  %v1618_v28 = vshrl.u32 %v15512_v13, %v1606_v57 }
 0x241   :  { %v3027_v42 = vxor.u32 2147483648, %v3026_v7  ;;  %v10094_v27 = vshrl.u32 %v820_v58, 30  ;;  %vm2206_vm3 = vcmp.lt.s32.totalorder %v10061_v0, 2  ;;  %v1614_v9 = vshll.u32 %v15510_v36, %v1605_v29 }
 0x242   :  { %v1617_v38 = vshll.u32 %v15511_v5, %v1605_v29  ;;  %v1620_v24 = vshll.u32 %v15512_v13, %v1605_v29  ;;  %v1621_v61 = vshrl.u32 %v15513_v18, %v1606_v57  ;;  %v1610_v25 = vor.u32 %v1609_v47, %v1608_v30 }
 0x243   :  { %v3028_v56 = vsel %vm2945_vm6, %v3027_v42, %v3026_v7  ;;  %v822_v59 = vshll.u32 %v10094_v27, 30  ;;  %v1613_v43 = vor.u32 %v1612_v23, %v1611_v21  ;;  %v1616_v53 = vor.u32 %v1615_v60, %v1614_v9 }
 0x244   :  { %v3031_v17 = vsel %vm10013_vm7, %v9727_v35, %v3028_v56  ;;  %v1619_v12 = vor.u32 %v1618_v28, %v1617_v38  ;;  %v1622_v44 = vor.u32 %v1621_v61, %v1620_v24  ;;  %v1599_v4 = vor.u32 8388608, %v1598_v8 }
 0x245   :  { %8108 = vcosq.f32 %v3031_v17  ;;  %v10109_v26 = vsub.s32 %v819_v10, %v822_v59  ;;  %v970_v46 = vand.u32 2139095040, %v9881_v40  ;;  %vm2203_vm4 = vweird.f32 %v9724_v39 }
 0x246   :  { %v2209_v16 = vsel %vm2207_vm14, %v8105_v49, %v2208_v41  ;;  %v2212_v19 = vsel %vm2210_vm2, %v2211_v1, %v8107_v22  ;;  %8110 = vsinq.f32 %v3031_v17  ;;  %vm1623_vm5 = vcmp.lt.s32.totalorder %v10088_v14, 1 }
 0x247   :  { %v825_v52 = vsub.s32 0, %v10109_v26  ;;  %vm1625_vm6 = vcmp.lt.s32.totalorder %v10088_v14, 3  ;;  %vm1626_vm7 = vcmp.lt.s32.totalorder %v10088_v14, 4  ;;  %v1631_v29 = vsel %vm1623_vm5, %v1610_v25, %v1613_v43 }
 0x248   :  { %v1607_v2 = vshrl.u32 %v15514_v63, %v1606_v57  ;;  %v1628_v3 = vsel %vm1626_vm7, %v1616_v53, 2102212464  ;;  %v1632_v10 = vsel %vm1626_vm7, %v1619_v12, 920167782  ;;  %v1636_v49 = vsel %vm1626_vm7, %v1622_v44, 1326507024 }
 0x249   :  { %v7491_v8 = vmin.u32 %v825_v52, %v10109_v26  ;;  %vm1624_vm8 = vcmp.lt.s32.totalorder %v10088_v14, 2  ;;  %v1633_v22 = vsel %vm1625_vm6, %v1616_v53, %v1632_v10  ;;  %v1635_v1 = vsel %vm1623_vm5, %v1613_v43, %v1616_v53 }
 0x24a   :  { %vm3039_vm9 = vcmp.eq.s32.totalorder %v10084_v45, 0  ;;  %v1634_v41 = vsel %vm1624_vm8, %v1631_v29, %v1633_v22  ;;  %v1637_v57 = vsel %vm1625_vm6, %v1619_v12, %v1636_v49  ;;  %v1639_v7 = vshll.u32 %v1599_v4, 8 }
 0x24b   :  { %v971_v58 = vshrl.u32 %v970_v46, 23  ;;  %v2213_v30 = vsel %vm2206_vm3, %v2209_v16, %v2212_v19  ;;  %vm3038_vm10 = vcmp.lt.s32.totalorder %v10084_v45, 2  ;;  %vm761_vm12 = vcmp.lt.s32.totalorder %v9872_v48, 0 }
 0x24c   :  { %v827_v47 = vclz %v7491_v8  ;;  %v1627_v23 = vsel %vm1623_vm5, %v1607_v2, %v1610_v25  ;;  %v1629_v60 = vsel %vm1625_vm6, %v1613_v43, %v1628_v3  ;;  %vm3035_vm13 = vweird.f32 %v9727_v35 }
 0x24d   :  { %v1638_v42 = vsel %vm1624_vm8, %v1635_v1, %v1637_v57  ;;  %v10146_v21 = vmul.u32.u64.low %v1639_v7, %v1634_v41  ;;  %v10147_v28 = vmul.u32.u64.high %v1639_v7, %v1634_v41, %v10146_v21  ;;  %v7498_v0 = vadd.s32 4294967169, %v971_v58 }
 0x24e   :  { %vm3042_vm11 = vcmp.eq.s32.totalorder %v10084_v45, 2  ;;  %v7492_v9 = vadd.s32 4294967294, %v827_v47  ;;  %v10151_v38 = vmul.u32.u64.low %v1639_v7, %v1638_v42  ;;  %v10152_v24 = vmul.u32.u64.high %v1639_v7, %v1638_v42, %v10151_v38 }
 0x24f   :  { %v815_v61 = vadd.s32 %v10049_v34, %v10046_v11  ;;  %v1630_v56 = vsel %vm1624_vm8, %v1627_v23, %v1629_v60  ;;  %v967_v59 = vand.u32 2147483647, %v9881_v40  ;;  %v977_v25 = vadd.s32 1, %v7498_v0  ;;  %v8109_v43 = vpop.eup %8108 }
 0x250   :  { %v2214_v17 = vsel %vm2203_vm4, nan, %v2213_v30  ;;  %vm7493_vm15 = vcmp.lt.s32.totalorder %v7492_v9, 0  ;;  %v845_v53 = vsub.s32 4, %v10094_v27  ;;  %v8111_v12 = vpop.eup %8110  ;;  %v3043_v44 = vxor.u32 2147483648, %v8109_v43 }
 0x251   :  { %v830_v4 = vsel %vm7493_vm15, 0, %v7492_v9  ;;  %v1649_v46 = vadd.s32 1, %v10147_v28  ;;  %vm978_vm0 = vcmp.gt.s32.totalorder %v977_v25, 0  ;;  %v8341_v11 = vmov 0.0  }
 0x252   :  { %3648 = vmatprep.mubr.f32.mxu0 %v8341_v11  ;;  %3737 = vmatprep.mubr.f32.mxu1 %v8341_v11  ;;  %v3040_v34 = vxor.u32 2147483648, %v8111_v12  ;;  %v831_v14 = vsub.s32 32, %v830_v4  ;;  %v835_v16 = vsub.s32 4294967266, %v830_v4  ;;  %v1646_v19 = vmul.u32 %v1639_v7, %v1630_v56 }
 0x253   :  { %v3044_v39 = vsel %vm3042_vm11, %v3043_v44, %v8111_v12  ;;  %v832_v52 = vshll.u32 %v10109_v26, %v830_v4  ;;  %vm1648_vm1 = vc.u32 %v10152_v24, %v10146_v21  ;;  %v979_v29 = vsel %vm978_vm0, %v977_v25, 0 }
 0x254   :  { %v3041_v2 = vsel %vm3039_vm9, %v8109_v43, %v3040_v34  ;;  %v833_v3 = vshrl.u32 %v815_v61, %v831_v14  ;;  %v836_v10 = vadd.s32 127, %v835_v16  ;;  %v1650_v49 = vsel %vm1648_vm1, %v1649_v46, %v10147_v28 }
 0x255   :  { %v3045_v8 = vsel %vm3038_vm10, %v3041_v2, %v3044_v39  ;;  %v10178_v22 = vsel %vm761_vm12, %v845_v53, %v10094_v27  ;;  %v1651_v26 = vadd.s32 %v1650_v49, %v1646_v19  ;;  %v981_v1 = vand.u32 31, %v979_v29 }
 0x256   :  { %v3046_v41 = vsel %vm3035_vm13, nan, %v3045_v8  ;;  %vm10184_vm14 = vcmp.le.f32.partialorder %v759_v32, 0.7853982  ;;  %v834_v7 = vor.u32 %v833_v3, %v832_v52  ;;  %v837_v58 = vshll.u32 %v836_v10, 23 }
 0x257   :  { %v7756_v45 = vpack.c.bf16 %v3046_v41, %v2214_v17  ;;  %v1652_v30 = vadd.s32 536870912, %v1651_v26  ;;  %v974_v47 = vand.u32 8388607, %v967_v59  ;;  %v982_v27 = vsub.s32 32, %v981_v1 }
 0x258   :  { %v10191_v23 = vand.u32 31, %v10070_v15  ;;  %v10194_v35 = vadd.s32 1, %v10057_v50  ;;  %v838_v60 = vor.u32 4788187, %v837_v58  ;;  %v848_v32 = vsel %vm10184_vm14, 0, %v10178_v22 }
 0x259   :  { %7757 = vmatpush1.bf16.msra.mxu1 %v7756_v45  ;;  %v841_v42 = vcvt.s32.f32 %v834_v7  ;;  %v1653_v28 = vshrl.u32 %v1652_v30, 30  ;;  %v985_v0 = vshrl.u32 %v15520_v31, %v982_v27  ;;  %v1799_v9 = vand.u32 2147483647, %v9989_v51 }
 0x25a   :  { %v839_v38 = vand.u32 2147483647, %v838_v60  ;;  %v988_v61 = vshrl.u32 %v15510_v36, %v982_v27  ;;  %v991_v56 = vshrl.u32 %v15511_v5, %v982_v27  ;;  %v994_v50 = vshrl.u32 %v15512_v13, %v982_v27 }
 0x25b   :  { %v1654_v25 = vshll.u32 %v1653_v28, 30  ;;  %v975_v43 = vor.u32 8388608, %v974_v47  ;;  %v984_v17 = vshll.u32 %v15514_v63, %v981_v1  ;;  %v990_v53 = vshll.u32 %v15510_v36, %v981_v1 }
 0x25c   :  { %v842_v12 = vmul.f32 %v841_v42, %v839_v38  ;;  %vm1593_vm2 = vcmp.lt.s32.totalorder %v9877_v20, 0  ;;  %v980_v44 = vshrl.u32 %v979_v29, 5  ;;  %v987_v4 = vshll.u32 %v15520_v31, %v981_v1 }
 0x25d   :  { %v993_v46 = vshll.u32 %v15511_v5, %v981_v1  ;;  %v10209_v34 = vsub.s32 %v1651_v26, %v1654_v25  ;;  %v986_v14 = vor.u32 %v985_v0, %v984_v17  ;;  %v992_v16 = vor.u32 %v991_v56, %v990_v53 }
 0x25e   :  { %v997_v19 = vshrl.u32 %v15513_v18, %v982_v27  ;;  %v843_v39 = vxor.u32 2147483648, %v842_v12  ;;  %v989_v52 = vor.u32 %v988_v61, %v987_v4  ;;  %v996_v3 = vshll.u32 %v15512_v13, %v981_v1 }
 0x25f   :  { %v995_v2 = vor.u32 %v994_v50, %v993_v46  ;;  %v1657_v10 = vsub.s32 0, %v10209_v34  ;;  %v983_v49 = vshrl.u32 %v15514_v63, %v982_v27  ;;  %v10215_v29 = vshll.u32 %v975_v43, 8  ;;  %v3567_v46 = vld [vmem:[%s15386_s2] sm:$0xff] }
 0x260   :  { %v1802_v8 = vand.u32 2139095040, %v9989_v51  ;;  %v844_v26 = vsel %vm761_vm12, %v843_v39, %v842_v12  ;;  %vm10222_vm3 = vcmp.le.f32.partialorder %v1591_v6, 0.7853982  ;;  %v1677_v7 = vsub.s32 4, %v1653_v28 }
 0x261   :  { %v998_v58 = vor.u32 %v997_v19, %v996_v3  ;;  %vm1002_vm4 = vcmp.lt.s32.totalorder %v980_v44, 4  ;;  %v847_v1 = vsel %vm10184_vm14, %v9872_v48, %v844_v26  ;;  %v7523_v45 = vmin.u32 %v1657_v10, %v10209_v34 }
 0x262   :  { %vm999_vm5 = vcmp.lt.s32.totalorder %v980_v44, 1  ;;  %v1004_v30 = vsel %vm1002_vm4, %v992_v16, 2102212464  ;;  %8112 = vcosq.f32 %v847_v1  ;;  %vm1000_vm6 = vcmp.lt.s32.totalorder %v980_v44, 2 }
 0x263   :  { %v1007_v47 = vsel %vm999_vm5, %v986_v14, %v989_v52  ;;  %v1008_v6 = vsel %vm1002_vm4, %v995_v2, 920167782  ;;  %8114 = vsinq.f32 %v847_v1  ;;  %v1659_v27 = vclz %v7523_v45 }
 0x264   :  { %vm1001_vm7 = vcmp.lt.s32.totalorder %v980_v44, 3  ;;  %v1011_v60 = vsel %vm999_vm5, %v989_v52, %v992_v16  ;;  %v1003_v42 = vsel %vm999_vm5, %v983_v49, %v986_v14  ;;  %v1012_v61 = vsel %vm1002_vm4, %v998_v58, 1326507024 }
 0x265   :  { %v1005_v0 = vsel %vm1001_vm7, %v989_v52, %v1004_v30  ;;  %v1009_v38 = vsel %vm1001_vm7, %v992_v16, %v1008_v6  ;;  %v7524_v56 = vadd.s32 4294967294, %v1659_v27  ;;  %v1678_v50 = vsel %vm1593_vm2, %v1677_v7, %v1653_v28 }
 0x266   :  { %v1010_v25 = vsel %vm1000_vm6, %v1007_v47, %v1009_v38  ;;  %v1013_v43 = vsel %vm1001_vm7, %v995_v2, %v1012_v61  ;;  %v1803_v4 = vshrl.u32 %v1802_v8, 23  ;;  %v1006_v14 = vsel %vm1000_vm6, %v1003_v42, %v1005_v0 }
 0x267   :  { %v1014_v17 = vsel %vm1000_vm6, %v1011_v60, %v1013_v43  ;;  %v10238_v53 = vmul.u32.u64.low %v10215_v29, %v1010_v25  ;;  %v10239_v12 = vmul.u32.u64.high %v10215_v29, %v1010_v25, %v10238_v53  ;;  %vm7525_vm8 = vcmp.lt.s32.totalorder %v7524_v56, 0 }
 0x268   :  { %v10246_v16 = vmul.u32.u64.low %v10215_v29, %v1014_v17  ;;  %v10247_v28 = vmul.u32.u64.high %v10215_v29, %v1014_v17, %v10246_v16  ;;  %v852_v19 = vadd.s32 3, %v848_v32  ;;  %v1662_v39 = vsel %vm7525_vm8, 0, %v7524_v56 }
 0x269   :  { %v7530_v52 = vadd.s32 4294967169, %v1803_v4  ;;  %vm3571_vm9 = vcmask 261120   ;;  %v1647_v2 = vadd.s32 %v10146_v21, %v10152_v24  ;;  %v1663_v3 = vsub.s32 32, %v1662_v39 }
 0x26a   :  { %v1667_v10 = vsub.s32 4294967266, %v1662_v39  ;;  %v1680_v44 = vsel %vm10222_vm3, 0, %v1678_v50  ;;  %7598 = vmatmul.mubr.msk.f32.vlgmr.msra.gmra.mrb[0].mxu0 %vm3571_vm9, %v3567_v46  ;;  %7602 = vmatmul.mubr.msk.f32.vlgmr.msra.gmra.mrb[0].mxu1 %vm3571_vm9, %v3567_v46  ;;  %v1022_v57 = vmul.u32 %v10215_v29, %v1006_v14  ;;  %v1025_v22 = vadd.s32 1, %v10239_v12 }
 0x26b   :  { %v1806_v32 = vand.u32 8388607, %v1799_v9  ;;  %v1809_v49 = vadd.s32 1, %v7530_v52  ;;  %3654 = vmatprep.mubr.f32.mxu0 %v8341_v11  ;;  %3743 = vmatprep.mubr.f32.mxu1 %v8341_v11  ;;  %v1664_v21 = vshll.u32 %v10209_v34, %v1662_v39  ;;  %v1665_v24 = vshrl.u32 %v1647_v2, %v1663_v3 }
 0x26c   :  { %v1668_v8 = vadd.s32 127, %v1667_v10  ;;  %vm1024_vm10 = vc.u32 %v10247_v28, %v10238_v53  ;;  %v8113_v26 = vpop.eup %8112  ;;  %vm1498_vm12 = vcmp.gt.s32.totalorder %v10194_v35, 0  ;;  %v10268_v29 = vand.u32 3, %v852_v19 }
 0x26d   :  { %v1026_v7 = vsel %vm1024_vm10, %v1025_v22, %v10239_v12  ;;  %vm1810_vm13 = vcmp.gt.s32.totalorder %v1809_v49, 0  ;;  %v8115_v58 = vpop.eup %8114  ;;  %v10272_v1 = vand.u32 31, %v10076_v37  ;;  %v1666_v45 = vor.u32 %v1665_v24, %v1664_v21 }
 0x26e   :  { %v1669_v30 = vshll.u32 %v1668_v8, 23  ;;  %v1027_v47 = vadd.s32 %v1026_v7, %v1022_v57  ;;  %v10275_v34 = vadd.s32 1, %v10079_v33  ;;  %v1684_v6 = vadd.s32 3, %v1680_v44 }
 0x26f   :  { %v1807_v27 = vor.u32 8388608, %v1806_v32  ;;  %v1811_v60 = vsel %vm1810_vm13, %v1809_v49, 0  ;;  %v10278_v42 = vsel %vm1498_vm12, %v10194_v35, 0  ;;  %v655_v61 = vand.u32 2147483647, %v15549_v62 }
 0x270   :  { %v1670_v0 = vor.u32 4788187, %v1669_v30  ;;  %v1028_v38 = vadd.s32 536870912, %v1027_v47  ;;  %vm855_vm11 = vcmp.eq.s32.totalorder %v10268_v29, 0  ;;  %v856_v56 = vxor.u32 2147483648, %v8115_v58 }
 0x271   :  { %v859_v50 = vxor.u32 2147483648, %v8113_v26  ;;  %v1813_v25 = vand.u32 31, %v1811_v60  ;;  %vm858_vm15 = vcmp.eq.s32.totalorder %v10268_v29, 2  ;;  %v1673_v33 = vcvt.s32.f32 %v1666_v45 }
 0x272   :  { %v1671_v43 = vand.u32 2147483647, %v1670_v0  ;;  %v10283_v17 = vshrl.u32 %v1028_v38, 30  ;;  %vm854_vm0 = vcmp.lt.s32.totalorder %v10268_v29, 2  ;;  %v10286_v12 = vand.u32 3, %v1684_v6 }
 0x273   :  { %v10289_v35 = vadd.s32 %v10238_v53, %v10247_v28  ;;  %v1814_v4 = vsub.s32 32, %v1813_v25  ;;  %v10291_v46 = vshll.u32 %v1807_v27, 8  ;;  %v10296_v19 = vand.u32 8388607, %v655_v61 }
 0x274   :  { %v1674_v14 = vmul.f32 %v1673_v33, %v1671_v43  ;;  %v1030_v16 = vshll.u32 %v10283_v17, 30  ;;  %v10299_v39 = vshrl.u32 %v10070_v15, 5  ;;  %v857_v52 = vsel %vm855_vm11, %v8113_v26, %v856_v56 }
 0x275   :  { %v860_v2 = vsel %vm858_vm15, %v859_v50, %v8115_v58  ;;  %v1817_v53 = vshrl.u32 %v15520_v31, %v1814_v4  ;;  %v1820_v28 = vshrl.u32 %v15510_v36, %v1814_v4  ;;  %v1816_v44 = vshll.u32 %v15514_v63, %v1813_v25 }
 0x276   :  { %v1675_v3 = vxor.u32 2147483648, %v1674_v14  ;;  %v10305_v10 = vsub.s32 %v1027_v47, %v1030_v16  ;;  %v1823_v57 = vshrl.u32 %v15511_v5, %v1814_v4  ;;  %v1812_v22 = vshrl.u32 %v1811_v60, 5 }
 0x277   :  { %v1819_v32 = vshll.u32 %v15520_v31, %v1813_v25  ;;  %v1822_v15 = vshll.u32 %v15510_v36, %v1813_v25  ;;  %v1825_v49 = vshll.u32 %v15511_v5, %v1813_v25  ;;  %v1818_v8 = vor.u32 %v1817_v53, %v1816_v44 }
 0x278   :  { %v1676_v21 = vsel %vm1593_vm2, %v1675_v3, %v1674_v14  ;;  %v1033_v24 = vsub.s32 0, %v10305_v10  ;;  %v1826_v26 = vshrl.u32 %v15512_v13, %v1814_v4  ;;  %vm851_vm1 = vweird.f32 %v9872_v48 }
 0x279   :  { %v1679_v7 = vsel %vm10222_vm3, %v9877_v20, %v1676_v21  ;;  %v1821_v58 = vor.u32 %v1820_v28, %v1819_v32  ;;  %v1828_v45 = vshll.u32 %v15512_v13, %v1813_v25  ;;  %v1829_v30 = vshrl.u32 %v15513_v18, %v1814_v4 }
 0x27a   :  { %8116 = vcosq.f32 %v1679_v7  ;;  %v7499_v47 = vmin.u32 %v1033_v24, %v10305_v10  ;;  %v1824_v6 = vor.u32 %v1823_v57, %v1822_v15  ;;  %v1827_v27 = vor.u32 %v1826_v26, %v1825_v49 }
 0x27b   :  { %8118 = vsinq.f32 %v1679_v7  ;;  %v1815_v60 = vshrl.u32 %v15514_v63, %v1814_v4  ;;  %v1830_v0 = vor.u32 %v1829_v30, %v1828_v45  ;;  %v10325_v38 = vsub.s32 32, %v10191_v23 }
 0x27c   :  { %v861_v41 = vsel %vm854_vm0, %v857_v52, %v860_v2  ;;  %v1035_v56 = vclz %v7499_v47  ;;  %vm1831_vm14 = vcmp.lt.s32.totalorder %v1812_v22, 1  ;;  %vm1832_vm2 = vcmp.lt.s32.totalorder %v1812_v22, 2 }
 0x27d   :  { %vm1833_vm3 = vcmp.lt.s32.totalorder %v1812_v22, 3  ;;  %vm1834_vm4 = vcmp.lt.s32.totalorder %v1812_v22, 4  ;;  %v1835_v50 = vsel %vm1831_vm14, %v1815_v60, %v1818_v8  ;;  %v1839_v25 = vsel %vm1831_vm14, %v1818_v8, %v1821_v58 }
 0x27e   :  { %vm1690_vm5 = vcmp.eq.s32.totalorder %v10286_v12, 2  ;;  %v7500_v43 = vadd.s32 4294967294, %v1035_v56  ;;  %v1836_v33 = vsel %vm1834_vm4, %v1824_v6, 2102212464  ;;  %v1840_v14 = vsel %vm1834_vm4, %v1827_v27, 920167782 }
 0x27f   :  { %v1843_v4 = vsel %vm1831_vm14, %v1821_v58, %v1824_v6  ;;  %vm1687_vm6 = vcmp.eq.s32.totalorder %v10286_v12, 0  ;;  %v1837_v16 = vsel %vm1833_vm3, %v1821_v58, %v1836_v33  ;;  %v1841_v29 = vsel %vm1833_vm3, %v1824_v6, %v1840_v14 }
 0x280   :  { %v1844_v52 = vsel %vm1834_vm4, %v1830_v0, 1326507024  ;;  %v673_v2 = vshrl.u32 %v15520_v31, %v10325_v38  ;;  %vm1686_vm7 = vcmp.lt.s32.totalorder %v10286_v12, 2  ;;  %vm7501_vm8 = vcmp.lt.s32.totalorder %v7500_v43, 0 }
 0x281   :  { %v1838_v53 = vsel %vm1832_vm2, %v1835_v50, %v1837_v16  ;;  %v1842_v28 = vsel %vm1832_vm2, %v1839_v25, %v1841_v29  ;;  %v1845_v3 = vsel %vm1833_vm3, %v1827_v27, %v1844_v52  ;;  %vm1683_vm10 = vweird.f32 %v9877_v20 }
 0x282   :  { %v1038_v44 = vsel %vm7501_vm8, 0, %v7500_v43  ;;  %v1846_v57 = vsel %vm1832_vm2, %v1843_v4, %v1845_v3  ;;  %v10342_v32 = vmul.u32.u64.low %v10291_v46, %v1842_v28  ;;  %v10343_v15 = vmul.u32.u64.high %v10291_v46, %v1842_v28, %v10342_v32 }
 0x283   :  { %v862_v49 = vsel %vm851_vm1, nan, %v861_v41  ;;  %v1039_v21 = vsub.s32 32, %v1038_v44  ;;  %v1043_v24 = vsub.s32 4294967266, %v1038_v44  ;;  %v672_v8 = vshll.u32 %v15514_v63, %v10191_v23 }
 0x284   :  { %v1040_v26 = vshll.u32 %v10305_v10, %v1038_v44  ;;  %v1053_v7 = vsub.s32 4, %v10283_v17  ;;  %v10353_v22 = vmul.u32.u64.low %v10291_v46, %v1846_v57  ;;  %v10354_v58 = vmul.u32.u64.high %v10291_v46, %v1846_v57, %v10353_v22  ;;  %v8117_v45 = vpop.eup %8116 }
 0x285   :  { %v1041_v30 = vshrl.u32 %v10289_v35, %v1039_v21  ;;  %v1044_v47 = vadd.s32 127, %v1043_v24  ;;  %v1854_v48 = vmul.u32 %v10291_v46, %v1838_v53  ;;  %v676_v6 = vshrl.u32 %v15510_v36, %v10325_v38  ;;  %v8119_v27 = vpop.eup %8118 }
 0x286   :  { %v1691_v60 = vxor.u32 2147483648, %v8117_v45  ;;  %v1857_v0 = vadd.s32 1, %v10343_v15  ;;  %v674_v10 = vor.u32 %v673_v2, %v672_v8  ;;  %v675_v41 = vshll.u32 %v15520_v31, %v10191_v23 }
 0x287   :  { %v1688_v56 = vxor.u32 2147483648, %v8119_v27  ;;  %v1042_v50 = vor.u32 %v1041_v30, %v1040_v26  ;;  %v1045_v25 = vshll.u32 %v1044_v47, 23  ;;  %v678_v35 = vshll.u32 %v15510_v36, %v10191_v23 }
 0x288   :  { %v1692_v46 = vsel %vm1690_vm5, %v1691_v60, %v8119_v27  ;;  %vm1856_vm12 = vc.u32 %v10354_v58, %v10342_v32  ;;  %v679_v43 = vshrl.u32 %v15511_v5, %v10325_v38  ;;  %v681_v33 = vshll.u32 %v15511_v5, %v10191_v23 }
 0x289   :  { %v1689_v14 = vsel %vm1687_vm6, %v8117_v45, %v1688_v56  ;;  %v1046_v4 = vor.u32 4788187, %v1045_v25  ;;  %v1858_v16 = vsel %vm1856_vm12, %v1857_v0, %v10343_v15  ;;  %v677_v29 = vor.u32 %v676_v6, %v675_v41 }
 0x28a   :  { %v1693_v52 = vsel %vm1686_vm7, %v1689_v14, %v1692_v46  ;;  %v1049_v2 = vcvt.s32.f32 %v1042_v50  ;;  %v1859_v53 = vadd.s32 %v1858_v16, %v1854_v48  ;;  %v682_v28 = vshrl.u32 %v15512_v13, %v10325_v38 }
 0x28b   :  { %vm1706_vm13 = vcmp.gt.s32.totalorder %v10275_v34, 0  ;;  %v1694_v3 = vsel %vm1683_vm10, nan, %v1693_v52  ;;  %v1047_v44 = vand.u32 2147483647, %v1046_v4  ;;  %v684_v57 = vshll.u32 %v15512_v13, %v10191_v23 }
 0x28c   :  { %v685_v15 = vshrl.u32 %v15513_v18, %v10325_v38  ;;  %v7758_v21 = vpack.c.bf16 %v1694_v3, %v862_v49  ;;  %v1860_v12 = vadd.s32 536870912, %v1859_v53  ;;  %v680_v24 = vor.u32 %v679_v43, %v678_v35  ;;  %v15585_v3 = vld [vmem:[#allocation13_spill] sm:$0xff] }
 0x28d   :  { %v683_v8 = vor.u32 %v682_v28, %v681_v33  ;;  %vm10389_vm11 = vcmp.le.f32.partialorder %v967_v59, 0.7853982  ;;  %vm969_vm15 = vcmp.lt.s32.totalorder %v9881_v40, 0  ;;  %v1050_v20 = vmul.f32 %v1049_v2, %v1047_v44 }
 0x28e   :  { %v686_v22 = vor.u32 %v685_v15, %v684_v57  ;;  %7759 = vmatprep.subr.bf16.mxu0 %v7758_v21  ;;  %v1861_v45 = vshrl.u32 %v1860_v12, 30  ;;  %v663_v23 = vor.u32 8388608, %v10296_v19  ;;  %vm687_vm0 = vcmp.lt.s32.totalorder %v10299_v39, 1  ;;  %v15587_v21 = vld [vmem:[#allocation24_spill] sm:$0xff] }
 0x28f   :  { %vm690_vm1 = vcmp.lt.s32.totalorder %v10299_v39, 4  ;;  %v1051_v49 = vxor.u32 2147483648, %v1050_v20  ;;  %vm689_vm14 = vcmp.lt.s32.totalorder %v10299_v39, 3  ;;  %v695_v59 = vsel %vm687_vm0, %v674_v10, %v677_v29 }
 0x290   :  { %v696_v30 = vsel %vm690_vm1, %v683_v8, 920167782  ;;  %v1054_v47 = vsel %vm969_vm15, %v1053_v7, %v10283_v17  ;;  %v1862_v48 = vshll.u32 %v1861_v45, 30  ;;  %v699_v19 = vsel %vm687_vm0, %v677_v29, %v680_v24 }
 0x291   :  { %v697_v6 = vsel %vm689_vm14, %v680_v24, %v696_v30  ;;  %v1052_v27 = vsel %vm969_vm15, %v1051_v49, %v1050_v20  ;;  %vm688_vm2 = vcmp.lt.s32.totalorder %v10299_v39, 2  ;;  %v692_v60 = vsel %vm690_vm1, %v680_v24, 2102212464  ;;  %v15590_v49 = vld [vmem:[#allocation16_spill] sm:$0xff]  ;;  %v15591_v30 = vld [vmem:[#allocation15_spill] sm:$0xff] }
 0x292   :  { %v700_v0 = vsel %vm690_vm1, %v686_v22, 1326507024  ;;  %v10410_v41 = vsub.s32 %v1859_v53, %v1862_v48  ;;  %v671_v56 = vshrl.u32 %v15514_v63, %v10325_v38  ;;  %v698_v17 = vsel %vm688_vm2, %v695_v59, %v697_v6 }
 0x293   :  { %v701_v7 = vsel %vm689_vm14, %v683_v8, %v700_v0  ;;  %v1056_v50 = vsel %vm10389_vm11, 0, %v1054_v47  ;;  %v1885_v25 = vsub.s32 4, %v1861_v45  ;;  %v703_v46 = vshll.u32 %v663_v23, 8 }
 0x294   :  { %v702_v35 = vsel %vm688_vm2, %v699_v19, %v701_v7  ;;  %v1055_v43 = vsel %vm10389_vm11, %v9881_v40, %v1052_v27  ;;  %v1865_v38 = vsub.s32 0, %v10410_v41  ;;  %v691_v33 = vsel %vm687_vm0, %v671_v56, %v674_v10 }
 0x295   :  { %v693_v14 = vsel %vm689_vm14, %v677_v29, %v692_v60  ;;  %v10430_v4 = vmul.u32.u64.low %v703_v46, %v702_v35  ;;  %v10431_v16 = vmul.u32.u64.high %v703_v46, %v702_v35, %v10430_v4  ;;  %v1501_v53 = vand.u32 31, %v10278_v42  ;;  %v15586_v29 = vld [vmem:[#allocation23_spill] sm:$0xff] }
 0x296   :  { %v10433_v52 = vmul.u32.u64.low %v703_v46, %v698_v17  ;;  %v10434_v2 = vmul.u32.u64.high %v703_v46, %v698_v17, %v10433_v52  ;;  %v10441_v28 = vsel %vm1706_vm13, %v10275_v34, 0  ;;  %vm1801_vm3 = vcmp.lt.s32.totalorder %v9989_v51, 0 }
 0x297   :  { %v7531_v10 = vmin.u32 %v1865_v38, %v10410_v41  ;;  %v10447_v44 = vmul.f32 %v15586_v29, %v15585_v3  ;;  %8120 = vcosq.f32 %v1055_v43  ;;  %v1886_v57 = vsel %vm1801_vm3, %v1885_v25, %v1861_v45 }
 0x298   :  { %v694_v15 = vsel %vm688_vm2, %v691_v33, %v693_v14  ;;  %v10455_v12 = vmul.f32 %v15587_v21, %v15585_v3  ;;  %8122 = vsinq.f32 %v1055_v43  ;;  %v1060_v34 = vadd.s32 3, %v1056_v50 }
 0x299   :  { %v1867_v24 = vclz %v7531_v10  ;;  %v10458_v8 = vand.u32 31, %v10441_v28  ;;  %vm10462_vm4 = vcmp.le.f32.partialorder %v1799_v9, 0.7853982  ;;  %vm712_vm5 = vc.u32 %v10431_v16, %v10433_v52 }
 0x29a   :  { %v713_v39 = vadd.s32 1, %v10434_v2  ;;  %v1888_v22 = vsel %vm10462_vm4, 0, %v1886_v57  ;;  %v710_v45 = vmul.u32 %v703_v46, %v694_v15  ;;  %v1502_v23 = vsub.s32 32, %v1501_v53 }
 0x29b   :  { %v7532_v20 = vadd.s32 4294967294, %v1867_v24  ;;  %v2322_v59 = vand.u32 2139095040, %v15590_v49  ;;  %v10474_v47 = vmul.f32 %v15586_v29, %v15591_v30  ;;  %v10478_v9 = vmul.f32 %v15587_v21, %v15591_v30 }
 0x29c   :  { %v714_v48 = vsel %vm712_vm5, %v713_v39, %v10434_v2  ;;  %v10481_v6 = vand.u32 3, %v1060_v34  ;;  %v1855_v19 = vadd.s32 %v10342_v32, %v10354_v58  ;;  %v10485_v0 = vadd.s32 3, %v1888_v22 }
 0x29d   :  { %vm7533_vm6 = vcmp.lt.s32.totalorder %v7532_v20, 0  ;;  %v715_v27 = vadd.s32 %v714_v48, %v710_v45  ;;  %v1487_v56 = vand.u32 2147483647, %v15573_v55  ;;  %v10489_v17 = vshrl.u32 %v10278_v42, 5 }
 0x29e   :  { %v1870_v60 = vsel %vm7533_vm6, 0, %v7532_v20  ;;  %v1504_v25 = vshll.u32 %v15514_v63, %v1501_v53  ;;  %v1505_v35 = vshrl.u32 %v15520_v31, %v1502_v23  ;;  %v1508_v43 = vshrl.u32 %v15510_v36, %v1502_v23 }
 0x29f   :  { %v1871_v7 = vsub.s32 32, %v1870_v60  ;;  %v1875_v50 = vsub.s32 4294967266, %v1870_v60  ;;  %v716_v46 = vadd.s32 536870912, %v715_v27  ;;  %v1511_v32 = vshrl.u32 %v15511_v5, %v1502_v23 }
 0x2a0   :  { %v1514_v58 = vshrl.u32 %v15512_v13, %v1502_v23  ;;  %v1872_v38 = vshll.u32 %v10410_v41, %v1870_v60  ;;  %v1517_v42 = vshrl.u32 %v15513_v18, %v1502_v23  ;;  %v1494_v10 = vand.u32 8388607, %v1487_v56 }
 0x2a1   :  { %v1873_v33 = vshrl.u32 %v1855_v19, %v1871_v7  ;;  %v1876_v14 = vadd.s32 127, %v1875_v50  ;;  %v8121_v4 = vpop.eup %8120  ;;  %v10498_v2 = vshrl.u32 %v716_v46, 30  ;;  %v1507_v3 = vshll.u32 %v15520_v31, %v1501_v53 }
 0x2a2   :  { %v1513_v29 = vshll.u32 %v15511_v5, %v1501_v53  ;;  %v8123_v57 = vpop.eup %8122  ;;  %vm1063_vm7 = vcmp.eq.s32.totalorder %v10481_v6, 0  ;;  %vm1066_vm8 = vcmp.eq.s32.totalorder %v10481_v6, 2  ;;  %v1510_v21 = vshll.u32 %v15510_v36, %v1501_v53 }
 0x2a3   :  { %v1874_v41 = vor.u32 %v1873_v33, %v1872_v38  ;;  %v1877_v15 = vshll.u32 %v1876_v14, 23  ;;  %v1516_v34 = vshll.u32 %v15512_v13, %v1501_v53  ;;  %v718_v24 = vshll.u32 %v10498_v2, 30 }
 0x2a4   :  { %v1506_v39 = vor.u32 %v1505_v35, %v1504_v25  ;;  %v1509_v20 = vor.u32 %v1508_v43, %v1507_v3  ;;  %v1515_v22 = vor.u32 %v1514_v58, %v1513_v29  ;;  %v1503_v30 = vshrl.u32 %v15514_v63, %v1502_v23 }
 0x2a5   :  { %v1878_v45 = vor.u32 4788187, %v1877_v15  ;;  %v1512_v48 = vor.u32 %v1511_v32, %v1510_v21  ;;  %v1518_v19 = vor.u32 %v1517_v42, %v1516_v34  ;;  %v1064_v60 = vxor.u32 2147483648, %v8123_v57 }
 0x2a6   :  { %v1067_v7 = vxor.u32 2147483648, %v8121_v4  ;;  %v10510_v50 = vsub.s32 %v715_v27, %v718_v24  ;;  %v1495_v46 = vor.u32 8388608, %v1494_v10  ;;  %v1881_v33 = vcvt.s32.f32 %v1874_v41 }
 0x2a7   :  { %v1879_v38 = vand.u32 2147483647, %v1878_v45  ;;  %vm1519_vm10 = vcmp.lt.s32.totalorder %v10489_v17, 1  ;;  %vm1522_vm12 = vcmp.lt.s32.totalorder %v10489_v17, 4  ;;  %vm1521_vm13 = vcmp.lt.s32.totalorder %v10489_v17, 3 }
 0x2a8   :  { %v721_v53 = vsub.s32 0, %v10510_v50  ;;  %v1527_v23 = vsel %vm1519_vm10, %v1506_v39, %v1509_v20  ;;  %v1528_v25 = vsel %vm1522_vm12, %v1515_v22, 920167782  ;;  %v1531_v43 = vsel %vm1519_vm10, %v1509_v20, %v1512_v48 }
 0x2a9   :  { %v1882_v35 = vmul.f32 %v1881_v33, %v1879_v38  ;;  %v1529_v27 = vsel %vm1521_vm13, %v1512_v48, %v1528_v25  ;;  %v1532_v32 = vsel %vm1522_vm12, %v1518_v19, 1326507024  ;;  %vm1520_vm11 = vcmp.lt.s32.totalorder %v10489_v17, 2 }
 0x2aa   :  { %v7487_v58 = vmin.u32 %v721_v53, %v10510_v50  ;;  %v1524_v14 = vsel %vm1522_vm12, %v1512_v48, 2102212464  ;;  %v1533_v42 = vsel %vm1521_vm13, %v1515_v22, %v1532_v32  ;;  %v1530_v3 = vsel %vm1520_vm11, %v1527_v23, %v1529_v27 }
 0x2ab   :  { %v1883_v10 = vxor.u32 2147483648, %v1882_v35  ;;  %v1534_v29 = vsel %vm1520_vm11, %v1531_v43, %v1533_v42  ;;  %v1535_v41 = vshll.u32 %v1495_v46, 8  ;;  %v1065_v15 = vsel %vm1063_vm7, %v8121_v4, %v1064_v60 }
 0x2ac   :  { %v1068_v21 = vsel %vm1066_vm8, %v1067_v7, %v8123_v57  ;;  %v723_v34 = vclz %v7487_v58  ;;  %v1523_v24 = vsel %vm1519_vm10, %v1503_v30, %v1506_v39  ;;  %v1525_v45 = vsel %vm1521_vm13, %v1509_v20, %v1524_v14  ;;  %v15592_v7 = vld [vmem:[#allocation17_spill] sm:$0xff] }
 0x2ad   :  { %v1884_v22 = vsel %vm1801_vm3, %v1883_v10, %v1882_v35  ;;  %v10540_v48 = vmul.u32.u64.low %v1535_v41, %v1534_v29  ;;  %v10541_v19 = vmul.u32.u64.high %v1535_v41, %v1534_v29, %v10540_v48  ;;  %v2530_v39 = vand.u32 2139095040, %v15592_v7 }
 0x2ae   :  { %v1887_v4 = vsel %vm10462_vm4, %v9989_v51, %v1884_v22  ;;  %v7488_v60 = vadd.s32 4294967294, %v723_v34  ;;  %v10546_v46 = vmul.u32.u64.low %v1535_v41, %v1530_v3  ;;  %v10547_v57 = vmul.u32.u64.high %v1535_v41, %v1530_v3, %v10546_v46 }
 0x2af   :  { %vm1062_vm15 = vcmp.lt.s32.totalorder %v10481_v6, 2  ;;  %8124 = vcosq.f32 %v1887_v4  ;;  %v10553_v30 = vand.u32 3, %v10485_v0  ;;  %v711_v20 = vadd.s32 %v10433_v52, %v10431_v16  ;;  %v15593_v52 = vld [vmem:[#allocation7_spill] sm:$0xff] }
 0x2b0   :  { %8126 = vsinq.f32 %v1887_v4  ;;  %vm7489_vm0 = vcmp.lt.s32.totalorder %v7488_v60, 0  ;;  %v1526_v26 = vsel %vm1520_vm11, %v1523_v24, %v1525_v45  ;;  %v1069_v38 = vsel %vm1062_vm15, %v1065_v15, %v1068_v21 }
 0x2b1   :  { %v726_v33 = vsel %vm7489_vm0, 0, %v7488_v60  ;;  %vm1544_vm1 = vc.u32 %v10541_v19, %v10546_v46  ;;  %v878_v53 = vsub.s32 32, %v10272_v1  ;;  %v741_v0 = vsub.s32 4, %v10498_v2 }
 0x2b2   :  { %v727_v6 = vsub.s32 32, %v726_v33  ;;  %v731_v23 = vsub.s32 4294967266, %v726_v33  ;;  %v1545_v25 = vadd.s32 1, %v10547_v57  ;;  %vm1059_vm14 = vweird.f32 %v9881_v40 }
 0x2b3   :  { %vm657_vm2 = vcmp.lt.s32.totalorder %v15549_v62, 0  ;;  %v1542_v16 = vmul.u32 %v1535_v41, %v1526_v26  ;;  %v863_v17 = vand.u32 2147483647, %v15593_v52  ;;  %vm1895_vm3 = vcmp.eq.s32.totalorder %v10553_v30, 0 }
 0x2b4   :  { %v728_v35 = vshll.u32 %v10510_v50, %v726_v33  ;;  %v729_v27 = vshrl.u32 %v711_v20, %v727_v6  ;;  %v732_v43 = vadd.s32 127, %v731_v23  ;;  %v1546_v32 = vsel %vm1544_vm1, %v1545_v25, %v10547_v57 }
 0x2b5   :  { %v1070_v58 = vsel %vm1059_vm14, nan, %v1069_v38  ;;  %vm1894_vm4 = vcmp.lt.s32.totalorder %v10553_v30, 2  ;;  %vm1898_vm5 = vcmp.eq.s32.totalorder %v10553_v30, 2  ;;  %v1547_v14 = vadd.s32 %v1546_v32, %v1542_v16 }
 0x2b6   :  { %v881_v40 = vshrl.u32 %v15520_v31, %v878_v53  ;;  %vm1891_vm6 = vweird.f32 %v9989_v51  ;;  %v730_v42 = vor.u32 %v729_v27, %v728_v35  ;;  %v733_v10 = vshll.u32 %v732_v43, 23 }
 0x2b7   :  { %v10577_v50 = vsel %vm657_vm2, %v741_v0, %v10498_v2  ;;  %v10580_v3 = vshrl.u32 %v10076_v37, 5  ;;  %v1548_v29 = vadd.s32 536870912, %v1547_v14  ;;  %v870_v41 = vand.u32 8388607, %v863_v17 }
 0x2b8   :  { %v880_v15 = vshll.u32 %v15514_v63, %v10272_v1  ;;  %v884_v21 = vshrl.u32 %v15510_v36, %v878_v53  ;;  %v734_v34 = vor.u32 4788187, %v733_v10  ;;  %v879_v24 = vshrl.u32 %v15514_v63, %v878_v53 }
 0x2b9   :  { %v883_v22 = vshll.u32 %v15520_v31, %v10272_v1  ;;  %v890_v2 = vshrl.u32 %v15512_v13, %v878_v53  ;;  %v8125_v45 = vpop.eup %8124  ;;  %v1549_v37 = vshrl.u32 %v1548_v29, 30  ;;  %v887_v4 = vshrl.u32 %v15511_v5, %v878_v53 }
 0x2ba   :  { %v882_v48 = vor.u32 %v881_v40, %v880_v15  ;;  %v889_v60 = vshll.u32 %v15511_v5, %v10272_v1  ;;  %v8127_v57 = vpop.eup %8126  ;;  %v1899_v20 = vxor.u32 2147483648, %v8125_v45  ;;  %v735_v26 = vand.u32 2147483647, %v734_v34 }
 0x2bb   :  { %v737_v38 = vcvt.s32.f32 %v730_v42  ;;  %v893_v33 = vshrl.u32 %v15513_v18, %v878_v53  ;;  %v1896_v6 = vxor.u32 2147483648, %v8127_v57  ;;  %v1550_v23 = vshll.u32 %v1549_v37, 30 }
 0x2bc   :  { %v885_v0 = vor.u32 %v884_v21, %v883_v22  ;;  %v886_v25 = vshll.u32 %v15510_v36, %v10272_v1  ;;  %v1900_v16 = vsel %vm1898_vm5, %v1899_v20, %v8127_v57  ;;  %v891_v27 = vor.u32 %v890_v2, %v889_v60 }
 0x2bd   :  { %v738_v35 = vmul.f32 %v737_v38, %v735_v26  ;;  %v892_v43 = vshll.u32 %v15512_v13, %v10272_v1  ;;  %v1897_v32 = vsel %vm1895_vm3, %v8125_v45, %v1896_v6  ;;  %v10603_v40 = vsub.s32 %v1547_v14, %v1550_v23 }
 0x2be   :  { %v871_v53 = vor.u32 8388608, %v870_v41  ;;  %v888_v42 = vor.u32 %v887_v4, %v886_v25  ;;  %v1901_v10 = vsel %vm1894_vm4, %v1897_v32, %v1900_v16  ;;  %vm895_vm7 = vcmp.lt.s32.totalorder %v10580_v3, 1 }
 0x2bf   :  { %v894_v29 = vor.u32 %v893_v33, %v892_v43  ;;  %vm898_vm8 = vcmp.lt.s32.totalorder %v10580_v3, 4  ;;  %v1902_v15 = vsel %vm1891_vm6, nan, %v1901_v10  ;;  %v739_v21 = vxor.u32 2147483648, %v738_v35 }
 0x2c0   :  { %v1553_v1 = vsub.s32 0, %v10603_v40  ;;  %v903_v14 = vsel %vm895_vm7, %v882_v48, %v885_v0  ;;  %v7766_v34 = vpack.c.bf16 %v1902_v15, %v1070_v58  ;;  %vm896_vm10 = vcmp.lt.s32.totalorder %v10580_v3, 2 }
 0x2c1   :  { %vm897_vm12 = vcmp.lt.s32.totalorder %v10580_v3, 3  ;;  %v904_v30 = vsel %vm898_vm8, %v891_v27, 920167782  ;;  %v1573_v22 = vsub.s32 4, %v1549_v37  ;;  %v900_v51 = vsel %vm898_vm8, %v888_v42, 2102212464 }
 0x2c2   :  { %v7519_v41 = vmin.u32 %v1553_v1, %v10603_v40  ;;  %v905_v2 = vsel %vm897_vm12, %v888_v42, %v904_v30  ;;  %7767 = vmatprep.subr.bf16.mxu1 %v7766_v34  ;;  %v907_v45 = vsel %vm895_vm7, %v885_v0, %v888_v42  ;;  %v908_v4 = vsel %vm898_vm8, %v894_v29, 1326507024  ;;  %v15598_v30 = vld [vmem:[#allocation18_spill] sm:$0xff] }
 0x2c3   :  { %v906_v58 = vsel %vm896_vm10, %v903_v14, %v905_v2  ;;  %v911_v60 = vshll.u32 %v871_v53, 8  ;;  %vm10631_vm13 = vcmp.le.f32.partialorder %v655_v61, 0.7853982  ;;  %v740_v20 = vsel %vm657_vm2, %v739_v21, %v738_v35 }
 0x2c4   :  { %v1555_v26 = vclz %v7519_v41  ;;  %v899_v38 = vsel %vm895_vm7, %v879_v24, %v882_v48  ;;  %v901_v33 = vsel %vm897_vm12, %v885_v0, %v900_v51  ;;  %v909_v6 = vsel %vm897_vm12, %v891_v27, %v908_v4 }
 0x2c5   :  { %v10643_v23 = vmul.u32.u64.low %v911_v60, %v906_v58  ;;  %v10644_v25 = vmul.u32.u64.high %v911_v60, %v906_v58, %v10643_v23  ;;  %v744_v61 = vsel %vm10631_vm13, 0, %v10577_v50  ;;  %vm1489_vm11 = vcmp.lt.s32.totalorder %v15573_v55, 0 }
 0x2c6   :  { %v7520_v16 = vadd.s32 4294967294, %v1555_v26  ;;  %v910_v24 = vsel %vm896_vm10, %v907_v45, %v909_v6  ;;  %v743_v48 = vsel %vm10631_vm13, %v15549_v62, %v740_v20  ;;  %v1574_v0 = vsel %vm1489_vm11, %v1573_v22, %v1549_v37 }
 0x2c7   :  { %v10658_v35 = vmul.u32.u64.low %v911_v60, %v910_v24  ;;  %v10659_v27 = vmul.u32.u64.high %v911_v60, %v910_v24, %v10658_v35  ;;  %vm10663_vm15 = vcmp.le.f32.partialorder %v1487_v56, 0.7853982  ;;  %v902_v43 = vsel %vm896_vm10, %v899_v38, %v901_v33 }
 0x2c8   :  { %vm7521_vm0 = vcmp.lt.s32.totalorder %v7520_v16, 0  ;;  %v1710_v32 = vsub.s32 32, %v10458_v8  ;;  %v748_v53 = vadd.s32 3, %v744_v61  ;;  %v1543_v42 = vadd.s32 %v10546_v46, %v10541_v19 }
 0x2c9   :  { %v1558_v37 = vsel %vm7521_vm0, 0, %v7520_v16  ;;  %v921_v10 = vadd.s32 1, %v10644_v25  ;;  %8128 = vcosq.f32 %v743_v48  ;;  %v1576_v56 = vsel %vm10663_vm15, 0, %v1574_v0 }
 0x2ca   :  { %v1559_v29 = vsub.s32 32, %v1558_v37  ;;  %v1563_v15 = vsub.s32 4294967266, %v1558_v37  ;;  %v1560_v21 = vshll.u32 %v10603_v40, %v1558_v37  ;;  %v918_v1 = vmul.u32 %v911_v60, %v902_v43 }
 0x2cb   :  { %vm920_vm1 = vc.u32 %v10659_v27, %v10643_v23  ;;  %v1695_v3 = vand.u32 2147483647, %v15574_v54  ;;  %v1713_v46 = vshrl.u32 %v15520_v31, %v1710_v32  ;;  %v3154_v41 = vand.u32 2139095040, %v15598_v30 }
 0x2cc   :  { %v1561_v14 = vshrl.u32 %v1543_v42, %v1559_v29  ;;  %v1564_v34 = vadd.s32 127, %v1563_v15  ;;  %v922_v19 = vsel %vm920_vm1, %v921_v10, %v10644_v25  ;;  %8130 = vsinq.f32 %v743_v48 }
 0x2cd   :  { %v10682_v22 = vand.u32 3, %v748_v53  ;;  %v923_v51 = vadd.s32 %v922_v19, %v918_v1  ;;  %v1712_v58 = vshll.u32 %v15514_v63, %v10458_v8  ;;  %v1716_v45 = vshrl.u32 %v15510_v36, %v1710_v32 }
 0x2ce   :  { %v1562_v2 = vor.u32 %v1561_v14, %v1560_v21  ;;  %v1565_v40 = vshll.u32 %v1564_v34, 23  ;;  %v1580_v4 = vadd.s32 3, %v1576_v56  ;;  %v1702_v57 = vand.u32 8388607, %v1695_v3 }
 0x2cf   :  { %v924_v60 = vadd.s32 536870912, %v923_v51  ;;  %v10690_v20 = vshrl.u32 %v10441_v28, 5  ;;  %v1714_v38 = vor.u32 %v1713_v46, %v1712_v58  ;;  %v1715_v33 = vshll.u32 %v15520_v31, %v10458_v8 }
 0x2d0   :  { %v1566_v26 = vor.u32 4788187, %v1565_v40  ;;  %v1719_v6 = vshrl.u32 %v15511_v5, %v1710_v32  ;;  %v1718_v61 = vshll.u32 %v15510_v36, %v10458_v8  ;;  %v1721_v16 = vshll.u32 %v15511_v5, %v10458_v8 }
 0x2d1   :  { %v10695_v25 = vshrl.u32 %v924_v60, 30  ;;  %v1722_v24 = vshrl.u32 %v15512_v13, %v1710_v32  ;;  %v1569_v28 = vcvt.s32.f32 %v1562_v2  ;;  %v1717_v0 = vor.u32 %v1716_v45, %v1715_v33 }
 0x2d2   :  { %v1567_v48 = vand.u32 2147483647, %v1566_v26  ;;  %v1725_v35 = vshrl.u32 %v15513_v18, %v1710_v32  ;;  %v10705_v43 = vshrl.u32 %v2322_v59, 23  ;;  %v10707_v53 = vshrl.u32 %v3154_v41, 23 }
 0x2d3   :  { %v926_v42 = vshll.u32 %v10695_v25, 30  ;;  %v1723_v37 = vor.u32 %v1722_v24, %v1721_v16  ;;  %v8129_v10 = vpop.eup %8128  ;;  %vm754_vm14 = vcmp.eq.s32.totalorder %v10682_v22, 2  ;;  %v1720_v15 = vor.u32 %v1719_v6, %v1718_v61 }
 0x2d4   :  { %v1570_v29 = vmul.f32 %v1569_v28, %v1567_v48  ;;  %v1724_v56 = vshll.u32 %v15512_v13, %v10458_v8  ;;  %v10713_v21 = vand.u32 3, %v1580_v4  ;;  %v1703_v14 = vor.u32 8388608, %v1702_v57 }
 0x2d5   :  { %v10715_v1 = vsub.s32 %v923_v51, %v926_v42  ;;  %vm1727_vm2 = vcmp.lt.s32.totalorder %v10690_v20, 1  ;;  %vm751_vm3 = vcmp.eq.s32.totalorder %v10682_v22, 0  ;;  %vm1730_vm4 = vcmp.lt.s32.totalorder %v10690_v20, 4 }
 0x2d6   :  { %v1571_v59 = vxor.u32 2147483648, %v1570_v29  ;;  %v1726_v34 = vor.u32 %v1725_v35, %v1724_v56  ;;  %v1735_v19 = vsel %vm1727_vm2, %v1714_v38, %v1717_v0  ;;  %v8131_v46 = vpop.eup %8130  ;;  %v1711_v8 = vshrl.u32 %v15514_v63, %v1710_v32 }
 0x2d7   :  { %v929_v41 = vsub.s32 0, %v10715_v1  ;;  %vm1729_vm5 = vcmp.lt.s32.totalorder %v10690_v20, 3  ;;  %v1736_v51 = vsel %vm1730_vm4, %v1723_v37, 920167782  ;;  %v755_v2 = vxor.u32 2147483648, %v8129_v10 }
 0x2d8   :  { %v1572_v40 = vsel %vm1489_vm11, %v1571_v59, %v1570_v29  ;;  %vm1728_vm6 = vcmp.lt.s32.totalorder %v10690_v20, 2  ;;  %v1737_v58 = vsel %vm1729_vm5, %v1720_v15, %v1736_v51  ;;  %vm750_vm7 = vcmp.lt.s32.totalorder %v10682_v22, 2 }
 0x2d9   :  { %v1575_v32 = vsel %vm10663_vm15, %v15573_v55, %v1572_v40  ;;  %v7495_v45 = vmin.u32 %v929_v41, %v10715_v1  ;;  %v1732_v4 = vsel %vm1730_vm4, %v1720_v15, 2102212464  ;;  %v1738_v60 = vsel %vm1728_vm6, %v1735_v19, %v1737_v58 }
 0x2da   :  { %8132 = vcosq.f32 %v1575_v32  ;;  %v1739_v57 = vsel %vm1727_vm2, %v1717_v0, %v1720_v15  ;;  %v1740_v26 = vsel %vm1730_vm4, %v1726_v34, 1326507024  ;;  %v1743_v33 = vshll.u32 %v1703_v14, 8  ;;  %v15602_v14 = vld [vmem:[#allocation12_spill] sm:$0xff]  ;;  %v15603_v34 = vld [vmem:[#allocation11_spill] sm:$0xff] }
 0x2db   :  { %v752_v6 = vxor.u32 2147483648, %v8131_v46  ;;  %8134 = vsinq.f32 %v1575_v32  ;;  %vm865_vm8 = vcmp.lt.s32.totalorder %v15593_v52, 0  ;;  %v931_v50 = vclz %v7495_v45 }
 0x2dc   :  { %v1731_v61 = vsel %vm1727_vm2, %v1711_v8, %v1714_v38  ;;  %vm747_vm10 = vweird.f32 %v15549_v62  ;;  %v1733_v16 = vsel %vm1729_vm5, %v1717_v0, %v1732_v4  ;;  %v1741_v24 = vsel %vm1729_vm5, %v1723_v37, %v1740_v26  ;;  %v15599_v38 = vld [vmem:[#allocation10_spill] sm:$0xff] }
 0x2dd   :  { %v10753_v48 = vmul.u32.u64.low %v1743_v33, %v1738_v60  ;;  %v10754_v28 = vmul.u32.u64.high %v1743_v33, %v1738_v60, %v10753_v48  ;;  %v756_v35 = vsel %vm754_vm14, %v755_v2, %v8131_v46  ;;  %v7496_v42 = vadd.s32 4294967294, %v931_v50 }
 0x2de   :  { %v1742_v29 = vsel %vm1728_vm6, %v1739_v57, %v1741_v24  ;;  %v10763_v15 = vadd.f32 %v10447_v44, %v15599_v38  ;;  %vm10767_vm12 = vcmp.le.f32.partialorder %v863_v17, 0.7853982  ;;  %v10776_v59 = vadd.f32 %v10474_v47, %v15602_v14 }
 0x2df   :  { %v10771_v37 = vmul.u32.u64.low %v1743_v33, %v1742_v29  ;;  %v10772_v56 = vmul.u32.u64.high %v1743_v33, %v1742_v29, %v10771_v37  ;;  %v10780_v19 = vadd.f32 %v10455_v12, %v15603_v34  ;;  %v753_v44 = vsel %vm751_vm3, %v8129_v10, %v752_v6 }
 0x2e0   :  { %vm1583_vm13 = vcmp.eq.s32.totalorder %v10713_v21, 0  ;;  %vm7497_vm11 = vcmp.lt.s32.totalorder %v7496_v42, 0  ;;  %v1734_v17 = vsel %vm1728_vm6, %v1731_v61, %v1733_v16  ;;  %v2426_v46 = vand.u32 2139095040, %v10763_v15 }
 0x2e1   :  { %vm1582_vm15 = vcmp.lt.s32.totalorder %v10713_v21, 2  ;;  %v934_v41 = vsel %vm7497_vm11, 0, %v7496_v42  ;;  %v949_v47 = vsub.s32 4, %v10695_v25  ;;  %v1753_v8 = vadd.s32 1, %v10754_v28 }
 0x2e2   :  { %v2423_v12 = vand.u32 2147483647, %v10763_v15  ;;  %vm1579_vm0 = vweird.f32 %v15573_v55  ;;  %vm1586_vm1 = vcmp.eq.s32.totalorder %v10713_v21, 2  ;;  %v919_v10 = vadd.s32 %v10643_v23, %v10659_v27 }
 0x2e3   :  { %v935_v20 = vsub.s32 32, %v934_v41  ;;  %v939_v51 = vsub.s32 4294967266, %v934_v41  ;;  %v757_v2 = vsel %vm750_vm7, %v753_v44, %v756_v35  ;;  %v1750_v40 = vmul.u32 %v1743_v33, %v1734_v17 }
 0x2e4   :  { %vm1752_vm14 = vc.u32 %v10772_v56, %v10753_v48  ;;  %v2427_v58 = vshrl.u32 %v2426_v46, 23  ;;  %v936_v32 = vshll.u32 %v10715_v1, %v934_v41  ;;  %v8133_v57 = vpop.eup %8132  ;;  %v950_v23 = vsel %vm865_vm8, %v949_v47, %v10695_v25 }
 0x2e5   :  { %v937_v45 = vshrl.u32 %v919_v10, %v935_v20  ;;  %v940_v4 = vadd.s32 127, %v939_v51  ;;  %v1754_v60 = vsel %vm1752_vm14, %v1753_v8, %v10754_v28  ;;  %v2430_v22 = vand.u32 8388607, %v2423_v12  ;;  %v8135_v33 = vpop.eup %8134 }
 0x2e6   :  { %v1755_v27 = vadd.s32 %v1754_v60, %v1750_v40  ;;  %v7554_v26 = vadd.s32 4294967169, %v2427_v58  ;;  %v758_v6 = vsel %vm747_vm10, nan, %v757_v2  ;;  %v1587_v50 = vxor.u32 2147483648, %v8133_v57 }
 0x2e7   :  { %v938_v1 = vor.u32 %v937_v45, %v936_v32  ;;  %v941_v61 = vshll.u32 %v940_v4, 23  ;;  %v1584_v16 = vxor.u32 2147483648, %v8135_v33  ;;  %v3258_v35 = vand.u32 2139095040, %v10776_v59 }
 0x2e8   :  { %v1756_v24 = vadd.s32 536870912, %v1755_v27  ;;  %v2433_v28 = vadd.s32 1, %v7554_v26  ;;  %v1588_v25 = vsel %vm1586_vm1, %v1587_v50, %v8135_v33  ;;  %v952_v29 = vsel %vm10767_vm12, 0, %v950_v23 }
 0x2e9   :  { %v942_v42 = vor.u32 4788187, %v941_v61  ;;  %v3255_v38 = vand.u32 2147483647, %v10776_v59  ;;  %v1585_v62 = vsel %vm1583_vm13, %v8133_v57, %v1584_v16  ;;  %v2431_v14 = vor.u32 8388608, %v2430_v22 }
 0x2ea   :  { %v1757_v37 = vshrl.u32 %v1756_v24, 30  ;;  %vm2434_vm2 = vcmp.gt.s32.totalorder %v2433_v28, 0  ;;  %v1589_v34 = vsel %vm1582_vm15, %v1585_v62, %v1588_v25  ;;  %v945_v17 = vcvt.s32.f32 %v938_v1 }
 0x2eb   :  { %v943_v44 = vand.u32 2147483647, %v942_v42  ;;  %v2435_v46 = vsel %vm2434_vm2, %v2433_v28, 0  ;;  %v1590_v41 = vsel %vm1579_vm0, nan, %v1589_v34  ;;  %v3259_v10 = vshrl.u32 %v3258_v35, 23 }
 0x2ec   :  { %v1758_v47 = vshll.u32 %v1757_v37, 30  ;;  %v1781_v8 = vsub.s32 4, %v1757_v37  ;;  %v7760_v20 = vpack.c.bf16 %v1590_v41, %v758_v6  ;;  %vm1697_vm3 = vcmp.lt.s32.totalorder %v15574_v54, 0 }
 0x2ed   :  { %v946_v51 = vmul.f32 %v945_v17, %v943_v44  ;;  %v2437_v2 = vand.u32 31, %v2435_v46  ;;  %v10822_v40 = vadd.s32 3, %v952_v29  ;;  %vm10826_vm4 = vcmp.le.f32.partialorder %v1695_v3, 0.7853982 }
 0x2ee   :  { %v1751_v55 = vadd.s32 %v10753_v48, %v10772_v56  ;;  %v1759_v58 = vsub.s32 %v1755_v27, %v1758_v47  ;;  %7761 = vmatpush1.bf16.msra.mxu0 %v7760_v20  ;;  %v2436_v45 = vshrl.u32 %v2435_v46, 5  ;;  %v10832_v60 = vshll.u32 %v2431_v14, 8 }
 0x2ef   :  { %v947_v32 = vxor.u32 2147483648, %v946_v51  ;;  %v2438_v4 = vsub.s32 32, %v2437_v2  ;;  %v1782_v23 = vsel %vm1697_vm3, %v1781_v8, %v1757_v37  ;;  %v7586_v26 = vadd.s32 4294967169, %v3259_v10 }
 0x2f0   :  { %v1761_v57 = vsub.s32 0, %v1759_v58  ;;  %v10838_v3 = vand.u32 8388607, %v3255_v38  ;;  %v2440_v48 = vshll.u32 %v15514_v63, %v2437_v2  ;;  %v2443_v50 = vshll.u32 %v15520_v31, %v2437_v2 }
 0x2f1   :  { %v948_v22 = vsel %vm865_vm8, %v947_v32, %v946_v51  ;;  %v2441_v56 = vshrl.u32 %v15520_v31, %v2438_v4  ;;  %v2444_v27 = vshrl.u32 %v15510_v36, %v2438_v4  ;;  %v2447_v1 = vshrl.u32 %v15511_v5, %v2438_v4 }
 0x2f2   :  { %v951_v33 = vsel %vm10767_vm12, %v15593_v52, %v948_v22  ;;  %v7527_v6 = vmin.u32 %v1761_v57, %v1759_v58  ;;  %v1784_v61 = vsel %vm10826_vm4, 0, %v1782_v23  ;;  %v2446_v16 = vshll.u32 %v15510_v36, %v2437_v2 }
 0x2f3   :  { %vm2455_vm5 = vcmp.lt.s32.totalorder %v2436_v45, 1  ;;  %vm2456_vm6 = vcmp.lt.s32.totalorder %v2436_v45, 2  ;;  %v2439_v28 = vshrl.u32 %v15514_v63, %v2438_v4  ;;  %v2442_v35 = vor.u32 %v2441_v56, %v2440_v48 }
 0x2f4   :  { %v1763_v24 = vclz %v7527_v6  ;;  %v2445_v25 = vor.u32 %v2444_v27, %v2443_v50  ;;  %8136 = vcosq.f32 %v951_v33  ;;  %v2448_v0 = vor.u32 %v2447_v1, %v2446_v16 }
 0x2f5   :  { %v2449_v42 = vshll.u32 %v15511_v5, %v2437_v2  ;;  %v2450_v29 = vshrl.u32 %v15512_v13, %v2438_v4  ;;  %v2452_v37 = vshll.u32 %v15512_v13, %v2437_v2  ;;  %v2453_v14 = vshrl.u32 %v15513_v18, %v2438_v4 }
 0x2f6   :  { %v7528_v62 = vadd.s32 4294967294, %v1763_v24  ;;  %vm2458_vm7 = vcmp.lt.s32.totalorder %v2436_v45, 4  ;;  %8138 = vsinq.f32 %v951_v33  ;;  %vm2457_vm8 = vcmp.lt.s32.totalorder %v2436_v45, 3 }
 0x2f7   :  { %v2451_v34 = vor.u32 %v2450_v29, %v2449_v42  ;;  %v2460_v44 = vsel %vm2458_vm7, %v2448_v0, 2102212464  ;;  %v2454_v17 = vor.u32 %v2453_v14, %v2452_v37  ;;  %v2459_v46 = vsel %vm2455_vm5, %v2439_v28, %v2442_v35 }
 0x2f8   :  { %vm7529_vm10 = vcmp.lt.s32.totalorder %v7528_v62, 0  ;;  %v2463_v41 = vsel %vm2455_vm5, %v2442_v35, %v2445_v25  ;;  %v2461_v8 = vsel %vm2457_vm8, %v2445_v25, %v2460_v44  ;;  %v3265_v20 = vadd.s32 1, %v7586_v26 }
 0x2f9   :  { %v1766_v47 = vsel %vm7529_vm10, 0, %v7528_v62  ;;  %v2464_v10 = vsel %vm2458_vm7, %v2451_v34, 920167782  ;;  %v2467_v4 = vsel %vm2455_vm5, %v2445_v25, %v2448_v0  ;;  %v2468_v22 = vsel %vm2458_vm7, %v2454_v17, 1326507024 }
 0x2fa   :  { %v1767_v51 = vsub.s32 32, %v1766_v47  ;;  %v1771_v2 = vsub.s32 4294967266, %v1766_v47  ;;  %v2465_v32 = vsel %vm2457_vm8, %v2448_v0, %v2464_v10  ;;  %v1768_v57 = vshll.u32 %v1759_v58, %v1766_v47 }
 0x2fb   :  { %v2466_v23 = vsel %vm2456_vm6, %v2463_v41, %v2465_v32  ;;  %vm3266_vm12 = vcmp.gt.s32.totalorder %v3265_v20, 0  ;;  %v2469_v27 = vsel %vm2457_vm8, %v2451_v34, %v2468_v22  ;;  %v1788_v6 = vadd.s32 3, %v1784_v61 }
 0x2fc   :  { %v1769_v48 = vshrl.u32 %v1751_v55, %v1767_v51  ;;  %v1772_v56 = vadd.s32 127, %v1771_v2  ;;  %v3267_v33 = vsel %vm3266_vm12, %v3265_v20, 0  ;;  %v2470_v26 = vsel %vm2456_vm6, %v2467_v4, %v2469_v27  ;;  %v3568_v20 = vld [vmem:[%s15386_s2 + $0x8] sm:$0xff] }
 0x2fd   :  { %v10870_v50 = vmul.u32.u64.low %v10832_v60, %v2466_v23  ;;  %v10871_v1 = vmul.u32.u64.high %v10832_v60, %v2466_v23, %v10870_v50  ;;  %v2462_v24 = vsel %vm2456_vm6, %v2459_v46, %v2461_v8  ;;  %v3269_v28 = vand.u32 31, %v3267_v33  ;;  %7599 = vmatmul.mubr.msk.f32.gmra.mrb[2].mxu0 %vm3571_vm9, %v3568_v20  ;;  %7603 = vmatmul.mubr.msk.f32.gmra.mrb[2].mxu1 %vm3571_vm9, %v3568_v20 }
 0x2fe   :  { %v1770_v16 = vor.u32 %v1769_v48, %v1768_v57  ;;  %v1773_v58 = vshll.u32 %v1772_v56, 23  ;;  %v10875_v35 = vpop.eup %8136  ;;  %v10878_v55 = vadd.s32 4294967169, %v10705_v43  ;;  %v10882_v61 = vshrl.u32 %v2530_v39, 23  ;;  %3660 = vmatprep.mubr.f32.mxu0 %v8341_v11  ;;  %3749 = vmatprep.mubr.f32.mxu1 %v8341_v11 }
 0x2ff   :  { %v10885_v25 = vmul.u32.u64.low %v10832_v60, %v2470_v26  ;;  %v10886_v0 = vmul.u32.u64.high %v10832_v60, %v2470_v26, %v10885_v25  ;;  %v10889_v42 = vadd.s32 4294967169, %v10707_v53  ;;  %v10892_v45 = vand.u32 3, %v10822_v40 }
 0x300   :  { %v1774_v29 = vor.u32 4788187, %v1773_v58  ;;  %v3270_v62 = vsub.s32 32, %v3269_v28  ;;  %v10894_v37 = vpop.eup %8138  ;;  %v10896_v43 = vand.u32 3, %v1788_v6  ;;  %v2478_v14 = vmul.u32 %v10832_v60, %v2462_v24 }
 0x301   :  { %v2481_v39 = vadd.s32 1, %v10871_v1  ;;  %v3263_v34 = vor.u32 8388608, %v10838_v3  ;;  %v1777_v17 = vcvt.s32.f32 %v1770_v16  ;;  %v3272_v53 = vshll.u32 %v15514_v63, %v3269_v28 }
 0x302   :  { %v1775_v44 = vand.u32 2147483647, %v1774_v29  ;;  %v3273_v46 = vshrl.u32 %v15520_v31, %v3270_v62  ;;  %vm2480_vm13 = vc.u32 %v10886_v0, %v10870_v50  ;;  %v10905_v40 = vshrl.u32 %v3267_v33, 5 }
 0x303   :  { %v3275_v41 = vshll.u32 %v15520_v31, %v3269_v28  ;;  %v3276_v47 = vshrl.u32 %v15510_v36, %v3270_v62  ;;  %v2482_v8 = vsel %vm2480_vm13, %v2481_v39, %v10871_v1  ;;  %v3278_v3 = vshll.u32 %v15510_v36, %v3269_v28 }
 0x304   :  { %v1778_v60 = vmul.f32 %v1777_v17, %v1775_v44  ;;  %v3274_v10 = vor.u32 %v3273_v46, %v3272_v53  ;;  %v2483_v51 = vadd.s32 %v2482_v8, %v2478_v14  ;;  %v3279_v32 = vshrl.u32 %v15511_v5, %v3270_v62 }
 0x305   :  { %v3277_v2 = vor.u32 %v3276_v47, %v3275_v41  ;;  %v3281_v4 = vshll.u32 %v15511_v5, %v3269_v28  ;;  %v3282_v23 = vshrl.u32 %v15512_v13, %v3270_v62  ;;  %v3284_v22 = vshll.u32 %v15512_v13, %v3269_v28 }
 0x306   :  { %v1779_v57 = vxor.u32 2147483648, %v1778_v60  ;;  %v3285_v48 = vshrl.u32 %v15513_v18, %v3270_v62  ;;  %vm959_vm11 = vcmp.eq.s32.totalorder %v10892_v45, 0  ;;  %v960_v56 = vxor.u32 2147483648, %v10894_v37 }
 0x307   :  { %v963_v27 = vxor.u32 2147483648, %v10875_v35  ;;  %v2484_v33 = vadd.s32 536870912, %v2483_v51  ;;  %v3280_v6 = vor.u32 %v3279_v32, %v3278_v3  ;;  %v3283_v1 = vor.u32 %v3282_v23, %v3281_v4 }
 0x308   :  { %v1780_v26 = vsel %vm1697_vm3, %v1779_v57, %v1778_v60  ;;  %v3286_v16 = vor.u32 %v3285_v48, %v3284_v22  ;;  %vm3287_vm15 = vcmp.lt.s32.totalorder %v10905_v40, 1  ;;  %v3271_v28 = vshrl.u32 %v15514_v63, %v3270_v62  ;;  %v15606_v57 = vld [vmem:[#allocation14_spill] sm:$0xff] }
 0x309   :  { %v1783_v58 = vsel %vm10826_vm4, %v15574_v54, %v1780_v26  ;;  %v2485_v24 = vshrl.u32 %v2484_v33, 30  ;;  %vm3290_vm0 = vcmp.lt.s32.totalorder %v10905_v40, 4  ;;  %vm958_vm1 = vcmp.lt.s32.totalorder %v10892_v45, 2 }
 0x30a   :  { %8140 = vcosq.f32 %v1783_v58  ;;  %vm3288_vm14 = vcmp.lt.s32.totalorder %v10905_v40, 2  ;;  %v3295_v25 = vsel %vm3287_vm15, %v3274_v10, %v3277_v2  ;;  %v3296_v29 = vsel %vm3290_vm0, %v3283_v1, 920167782 }
 0x30b   :  { %8142 = vsinq.f32 %v1783_v58  ;;  %v2486_v14 = vshll.u32 %v2485_v24, 30  ;;  %vm3289_vm2 = vcmp.lt.s32.totalorder %v10905_v40, 3  ;;  %v3292_v21 = vsel %vm3290_vm0, %v3280_v6, 2102212464 }
 0x30c   :  { %v3297_v39 = vsel %vm3289_vm2, %v3280_v6, %v3296_v29  ;;  %v3299_v62 = vsel %vm3287_vm15, %v3277_v2, %v3280_v6  ;;  %v3300_v44 = vsel %vm3290_vm0, %v3286_v16, 1326507024  ;;  %v3303_v17 = vshll.u32 %v3263_v34, 8 }
 0x30d   :  { %vm955_vm3 = vweird.f32 %v15593_v52  ;;  %v10942_v53 = vsub.s32 %v2483_v51, %v2486_v14  ;;  %v3291_v46 = vsel %vm3287_vm15, %v3271_v28, %v3274_v10  ;;  %v3298_v41 = vsel %vm3288_vm14, %v3295_v25, %v3297_v39 }
 0x30e   :  { %v3301_v47 = vsel %vm3289_vm2, %v3283_v1, %v3300_v44  ;;  %v3293_v60 = vsel %vm3289_vm2, %v3277_v2, %v3292_v21  ;;  %v10950_v3 = vmul.u32.u64.low %v3303_v17, %v3298_v41  ;;  %v10951_v20 = vmul.u32.u64.high %v3303_v17, %v3298_v41, %v10950_v3 }
 0x30f   :  { %v3302_v8 = vsel %vm3288_vm14, %v3299_v62, %v3301_v47  ;;  %vm962_vm4 = vcmp.eq.s32.totalorder %v10892_v45, 2  ;;  %v2489_v34 = vsub.s32 0, %v10942_v53  ;;  %v961_v10 = vsel %vm959_vm11, %v10875_v35, %v960_v56 }
 0x310   :  { %v10956_v51 = vmul.u32.u64.low %v3303_v17, %v3302_v8  ;;  %v10957_v32 = vmul.u32.u64.high %v3303_v17, %v3302_v8, %v10956_v51  ;;  %v964_v2 = vsel %vm962_vm4, %v963_v27, %v10894_v37  ;;  %v2509_v4 = vsub.s32 4, %v2485_v24 }
 0x311   :  { %v10965_v23 = vadd.f32 %v10478_v9, %v15606_v57  ;;  %vm1787_vm5 = vweird.f32 %v15574_v54  ;;  %v7555_v22 = vmin.u32 %v2489_v34, %v10942_v53  ;;  %v3294_v48 = vsel %vm3288_vm14, %v3291_v46, %v3293_v60 }
 0x312   :  { %v2631_v33 = vand.u32 2147483647, %v10780_v19  ;;  %v2634_v6 = vand.u32 2139095040, %v10780_v19  ;;  %vm1790_vm6 = vcmp.lt.s32.totalorder %v10896_v43, 2  ;;  %vm10976_vm7 = vcmp.le.f32.partialorder %v2423_v12, 0.7853982 }
 0x313   :  { %vm2425_vm8 = vcmp.lt.s32.totalorder %v10763_v15, 0  ;;  %v3313_v9 = vadd.s32 1, %v10951_v20  ;;  %v965_v37 = vsel %vm958_vm1, %v961_v10, %v964_v2  ;;  %vm1791_vm10 = vcmp.eq.s32.totalorder %v10896_v43, 0 }
 0x314   :  { %vm1794_vm12 = vcmp.eq.s32.totalorder %v10896_v43, 2  ;;  %v2491_v40 = vclz %v7555_v22  ;;  %v8141_v56 = vpop.eup %8140  ;;  %v2510_v27 = vsel %vm2425_vm8, %v2509_v4, %v2485_v24  ;;  %v3310_v12 = vmul.u32 %v3303_v17, %v3294_v48  ;;  %v15609_v4 = vld [vmem:[#allocation19_spill] sm:$0xff] }
 0x315   :  { %vm3312_vm13 = vc.u32 %v10957_v32, %v10950_v3  ;;  %v2635_v26 = vshrl.u32 %v2634_v6, 23  ;;  %v8143_v1 = vpop.eup %8142  ;;  %v1795_v16 = vxor.u32 2147483648, %v8141_v56  ;;  %v2638_v28 = vand.u32 8388607, %v2631_v33 }
 0x316   :  { %v7556_v58 = vadd.s32 4294967294, %v2491_v40  ;;  %v3314_v45 = vsel %vm3312_vm13, %v3313_v9, %v10951_v20  ;;  %v966_v25 = vsel %vm955_vm3, nan, %v965_v37  ;;  %v1792_v29 = vxor.u32 2147483648, %v8143_v1 }
 0x317   :  { %v3315_v14 = vadd.s32 %v3314_v45, %v3310_v12  ;;  %v7562_v21 = vadd.s32 4294967169, %v2635_v26  ;;  %v1796_v24 = vsel %vm1794_vm12, %v1795_v16, %v8143_v1  ;;  %v2479_v39 = vadd.s32 %v10870_v50, %v10886_v0 }
 0x318   :  { %vm7557_vm11 = vcmp.lt.s32.totalorder %v7556_v58, 0  ;;  %v2512_v62 = vsel %vm10976_vm7, 0, %v2510_v27  ;;  %v1793_v44 = vsel %vm1791_vm10, %v8141_v56, %v1792_v29  ;;  %v2639_v8 = vor.u32 8388608, %v2638_v28 }
 0x319   :  { %v2494_v17 = vsel %vm7557_vm11, 0, %v7556_v58  ;;  %v3316_v46 = vadd.s32 536870912, %v3315_v14  ;;  %v2641_v52 = vadd.s32 1, %v7562_v21  ;;  %v1797_v41 = vsel %vm1790_vm6, %v1793_v44, %v1796_v24 }
 0x31a   :  { %v2495_v47 = vsub.s32 32, %v2494_v17  ;;  %v2499_v60 = vsub.s32 4294967266, %v2494_v17  ;;  %v1798_v20 = vsel %vm1787_vm5, nan, %v1797_v41  ;;  %v2496_v50 = vshll.u32 %v10942_v53, %v2494_v17 }
 0x31b   :  { %v11008_v0 = vshrl.u32 %v3316_v46, 30  ;;  %vm2642_vm15 = vcmp.gt.s32.totalorder %v2641_v52, 0  ;;  %v7768_v34 = vpack.c.bf16 %v1798_v20, %v966_v25  ;;  %v3362_v57 = vand.u32 2139095040, %v15609_v4 }
 0x31c   :  { %v2497_v51 = vshrl.u32 %v2479_v39, %v2495_v47  ;;  %v2500_v10 = vadd.s32 127, %v2499_v60  ;;  %v2643_v2 = vsel %vm2642_vm15, %v2641_v52, 0  ;;  %v11013_v48 = vadd.s32 1, %v10878_v55 }
 0x31d   :  { %v3318_v43 = vshll.u32 %v11008_v0, 30  ;;  %v2645_v22 = vand.u32 31, %v2643_v2  ;;  %v11016_v54 = vadd.s32 4294967169, %v10882_v61  ;;  %7769 = vmatpush1.bf16.msra.mxu1 %v7768_v34  ;;  %v11019_v9 = vadd.s32 1, %v10889_v42 }
 0x31e   :  { %v2498_v53 = vor.u32 %v2497_v51, %v2496_v50  ;;  %v2501_v6 = vshll.u32 %v2500_v10, 23  ;;  %v11021_v37 = vadd.s32 3, %v2512_v62  ;;  %v3311_v12 = vadd.s32 %v10950_v3, %v10957_v32 }
 0x31f   :  { %v11023_v40 = vsub.s32 %v3315_v14, %v3318_v43  ;;  %v2646_v56 = vsub.s32 32, %v2645_v22  ;;  %v11027_v55 = vshll.u32 %v2639_v8, 8  ;;  %v3466_v61 = vand.u32 2139095040, %v10965_v23 }
 0x320   :  { %v2502_v27 = vor.u32 4788187, %v2501_v6  ;;  %v3341_v1 = vsub.s32 4, %v11008_v0  ;;  %v2644_v16 = vshrl.u32 %v2643_v2, 5  ;;  %v2505_v45 = vcvt.s32.f32 %v2498_v53 }
 0x321   :  { %v3321_v26 = vsub.s32 0, %v11023_v40  ;;  %v2649_v42 = vshrl.u32 %v15520_v31, %v2646_v56  ;;  %v2652_v28 = vshrl.u32 %v15510_v36, %v2646_v56  ;;  %v2655_v25 = vshrl.u32 %v15511_v5, %v2646_v56 }
 0x322   :  { %v2503_v58 = vand.u32 2147483647, %v2502_v27  ;;  %v2648_v3 = vshll.u32 %v15514_v63, %v2645_v22  ;;  %v2651_v32 = vshll.u32 %v15520_v31, %v2645_v22  ;;  %v2654_v14 = vshll.u32 %v15510_v36, %v2645_v22 }
 0x323   :  { %v7587_v29 = vmin.u32 %v3321_v26, %v11023_v40  ;;  %v2657_v24 = vshll.u32 %v15511_v5, %v2645_v22  ;;  %v2658_v39 = vshrl.u32 %v15512_v13, %v2646_v56  ;;  %v3467_v62 = vshrl.u32 %v3466_v61, 23 }
 0x324   :  { %v2506_v21 = vmul.f32 %v2505_v45, %v2503_v58  ;;  %vm3257_vm0 = vcmp.lt.s32.totalorder %v10776_v59, 0  ;;  %v2650_v17 = vor.u32 %v2649_v42, %v2648_v3  ;;  %v2653_v46 = vor.u32 %v2652_v28, %v2651_v32 }
 0x325   :  { %v3323_v44 = vclz %v7587_v29  ;;  %v2656_v52 = vor.u32 %v2655_v25, %v2654_v14  ;;  %vm2330_vm1 = vcmp.gt.s32.totalorder %v11013_v48, 0  ;;  %v2659_v47 = vor.u32 %v2658_v39, %v2657_v24 }
 0x326   :  { %v2507_v41 = vxor.u32 2147483648, %v2506_v21  ;;  %v2660_v60 = vshll.u32 %v15512_v13, %v2645_v22  ;;  %v2661_v8 = vshrl.u32 %v15513_v18, %v2646_v56  ;;  %v2647_v50 = vshrl.u32 %v15514_v63, %v2646_v56 }
 0x327   :  { %v7588_v20 = vadd.s32 4294967294, %v3323_v44  ;;  %vm2663_vm14 = vcmp.lt.s32.totalorder %v2644_v16, 1  ;;  %vm2664_vm2 = vcmp.lt.s32.totalorder %v2644_v16, 2  ;;  %vm2665_vm3 = vcmp.lt.s32.totalorder %v2644_v16, 3 }
 0x328   :  { %v2508_v34 = vsel %vm2425_vm8, %v2507_v41, %v2506_v21  ;;  %v2662_v51 = vor.u32 %v2661_v8, %v2660_v60  ;;  %vm2666_vm4 = vcmp.lt.s32.totalorder %v2644_v16, 4  ;;  %v2667_v2 = vsel %vm2663_vm14, %v2647_v50, %v2650_v17 }
 0x329   :  { %v2511_v10 = vsel %vm10976_vm7, %v10763_v15, %v2508_v34  ;;  %vm7589_vm5 = vcmp.lt.s32.totalorder %v7588_v20, 0  ;;  %v2668_v43 = vsel %vm2666_vm4, %v2656_v52, 2102212464  ;;  %v2671_v53 = vsel %vm2663_vm14, %v2650_v17, %v2653_v46 }
 0x32a   :  { %8144 = vcosq.f32 %v2511_v10  ;;  %v3326_v22 = vsel %vm7589_vm5, 0, %v7588_v20  ;;  %v2672_v6 = vsel %vm2666_vm4, %v2659_v47, 920167782  ;;  %v2669_v61 = vsel %vm2665_vm3, %v2653_v46, %v2668_v43 }
 0x32b   :  { %8146 = vsinq.f32 %v2511_v10  ;;  %v3327_v56 = vsub.s32 32, %v3326_v22  ;;  %v3331_v27 = vsub.s32 4294967266, %v3326_v22  ;;  %v3328_v26 = vshll.u32 %v11023_v40, %v3326_v22 }
 0x32c   :  { %v2673_v35 = vsel %vm2665_vm3, %v2656_v52, %v2672_v6  ;;  %v2675_v42 = vsel %vm2663_vm14, %v2653_v46, %v2656_v52  ;;  %v2676_v58 = vsel %vm2666_vm4, %v2662_v51, 1326507024  ;;  %v3342_v3 = vsel %vm3257_vm0, %v3341_v1, %v11008_v0 }
 0x32d   :  { %v3329_v45 = vshrl.u32 %v3311_v12, %v3327_v56  ;;  %v3332_v28 = vadd.s32 127, %v3331_v27  ;;  %v2674_v25 = vsel %vm2664_vm2, %v2671_v53, %v2673_v35  ;;  %v2677_v29 = vsel %vm2665_vm3, %v2659_v47, %v2676_v58 }
 0x32e   :  { %v2678_v32 = vsel %vm2664_vm2, %v2675_v42, %v2677_v29  ;;  %v11067_v40 = vmul.u32.u64.low %v11027_v55, %v2674_v25  ;;  %v11068_v14 = vmul.u32.u64.high %v11027_v55, %v2674_v25, %v11067_v40  ;;  %vm11077_vm6 = vcmp.le.f32.partialorder %v3255_v38, 0.7853982 }
 0x32f   :  { %v3330_v21 = vor.u32 %v3329_v45, %v3328_v26  ;;  %v3333_v24 = vshll.u32 %v3332_v28, 23  ;;  %v11072_v12 = vmul.u32.u64.low %v11027_v55, %v2678_v32  ;;  %v11073_v39 = vmul.u32.u64.high %v11027_v55, %v2678_v32, %v11072_v12 }
 0x330   :  { %v2670_v0 = vsel %vm2664_vm2, %v2667_v2, %v2669_v61  ;;  %v3463_v1 = vand.u32 2147483647, %v10965_v23  ;;  %v7594_v17 = vadd.s32 4294967169, %v3467_v62  ;;  %v2331_v46 = vsel %vm2330_vm1, %v11013_v48, 0 }
 0x331   :  { %v3363_v52 = vshrl.u32 %v3362_v57, 23  ;;  %v3334_v41 = vor.u32 4788187, %v3333_v24  ;;  %v3344_v47 = vsel %vm11077_vm6, 0, %v3342_v3  ;;  %vm3162_vm7 = vcmp.gt.s32.totalorder %v11019_v9, 0 }
 0x332   :  { %v11092_v38 = vand.u32 3, %v11021_v37  ;;  %v2689_v16 = vadd.s32 1, %v11068_v14  ;;  %v3473_v60 = vadd.s32 1, %v7594_v17  ;;  %v3337_v8 = vcvt.s32.f32 %v3330_v21 }
 0x333   :  { %v3335_v62 = vand.u32 2147483647, %v3334_v41  ;;  %v2686_v20 = vmul.u32 %v11027_v55, %v2670_v0  ;;  %vm2688_vm8 = vc.u32 %v11073_v39, %v11067_v40  ;;  %v3348_v48 = vadd.s32 3, %v3344_v47 }
 0x334   :  { %v8145_v57 = vpop.eup %8144  ;;  %v2690_v50 = vsel %vm2688_vm8, %v2689_v16, %v11068_v14  ;;  %v3470_v34 = vand.u32 8388607, %v3463_v1  ;;  %vm3474_vm10 = vcmp.gt.s32.totalorder %v3473_v60, 0  ;;  %v11102_v51 = vadd.s32 1, %v11016_v54 }
 0x335   :  { %v8147_v37 = vpop.eup %8146  ;;  %v3338_v10 = vmul.f32 %v3337_v8, %v3335_v62  ;;  %v2691_v2 = vadd.s32 %v2690_v50, %v2686_v20  ;;  %v3475_v43 = vsel %vm3474_vm10, %v3473_v60, 0  ;;  %v11104_v22 = vand.u32 31, %v2331_v46 }
 0x336   :  { %v11109_v55 = vsel %vm3162_vm7, %v11019_v9, 0  ;;  %v11111_v53 = vadd.s32 4294967169, %v3363_v52  ;;  %v3477_v6 = vand.u32 31, %v3475_v43  ;;  %vm2519_vm12 = vcmp.eq.s32.totalorder %v11092_v38, 0 }
 0x337   :  { %vm2522_vm13 = vcmp.eq.s32.totalorder %v11092_v38, 2  ;;  %v3339_v56 = vxor.u32 2147483648, %v3338_v10  ;;  %v2692_v54 = vadd.s32 536870912, %v2691_v2  ;;  %v11115_v27 = vand.u32 3, %v3348_v48 }
 0x338   :  { %v3471_v61 = vor.u32 8388608, %v3470_v34  ;;  %v3478_v26 = vsub.s32 32, %v3477_v6  ;;  %v2319_v35 = vand.u32 2147483647, %v15590_v49  ;;  %v2523_v42 = vxor.u32 2147483648, %v8145_v57 }
 0x339   :  { %v3340_v9 = vsel %vm3257_vm0, %v3339_v56, %v3338_v10  ;;  %v11120_v58 = vshrl.u32 %v2692_v54, 30  ;;  %v11122_v45 = vshrl.u32 %v2331_v46, 5  ;;  %v2520_v28 = vxor.u32 2147483648, %v8147_v37 }
 0x33a   :  { %v3343_v25 = vsel %vm11077_vm6, %v10776_v59, %v3340_v9  ;;  %v3476_v29 = vshrl.u32 %v3475_v43, 5  ;;  %v3481_v3 = vshrl.u32 %v15520_v31, %v3478_v26  ;;  %vm2518_vm11 = vcmp.lt.s32.totalorder %v11092_v38, 2 }
 0x33b   :  { %8148 = vcosq.f32 %v3343_v25  ;;  %v2694_v32 = vshll.u32 %v11120_v58, 30  ;;  %v3480_v14 = vshll.u32 %v15514_v63, %v3477_v6  ;;  %v3484_v21 = vshrl.u32 %v15510_v36, %v3478_v26 }
 0x33c   :  { %8150 = vsinq.f32 %v3343_v25  ;;  %v3483_v24 = vshll.u32 %v15520_v31, %v3477_v6  ;;  %v3486_v12 = vshll.u32 %v15510_v36, %v3477_v6  ;;  %v3487_v44 = vshrl.u32 %v15511_v5, %v3478_v26 }
 0x33d   :  { %v11135_v0 = vsub.s32 %v2691_v2, %v2694_v32  ;;  %v3482_v17 = vor.u32 %v3481_v3, %v3480_v14  ;;  %v3489_v46 = vshll.u32 %v15511_v5, %v3477_v6  ;;  %v3490_v52 = vshrl.u32 %v15512_v13, %v3478_v26 }
 0x33e   :  { %v3485_v41 = vor.u32 %v3484_v21, %v3483_v24  ;;  %v3488_v47 = vor.u32 %v3487_v44, %v3486_v12  ;;  %v3492_v16 = vshll.u32 %v15512_v13, %v3477_v6  ;;  %v3493_v60 = vshrl.u32 %v15513_v18, %v3478_v26 }
 0x33f   :  { %v2524_v62 = vsel %vm2522_vm13, %v2523_v42, %v8147_v37  ;;  %vm3354_vm15 = vcmp.eq.s32.totalorder %v11115_v27, 2  ;;  %v2697_v8 = vsub.s32 0, %v11135_v0  ;;  %v3491_v20 = vor.u32 %v3490_v52, %v3489_v46 }
 0x340   :  { %v11145_v48 = vshll.u32 %v3471_v61, 8  ;;  %vm2515_vm0 = vweird.f32 %v10763_v15  ;;  %v2521_v50 = vsel %vm2519_vm12, %v8145_v57, %v2520_v28  ;;  %vm3351_vm1 = vcmp.eq.s32.totalorder %v11115_v27, 0 }
 0x341   :  { %v3479_v34 = vshrl.u32 %v15514_v63, %v3478_v26  ;;  %v3494_v10 = vor.u32 %v3493_v60, %v3492_v16  ;;  %vm3498_vm14 = vcmp.lt.s32.totalorder %v3476_v29, 4  ;;  %vm3350_vm2 = vcmp.lt.s32.totalorder %v11115_v27, 2 }
 0x342   :  { %v7563_v37 = vmin.u32 %v2697_v8, %v11135_v0  ;;  %vm3495_vm3 = vcmp.lt.s32.totalorder %v3476_v29, 1  ;;  %vm3497_vm4 = vcmp.lt.s32.totalorder %v3476_v29, 3  ;;  %v3500_v2 = vsel %vm3498_vm14, %v3488_v47, 2102212464 }
 0x343   :  { %vm3347_vm5 = vweird.f32 %v10776_v59  ;;  %v3499_v43 = vsel %vm3495_vm3, %v3479_v34, %v3482_v17  ;;  %v3501_v6 = vsel %vm3497_vm4, %v3485_v41, %v3500_v2  ;;  %v3503_v57 = vsel %vm3495_vm3, %v3482_v17, %v3485_v41 }
 0x344   :  { %v3504_v56 = vsel %vm3498_vm14, %v3491_v20, 920167782  ;;  %v2687_v54 = vadd.s32 %v11067_v40, %v11073_v39  ;;  %v2699_v61 = vclz %v7563_v37  ;;  %v3507_v26 = vsel %vm3495_vm3, %v3485_v41, %v3488_v47 }
 0x345   :  { %v11161_v42 = vsub.s32 32, %v11104_v22  ;;  %v2525_v9 = vsel %vm2518_vm11, %v2521_v50, %v2524_v62  ;;  %vm3496_vm6 = vcmp.lt.s32.totalorder %v3476_v29, 2  ;;  %v3505_v28 = vsel %vm3497_vm4, %v3488_v47, %v3504_v56  ;;  %v8149_v3 = vpop.eup %8148 }
 0x346   :  { %v3508_v25 = vsel %vm3498_vm14, %v3494_v10, 1326507024  ;;  %v7564_v32 = vadd.s32 4294967294, %v2699_v61  ;;  %v3502_v14 = vsel %vm3496_vm6, %v3499_v43, %v3501_v6  ;;  %v3506_v21 = vsel %vm3496_vm6, %v3503_v57, %v3505_v28  ;;  %v8151_v40 = vpop.eup %8150 }
 0x347   :  { %v3509_v24 = vsel %vm3497_vm4, %v3491_v20, %v3508_v25  ;;  %v3355_v39 = vxor.u32 2147483648, %v8149_v3  ;;  %v11169_v44 = vmul.u32.u64.low %v11145_v48, %v3506_v21  ;;  %v11170_v17 = vmul.u32.u64.high %v11145_v48, %v3506_v21, %v11169_v44 }
 0x348   :  { %v3510_v12 = vsel %vm3496_vm6, %v3507_v26, %v3509_v24  ;;  %v3352_v38 = vxor.u32 2147483648, %v8151_v40  ;;  %vm7565_vm7 = vcmp.lt.s32.totalorder %v7564_v32, 0  ;;  %v11181_v29 = vand.u32 8388607, %v2319_v35 }
 0x349   :  { %v11174_v46 = vmul.u32.u64.low %v11145_v48, %v3510_v12  ;;  %v11175_v52 = vmul.u32.u64.high %v11145_v48, %v3510_v12, %v11174_v46  ;;  %v3356_v41 = vsel %vm3354_vm15, %v3355_v39, %v8151_v40  ;;  %v2702_v47 = vsel %vm7565_vm7, 0, %v7564_v32 }
 0x34a   :  { %v2336_v16 = vshll.u32 %v15514_v63, %v11104_v22  ;;  %v2526_v60 = vsel %vm2515_vm0, nan, %v2525_v9  ;;  %v3353_v62 = vsel %vm3351_vm1, %v8149_v3, %v3352_v38  ;;  %v2703_v8 = vsub.s32 32, %v2702_v47 }
 0x34b   :  { %v2707_v20 = vsub.s32 4294967266, %v2702_v47  ;;  %v3357_v50 = vsel %vm3350_vm2, %v3353_v62, %v3356_v41  ;;  %v3518_v34 = vmul.u32 %v11145_v48, %v3502_v14  ;;  %v3521_v10 = vadd.s32 1, %v11170_v17 }
 0x34c   :  { %v2337_v37 = vshrl.u32 %v15520_v31, %v11161_v42  ;;  %v3358_v2 = vsel %vm3347_vm5, nan, %v3357_v50  ;;  %v2704_v15 = vshll.u32 %v11135_v0, %v2702_v47  ;;  %v2705_v43 = vshrl.u32 %v2687_v54, %v2703_v8 }
 0x34d   :  { %v2708_v6 = vadd.s32 127, %v2707_v20  ;;  %v7762_v57 = vpack.c.bf16 %v3358_v2, %v2526_v60  ;;  %vm3520_vm8 = vc.u32 %v11175_v52, %v11169_v44  ;;  %v2340_v27 = vshrl.u32 %v15510_v36, %v11161_v42 }
 0x34e   :  { %v2343_v48 = vshrl.u32 %v15511_v5, %v11161_v42  ;;  %v2706_v56 = vor.u32 %v2705_v43, %v2704_v15  ;;  %v3522_v26 = vsel %vm3520_vm8, %v3521_v10, %v11170_v17  ;;  %v2339_v59 = vshll.u32 %v15520_v31, %v11104_v22 }
 0x34f   :  { %v2709_v61 = vshll.u32 %v2708_v6, 23  ;;  %7763 = vmatprep.subr.bf16.mxu0 %v7762_v57  ;;  %v3523_v0 = vadd.s32 %v3522_v26, %v3518_v34  ;;  %v2342_v54 = vshll.u32 %v15510_v36, %v11104_v22  ;;  %v2345_v9 = vshll.u32 %v15511_v5, %v11104_v22 }
 0x350   :  { %v2346_v28 = vshrl.u32 %v15512_v13, %v11161_v42  ;;  %v2338_v3 = vor.u32 %v2337_v37, %v2336_v16  ;;  %v2348_v32 = vshll.u32 %v15512_v13, %v11104_v22  ;;  %v2349_v14 = vshrl.u32 %v15513_v18, %v11161_v42 }
 0x351   :  { %v2710_v25 = vor.u32 4788187, %v2709_v61  ;;  %v3524_v21 = vadd.s32 536870912, %v3523_v0  ;;  %v2341_v24 = vor.u32 %v2340_v27, %v2339_v59  ;;  %v2344_v40 = vor.u32 %v2343_v48, %v2342_v54 }
 0x352   :  { %v2347_v39 = vor.u32 %v2346_v28, %v2345_v9  ;;  %v2713_v17 = vcvt.s32.f32 %v2706_v56  ;;  %v2350_v38 = vor.u32 %v2349_v14, %v2348_v32  ;;  %vm2354_vm10 = vcmp.lt.s32.totalorder %v11122_v45, 4 }
 0x353   :  { %v2711_v12 = vand.u32 2147483647, %v2710_v25  ;;  %vm2538_vm12 = vcmp.gt.s32.totalorder %v11102_v51, 0  ;;  %v11220_v46 = vand.u32 31, %v11109_v55  ;;  %v3525_v41 = vshrl.u32 %v3524_v21, 30 }
 0x354   :  { %v2360_v22 = vsel %vm2354_vm10, %v2347_v39, 920167782  ;;  %v2717_v16 = vsub.s32 4, %v11120_v58  ;;  %v2327_v60 = vor.u32 8388608, %v11181_v29  ;;  %vm2351_vm13 = vcmp.lt.s32.totalorder %v11122_v45, 1 }
 0x355   :  { %v2714_v47 = vmul.f32 %v2713_v17, %v2711_v12  ;;  %vm2633_vm11 = vcmp.lt.s32.totalorder %v10780_v19, 0  ;;  %v3526_v62 = vshll.u32 %v3525_v41, 30  ;;  %vm2353_vm15 = vcmp.lt.s32.totalorder %v11122_v45, 3 }
 0x356   :  { %v2363_v8 = vsel %vm2351_vm13, %v2341_v24, %v2344_v40  ;;  %v2359_v50 = vsel %vm2351_vm13, %v2338_v3, %v2341_v24  ;;  %v2361_v34 = vsel %vm2353_vm15, %v2344_v40, %v2360_v22  ;;  %v2364_v29 = vsel %vm2354_vm10, %v2350_v38, 1326507024 }
 0x357   :  { %v2715_v20 = vxor.u32 2147483648, %v2714_v47  ;;  %v11237_v10 = vsub.s32 %v3523_v0, %v3526_v62  ;;  %vm2352_vm0 = vcmp.lt.s32.totalorder %v11122_v45, 2  ;;  %v2356_v37 = vsel %vm2354_vm10, %v2344_v40, 2102212464  ;;  %v11296_v40 = vld [vmem:[%s15386_s2 + $0x10] sm:$0xff] }
 0x358   :  { %v2365_v2 = vsel %vm2353_vm15, %v2347_v39, %v2364_v29  ;;  %v2718_v15 = vsel %vm2633_vm11, %v2717_v16, %v11120_v58  ;;  %v2335_v43 = vshrl.u32 %v15514_v63, %v11161_v42  ;;  %v2367_v57 = vshll.u32 %v2327_v60, 8  ;;  %7600 = vmatmul.mubr.msk.f32.gmra.mrb[4].mxu0 %vm3571_vm9, %v11296_v40  ;;  %7604 = vmatmul.mubr.msk.f32.gmra.mrb[4].mxu1 %vm3571_vm9, %v11296_v40 }
 0x359   :  { %v2366_v6 = vsel %vm2352_vm0, %v2363_v8, %v2365_v2  ;;  %vm11253_vm1 = vcmp.le.f32.partialorder %v2631_v33, 0.7853982  ;;  %v2716_v48 = vsel %vm2633_vm11, %v2715_v20, %v2714_v47  ;;  %v3529_v56 = vsub.s32 0, %v11237_v10  ;;  %3666 = vmatprep.mubr.f32.mxu0 %v8341_v11  ;;  %3755 = vmatprep.mubr.f32.mxu1 %v8341_v11 }
 0x35a   :  { %v2362_v58 = vsel %vm2352_vm0, %v2359_v50, %v2361_v34  ;;  %v2355_v42 = vsel %vm2351_vm13, %v2335_v43, %v2338_v3  ;;  %v2357_v61 = vsel %vm2353_vm15, %v2341_v24, %v2356_v37  ;;  %v11272_v33 = vsel %vm2538_vm12, %v11102_v51, 0 }
 0x35b   :  { %v11266_v26 = vmul.u32.u64.low %v2367_v57, %v2366_v6  ;;  %v11267_v59 = vmul.u32.u64.high %v2367_v57, %v2366_v6, %v11266_v26  ;;  %v2720_v0 = vsel %vm11253_vm1, 0, %v2718_v15  ;;  %v7595_v54 = vmin.u32 %v3529_v56, %v11237_v10 }
 0x35c   :  { %v3549_v9 = vsub.s32 4, %v3525_v41  ;;  %v2719_v28 = vsel %vm11253_vm1, %v10780_v19, %v2716_v48  ;;  %v11280_v25 = vmul.u32.u64.low %v2367_v57, %v2362_v58  ;;  %v11281_v3 = vmul.u32.u64.high %v2367_v57, %v2362_v58, %v11280_v25 }
 0x35d   :  { %v3151_v32 = vand.u32 2147483647, %v15598_v30  ;;  %v11286_v14 = vadd.s32 1, %v11111_v53  ;;  %v3531_v51 = vclz %v7595_v54  ;;  %v2358_v21 = vsel %vm2352_vm0, %v2355_v42, %v2357_v61 }
 0x35e   :  { %v11291_v24 = vsub.s32 32, %v11220_v46  ;;  %v11299_v39 = vand.u32 31, %v11272_v33  ;;  %v2724_v12 = vadd.s32 3, %v2720_v0  ;;  %vm3465_vm14 = vcmp.lt.s32.totalorder %v10965_v23, 0 }
 0x35f   :  { %v3519_v53 = vadd.s32 %v11169_v44, %v11175_v52  ;;  %8152 = vcosq.f32 %v2719_v28  ;;  %vm11310_vm2 = vcmp.le.f32.partialorder %v3463_v1, 0.7853982  ;;  %v7596_v17 = vadd.s32 4294967294, %v3531_v51  ;;  %v11323_v44 = vld [vmem:[%s15386_s2 + $0x18] sm:$0xff] }
 0x360   :  { %v3550_v38 = vsel %vm3465_vm14, %v3549_v9, %v3525_v41  ;;  %vm2376_vm3 = vc.u32 %v11267_v59, %v11280_v25  ;;  %8154 = vsinq.f32 %v2719_v28  ;;  %v2374_v1 = vmul.u32 %v2367_v57, %v2358_v21  ;;  %7601 = vmatmul.mubr.msk.f32.gmra.mrb[6].mxu0 %vm3571_vm9, %v11323_v44  ;;  %7605 = vmatmul.mubr.msk.f32.gmra.mrb[6].mxu1 %vm3571_vm9, %v11323_v44 }
 0x361   :  { %v2377_v52 = vadd.s32 1, %v11281_v3  ;;  %v11328_v22 = vand.u32 8388607, %v3151_v32  ;;  %vm7597_vm4 = vcmp.lt.s32.totalorder %v7596_v17, 0  ;;  %v11331_v41 = vshrl.u32 %v11109_v55, 5  ;;  %3826 = vmatprep.mubr.f32.mxu0 %v8341_v11  ;;  %3915 = vmatprep.mubr.f32.mxu1 %v8341_v11 }
 0x362   :  { %v3169_v47 = vshrl.u32 %v15520_v31, %v11291_v24  ;;  %v3172_v16 = vshrl.u32 %v15510_v36, %v11291_v24  ;;  %v3534_v60 = vsel %vm7597_vm4, 0, %v7596_v17  ;;  %v3175_v8 = vshrl.u32 %v15511_v5, %v11291_v24 }
 0x363   :  { %v2378_v62 = vsel %vm2376_vm3, %v2377_v52, %v11281_v3  ;;  %v3178_v20 = vshrl.u32 %v15512_v13, %v11291_v24  ;;  %v3535_v55 = vsub.s32 32, %v3534_v60  ;;  %v3539_v50 = vsub.s32 4294967266, %v3534_v60 }
 0x364   :  { %v2379_v34 = vadd.s32 %v2378_v62, %v2374_v1  ;;  %v3168_v29 = vshll.u32 %v15514_v63, %v11220_v46  ;;  %v3536_v37 = vshll.u32 %v11237_v10, %v3534_v60  ;;  %v3171_v2 = vshll.u32 %v15520_v31, %v11220_v46 }
 0x365   :  { %v3174_v15 = vshll.u32 %v15510_v36, %v11220_v46  ;;  %v3177_v43 = vshll.u32 %v15511_v5, %v11220_v46  ;;  %v3537_v6 = vshrl.u32 %v3519_v53, %v3535_v55  ;;  %v3540_v57 = vadd.s32 127, %v3539_v50  ;;  %v11392_v55 = vpop.f32.mrb[0].mxu0 }
 0x366   :  { %v2380_v27 = vadd.s32 536870912, %v2379_v34  ;;  %v3181_v48 = vshrl.u32 %v15513_v18, %v11291_v24  ;;  %v3170_v56 = vor.u32 %v3169_v47, %v3168_v29  ;;  %v3173_v58 = vor.u32 %v3172_v16, %v3171_v2 }
 0x367   :  { %v3176_v42 = vor.u32 %v3175_v8, %v3174_v15  ;;  %v3179_v61 = vor.u32 %v3178_v20, %v3177_v43  ;;  %v3538_v10 = vor.u32 %v3537_v6, %v3536_v37  ;;  %v3541_v26 = vshll.u32 %v3540_v57, 23  ;;  %v7268_v8 = vld [vmem:[%s15387_s3] sm:$0xff]  ;;  %v7269_v20 = vld [vmem:[%s15387_s3 + $0x8] sm:$0xff]  ;;  %v7270_v6 = vld [vmem:[%s15387_s3 + $0x10] sm:$0xff] }
 0x368   :  { %v11359_v0 = vshrl.u32 %v2380_v27, 30  ;;  %v3180_v54 = vshll.u32 %v15512_v13, %v11220_v46  ;;  %vm3370_vm5 = vcmp.gt.s32.totalorder %v11286_v14, 0  ;;  %v11364_v9 = vand.u32 3, %v2724_v12  ;;  %7274 = vperm.xlu1 %8046, %v7268_v8   ;;  %7279 = vperm.xlu0 %8047, %v7269_v20  }
 0x369   :  { %v3552_v28 = vsel %vm11310_vm2, 0, %v3550_v38  ;;  %vm3183_vm6 = vcmp.lt.s32.totalorder %v11331_v41, 1  ;;  %v8153_v3 = vpop.eup %8152  ;;  %v3542_v51 = vor.u32 4788187, %v3541_v26  ;;  %vm3186_vm7 = vcmp.lt.s32.totalorder %v11331_v41, 4 }
 0x36a   :  { %v2382_v21 = vshll.u32 %v11359_v0, 30  ;;  %v3182_v53 = vor.u32 %v3181_v48, %v3180_v54  ;;  %v8155_v17 = vpop.eup %8154  ;;  %v3159_v1 = vor.u32 8388608, %v11328_v22  ;;  %vm3185_vm8 = vcmp.lt.s32.totalorder %v11331_v41, 3 }
 0x36b   :  { %v3191_v46 = vsel %vm3183_vm6, %v3170_v56, %v3173_v58  ;;  %v3192_v12 = vsel %vm3186_vm7, %v3179_v61, 920167782  ;;  %v3543_v38 = vand.u32 2147483647, %v3542_v51  ;;  %v3545_v52 = vcvt.s32.f32 %v3538_v10 }
 0x36c   :  { %v11377_v47 = vsub.s32 %v2379_v34, %v2382_v21  ;;  %v3193_v16 = vsel %vm3185_vm8, %v3176_v42, %v3192_v12  ;;  %v3556_v60 = vadd.s32 3, %v3552_v28  ;;  %v3167_v62 = vshrl.u32 %v15514_v63, %v11291_v24  ;;  %7284 = vperm.xlu1 %8046, %v7270_v6  }
 0x36d   :  { %vm3184_vm10 = vcmp.lt.s32.totalorder %v11331_v41, 2  ;;  %v3195_v22 = vsel %vm3183_vm6, %v3173_v58, %v3176_v42  ;;  %v3546_v50 = vmul.f32 %v3545_v52, %v3543_v38  ;;  %v3188_v24 = vsel %vm3186_vm7, %v3176_v42, 2102212464 }
 0x36e   :  { %v2385_v34 = vsub.s32 0, %v11377_v47  ;;  %v3196_v29 = vsel %vm3186_vm7, %v3182_v53, 1326507024  ;;  %v2731_v37 = vxor.u32 2147483648, %v8153_v3  ;;  %v3194_v2 = vsel %vm3184_vm10, %v3191_v46, %v3193_v16 }
 0x36f   :  { %v3197_v15 = vsel %vm3185_vm8, %v3179_v61, %v3196_v29  ;;  %v3199_v43 = vshll.u32 %v3159_v1, 8  ;;  %v2728_v57 = vxor.u32 2147483648, %v8155_v17  ;;  %v3547_v27 = vxor.u32 2147483648, %v3546_v50 }
 0x370   :  { %v7551_v48 = vmin.u32 %v2385_v34, %v11377_v47  ;;  %v3198_v42 = vsel %vm3184_vm10, %v3195_v22, %v3197_v15  ;;  %v3187_v10 = vsel %vm3183_vm6, %v3167_v62, %v3170_v56  ;;  %v3189_v26 = vsel %vm3185_vm8, %v3173_v58, %v3188_v24  ;;  %v7271_v58 = vld [vmem:[%s15387_s3 + $0x18] sm:$0xff] }
 0x371   :  { %v11413_v54 = vmul.u32.u64.low %v3199_v43, %v3198_v42  ;;  %v11414_v61 = vmul.u32.u64.high %v3199_v43, %v3198_v42, %v11413_v54  ;;  %v3548_v28 = vsel %vm3465_vm14, %v3547_v27, %v3546_v50  ;;  %v11425_v1 = vsel %vm3370_vm5, %v11286_v14, 0  ;;  %7289 = vperm.xlu1 %8046, %v7271_v58  }
 0x372   :  { %v2387_v51 = vclz %v7551_v48  ;;  %v11418_v21 = vmul.u32.u64.low %v3199_v43, %v3194_v2  ;;  %v11419_v53 = vmul.u32.u64.high %v3199_v43, %v3194_v2, %v11418_v21  ;;  %vm2727_vm12 = vcmp.eq.s32.totalorder %v11364_v9, 0 }
 0x373   :  { %vm2730_vm13 = vcmp.eq.s32.totalorder %v11364_v9, 2  ;;  %v3551_v56 = vsel %vm11310_vm2, %v10965_v23, %v3548_v28  ;;  %v11435_v46 = vand.u32 3, %v3556_v60  ;;  %v3190_v14 = vsel %vm3184_vm10, %v3187_v10, %v3189_v26 }
 0x374   :  { %8156 = vcosq.f32 %v3551_v56  ;;  %v7552_v12 = vadd.s32 4294967294, %v2387_v51  ;;  %v2729_v38 = vsel %vm2727_vm12, %v8153_v3, %v2728_v57  ;;  %v2732_v52 = vsel %vm2730_vm13, %v2731_v37, %v8155_v17 }
 0x375   :  { %8158 = vsinq.f32 %v3551_v56  ;;  %vm3208_vm11 = vc.u32 %v11414_v61, %v11418_v21  ;;  %vm2726_vm15 = vcmp.lt.s32.totalorder %v11364_v9, 2  ;;  %v2375_v45 = vadd.s32 %v11280_v25, %v11267_v59  ;;  %v11455_v25 = vpop.f32.mrb[0].mxu1 }
 0x376   :  { %vm7553_vm0 = vcmp.lt.s32.totalorder %v7552_v12, 0  ;;  %v3209_v16 = vadd.s32 1, %v11419_v53  ;;  %v3206_v62 = vmul.u32 %v3199_v43, %v3190_v14  ;;  %v2527_v41 = vand.u32 2147483647, %v15592_v7 }
 0x377   :  { %v2390_v60 = vsel %vm7553_vm0, 0, %v7552_v12  ;;  %v11447_v3 = vsub.s32 32, %v11299_v39  ;;  %v2733_v17 = vsel %vm2726_vm15, %v2729_v38, %v2732_v52  ;;  %v11451_v9 = vand.u32 31, %v11425_v1 }
 0x378   :  { %v2391_v22 = vsub.s32 32, %v2390_v60  ;;  %v2395_v8 = vsub.s32 4294967266, %v2390_v60  ;;  %v3210_v20 = vsel %vm3208_vm11, %v3209_v16, %v11419_v53  ;;  %vm2723_vm1 = vweird.f32 %v10780_v19 }
 0x379   :  { %vm3559_vm14 = vcmp.eq.s32.totalorder %v11435_v46, 0  ;;  %v3211_v59 = vadd.s32 %v3210_v20, %v3206_v62  ;;  %vm3558_vm2 = vcmp.lt.s32.totalorder %v11435_v46, 2  ;;  %vm3562_vm3 = vcmp.eq.s32.totalorder %v11435_v46, 2 }
 0x37a   :  { %v2392_v50 = vshll.u32 %v11377_v47, %v2390_v60  ;;  %v2393_v34 = vshrl.u32 %v2375_v45, %v2391_v22  ;;  %v2396_v24 = vadd.s32 127, %v2395_v8  ;;  %v2734_v29 = vsel %vm2723_vm1, nan, %v2733_v17 }
 0x37b   :  { %vm3555_vm4 = vweird.f32 %v10965_v23  ;;  %v3212_v37 = vadd.s32 536870912, %v3211_v59  ;;  %v11463_v19 = vand.u32 8388607, %v2527_v41  ;;  %v2545_v2 = vshrl.u32 %v15520_v31, %v11447_v3 }
 0x37c   :  { %v2394_v15 = vor.u32 %v2393_v34, %v2392_v50  ;;  %v2397_v43 = vshll.u32 %v2396_v24, 23  ;;  %v11468_v6 = vshrl.u32 %v11272_v33, 5  ;;  %v2544_v47 = vshll.u32 %v15514_v63, %v11299_v39 }
 0x37d   :  { %v11472_v57 = vshrl.u32 %v3212_v37, 30  ;;  %v2547_v27 = vshll.u32 %v15520_v31, %v11299_v39  ;;  %v2548_v48 = vshrl.u32 %v15510_v36, %v11447_v3  ;;  %v2554_v42 = vshrl.u32 %v15512_v13, %v11447_v3 }
 0x37e   :  { %v8157_v10 = vpop.eup %8156  ;;  %vm2321_vm5 = vcmp.lt.s32.totalorder %v15590_v49, 0  ;;  %v2398_v26 = vor.u32 4788187, %v2397_v43  ;;  %v2550_v33 = vshll.u32 %v15510_v36, %v11299_v39  ;;  %v2551_v54 = vshrl.u32 %v15511_v5, %v11447_v3 }
 0x37f   :  { %v2557_v28 = vshrl.u32 %v15513_v18, %v11447_v3  ;;  %v8159_v51 = vpop.eup %8158  ;;  %v3563_v53 = vxor.u32 2147483648, %v8157_v10  ;;  %v3214_v56 = vshll.u32 %v11472_v57, 30  ;;  %v2546_v58 = vor.u32 %v2545_v2, %v2544_v47 }
 0x380   :  { %v2553_v12 = vshll.u32 %v15511_v5, %v11299_v39  ;;  %v3560_v14 = vxor.u32 2147483648, %v8159_v51  ;;  %v2399_v38 = vand.u32 2147483647, %v2398_v26  ;;  %v2401_v52 = vcvt.s32.f32 %v2394_v15 }
 0x381   :  { %v2556_v45 = vshll.u32 %v15512_v13, %v11299_v39  ;;  %v3564_v16 = vsel %vm3562_vm3, %v3563_v53, %v8159_v51  ;;  %vm11496_vm6 = vcmp.le.f32.partialorder %v2319_v35, 0.7853982  ;;  %v11500_v62 = vsub.s32 %v3211_v59, %v3214_v56 }
 0x382   :  { %v2549_v17 = vor.u32 %v2548_v48, %v2547_v27  ;;  %v2555_v22 = vor.u32 %v2554_v42, %v2553_v12  ;;  %v3561_v8 = vsel %vm3559_vm14, %v8157_v10, %v3560_v14  ;;  %v2402_v20 = vmul.f32 %v2401_v52, %v2399_v38 }
 0x383   :  { %v2552_v50 = vor.u32 %v2551_v54, %v2550_v33  ;;  %v2558_v34 = vor.u32 %v2557_v28, %v2556_v45  ;;  %v3565_v39 = vsel %vm3558_vm2, %v3561_v8, %v3564_v16  ;;  %v2405_v24 = vsub.s32 4, %v11359_v0 }
 0x384   :  { %v3217_v35 = vsub.s32 0, %v11500_v62  ;;  %v2535_v37 = vor.u32 8388608, %v11463_v19  ;;  %v3566_v59 = vsel %vm3555_vm4, nan, %v3565_v39  ;;  %v2403_v2 = vxor.u32 2147483648, %v2402_v20 }
 0x385   :  { %vm2559_vm7 = vcmp.lt.s32.totalorder %v11468_v6, 1  ;;  %vm2562_vm8 = vcmp.lt.s32.totalorder %v11468_v6, 4  ;;  %v7770_v15 = vpack.c.bf16 %v3566_v59, %v2734_v29  ;;  %vm2561_vm10 = vcmp.lt.s32.totalorder %v11468_v6, 3 }
 0x386   :  { %v7583_v43 = vmin.u32 %v3217_v35, %v11500_v62  ;;  %v2568_v46 = vsel %vm2562_vm8, %v2555_v22, 920167782  ;;  %v2567_v47 = vsel %vm2559_vm7, %v2546_v58, %v2549_v17  ;;  %v2571_v23 = vsel %vm2559_vm7, %v2549_v17, %v2552_v50 }
 0x387   :  { %v2569_v19 = vsel %vm2561_vm10, %v2552_v50, %v2568_v46  ;;  %v2572_v27 = vsel %vm2562_vm8, %v2558_v34, 1326507024  ;;  %7771 = vmatprep.subr.bf16.mxu1 %v7770_v15  ;;  %v2406_v29 = vsel %vm2321_vm5, %v2405_v24, %v11359_v0  ;;  %v2543_v42 = vshrl.u32 %v15514_v63, %v11447_v3 }
 0x388   :  { %v3219_v48 = vclz %v7583_v43  ;;  %v2564_v10 = vsel %vm2562_vm8, %v2552_v50, 2102212464  ;;  %v2404_v26 = vsel %vm2321_vm5, %v2403_v2, %v2402_v20  ;;  %v3237_v33 = vsub.s32 4, %v11472_v57 }
 0x389   :  { %vm2560_vm12 = vcmp.lt.s32.totalorder %v11468_v6, 2  ;;  %v2573_v54 = vsel %vm2561_vm10, %v2555_v22, %v2572_v27  ;;  %v2575_v53 = vshll.u32 %v2535_v37, 8  ;;  %v2408_v3 = vsel %vm11496_vm6, 0, %v2406_v29 }
 0x38a   :  { %v7584_v28 = vadd.s32 4294967294, %v3219_v48  ;;  %v2570_v51 = vsel %vm2560_vm12, %v2567_v47, %v2569_v19  ;;  %v2574_v0 = vsel %vm2560_vm12, %v2571_v23, %v2573_v54  ;;  %vm11540_vm13 = vcmp.le.f32.partialorder %v3151_v32, 0.7853982 }
 0x38b   :  { %v2563_v12 = vsel %vm2559_vm7, %v2543_v42, %v2546_v58  ;;  %v2565_v14 = vsel %vm2561_vm10, %v2549_v17, %v2564_v10  ;;  %v2407_v38 = vsel %vm11496_vm6, %v15590_v49, %v2404_v26  ;;  %vm3153_vm15 = vcmp.lt.s32.totalorder %v15598_v30, 0 }
 0x38c   :  { %vm7585_vm11 = vcmp.lt.s32.totalorder %v7584_v28, 0  ;;  %v11551_v52 = vmul.u32.u64.low %v2575_v53, %v2574_v0  ;;  %v11552_v45 = vmul.u32.u64.high %v2575_v53, %v2574_v0, %v11551_v52  ;;  %v3207_v58 = vadd.s32 %v11418_v21, %v11414_v61  ;;  %v11570_v61 = vpop.f32.mrb[1].mxu0 }
 0x38d   :  { %v3222_v32 = vsel %vm7585_vm11, 0, %v7584_v28  ;;  %v11555_v16 = vmul.u32.u64.low %v2575_v53, %v2570_v51  ;;  %v11556_v22 = vmul.u32.u64.high %v2575_v53, %v2570_v51, %v11555_v16  ;;  %v3238_v60 = vsel %vm3153_vm15, %v3237_v33, %v11472_v57 }
 0x38e   :  { %v3223_v8 = vsub.s32 32, %v3222_v32  ;;  %v3227_v17 = vsub.s32 4294967266, %v3222_v32  ;;  %8160 = vcosq.f32 %v2407_v38  ;;  %v2412_v20 = vadd.s32 3, %v2408_v3 }
 0x38f   :  { %v2566_v50 = vsel %vm2560_vm12, %v2563_v12, %v2565_v14  ;;  %v3374_v34 = vsub.s32 32, %v11451_v9  ;;  %v3224_v39 = vshll.u32 %v11500_v62, %v3222_v32  ;;  %vm2584_vm0 = vc.u32 %v11552_v45, %v11555_v16 }
 0x390   :  { %v3225_v24 = vshrl.u32 %v3207_v58, %v3223_v8  ;;  %v3228_v35 = vadd.s32 127, %v3227_v17  ;;  %8162 = vsinq.f32 %v2407_v38  ;;  %v3240_v21 = vsel %vm11540_vm13, 0, %v3238_v60 }
 0x391   :  { %v2585_v57 = vadd.s32 1, %v11556_v22  ;;  %v3359_v6 = vand.u32 2147483647, %v15609_v4  ;;  %v2582_v2 = vmul.u32 %v2575_v53, %v2566_v50  ;;  %v3377_v62 = vshrl.u32 %v15520_v31, %v3374_v34 }
 0x392   :  { %v3226_v37 = vor.u32 %v3225_v24, %v3224_v39  ;;  %v3229_v59 = vshll.u32 %v3228_v35, 23  ;;  %v3372_v43 = vshrl.u32 %v11425_v1, 5  ;;  %v3380_v46 = vshrl.u32 %v15510_v36, %v3374_v34 }
 0x393   :  { %v2586_v15 = vsel %vm2584_vm0, %v2585_v57, %v11556_v22  ;;  %v3386_v47 = vshrl.u32 %v15512_v13, %v3374_v34  ;;  %v3376_v27 = vshll.u32 %v15514_v63, %v11451_v9  ;;  %v3383_v29 = vshrl.u32 %v15511_v5, %v3374_v34 }
 0x394   :  { %v3230_v19 = vor.u32 4788187, %v3229_v59  ;;  %v2587_v23 = vadd.s32 %v2586_v15, %v2582_v2  ;;  %v3366_v48 = vand.u32 8388607, %v3359_v6  ;;  %v3379_v42 = vshll.u32 %v15520_v31, %v11451_v9 }
 0x395   :  { %v3382_v1 = vshll.u32 %v15510_v36, %v11451_v9  ;;  %v3385_v10 = vshll.u32 %v15511_v5, %v11451_v9  ;;  %v3233_v33 = vcvt.s32.f32 %v3226_v37  ;;  %v3378_v28 = vor.u32 %v3377_v62, %v3376_v27 }
 0x396   :  { %v3231_v26 = vand.u32 2147483647, %v3230_v19  ;;  %v2588_v54 = vadd.s32 536870912, %v2587_v23  ;;  %v3381_v51 = vor.u32 %v3380_v46, %v3379_v42  ;;  %v3388_v53 = vshll.u32 %v15512_v13, %v11451_v9 }
 0x397   :  { %v3387_v0 = vor.u32 %v3386_v47, %v3385_v10  ;;  %v3389_v3 = vshrl.u32 %v15513_v18, %v3374_v34  ;;  %v3384_v38 = vor.u32 %v3383_v29, %v3382_v1  ;;  %v2413_v32 = vand.u32 3, %v2412_v20 }
 0x398   :  { %v3234_v12 = vmul.f32 %v3233_v33, %v3231_v26  ;;  %v11595_v14 = vshrl.u32 %v2588_v54, 30  ;;  %v8161_v52 = vpop.eup %8160  ;;  %v3244_v22 = vadd.s32 3, %v3240_v21  ;;  %v3367_v58 = vor.u32 8388608, %v3366_v48 }
 0x399   :  { %v3390_v8 = vor.u32 %v3389_v3, %v3388_v53  ;;  %vm3391_vm1 = vcmp.lt.s32.totalorder %v3372_v43, 1  ;;  %vm3394_vm14 = vcmp.lt.s32.totalorder %v3372_v43, 4  ;;  %v3375_v39 = vshrl.u32 %v15514_v63, %v3374_v34 }
 0x39a   :  { %v3235_v17 = vxor.u32 2147483648, %v3234_v12  ;;  %v2590_v60 = vshll.u32 %v11595_v14, 30  ;;  %v8163_v50 = vpop.eup %8162  ;;  %vm3392_vm2 = vcmp.lt.s32.totalorder %v3372_v43, 2  ;;  %v3399_v9 = vsel %vm3391_vm1, %v3378_v28, %v3381_v51 }
 0x39b   :  { %v3400_v24 = vsel %vm3394_vm14, %v3387_v0, 920167782  ;;  %vm3393_vm3 = vcmp.lt.s32.totalorder %v3372_v43, 3  ;;  %v3396_v20 = vsel %vm3394_vm14, %v3384_v38, 2102212464  ;;  %v3403_v59 = vsel %vm3391_vm1, %v3381_v51, %v3384_v38 }
 0x39c   :  { %v3236_v35 = vsel %vm3153_vm15, %v3235_v17, %v3234_v12  ;;  %v11602_v57 = vsub.s32 %v2587_v23, %v2590_v60  ;;  %v3401_v37 = vsel %vm3393_vm3, %v3384_v38, %v3400_v24  ;;  %v3404_v34 = vsel %vm3394_vm14, %v3390_v8, 1326507024 }
 0x39d   :  { %v3239_v21 = vsel %vm11540_vm13, %v15598_v30, %v3236_v35  ;;  %v2419_v2 = vxor.u32 2147483648, %v8161_v52  ;;  %v3402_v15 = vsel %vm3392_vm2, %v3399_v9, %v3401_v37  ;;  %v2416_v46 = vxor.u32 2147483648, %v8163_v50 }
 0x39e   :  { %8164 = vcosq.f32 %v3239_v21  ;;  %v2593_v62 = vsub.s32 0, %v11602_v57  ;;  %v3405_v47 = vsel %vm3393_vm3, %v3387_v0, %v3404_v34  ;;  %v3407_v19 = vshll.u32 %v3367_v58, 8 }
 0x39f   :  { %8166 = vsinq.f32 %v3239_v21  ;;  %v3395_v56 = vsel %vm3391_vm1, %v3375_v39, %v3378_v28  ;;  %v3397_v27 = vsel %vm3393_vm3, %v3381_v51, %v3396_v20  ;;  %v3406_v29 = vsel %vm3392_vm2, %v3403_v59, %v3405_v47 }
 0x3a0   :  { %v7559_v23 = vmin.u32 %v2593_v62, %v11602_v57  ;;  %v11616_v48 = vmul.u32.u64.low %v3407_v19, %v3406_v29  ;;  %v11617_v42 = vmul.u32.u64.high %v3407_v19, %v3406_v29, %v11616_v48  ;;  %vm2418_vm4 = vcmp.eq.s32.totalorder %v2413_v32, 2 }
 0x3a1   :  { %v11619_v1 = vmul.u32.u64.low %v3407_v19, %v3402_v15  ;;  %v11620_v10 = vmul.u32.u64.high %v3407_v19, %v3402_v15, %v11619_v1  ;;  %v3398_v33 = vsel %vm3392_vm2, %v3395_v56, %v3397_v27  ;;  %v3943_v54 = vand.u32 2139095040, %v11392_v55 }
 0x3a2   :  { %v2595_v26 = vclz %v7559_v23  ;;  %vm2415_vm5 = vcmp.eq.s32.totalorder %v2413_v32, 0  ;;  %v2420_v0 = vsel %vm2418_vm4, %v2419_v2, %v8163_v50  ;;  %v3245_v28 = vand.u32 3, %v3244_v22 }
 0x3a3   :  { %v2417_v51 = vsel %vm2415_vm5, %v8161_v52, %v2416_v46  ;;  %vm3416_vm6 = vc.u32 %v11617_v42, %v11619_v1  ;;  %v3417_v3 = vadd.s32 1, %v11620_v10  ;;  %v3944_v12 = vshrl.u32 %v3943_v54, 23 }
 0x3a4   :  { %v7560_v53 = vadd.s32 4294967294, %v2595_v26  ;;  %v3414_v38 = vmul.u32 %v3407_v19, %v3398_v33  ;;  %vm2414_vm8 = vcmp.lt.s32.totalorder %v2413_v32, 2  ;;  %v2583_v43 = vadd.s32 %v11555_v16, %v11552_v45  ;;  %v11632_v16 = vpop.f32.mrb[1].mxu1 }
 0x3a5   :  { %v3418_v8 = vsel %vm3416_vm6, %v3417_v3, %v11620_v10  ;;  %v2421_v60 = vsel %vm2414_vm8, %v2417_v51, %v2420_v0  ;;  %vm2411_vm10 = vweird.f32 %v15590_v49  ;;  %vm3250_vm12 = vcmp.eq.s32.totalorder %v3245_v28, 2  ;;  %15620 = vst [vmem:[#allocation20_spill] sm:$0xff] %v11632_v16 }
 0x3a6   :  { %vm7561_vm7 = vcmp.lt.s32.totalorder %v7560_v53, 0  ;;  %v3419_v52 = vadd.s32 %v3418_v8, %v3414_v38  ;;  %v7614_v24 = vadd.s32 4294967169, %v3944_v12  ;;  %v2422_v37 = vsel %vm2411_vm10, nan, %v2421_v60 }
 0x3a7   :  { %v2598_v58 = vsel %vm7561_vm7, 0, %v7560_v53  ;;  %vm3246_vm13 = vcmp.lt.s32.totalorder %v3245_v28, 2  ;;  %vm3247_vm11 = vcmp.eq.s32.totalorder %v3245_v28, 0  ;;  %vm3243_vm15 = vweird.f32 %v15598_v30  ;;  %v11642_v30 = vld [vmem:[%s15386_s2] sm:$0xff]  ;;  %v11650_v53 = vld [vmem:[%s15386_s2 + $0x8] sm:$0xff] }
 0x3a8   :  { %v8165_v17 = vpop.eup %8164  ;;  %v2599_v22 = vsub.s32 32, %v2598_v58  ;;  %v2603_v50 = vsub.s32 4294967266, %v2598_v58  ;;  %v3420_v21 = vadd.s32 536870912, %v3419_v52  ;;  %v2600_v34 = vshll.u32 %v11602_v57, %v2598_v58 }
 0x3a9   :  { %v8167_v39 = vpop.eup %8166  ;;  %v3251_v9 = vxor.u32 2147483648, %v8165_v17  ;;  %v3950_v15 = vadd.s32 1, %v7614_v24  ;;  %vm2529_vm14 = vcmp.lt.s32.totalorder %v15592_v7, 0  ;;  %v3415_v3 = vadd.s32 %v11619_v1, %v11617_v42 }
 0x3aa   :  { %v3248_v35 = vxor.u32 2147483648, %v8167_v39  ;;  %v2601_v20 = vshrl.u32 %v2583_v43, %v2599_v22  ;;  %v2604_v32 = vadd.s32 127, %v2603_v50  ;;  %v11635_v62 = vshrl.u32 %v3420_v21, 30 }
 0x3ab   :  { %v3252_v45 = vsel %vm3250_vm12, %v3251_v9, %v8167_v39  ;;  %vm3951_vm0 = vcmp.gt.s32.totalorder %v3950_v15, 0  ;;  %vm11668_vm2 = vcmp.le.f32.partialorder %v2527_v41, 0.7853982  ;;  %v4151_v41 = vand.u32 2139095040, %v11455_v25 }
 0x3ac   :  { %v3249_v59 = vsel %vm3247_vm11, %v8165_v17, %v3248_v35  ;;  %v2605_v2 = vshll.u32 %v2604_v32, 23  ;;  %v2602_v47 = vor.u32 %v2601_v20, %v2600_v34  ;;  %v3422_v23 = vshll.u32 %v11635_v62, 30 }
 0x3ad   :  { %v3253_v49 = vsel %vm3246_vm13, %v3249_v59, %v3252_v45  ;;  %v3952_v33 = vsel %vm3951_vm0, %v3950_v15, 0  ;;  %v2613_v17 = vsub.s32 4, %v11595_v14  ;;  %v3940_v24 = vand.u32 2147483647, %v11392_v55 }
 0x3ae   :  { %v3254_v46 = vsel %vm3243_vm15, nan, %v3253_v49  ;;  %v2606_v19 = vor.u32 4788187, %v2605_v2  ;;  %v3423_v29 = vsub.s32 %v3419_v52, %v3422_v23  ;;  %v2609_v48 = vcvt.s32.f32 %v2602_v47 }
 0x3af   :  { %v7764_v56 = vpack.c.bf16 %v3254_v46, %v2422_v37  ;;  %v3954_v51 = vand.u32 31, %v3952_v33  ;;  %v2614_v9 = vsel %vm2529_vm14, %v2613_v17, %v11595_v14  ;;  %v11684_v35 = vshrl.u32 %v3952_v33, 5 }
 0x3b0   :  { %v2607_v27 = vand.u32 2147483647, %v2606_v19  ;;  %v3425_v10 = vsub.s32 0, %v3423_v29  ;;  %v4152_v49 = vshrl.u32 %v4151_v41, 23  ;;  %v2616_v23 = vsel %vm11668_vm2, 0, %v2614_v9 }
 0x3b1   :  { %7765 = vmatpush1.bf16.msra.mxu0 %v7764_v56  ;;  %v11662_v8 = vsub.s32 32, %v3954_v51  ;;  %v3966_v21 = vshll.u32 %v15511_v5, %v3954_v51  ;;  %v3969_v45 = vshll.u32 %v15512_v13, %v3954_v51  ;;  %v3957_v15 = vshll.u32 %v15514_v63, %v3954_v51 }
 0x3b2   :  { %v2610_v57 = vmul.f32 %v2609_v48, %v2607_v27  ;;  %v7591_v26 = vmin.u32 %v3425_v10, %v3423_v29  ;;  %v3960_v46 = vshll.u32 %v15520_v31, %v3954_v51  ;;  %v3963_v47 = vshll.u32 %v15510_v36, %v3954_v51 }
 0x3b3   :  { %v3967_v39 = vshrl.u32 %v15512_v13, %v11662_v8  ;;  %v3970_v20 = vshrl.u32 %v15513_v18, %v11662_v8  ;;  %v3961_v37 = vshrl.u32 %v15510_v36, %v11662_v8  ;;  %v3964_v14 = vshrl.u32 %v15511_v5, %v11662_v8 }
 0x3b4   :  { %7606 = vmatmul.mubr.msk.f32.vlgmr.msra.gmra.mrb[8].mxu0 %vm3571_vm9, %v11642_v30  ;;  %v3427_v54 = vclz %v7591_v26  ;;  %v2611_v0 = vxor.u32 2147483648, %v2610_v57  ;;  %v3445_v27 = vsub.s32 4, %v11635_v62  ;;  %vm3975_vm3 = vcmp.lt.s32.totalorder %v11684_v35, 4 }
 0x3b5   :  { %3832 = vmatprep.mubr.f32.mxu0 %v8341_v11  ;;  %v3968_v2 = vor.u32 %v3967_v39, %v3966_v21  ;;  %v3971_v19 = vor.u32 %v3970_v20, %v3969_v45  ;;  %v3962_v10 = vor.u32 %v3961_v37, %v3960_v46  ;;  %vm11709_vm4 = vcmp.le.f32.partialorder %v3359_v6, 0.7853982 }
 0x3b6   :  { %v7592_v28 = vadd.s32 4294967294, %v3427_v54  ;;  %v2612_v38 = vsel %vm2529_vm14, %v2611_v0, %v2610_v57  ;;  %v3965_v57 = vor.u32 %v3964_v14, %v3963_v47  ;;  %v7622_v54 = vadd.s32 4294967169, %v4152_v49 }
 0x3b7   :  { %v2615_v50 = vsel %vm11668_vm2, %v15592_v7, %v2612_v38  ;;  %v3981_v33 = vsel %vm3975_vm3, %v3968_v2, 920167782  ;;  %v2620_v0 = vadd.s32 3, %v2616_v23  ;;  %vm3361_vm5 = vcmp.lt.s32.totalorder %v15609_v4, 0 }
 0x3b8   :  { %7607 = vmatmul.mubr.msk.f32.gmra.mrb[10].mxu0 %vm3571_vm9, %v11650_v53  ;;  %vm7593_vm1 = vcmp.lt.s32.totalorder %v7592_v28, 0  ;;  %8168 = vcosq.f32 %v2615_v50  ;;  %v3985_v51 = vsel %vm3975_vm3, %v3971_v19, 1326507024  ;;  %vm3972_vm6 = vcmp.lt.s32.totalorder %v11684_v35, 1 }
 0x3b9   :  { %3838 = vmatprep.mubr.f32.mxu0 %v8341_v11  ;;  %v3430_v12 = vsel %vm7593_vm1, 0, %v7592_v28  ;;  %8170 = vsinq.f32 %v2615_v50  ;;  %vm3974_vm7 = vcmp.lt.s32.totalorder %v11684_v35, 3  ;;  %vm3973_vm8 = vcmp.lt.s32.totalorder %v11684_v35, 2 }
 0x3ba   :  { %v3431_v43 = vsub.s32 32, %v3430_v12  ;;  %v3435_v58 = vsub.s32 4294967266, %v3430_v12  ;;  %v3432_v42 = vshll.u32 %v3423_v29, %v3430_v12  ;;  %v3947_v29 = vand.u32 8388607, %v3940_v24 }
 0x3bb   :  { %v3446_v12 = vsel %vm3361_vm5, %v3445_v27, %v11635_v62  ;;  %v3984_v62 = vsel %vm3972_vm6, %v3962_v10, %v3965_v57  ;;  %v3986_v60 = vsel %vm3974_vm7, %v3968_v2, %v3985_v51  ;;  %v4047_v45 = vand.u32 2139095040, %v11570_v61 }
 0x3bc   :  { %7608 = vmatmul.mubr.msk.f32.gmra.mrb[12].mxu0 %vm3571_vm9, %v11296_v40  ;;  %v3433_v1 = vshrl.u32 %v3415_v3, %v3431_v43  ;;  %v3436_v22 = vadd.s32 127, %v3435_v58  ;;  %v3948_v6 = vor.u32 8388608, %v3947_v29  ;;  %v3982_v58 = vsel %vm3974_vm7, %v3965_v57, %v3981_v33 }
 0x3bd   :  { %3844 = vmatprep.mubr.f32.mxu0 %v8341_v11  ;;  %v3977_v49 = vsel %vm3975_vm3, %v3965_v57, 2102212464  ;;  %v3956_v46 = vshrl.u32 %v15514_v63, %v11662_v8  ;;  %vm2619_vm15 = vweird.f32 %v15592_v7  ;;  %v4048_v27 = vshrl.u32 %v4047_v45, 23 }
 0x3be   :  { %v3434_v40 = vor.u32 %v3433_v1, %v3432_v42  ;;  %v3437_v52 = vshll.u32 %v3436_v22, 23  ;;  %v4158_v42 = vadd.s32 1, %v7622_v54  ;;  %v3448_v22 = vsel %vm11709_vm4, 0, %v3446_v12 }
 0x3bf   :  { %v3988_v39 = vshll.u32 %v3948_v6, 8  ;;  %v3452_v20 = vadd.s32 3, %v3448_v22  ;;  %v3978_v57 = vsel %vm3974_vm7, %v3962_v10, %v3977_v49  ;;  %vm3451_vm3 = vweird.f32 %v15609_v4 }
 0x3c0   :  { %7609 = vmatmul.mubr.msk.f32.gmra.mrb[14].mxu0 %vm3571_vm9, %v11323_v44  ;;  %v3438_v32 = vor.u32 4788187, %v3437_v52  ;;  %v3958_v44 = vshrl.u32 %v15520_v31, %v11662_v8  ;;  %v3441_v34 = vcvt.s32.f32 %v3434_v40  ;;  %v2621_v40 = vand.u32 3, %v2620_v0 }
 0x3c1   :  { %v3987_v52 = vsel %vm3973_vm8, %v3984_v62, %v3986_v60  ;;  %vm4159_vm10 = vcmp.gt.s32.totalorder %v4158_v42, 0  ;;  %v3453_v2 = vand.u32 3, %v3452_v20  ;;  %v7618_v51 = vadd.s32 4294967169, %v4048_v27 }
 0x3c2   :  { %v3439_v59 = vand.u32 2147483647, %v3438_v32  ;;  %v3959_v48 = vor.u32 %v3958_v44, %v3957_v15  ;;  %v8169_v17 = vpop.eup %8168  ;;  %v11741_v21 = vmul.u32.u64.low %v3988_v39, %v3987_v52  ;;  %v11742_v37 = vmul.u32.u64.high %v3988_v39, %v3987_v52, %v11741_v21 }
 0x3c3   :  { %v8171_v1 = vpop.eup %8170  ;;  %v2627_v9 = vxor.u32 2147483648, %v8169_v17  ;;  %vm2623_vm12 = vcmp.eq.s32.totalorder %v2621_v40, 0  ;;  %vm2626_vm13 = vcmp.eq.s32.totalorder %v2621_v40, 2  ;;  %v4160_v14 = vsel %vm4159_vm10, %v4158_v42, 0 }
 0x3c4   :  { %v3442_v56 = vmul.f32 %v3441_v34, %v3439_v59  ;;  %v3980_v43 = vsel %vm3972_vm6, %v3959_v48, %v3962_v10  ;;  %v2624_v41 = vxor.u32 2147483648, %v8171_v1  ;;  %vm2622_vm11 = vcmp.lt.s32.totalorder %v2621_v40, 2 }
 0x3c5   :  { %v3983_v50 = vsel %vm3973_vm8, %v3980_v43, %v3982_v58  ;;  %v2628_v34 = vsel %vm2626_vm13, %v2627_v9, %v8171_v1  ;;  %v4162_v47 = vand.u32 31, %v4160_v14  ;;  %vm3458_vm0 = vcmp.eq.s32.totalorder %v3453_v2, 2 }
 0x3c6   :  { %v3443_v26 = vxor.u32 2147483648, %v3442_v56  ;;  %v11737_v32 = vmul.u32.u64.low %v3988_v39, %v3983_v50  ;;  %v11738_v44 = vmul.u32.u64.high %v3988_v39, %v3983_v50, %v11737_v32  ;;  %v2625_v59 = vsel %vm2623_vm12, %v8169_v17, %v2624_v41 }
 0x3c7   :  { %v2629_v23 = vsel %vm2622_vm11, %v2625_v59, %v2628_v34  ;;  %vm3454_vm1 = vcmp.lt.s32.totalorder %v3453_v2, 2  ;;  %vm3455_vm14 = vcmp.eq.s32.totalorder %v3453_v2, 0  ;;  %v11757_v7 = vsub.s32 32, %v4162_v47 }
 0x3c8   :  { %v3444_v3 = vsel %vm3361_vm5, %v3443_v26, %v3442_v56  ;;  %v3976_v26 = vsel %vm3972_vm6, %v3956_v46, %v3959_v48  ;;  %v3998_v8 = vadd.s32 1, %v11738_v44  ;;  %v2630_v54 = vsel %vm2619_vm15, nan, %v2629_v23 }
 0x3c9   :  { %v3447_v38 = vsel %vm11709_vm4, %v15609_v4, %v3444_v3  ;;  %vm3997_vm2 = vc.u32 %v11742_v37, %v11737_v32  ;;  %v3979_v48 = vsel %vm3973_vm8, %v3976_v26, %v3978_v57  ;;  %v15440_v58 = vand.u32 2147483647, %v11455_v25 }
 0x3ca   :  { %8172 = vcosq.f32 %v3447_v38  ;;  %v3995_v43 = vmul.u32 %v3988_v39, %v3979_v48  ;;  %v4175_v17 = vshrl.u32 %v15512_v13, %v11757_v7  ;;  %v4054_v4 = vadd.s32 1, %v7618_v51 }
 0x3cb   :  { %8174 = vsinq.f32 %v3447_v38  ;;  %v3999_v38 = vsel %vm3997_vm2, %v3998_v8, %v11738_v44  ;;  %v4174_v35 = vshll.u32 %v15511_v5, %v4162_v47  ;;  %v4178_v60 = vshrl.u32 %v15513_v18, %v11757_v7 }
 0x3cc   :  { %v4000_v62 = vadd.s32 %v3999_v38, %v3995_v43  ;;  %v11773_v42 = vshrl.u32 %v4160_v14, 5  ;;  %v4166_v1 = vshrl.u32 %v15520_v31, %v11757_v7  ;;  %v4169_v22 = vshrl.u32 %v15510_v36, %v11757_v7 }
 0x3cd   :  { %v4172_v50 = vshrl.u32 %v15511_v5, %v11757_v7  ;;  %v4155_v40 = vand.u32 8388607, %v15440_v58  ;;  %v4176_v52 = vor.u32 %v4175_v17, %v4174_v35  ;;  %v4177_v39 = vshll.u32 %v15512_v13, %v4162_v47 }
 0x3ce   :  { %v4165_v41 = vshll.u32 %v15514_v63, %v4162_v47  ;;  %v4168_v9 = vshll.u32 %v15520_v31, %v4162_v47  ;;  %v4171_v20 = vshll.u32 %v15510_v36, %v4162_v47  ;;  %vm4055_vm4 = vcmp.gt.s32.totalorder %v4054_v4, 0 }
 0x3cf   :  { %v4001_v44 = vadd.s32 536870912, %v4000_v62  ;;  %v4179_v21 = vor.u32 %v4178_v60, %v4177_v39  ;;  %v4255_v14 = vand.u32 2139095040, %v11632_v16  ;;  %vm4183_vm5 = vcmp.lt.s32.totalorder %v11773_v42, 4 }
 0x3d0   :  { %v11762_v3 = vpop.f32.mrb[2].mxu0  ;;  %v11765_v6 = vpop.f32.mrb[2].mxu1  ;;  %v4170_v45 = vor.u32 %v4169_v22, %v4168_v9  ;;  %v4173_v59 = vor.u32 %v4172_v50, %v4171_v20  ;;  %v4189_v34 = vsel %vm4183_vm5, %v4176_v52, 920167782  ;;  %v4056_v2 = vsel %vm4055_vm4, %v4054_v4, 0 }
 0x3d1   :  { %15625 = vst [vmem:[#allocation6_spill] sm:$0xff] %v11762_v3  ;;  %15626 = vst [vmem:[#allocation21_spill] sm:$0xff] %v11765_v6  ;;  %v4156_v49 = vor.u32 8388608, %v4155_v40  ;;  %vm4180_vm6 = vcmp.lt.s32.totalorder %v11773_v42, 1  ;;  %vm4182_vm7 = vcmp.lt.s32.totalorder %v11773_v42, 3  ;;  %v4256_v46 = vshrl.u32 %v4255_v14, 23 }
 0x3d2   :  { %v11801_v47 = vshrl.u32 %v4001_v44, 30  ;;  %v4058_v23 = vand.u32 31, %v4056_v2  ;;  %vm4181_vm8 = vcmp.lt.s32.totalorder %v11773_v42, 2  ;;  %v4192_v27 = vsel %vm4180_vm6, %v4170_v45, %v4173_v59  ;;  %v11844_v60 = vpop.f32.mrb[3].mxu0 }
 0x3d3   :  { %v7626_v57 = vadd.s32 4294967169, %v4256_v46  ;;  %v4196_v8 = vshll.u32 %v4156_v49, 8  ;;  %v4164_v17 = vshrl.u32 %v15514_v63, %v11757_v7  ;;  %v15439_v4 = vand.u32 2147483647, %v11570_v61  ;;  %15627 = vst [vmem:[#allocation22_spill] sm:$0xff] %v11844_v60 }
 0x3d4   :  { %v8173_v15 = vpop.eup %8172  ;;  %v4070_v50 = vshll.u32 %v15511_v5, %v4058_v23  ;;  %v4061_v20 = vshll.u32 %v15514_v63, %v4058_v23  ;;  %v4064_v44 = vshll.u32 %v15520_v31, %v4058_v23 }
 0x3d5   :  { %v8175_v19 = vpop.eup %8174  ;;  %v3459_v56 = vxor.u32 2147483648, %v8173_v15  ;;  %v4262_v51 = vadd.s32 1, %v7626_v57 }
 0x3d6   :  { %v3456_v29 = vxor.u32 2147483648, %v8175_v19 }
 0x3d7   :  { %v3460_v33 = vsel %vm3458_vm0, %v3459_v56, %v8175_v19  ;;  %v4190_v19 = vsel %vm4182_vm7, %v4173_v59, %v4189_v34  ;;  %v8307_v56 = vld [vmem:[%s15386_s2 + $0x10] sm:$0xff] }
 0x3d8   :  { %v3457_v0 = vsel %vm3455_vm14, %v8173_v15, %v3456_v29  ;;  %v4193_v15 = vsel %vm4183_vm5, %v4179_v21, 1326507024  ;;  %v4067_v21 = vshll.u32 %v15510_v36, %v4058_v23 }
 0x3d9   :  { %v3461_v28 = vsel %vm3454_vm1, %v3457_v0, %v3460_v33  ;;  %v4194_v29 = vsel %vm4182_vm7, %v4176_v52, %v4193_v15  ;;  %v4003_v33 = vshll.u32 %v11801_v47, 30  ;;  %v4073_v52 = vshll.u32 %v15512_v13, %v4058_v23 }
 0x3da   :  { %v3462_v10 = vsel %vm3451_vm3, nan, %v3461_v28  ;;  %v4195_v0 = vsel %vm4181_vm8, %v4192_v27, %v4194_v29 }
 0x3db   :  { %v7772_v12 = vpack.c.bf16 %v3462_v10, %v2630_v54  ;;  %v11820_v54 = vsub.s32 32, %v4058_v23  ;;  %v11832_v10 = vsub.s32 %v4000_v62, %v4003_v33  ;;  %v4185_v62 = vsel %vm4183_vm5, %v4173_v59, 2102212464 }
 0x3dc   :  { %v4186_v59 = vsel %vm4182_vm7, %v4170_v45, %v4185_v62 }
 0x3dd   :  { %7773 = vmatpush1.bf16.msra.mxu1 %v7772_v12  ;;  %v11834_v12 = vmul.u32.u64.low %v4196_v8, %v4195_v0  ;;  %v11835_v38 = vmul.u32.u64.high %v4196_v8, %v4195_v0, %v11834_v12  ;;  %v4071_v43 = vshrl.u32 %v15512_v13, %v11820_v54  ;;  %v4074_v35 = vshrl.u32 %v15513_v18, %v11820_v54 }
 0x3de   :  { %v4062_v22 = vshrl.u32 %v15520_v31, %v11820_v54  ;;  %v4065_v7 = vshrl.u32 %v15510_v36, %v11820_v54  ;;  %v4068_v40 = vshrl.u32 %v15511_v5, %v11820_v54  ;;  %v4006_v39 = vsub.s32 0, %v11832_v10 }
 0x3df   :  { %v4072_v9 = vor.u32 %v4071_v43, %v4070_v50  ;;  %v4075_v14 = vor.u32 %v4074_v35, %v4073_v52  ;;  %v15438_v43 = vand.u32 2147483647, %v11632_v16  ;;  %v4775_v35 = vand.u32 2139095040, %v11762_v3 }
 0x3e0   :  { %7610 = vmatmul.mubr.msk.f32.vlgmr.msra.gmra.mrb[8].mxu1 %vm3571_vm9, %v11642_v30  ;;  %v4167_v30 = vor.u32 %v4166_v1, %v4165_v41  ;;  %v11848_v1 = vshrl.u32 %v4056_v2, 5  ;;  %v4051_v2 = vand.u32 8388607, %v15439_v4  ;;  %v4063_v15 = vor.u32 %v4062_v22, %v4061_v20 }
 0x3e1   :  { %3921 = vmatprep.mubr.f32.mxu1 %v8341_v11  ;;  %v4066_v46 = vor.u32 %v4065_v7, %v4064_v44 }
 0x3e2   :  { %v4184_v41 = vsel %vm4180_vm6, %v4164_v17, %v4167_v30  ;;  %vm4079_vm10 = vcmp.lt.s32.totalorder %v11848_v1, 4  ;;  %vm4076_vm13 = vcmp.lt.s32.totalorder %v11848_v1, 1  ;;  %vm4078_vm11 = vcmp.lt.s32.totalorder %v11848_v1, 3 }
 0x3e3   :  { %v4089_v23 = vsel %vm4079_vm10, %v4075_v14, 1326507024  ;;  %v4052_v29 = vor.u32 8388608, %v4051_v2  ;;  %vm4077_vm15 = vcmp.lt.s32.totalorder %v11848_v1, 2  ;;  %v4776_v14 = vshrl.u32 %v4775_v35, 23 }
 0x3e4   :  { %7611 = vmatmul.mubr.msk.f32.gmra.mrb[10].mxu1 %vm3571_vm9, %v11650_v53  ;;  %v4188_v53 = vsel %vm4180_vm6, %v4167_v30, %v4170_v45  ;;  %v4069_v30 = vor.u32 %v4068_v40, %v4067_v21  ;;  %v4187_v45 = vsel %vm4181_vm8, %v4184_v41, %v4186_v59  ;;  %v4090_v0 = vsel %vm4078_vm11, %v4072_v9, %v4089_v23 }
 0x3e5   :  { %3927 = vmatprep.mubr.f32.mxu1 %v8341_v11  ;;  %v4191_v26 = vsel %vm4181_vm8, %v4188_v53, %v4190_v19  ;;  %v7615_v53 = vmin.u32 %v4006_v39, %v11832_v10  ;;  %v4085_v19 = vsel %vm4079_vm10, %v4072_v9, 920167782  ;;  %v4203_v42 = vmul.u32 %v4196_v8, %v4187_v45 }
 0x3e6   :  { %v11828_v28 = vmul.u32.u64.low %v4196_v8, %v4191_v26  ;;  %v11829_v48 = vmul.u32.u64.high %v4196_v8, %v4191_v26, %v11828_v28  ;;  %v4084_v26 = vsel %vm4076_vm13, %v4063_v15, %v4066_v46  ;;  %v4086_v57 = vsel %vm4078_vm11, %v4069_v30, %v4085_v19 }
 0x3e7   :  { %v4008_v33 = vclz %v7615_v53  ;;  %v4087_v12 = vsel %vm4077_vm15, %v4084_v26, %v4086_v57  ;;  %v4092_v17 = vshll.u32 %v4052_v29, 8  ;;  %v4259_v9 = vand.u32 8388607, %v15438_v43 }
 0x3e8   :  { %7612 = vmatmul.mubr.msk.f32.gmra.mrb[12].mxu1 %vm3571_vm9, %v8307_v56  ;;  %v4206_v34 = vadd.s32 1, %v11829_v48  ;;  %vm4205_vm12 = vc.u32 %v11835_v38, %v11828_v28  ;;  %v4081_v59 = vsel %vm4079_vm10, %v4069_v30, 2102212464  ;;  %v4060_v19 = vshrl.u32 %v15514_v63, %v11820_v54 }
 0x3e9   :  { %3933 = vmatprep.mubr.f32.mxu1 %v8341_v11  ;;  %v8308_v11 = vld [vmem:[%s15386_s2 + $0x18] sm:$0xff]  ;;  %v7616_v62 = vadd.s32 4294967294, %v4008_v33  ;;  %v11901_v22 = vmul.u32.u64.low %v4092_v17, %v4087_v12  ;;  %v11902_v50 = vmul.u32.u64.high %v4092_v17, %v4087_v12, %v11901_v22  ;;  %v4082_v33 = vsel %vm4078_vm11, %v4066_v46, %v4081_v59  ;;  %s8343_s2 = smov [#allocation2]  }
 0x3ea   :  { %v4207_v27 = vsel %vm4205_vm12, %v4206_v34, %v11829_v48  ;;  %v4080_v57 = vsel %vm4076_vm13, %v4060_v19, %v4063_v15  ;;  %vm3942_vm12 = vcmp.lt.s32.totalorder %v11392_v55, 0  ;;  %vm12058_vm11 = vcmp.le.f32.partialorder %v3940_v24, 0.7853982  ;;  %s7461_s24 = sshll.u32 %s8343_s2, 4  ;;  %s7462_s24 = int_to_ptr.vmem [resolvable:$true] %s7461_s24 }
 0x3eb   :  { %v11893_v48 = vadd.s32 %v4207_v27, %v4203_v42  ;;  %vm7617_vm0 = vcmp.lt.s32.totalorder %v7616_v62, 0  ;;  %v4102_v12 = vadd.s32 1, %v11902_v50  ;;  %s8309_s1 = scalar_lea.vmem %s7462_s24, 128  ;;  %p8314_p1 = scmp.lt.s32.totalorder %s7462_s24, %s7462_s24 }
 0x3ec   :  { %7613 = vmatmul.mubr.msk.f32.gmra.mrb[14].mxu1 %vm3571_vm9, %v8308_v11  ;;  %vm4263_vm9 = vcmp.gt.s32.totalorder %v4262_v51, 0  ;;  %v4088_v11 = vsel %vm4076_vm13, %v4066_v46, %v4069_v30  ;;  %v7646_v30 = vadd.s32 4294967169, %v4776_v14  ;;  %v11944_v35 = vsel %vm7617_vm0, 0, %v7616_v62  ;;  %p8310_p0 = scmp.ne.s32.totalorder %s7462_s24, %s8309_s1  ;;  %p8315_p2 = scmp.lt.s32.totalorder %s8309_s1, %s8309_s1 }
 0x3ed   :  { %v4264_v49 = vsel %vm4263_vm9, %v4262_v51, 0  ;;  %v4091_v8 = vsel %vm4077_vm15, %v4088_v11, %v4090_v0  ;;  %v4209_v52 = vadd.s32 536870912, %v11893_v48  ;;  %v4260_v46 = vor.u32 8388608, %v4259_v9  ;;  %v11961_v9 = vpop.f32.mrb[3].mxu1 }
 0x3ee   :  { %v4266_v56 = vand.u32 31, %v4264_v49  ;;  %v11910_v39 = vmul.u32.u64.low %v4092_v17, %v4091_v8  ;;  %v11911_v41 = vmul.u32.u64.high %v4092_v17, %v4091_v8, %v11910_v39  ;;  %v11921_v34 = vshrl.u32 %v4264_v49, 5  ;;  %p8316_p3 = por %p8315_p2, %p8314_p1 }
 0x3ef   :  { %v11930_v29 = vshrl.u32 %v4209_v52, 30  ;;  %v4782_v0 = vadd.s32 1, %v7646_v30  ;;  %v4300_v19 = vshll.u32 %v4260_v46, 8 }
 0x3f0   :  { %v11891_v51 = vsub.s32 32, %v4266_v56  ;;  %v4278_v44 = vshll.u32 %v15511_v5, %v4266_v56  ;;  %v4281_v21 = vshll.u32 %v15512_v13, %v4266_v56  ;;  %v4269_v45 = vshll.u32 %v15514_v63, %v4266_v56  ;;  %p8317_p4 = pnand %p8316_p3, %p8310_p0 }
 0x3f1   :  { %v4272_v26 = vshll.u32 %v15520_v31, %v4266_v56  ;;  %v4275_v49 = vshll.u32 %v15510_v36, %v4266_v56  ;;  %vm4287_vm1 = vcmp.lt.s32.totalorder %v11921_v34, 4  ;;  %v4211_v15 = vshll.u32 %v11930_v29, 30 }
 0x3f2   :  { %v4279_v7 = vshrl.u32 %v15512_v13, %v11891_v51  ;;  %v4282_v40 = vshrl.u32 %v15513_v18, %v11891_v51  ;;  %v4270_v20 = vshrl.u32 %v15520_v31, %v11891_v51  ;;  %v4273_v2 = vshrl.u32 %v15510_v36, %v11891_v51 }
 0x3f3   :  { %v4276_v53 = vshrl.u32 %v15511_v5, %v11891_v51  ;;  %vm4101_vm14 = vc.u32 %v11911_v41, %v11901_v22  ;;  %vm4284_vm2 = vcmp.lt.s32.totalorder %v11921_v34, 1  ;;  %vm4286_vm3 = vcmp.lt.s32.totalorder %v11921_v34, 3 }
 0x3f4   :  { %v4280_v23 = vor.u32 %v4279_v7, %v4278_v44  ;;  %v4283_v27 = vor.u32 %v4282_v40, %v4281_v21  ;;  %v4271_v42 = vor.u32 %v4270_v20, %v4269_v45  ;;  %v4274_v54 = vor.u32 %v4273_v2, %v4272_v26 }
 0x3f5   :  { %v4277_v11 = vor.u32 %v4276_v53, %v4275_v49  ;;  %v4083_v7 = vsel %vm4077_vm15, %v4080_v57, %v4082_v33  ;;  %vm4783_vm4 = vcmp.gt.s32.totalorder %v4782_v0, 0  ;;  %v4103_v1 = vsel %vm4101_vm14, %v4102_v12, %v11902_v50 }
 0x3f6   :  { %v4293_v8 = vsel %vm4287_vm1, %v4280_v23, 920167782  ;;  %v4297_v56 = vsel %vm4287_vm1, %v4283_v27, 1326507024  ;;  %v4292_v40 = vsel %vm4284_vm2, %v4271_v42, %v4274_v54  ;;  %v4784_v20 = vsel %vm4783_vm4, %v4782_v0, 0 }
 0x3f7   :  { %v4294_v62 = vsel %vm4286_vm3, %v4277_v11, %v4293_v8  ;;  %v4296_v52 = vsel %vm4284_vm2, %v4274_v54, %v4277_v11  ;;  %v4298_v39 = vsel %vm4286_vm3, %v4280_v23, %v4297_v56  ;;  %v4099_v44 = vmul.u32 %v4092_v17, %v4083_v7 }
 0x3f8   :  { %vm4285_vm5 = vcmp.lt.s32.totalorder %v11921_v34, 2  ;;  %v4016_v21 = vsub.s32 4294967266, %v11944_v35  ;;  %v11971_v2 = vsub.s32 %v11893_v48, %v4211_v15  ;;  %v4786_v45 = vand.u32 31, %v4784_v20 }
 0x3f9   :  { %v4295_v14 = vsel %vm4285_vm5, %v4292_v40, %v4294_v62  ;;  %v4299_v59 = vsel %vm4285_vm5, %v4296_v52, %v4298_v39  ;;  %v4104_v53 = vadd.s32 %v4103_v1, %v4099_v44  ;;  %v4983_v50 = vand.u32 2139095040, %v11765_v6 }
 0x3fa   :  { %v11974_v23 = vmul.u32.u64.low %v4300_v19, %v4299_v59  ;;  %v11975_v17 = vmul.u32.u64.high %v4300_v19, %v4299_v59, %v11974_v23  ;;  %v11977_v27 = vmul.u32.u64.low %v4300_v19, %v4295_v14  ;;  %v11978_v26 = vmul.u32.u64.high %v4300_v19, %v4295_v14, %v11977_v27 }
 0x3fb   :  { %v4012_v49 = vsub.s32 32, %v11944_v35  ;;  %v4017_v30 = vadd.s32 127, %v4016_v21  ;;  %v4214_v57 = vsub.s32 0, %v11971_v2  ;;  %v4105_v33 = vadd.s32 536870912, %v4104_v53 }
 0x3fc   :  { %v11983_v48 = vsub.s32 32, %v4786_v45  ;;  %v3996_v0 = vadd.s32 %v11737_v32, %v11742_v37  ;;  %v4984_v12 = vshrl.u32 %v4983_v50, 23  ;;  %v4289_v8 = vsel %vm4287_vm1, %v4277_v11, 2102212464 }
 0x3fd   :  { %v4018_v15 = vshll.u32 %v4017_v30, 23  ;;  %v4268_v46 = vshrl.u32 %v15514_v63, %v11891_v51  ;;  %v7623_v7 = vmin.u32 %v4214_v57, %v11971_v2  ;;  %v11992_v40 = vshrl.u32 %v4105_v33, 30 }
 0x3fe   :  { %v4014_v56 = vshrl.u32 %v3996_v0, %v4012_v49  ;;  %v15437_v62 = vand.u32 2147483647, %v11762_v3  ;;  %v4799_v52 = vshrl.u32 %v15512_v13, %v11983_v48  ;;  %v4290_v37 = vsel %vm4286_vm3, %v4274_v54, %v4289_v8 }
 0x3ff   :  { %v4288_v32 = vsel %vm4284_vm2, %v4268_v46, %v4271_v42  ;;  %v4802_v11 = vshrl.u32 %v15513_v18, %v11983_v48  ;;  %v7654_v39 = vadd.s32 4294967169, %v4984_v12  ;;  %vm4309_vm6 = vc.u32 %v11975_v17, %v11977_v27 }
 0x400   :  { %v4310_v51 = vadd.s32 1, %v11978_v26  ;;  %v12006_v1 = vshrl.u32 %v4784_v20, 5  ;;  %v4798_v44 = vshll.u32 %v15511_v5, %v4786_v45  ;;  %v4790_v21 = vshrl.u32 %v15520_v31, %v11983_v48 }
 0x401   :  { %v4793_v42 = vshrl.u32 %v15510_v36, %v11983_v48  ;;  %v4796_v54 = vshrl.u32 %v15511_v5, %v11983_v48  ;;  %v4801_v14 = vshll.u32 %v15512_v13, %v4786_v45  ;;  %v4107_v59 = vshll.u32 %v11992_v40, 30 }
 0x402   :  { %v4291_v50 = vsel %vm4285_vm5, %v4288_v32, %v4290_v37  ;;  %v4789_v20 = vshll.u32 %v15514_v63, %v4786_v45  ;;  %v4800_v23 = vor.u32 %v4799_v52, %v4798_v44  ;;  %v4792_v49 = vshll.u32 %v15520_v31, %v4786_v45 }
 0x403   :  { %v4795_v30 = vshll.u32 %v15510_v36, %v4786_v45  ;;  %v4803_v57 = vor.u32 %v4802_v11, %v4801_v14  ;;  %v4990_v33 = vadd.s32 1, %v7654_v39  ;;  %v4013_v0 = vshll.u32 %v11832_v10, %v11944_v35 }
 0x404   :  { %v4216_v12 = vclz %v7623_v7  ;;  %v4311_v8 = vsel %vm4309_vm6, %v4310_v51, %v11978_v26  ;;  %v4779_v34 = vand.u32 8388607, %v15437_v62  ;;  %v4791_v46 = vor.u32 %v4790_v21, %v4789_v20 }
 0x405   :  { %v4794_v52 = vor.u32 %v4793_v42, %v4792_v49  ;;  %v4797_v32 = vor.u32 %v4796_v54, %v4795_v30  ;;  %vm4807_vm7 = vcmp.lt.s32.totalorder %v12006_v1, 4  ;;  %v4019_v45 = vor.u32 4788187, %v4018_v15 }
 0x406   :  { %v4307_v37 = vmul.u32 %v4300_v19, %v4291_v50  ;;  %v4813_v11 = vsel %vm4807_vm7, %v4800_v23, 920167782  ;;  %vm4991_vm8 = vcmp.gt.s32.totalorder %v4990_v33, 0  ;;  %v4015_v10 = vor.u32 %v4014_v56, %v4013_v0 }
 0x407   :  { %v4026_v35 = vsub.s32 4, %v11801_v47  ;;  %v12034_v7 = vsub.s32 %v4104_v53, %v4107_v59  ;;  %v4817_v26 = vsel %vm4807_vm7, %v4803_v57, 1326507024  ;;  %vm4804_vm9 = vcmp.lt.s32.totalorder %v12006_v1, 1 }
 0x408   :  { %v4312_v39 = vadd.s32 %v4311_v8, %v4307_v37  ;;  %vm4806_vm10 = vcmp.lt.s32.totalorder %v12006_v1, 3  ;;  %v4992_v51 = vsel %vm4991_vm8, %v4990_v33, 0  ;;  %v7624_v15 = vadd.s32 4294967294, %v4216_v12 }
 0x409   :  { %v4780_v19 = vor.u32 8388608, %v4779_v34  ;;  %v4812_v44 = vsel %vm4804_vm9, %v4791_v46, %v4794_v52  ;;  %v4814_v56 = vsel %vm4806_vm10, %v4797_v32, %v4813_v11  ;;  %v4020_v53 = vand.u32 2147483647, %v4019_v45 }
 0x40a   :  { %v4816_v21 = vsel %vm4804_vm9, %v4794_v52, %v4797_v32  ;;  %v4818_v42 = vsel %vm4806_vm10, %v4800_v23, %v4817_v26  ;;  %v4027_v54 = vsel %vm3942_vm12, %v4026_v35, %v11801_v47  ;;  %v4110_v14 = vsub.s32 0, %v12034_v7 }
 0x40b   :  { %vm4805_vm13 = vcmp.lt.s32.totalorder %v12006_v1, 2  ;;  %v4994_v59 = vand.u32 31, %v4992_v51  ;;  %v4022_v50 = vcvt.s32.f32 %v4015_v10  ;;  %v4313_v20 = vadd.s32 536870912, %v4312_v39 }
 0x40c   :  { %v4815_v49 = vsel %vm4805_vm13, %v4812_v44, %v4814_v56  ;;  %vm7625_vm15 = vcmp.lt.s32.totalorder %v7624_v15, 0  ;;  %v4819_v47 = vsel %vm4805_vm13, %v4816_v21, %v4818_v42  ;;  %v4820_v23 = vshll.u32 %v4780_v19, 8 }
 0x40d   :  { %v4023_v57 = vmul.f32 %v4022_v50, %v4020_v53  ;;  %v4029_v33 = vsel %vm12058_vm11, 0, %v4027_v54  ;;  %v7619_v0 = vmin.u32 %v4110_v14, %v12034_v7  ;;  %v12071_v34 = vsub.s32 32, %v4994_v59 }
 0x40e   :  { %v12067_v12 = vmul.u32.u64.low %v4820_v23, %v4815_v49  ;;  %v12068_v8 = vmul.u32.u64.high %v4820_v23, %v4815_v49, %v12067_v12  ;;  %v12073_v24 = vsel %vm7625_vm15, 0, %v7624_v15  ;;  %v12075_v45 = vshrl.u32 %v4313_v20, 30 }
 0x40f   :  { %v12077_v37 = vmul.u32.u64.low %v4820_v23, %v4819_v47  ;;  %v12078_v11 = vmul.u32.u64.high %v4820_v23, %v4819_v47, %v12077_v37  ;;  %v12080_v10 = vadd.s32 3, %v4029_v33  ;;  %v4204_v35 = vadd.s32 %v11828_v28, %v11835_v38 }
 0x410   :  { %v4788_v26 = vshrl.u32 %v15514_v63, %v11983_v48  ;;  %v4809_v19 = vsel %vm4807_vm7, %v4797_v32, 2102212464  ;;  %v4024_v44 = vxor.u32 2147483648, %v4023_v57  ;;  %v4224_v15 = vsub.s32 4294967266, %v12073_v24 }
 0x411   :  { %v4112_v56 = vclz %v7619_v0  ;;  %v5007_v53 = vshrl.u32 %v15512_v13, %v12071_v34  ;;  %v4315_v21 = vshll.u32 %v12075_v45, 30  ;;  %v15442_v28 = vand.u32 2147483647, %v11765_v6 }
 0x412   :  { %v4808_v42 = vsel %vm4804_vm9, %v4788_v26, %v4791_v46  ;;  %v5010_v38 = vshrl.u32 %v15513_v18, %v12071_v34  ;;  %v4810_v48 = vsel %vm4806_vm10, %v4794_v52, %v4809_v19  ;;  %v12099_v32 = vshrl.u32 %v4992_v51, 5 }
 0x413   :  { %v4998_v54 = vshrl.u32 %v15520_v31, %v12071_v34  ;;  %v5006_v14 = vshll.u32 %v15511_v5, %v4994_v59  ;;  %v5001_v50 = vshrl.u32 %v15510_v36, %v12071_v34  ;;  %v5004_v46 = vshrl.u32 %v15511_v5, %v12071_v34 }
 0x414   :  { %v5009_v20 = vshll.u32 %v15512_v13, %v4994_v59  ;;  %v4879_v49 = vand.u32 2139095040, %v11844_v60  ;;  %v7620_v47 = vadd.s32 4294967294, %v4112_v56  ;;  %v4830_v52 = vadd.s32 1, %v12068_v8 }
 0x415   :  { %v4997_v51 = vshll.u32 %v15514_v63, %v4994_v59  ;;  %v5008_v33 = vor.u32 %v5007_v53, %v5006_v14  ;;  %vm4829_vm0 = vc.u32 %v12078_v11, %v12067_v12  ;;  %v5000_v0 = vshll.u32 %v15520_v31, %v4994_v59 }
 0x416   :  { %v5003_v37 = vshll.u32 %v15510_v36, %v4994_v59  ;;  %v5011_v26 = vor.u32 %v5010_v38, %v5009_v20  ;;  %v12118_v62 = vsub.s32 %v4312_v39, %v4315_v21  ;;  %v4811_v56 = vsel %vm4805_vm13, %v4808_v42, %v4810_v48 }
 0x417   :  { %v4987_v43 = vand.u32 8388607, %v15442_v28  ;;  %v4999_v4 = vor.u32 %v4998_v54, %v4997_v51  ;;  %v5002_v53 = vor.u32 %v5001_v50, %v5000_v0  ;;  %vm5015_vm1 = vcmp.lt.s32.totalorder %v12099_v32, 4 }
 0x418   :  { %v5005_v14 = vor.u32 %v5004_v46, %v5003_v37  ;;  %v4880_v58 = vshrl.u32 %v4879_v49, 23  ;;  %v4025_v59 = vsel %vm3942_vm12, %v4024_v44, %v4023_v57  ;;  %v4220_v38 = vsub.s32 32, %v12073_v24 }
 0x419   :  { %v4831_v39 = vsel %vm4829_vm0, %v4830_v52, %v12068_v8  ;;  %v5021_v1 = vsel %vm5015_vm1, %v5008_v33, 920167782  ;;  %v4225_v21 = vadd.s32 127, %v4224_v15  ;;  %vm7621_vm14 = vcmp.lt.s32.totalorder %v7620_v47, 0 }
 0x41a   :  { %v4827_v42 = vmul.u32 %v4820_v23, %v4811_v56  ;;  %v5025_v48 = vsel %vm5015_vm1, %v5011_v26, 1326507024  ;;  %v4318_v54 = vsub.s32 0, %v12118_v62  ;;  %vm5012_vm2 = vcmp.lt.s32.totalorder %v12099_v32, 1 }
 0x41b   :  { %vm5014_vm3 = vcmp.lt.s32.totalorder %v12099_v32, 3  ;;  %v7650_v57 = vadd.s32 4294967169, %v4880_v58  ;;  %v4988_v50 = vor.u32 8388608, %v4987_v43  ;;  %v5020_v8 = vsel %vm5012_vm2, %v4999_v4, %v5002_v53 }
 0x41c   :  { %v12136_v44 = vadd.s32 %v4831_v39, %v4827_v42  ;;  %v5022_v15 = vsel %vm5014_vm3, %v5005_v14, %v5021_v1  ;;  %v4222_v23 = vshrl.u32 %v4204_v35, %v4220_v38  ;;  %v5024_v46 = vsel %vm5012_vm2, %v5002_v53, %v5005_v14 }
 0x41d   :  { %v5026_v20 = vsel %vm5014_vm3, %v5008_v33, %v5025_v48  ;;  %v4886_v49 = vadd.s32 1, %v7650_v57  ;;  %v4028_v58 = vsel %vm12058_vm11, %v11392_v55, %v4025_v59  ;;  %vm4150_vm4 = vcmp.lt.s32.totalorder %v11455_v25, 0 }
 0x41e   :  { %v4226_v43 = vshll.u32 %v4225_v21, 23  ;;  %vm5013_vm5 = vcmp.lt.s32.totalorder %v12099_v32, 2  ;;  %v4221_v52 = vshll.u32 %v11971_v2, %v12073_v24  ;;  %v12154_v35 = vsel %vm7621_vm14, 0, %v7620_v47 }
 0x41f   :  { %v7627_v51 = vmin.u32 %v4318_v54, %v12118_v62  ;;  %v5023_v33 = vsel %vm5013_vm5, %v5020_v8, %v5022_v15  ;;  %v4833_v0 = vadd.s32 536870912, %v12136_v44  ;;  %v5027_v30 = vsel %vm5013_vm5, %v5024_v46, %v5026_v20 }
 0x420   :  { %v12162_v37 = vshll.u32 %v4988_v50, 8  ;;  %vm4887_vm6 = vcmp.gt.s32.totalorder %v4886_v49, 0  ;;  %8176 = vcosq.f32 %v4028_v58  ;;  %v12165_v26 = vand.u32 3, %v12080_v10 }
 0x421   :  { %v4223_v2 = vor.u32 %v4222_v23, %v4221_v52  ;;  %v4234_v24 = vsub.s32 4, %v11930_v29  ;;  %v4227_v56 = vor.u32 4788187, %v4226_v43  ;;  %v4888_v39 = vsel %vm4887_vm6, %v4886_v49, 0 }
 0x422   :  { %v12171_v59 = vmul.u32.u64.low %v12162_v37, %v5023_v33  ;;  %v12172_v38 = vmul.u32.u64.high %v12162_v37, %v5023_v33, %v12171_v59  ;;  %v4120_v1 = vsub.s32 4294967266, %v12154_v35  ;;  %v5017_v21 = vsel %vm5015_vm1, %v5005_v14, 2102212464 }
 0x423   :  { %v12179_v10 = vmul.u32.u64.low %v12162_v37, %v5027_v30  ;;  %v12180_v42 = vmul.u32.u64.high %v12162_v37, %v5027_v30, %v12179_v10  ;;  %v4320_v48 = vclz %v7627_v51  ;;  %v12182_v54 = vshrl.u32 %v4833_v0, 30 }
 0x424   :  { %15632 = vst [vmem:[#allocation13_spill] sm:$0xff] %v12171_v59  ;;  %v4996_v57 = vshrl.u32 %v15514_v63, %v12071_v34  ;;  %v4890_v50 = vand.u32 31, %v4888_v39  ;;  %8178 = vsinq.f32 %v4028_v58  ;;  %v12189_v8 = vsel %vm4150_vm4, %v4234_v24, %v11930_v29 }
 0x425   :  { %15633 = vst [vmem:[#allocation23_spill] sm:$0xff] %v12180_v42  ;;  %v4100_v14 = vadd.s32 %v11901_v22, %v11911_v41  ;;  %v15441_v15 = vand.u32 2147483647, %v11844_v60  ;;  %v5018_v46 = vsel %vm5014_vm3, %v5002_v53, %v5017_v21  ;;  %v5087_v34 = vand.u32 2139095040, %v11961_v9 }
 0x426   :  { %v5016_v23 = vsel %vm5012_vm2, %v4996_v57, %v4999_v4  ;;  %v12198_v20 = vsub.s32 32, %v4890_v50  ;;  %v4228_v49 = vand.u32 2147483647, %v4227_v56  ;;  %v4230_v58 = vcvt.s32.f32 %v4223_v2 }
 0x427   :  { %v4116_v29 = vsub.s32 32, %v12154_v35  ;;  %v4121_v43 = vadd.s32 127, %v4120_v1  ;;  %v7628_v52 = vadd.s32 4294967294, %v4320_v48  ;;  %v4835_v22 = vshll.u32 %v12182_v54, 30 }
 0x428   :  { %v4894_v41 = vshrl.u32 %v15520_v31, %v12198_v20  ;;  %v4897_v4 = vshrl.u32 %v15510_v36, %v12198_v20  ;;  %v5019_v53 = vsel %vm5013_vm5, %v5016_v23, %v5018_v46  ;;  %v4883_v51 = vand.u32 8388607, %v15441_v15 }
 0x429   :  { %v4900_v33 = vshrl.u32 %v15511_v5, %v12198_v20  ;;  %v4903_v0 = vshrl.u32 %v15512_v13, %v12198_v20  ;;  %v5038_v30 = vadd.s32 1, %v12172_v38  ;;  %v4893_v2 = vshll.u32 %v15514_v63, %v4890_v50 }
 0x42a   :  { %v4896_v24 = vshll.u32 %v15520_v31, %v4890_v50  ;;  %v5088_v56 = vshrl.u32 %v5087_v34, 23  ;;  %v12218_v1 = vpop.eup %8176  ;;  %v15634_v32 = vand.u32 2147483647, %v11455_v25  ;;  %vm5037_vm8 = vc.u32 %v12180_v42, %v12171_v59 }
 0x42b   :  { %v12116_v19 = vpop.f32.mrb[4].mxu0  ;;  %v12168_v47 = vpop.f32.mrb[4].mxu1  ;;  %v12228_v10 = vshrl.u32 %v4888_v39, 5  ;;  %v4899_v48 = vshll.u32 %v15510_v36, %v4890_v50  ;;  %v4902_v57 = vshll.u32 %v15511_v5, %v4890_v50  ;;  %v12232_v23 = vor.u32 %v4894_v41, %v4893_v2 }
 0x42c   :  { %15630 = vst [vmem:[#allocation8_spill] sm:$0xff] %v12116_v19  ;;  %15631 = vst [vmem:[#allocation9_spill] sm:$0xff] %v12168_v47  ;;  %vm12222_vm7 = vcmp.le.f32.partialorder %v15634_v32, 0.7853982  ;;  %v12234_v46 = vor.u32 %v4897_v4, %v4896_v24  ;;  %v4905_v34 = vshll.u32 %v15512_v13, %v4890_v50  ;;  %v4906_v32 = vshrl.u32 %v15513_v18, %v12198_v20 }
 0x42d   :  { %v4231_v15 = vmul.f32 %v4230_v58, %v4228_v49  ;;  %v4117_v28 = vshll.u32 %v12034_v7, %v12154_v35  ;;  %v4901_v60 = vor.u32 %v4900_v33, %v4899_v48  ;;  %v4904_v39 = vor.u32 %v4903_v0, %v4902_v57  ;;  %v12284_v33 = vpop.f32.mrb[5].mxu1 }
 0x42e   :  { %v4118_v6 = vshrl.u32 %v4100_v14, %v4116_v29  ;;  %v5039_v59 = vsel %vm5037_vm8, %v5038_v30, %v12172_v38  ;;  %v4907_v42 = vor.u32 %v4906_v32, %v4905_v34  ;;  %v7658_v3 = vadd.s32 4294967169, %v5088_v56  ;;  %v12242_v41 = vpop.eup %8178  ;;  %15638 = vst [vmem:[#allocation16_spill] sm:$0xff] %v12284_v33 }
 0x42f   :  { %v4122_v4 = vshll.u32 %v4121_v43, 23  ;;  %v12245_v2 = vsub.s32 %v12136_v44, %v4835_v22  ;;  %v5035_v50 = vmul.u32 %v12162_v37, %v5019_v53  ;;  %vm4908_vm9 = vcmp.lt.s32.totalorder %v12228_v10, 1 }
 0x430   :  { %vm7629_vm10 = vcmp.lt.s32.totalorder %v7628_v52, 0  ;;  %v4884_v49 = vor.u32 8388608, %v4883_v51  ;;  %vm4911_vm12 = vcmp.lt.s32.totalorder %v12228_v10, 4  ;;  %v4916_v7 = vsel %vm4908_vm9, %v12232_v23, %v12234_v46 }
 0x431   :  { %v12254_v35 = vadd.s32 %v5039_v59, %v5035_v50  ;;  %vm4910_vm13 = vcmp.lt.s32.totalorder %v12228_v10, 3  ;;  %v4917_v44 = vsel %vm4911_vm12, %v4904_v39, 920167782  ;;  %v4920_v37 = vsel %vm4908_vm9, %v12234_v46, %v4901_v60 }
 0x432   :  { %vm4909_vm11 = vcmp.lt.s32.totalorder %v12228_v10, 2  ;;  %v4918_v38 = vsel %vm4910_vm13, %v4901_v60, %v4917_v44  ;;  %v4921_v14 = vsel %vm4911_vm12, %v4907_v42, 1326507024  ;;  %v5094_v58 = vadd.s32 1, %v7658_v3 }
 0x433   :  { %vm4046_vm15 = vcmp.lt.s32.totalorder %v11570_v61, 0  ;;  %v12268_v59 = vsel %vm7629_vm10, 0, %v7628_v52  ;;  %v4838_v29 = vsub.s32 0, %v12245_v2  ;;  %v4919_v43 = vsel %vm4909_vm11, %v4916_v7, %v4918_v38  ;;  %v12282_v52 = vpop.f32.mrb[5].mxu0  ;;  %v12307_v50 = vpop.f32.mrb[6].mxu1 }
 0x434   :  { %v4922_v22 = vsel %vm4910_vm13, %v4904_v39, %v4921_v14  ;;  %v4237_v53 = vsel %vm12222_vm7, 0, %v12189_v8  ;;  %v4123_v51 = vor.u32 4788187, %v4122_v4  ;;  %v12280_v42 = vshll.u32 %v4884_v49, 8  ;;  %15637 = vst [vmem:[#allocation24_spill] sm:$0xff] %v12282_v52  ;;  %v12305_v4 = vpop.f32.mrb[6].mxu0 }
 0x435   :  { %v4923_v3 = vsel %vm4909_vm11, %v4920_v37, %v4922_v22  ;;  %v4232_v0 = vxor.u32 2147483648, %v4231_v15  ;;  %v4119_v30 = vor.u32 %v4118_v6, %v4117_v28  ;;  %v5041_v24 = vadd.s32 536870912, %v12254_v35  ;;  %15642 = vst [vmem:[#allocation15_spill] sm:$0xff] %v12307_v50 }
 0x436   :  { %vm5095_vm0 = vcmp.gt.s32.totalorder %v5094_v58, 0  ;;  %v4328_v56 = vsub.s32 4294967266, %v12268_v59  ;;  %v12289_v48 = vmul.u32.u64.low %v12280_v42, %v4919_v43  ;;  %v12290_v8 = vmul.u32.u64.high %v12280_v42, %v4919_v43, %v12289_v48 }
 0x437   :  { %v5096_v57 = vsel %vm5095_vm0, %v5094_v58, 0  ;;  %vm4036_vm1 = vcmp.eq.s32.totalorder %v12165_v26, 0  ;;  %v15639_v34 = vand.u32 2147483647, %v11570_v61  ;;  %v7647_v6 = vmin.u32 %v4838_v29, %v12245_v2 }
 0x438   :  { %v12302_v28 = vmul.u32.u64.low %v12280_v42, %v4923_v3  ;;  %v12303_v39 = vmul.u32.u64.high %v12280_v42, %v4923_v3, %v12302_v28  ;;  %v4241_v49 = vadd.s32 3, %v4237_v53  ;;  %v4124_v7 = vand.u32 2147483647, %v4123_v51 }
 0x439   :  { %vm12296_vm14 = vcmp.le.f32.partialorder %v15639_v34, 0.7853982  ;;  %v4130_v44 = vsub.s32 4, %v11992_v40  ;;  %v4324_v37 = vsub.s32 32, %v12268_v59  ;;  %v4040_v38 = vxor.u32 2147483648, %v12218_v1 }
 0x43a   :  { %v4233_v14 = vsel %vm4150_vm4, %v4232_v0, %v4231_v15  ;;  %v12314_v58 = vshrl.u32 %v5041_v24, 30  ;;  %v5098_v29 = vand.u32 31, %v5096_v57  ;;  %v4126_v43 = vcvt.s32.f32 %v4119_v30 }
 0x43b   :  { %v4308_v22 = vadd.s32 %v11977_v27, %v11975_v17  ;;  %v4329_v3 = vadd.s32 127, %v4328_v56  ;;  %v4913_v53 = vsel %vm4911_vm12, %v4901_v60, 2102212464  ;;  %v4037_v51 = vxor.u32 2147483648, %v12242_v41 }
 0x43c   :  { %vm4039_vm2 = vcmp.eq.s32.totalorder %v12165_v26, 2  ;;  %v4840_v34 = vclz %v7647_v6  ;;  %v4892_v28 = vshrl.u32 %v15514_v63, %v12198_v20  ;;  %v4236_v15 = vsel %vm12222_vm7, %v11455_v25, %v4233_v14 }
 0x43d   :  { %v12327_v0 = vmul.f32 %v4126_v43, %v4124_v7  ;;  %v12332_v17 = vsel %vm4046_vm15, %v4130_v44, %v11992_v40  ;;  %v4326_v60 = vshrl.u32 %v4308_v22, %v4324_v37  ;;  %v5043_v27 = vshll.u32 %v12314_v58, 30 }
 0x43e   :  { %v4912_v30 = vsel %vm4908_vm9, %v4892_v28, %v12232_v23  ;;  %v4914_v20 = vsel %vm4910_vm13, %v12234_v46, %v4913_v53  ;;  %v12341_v21 = vsub.s32 32, %v5098_v29  ;;  %v4041_v24 = vsel %vm4039_vm2, %v4040_v38, %v12242_v41 }
 0x43f   :  { %v12344_v56 = vand.u32 3, %v4241_v49  ;;  %v4330_v6 = vshll.u32 %v4329_v3, 23  ;;  %v4934_v40 = vadd.s32 1, %v12290_v8  ;;  %8180 = vcosq.f32 %v4236_v15 }
 0x440   :  { %v4325_v7 = vshll.u32 %v12118_v62, %v12268_v59  ;;  %v7648_v44 = vadd.s32 4294967294, %v4840_v34  ;;  %vm4933_vm3 = vc.u32 %v12303_v39, %v12289_v48  ;;  %v4038_v23 = vsel %vm4036_vm1, %v12218_v1, %v4037_v51 }
 0x441   :  { %8182 = vsinq.f32 %v4236_v15  ;;  %v4133_v46 = vsel %vm12296_vm14, 0, %v12332_v17  ;;  %v4915_v41 = vsel %vm4909_vm11, %v4912_v30, %v4914_v20  ;;  %vm4035_vm4 = vcmp.lt.s32.totalorder %v12165_v26, 2 }
 0x442   :  { %v4128_v62 = vxor.u32 2147483648, %v12327_v0  ;;  %v4327_v59 = vor.u32 %v4326_v60, %v4325_v7  ;;  %v12362_v49 = vsub.s32 %v12254_v35, %v5043_v27  ;;  %v5111_v37 = vshrl.u32 %v15512_v13, %v12341_v21 }
 0x443   :  { %v4331_v1 = vor.u32 4788187, %v4330_v6  ;;  %v4935_v38 = vsel %vm4933_vm3, %v4934_v40, %v12290_v8  ;;  %v15452_v14 = vand.u32 2147483647, %v11961_v9  ;;  %v5114_v10 = vshrl.u32 %v15513_v18, %v12341_v21 }
 0x444   :  { %vm7649_vm5 = vcmp.lt.s32.totalorder %v7648_v44, 0  ;;  %v4931_v43 = vmul.u32 %v12280_v42, %v4915_v41  ;;  %v12371_v22 = vshrl.u32 %v5096_v57, 5  ;;  %v5110_v3 = vshll.u32 %v15511_v5, %v5098_v29 }
 0x445   :  { %v5102_v35 = vshrl.u32 %v15520_v31, %v12341_v21  ;;  %v5105_v53 = vshrl.u32 %v15510_v36, %v12341_v21  ;;  %v5108_v8 = vshrl.u32 %v15511_v5, %v12341_v21  ;;  %v5113_v51 = vshll.u32 %v15512_v13, %v5098_v29 }
 0x446   :  { %v5046_v34 = vsub.s32 0, %v12362_v49  ;;  %v12382_v28 = vadd.s32 %v4935_v38, %v4931_v43  ;;  %v5112_v42 = vor.u32 %v5111_v37, %v5110_v3  ;;  %v5607_v57 = vand.u32 2139095040, %v12116_v19 }
 0x447   :  { %vm4032_vm6 = vweird.f32 %v11392_v55  ;;  %v5101_v15 = vshll.u32 %v15514_v63, %v5098_v29  ;;  %v5104_v17 = vshll.u32 %v15520_v31, %v5098_v29  ;;  %v5107_v60 = vshll.u32 %v15510_v36, %v5098_v29 }
 0x448   :  { %v5115_v27 = vor.u32 %v5114_v10, %v5113_v51  ;;  %v4332_v30 = vand.u32 2147483647, %v4331_v1  ;;  %v4334_v20 = vcvt.s32.f32 %v4327_v59  ;;  %v12390_v6 = vsel %vm7649_vm5, 0, %v7648_v44 }
 0x449   :  { %v5091_v40 = vand.u32 8388607, %v15452_v14  ;;  %v12394_v7 = vor.u32 %v5102_v35, %v5101_v15  ;;  %v12396_v41 = vor.u32 %v5105_v53, %v5104_v17  ;;  %v5109_v37 = vor.u32 %v5108_v8, %v5107_v60  ;;  %v12399_v38 = vpop.eup %8180  ;;  %v12416_v8 = vpop.f32.mrb[7].mxu0 }
 0x44a   :  { %vm5119_vm7 = vcmp.lt.s32.totalorder %v12371_v22, 4  ;;  %vm4247_vm8 = vcmp.eq.s32.totalorder %v12344_v56, 2  ;;  %vm4254_vm9 = vcmp.lt.s32.totalorder %v11632_v16, 0  ;;  %v7655_v29 = vmin.u32 %v5046_v34, %v12362_v49  ;;  %15643 = vst [vmem:[#allocation17_spill] sm:$0xff] %v12416_v8 }
 0x44b   :  { %v4937_v44 = vadd.s32 536870912, %v12382_v28  ;;  %v5125_v59 = vsel %vm5119_vm7, %v5112_v42, 920167782  ;;  %v5608_v1 = vshrl.u32 %v5607_v57, 23  ;;  %v12407_v10 = vpop.eup %8182  ;;  %v4042_v43 = vsel %vm4035_vm4, %v4038_v23, %v4041_v24 }
 0x44c   :  { %v4129_v3 = vsel %vm4046_vm15, %v4128_v62, %v12327_v0  ;;  %v4137_v35 = vadd.s32 3, %v4133_v46  ;;  %v5129_v53 = vsel %vm5119_vm7, %v5115_v27, 1326507024  ;;  %v4335_v51 = vmul.f32 %v4334_v20, %v4332_v30 }
 0x44d   :  { %v4848_v34 = vsub.s32 4294967266, %v12390_v6  ;;  %vm5116_vm10 = vcmp.lt.s32.totalorder %v12371_v22, 1  ;;  %vm5118_vm12 = vcmp.lt.s32.totalorder %v12371_v22, 3  ;;  %v5092_v57 = vor.u32 8388608, %v5091_v40 }
 0x44e   :  { %v5124_v26 = vsel %vm5116_vm10, %v12394_v7, %v12396_v41  ;;  %v5126_v0 = vsel %vm5118_vm12, %v5109_v37, %v5125_v59  ;;  %v7678_v24 = vadd.s32 4294967169, %v5608_v1  ;;  %v5048_v23 = vclz %v7655_v29 }
 0x44f   :  { %v12427_v46 = vshrl.u32 %v4937_v44, 30  ;;  %v5128_v62 = vsel %vm5116_vm10, %v12396_v41, %v5109_v37  ;;  %v5130_v15 = vsel %vm5118_vm12, %v5112_v42, %v5129_v53  ;;  %v4248_v17 = vxor.u32 2147483648, %v12399_v38 }
 0x450   :  { %v15644_v60 = vand.u32 2147483647, %v11632_v16  ;;  %v4338_v30 = vsub.s32 4, %v12075_v45  ;;  %vm5117_vm11 = vcmp.lt.s32.totalorder %v12371_v22, 2  ;;  %v5614_v20 = vadd.s32 1, %v7678_v24 }
 0x451   :  { %v12445_v40 = vsel %vm4032_vm6, nan, %v4042_v43  ;;  %v4132_v42 = vsel %vm12296_vm14, %v11570_v61, %v4129_v3  ;;  %v12450_v29 = vand.u32 3, %v4137_v35  ;;  %v5127_v44 = vsel %vm5117_vm11, %v5124_v26, %v5126_v0 }
 0x452   :  { %vm12437_vm13 = vcmp.le.f32.partialorder %v15644_v60, 0.7853982  ;;  %15647 = vst [vmem:[#allocation7_spill] sm:$0xff] %v12445_v40  ;;  %v4336_v59 = vxor.u32 2147483648, %v4335_v51  ;;  %v4849_v1 = vadd.s32 127, %v4848_v34  ;;  %v5131_v53 = vsel %vm5117_vm11, %v5128_v62, %v5130_v15 }
 0x453   :  { %v12456_v60 = vshll.u32 %v5092_v57, 8  ;;  %v7656_v43 = vadd.s32 4294967294, %v5048_v23  ;;  %v4939_v24 = vshll.u32 %v12427_v46, 30  ;;  %vm5615_vm15 = vcmp.gt.s32.totalorder %v5614_v20, 0 }
 0x454   :  { %v12463_v32 = vsel %vm4247_vm8, %v4248_v17, %v12407_v10  ;;  %v12468_v3 = vsel %vm4254_vm9, %v4338_v30, %v12075_v45  ;;  %8184 = vcosq.f32 %v4132_v42  ;;  %v5616_v0 = vsel %vm5615_vm15, %v5614_v20, 0 }
 0x455   :  { %v12471_v35 = vmul.u32.u64.low %v12456_v60, %v5127_v44  ;;  %v12472_v34 = vmul.u32.u64.high %v12456_v60, %v5127_v44, %v12471_v35  ;;  %v12476_v57 = vmul.u32.u64.low %v12456_v60, %v5131_v53  ;;  %v12477_v26 = vmul.u32.u64.high %v12456_v60, %v5131_v53, %v12476_v57  ;;  %v15648_v44 = vld [vmem:[#allocation6_spill] sm:$0xff] }
 0x456   :  { %8186 = vsinq.f32 %v4132_v42  ;;  %v4337_v23 = vsel %vm4254_vm9, %v4336_v59, %v4335_v51  ;;  %v4844_v62 = vsub.s32 32, %v12390_v6  ;;  %v4850_v15 = vshll.u32 %v4849_v1, 23 }
 0x457   :  { %v4828_v45 = vadd.s32 %v12067_v12, %v12078_v11  ;;  %vm7657_vm0 = vcmp.lt.s32.totalorder %v7656_v43, 0  ;;  %v12485_v17 = vsub.s32 %v12382_v28, %v4939_v24  ;;  %v5618_v30 = vand.u32 31, %v5616_v0 }
 0x458   :  { %v5100_v20 = vshrl.u32 %v15514_v63, %v12341_v21  ;;  %v5121_v42 = vsel %vm5119_vm7, %v5109_v37, 2102212464  ;;  %v15451_v51 = vand.u32 2147483647, %v12116_v19  ;;  %v12496_v59 = vsel %vm12437_vm13, %v11632_v16, %v4337_v23 }
 0x459   :  { %v4845_v12 = vshll.u32 %v12245_v2, %v12390_v6  ;;  %v12500_v11 = vsub.s32 32, %v5618_v30  ;;  %v5815_v28 = vand.u32 2139095040, %v12168_v47  ;;  %v4846_v1 = vshrl.u32 %v4828_v45, %v4844_v62 }
 0x45a   :  { %v12503_v53 = vor.u32 4788187, %v4850_v15  ;;  %v12505_v21 = vsel %vm7657_vm0, 0, %v7656_v43  ;;  %v5120_v37 = vsel %vm5116_vm10, %v5100_v20, %v12394_v7  ;;  %v4942_v24 = vsub.s32 0, %v12485_v17 }
 0x45b   :  { %v5122_v57 = vsel %vm5118_vm12, %v12396_v41, %v5121_v42  ;;  %v5622_v2 = vshrl.u32 %v15520_v31, %v12500_v11  ;;  %v5625_v6 = vshrl.u32 %v15510_v36, %v12500_v11  ;;  %v5142_v23 = vadd.s32 1, %v12472_v34 }
 0x45c   :  { %v5611_v43 = vand.u32 8388607, %v15451_v51  ;;  %v5628_v7 = vshrl.u32 %v15511_v5, %v12500_v11  ;;  %v5631_v62 = vshrl.u32 %v15512_v13, %v12500_v11  ;;  %vm5141_vm1 = vc.u32 %v12477_v26, %v12471_v35 }
 0x45d   :  { %v5621_v41 = vshll.u32 %v15514_v63, %v5618_v30  ;;  %v5624_v15 = vshll.u32 %v15520_v31, %v5618_v30  ;;  %v5816_v45 = vshrl.u32 %v5815_v28, 23  ;;  %v5123_v20 = vsel %vm5117_vm11, %v5120_v37, %v5122_v57 }
 0x45e   :  { %v12531_v42 = vshrl.u32 %v5616_v0, 5  ;;  %v5627_v51 = vshll.u32 %v15510_v36, %v5618_v30  ;;  %v5630_v14 = vshll.u32 %v15511_v5, %v5618_v30  ;;  %v12535_v55 = vpop.eup %8184  ;;  %vm4774_vm14 = vcmp.lt.s32.totalorder %v15648_v44, 0 }
 0x45f   :  { %v12538_v40 = vor.u32 %v5622_v2, %v5621_v41  ;;  %v12540_v8 = vor.u32 %v5625_v6, %v5624_v15  ;;  %v5633_v50 = vshll.u32 %v15512_v13, %v5618_v30  ;;  %v5634_v22 = vshrl.u32 %v15513_v18, %v12500_v11 }
 0x460   :  { %v12545_v28 = vpop.eup %8186  ;;  %v5143_v0 = vsel %vm5141_vm1, %v5142_v23, %v12472_v34  ;;  %v5612_v37 = vor.u32 8388608, %v5611_v43  ;;  %v5629_v57 = vor.u32 %v5628_v7, %v5627_v51  ;;  %v5632_v19 = vor.u32 %v5631_v62, %v5630_v14 }
 0x461   :  { %vm4244_vm2 = vcmp.eq.s32.totalorder %v12344_v56, 0  ;;  %8188 = vcosq.f32 %v12496_v59  ;;  %v5139_v2 = vmul.u32 %v12456_v60, %v5123_v20  ;;  %v5635_v6 = vor.u32 %v5634_v22, %v5633_v50 }
 0x462   :  { %v7686_v41 = vadd.s32 4294967169, %v5816_v45  ;;  %v4847_v15 = vor.u32 %v4846_v1, %v4845_v12  ;;  %v4852_v30 = vand.u32 2147483647, %v12503_v53  ;;  %v5056_v16 = vsub.s32 4294967266, %v12505_v21 }
 0x463   :  { %vm5636_vm3 = vcmp.lt.s32.totalorder %v12531_v42, 1  ;;  %v15649_v34 = vand.u32 2147483647, %v15648_v44  ;;  %v7651_v14 = vmin.u32 %v4942_v24, %v12485_v17  ;;  %v12561_v23 = vadd.s32 %v5143_v0, %v5139_v2 }
 0x464   :  { %vm5639_vm5 = vcmp.lt.s32.totalorder %v12531_v42, 4  ;;  %v5644_v50 = vsel %vm5636_vm3, %v12538_v40, %v12540_v8  ;;  %vm5638_vm6 = vcmp.lt.s32.totalorder %v12531_v42, 3  ;;  %v5648_v12 = vsel %vm5636_vm3, %v12540_v8, %v5629_v57 }
 0x465   :  { %vm12556_vm4 = vcmp.le.f32.partialorder %v15649_v34, 0.7853982  ;;  %v5645_v60 = vsel %vm5639_vm5, %v5632_v19, 920167782  ;;  %v12574_v1 = vshll.u32 %v5612_v37, 8  ;;  %vm4243_vm7 = vcmp.lt.s32.totalorder %v12344_v56, 2 }
 0x466   :  { %vm5637_vm8 = vcmp.lt.s32.totalorder %v12531_v42, 2  ;;  %v5646_v53 = vsel %vm5638_vm6, %v5629_v57, %v5645_v60  ;;  %v5649_v24 = vsel %vm5639_vm5, %v5635_v6, 1326507024  ;;  %v5822_v43 = vadd.s32 1, %v7686_v41  ;;  %v12594_v6 = vpop.f32.mrb[7].mxu1 }
 0x467   :  { %v4854_v7 = vcvt.s32.f32 %v4847_v15  ;;  %v5057_v62 = vadd.s32 127, %v5056_v16  ;;  %v5647_v45 = vsel %vm5637_vm8, %v5644_v50, %v5646_v53  ;;  %v5650_v20 = vsel %vm5638_vm6, %v5632_v19, %v5649_v24  ;;  %15652 = vst [vmem:[#allocation18_spill] sm:$0xff] %v12594_v6  ;;  %v15656_v53 = vld [vmem:[#allocation13_spill] sm:$0xff] }
 0x468   :  { %v5145_v22 = vadd.s32 536870912, %v12561_v23  ;;  %v5651_v0 = vsel %vm5637_vm8, %v5648_v12, %v5650_v20  ;;  %v12590_v37 = vmul.u32.u64.low %v12574_v1, %v5647_v45  ;;  %v12591_v2 = vmul.u32.u64.high %v12574_v1, %v5647_v45, %v12590_v37 }
 0x469   :  { %vm4140_vm9 = vcmp.eq.s32.totalorder %v12450_v29, 0  ;;  %vm4143_vm10 = vcmp.eq.s32.totalorder %v12450_v29, 2  ;;  %8190 = vsinq.f32 %v12496_v59  ;;  %v4855_v16 = vmul.f32 %v4854_v7, %v4852_v30  ;;  %v15655_v30 = vld [vmem:[#allocation23_spill] sm:$0xff] }
 0x46a   :  { %v15653_v19 = vsub.s32 4, %v12182_v54  ;;  %vm5823_vm12 = vcmp.gt.s32.totalorder %v5822_v43, 0  ;;  %vm4240_vm11 = vweird.f32 %v11455_v25  ;;  %v5052_v15 = vsub.s32 32, %v12505_v21 }
 0x46b   :  { %v4944_v34 = vclz %v7651_v14  ;;  %v12607_v50 = vmul.u32.u64.low %v12574_v1, %v5651_v0  ;;  %v12608_v60 = vmul.u32.u64.high %v12574_v1, %v5651_v0, %v12607_v50  ;;  %v15654_v12 = vxor.u32 2147483648, %v12407_v10  ;;  %v12622_v7 = vpop.eup %8188 }
 0x46c   :  { %v4859_v41 = vsel %vm4774_vm14, %v15653_v19, %v12182_v54  ;;  %v4341_v54 = vsel %vm12437_vm13, 0, %v12468_v3  ;;  %v5036_v24 = vadd.s32 %v15656_v53, %v15655_v30  ;;  %v5641_v14 = vsel %vm5639_vm5, %v5629_v57, 2102212464 }
 0x46d   :  { %v4246_v59 = vsel %vm4244_vm2, %v12399_v38, %v15654_v12  ;;  %vm4139_vm15 = vcmp.lt.s32.totalorder %v12450_v29, 2  ;;  %v5058_v45 = vshll.u32 %v5057_v62, 23  ;;  %v12625_v10 = vshrl.u32 %v5145_v22, 30  ;;  %v15657_v22 = vld [vmem:[#allocation21_spill] sm:$0xff] }
 0x46e   :  { %v5620_v38 = vshrl.u32 %v15514_v63, %v12500_v11  ;;  %v5824_v20 = vsel %vm5823_vm12, %v5822_v43, 0  ;;  %v4141_v27 = vxor.u32 2147483648, %v12545_v28  ;;  %v4144_v3 = vxor.u32 2147483648, %v12535_v55 }
 0x46f   :  { %v4856_v0 = vxor.u32 2147483648, %v4855_v16  ;;  %v4861_v57 = vsel %vm12556_vm4, 0, %v4859_v41  ;;  %v5054_v19 = vshrl.u32 %v5036_v24, %v5052_v15  ;;  %v7652_v50 = vadd.s32 4294967294, %v4944_v34 }
 0x470   :  { %v5640_v62 = vsel %vm5636_vm3, %v5620_v38, %v12538_v40  ;;  %v5642_v11 = vsel %vm5638_vm6, %v12540_v8, %v5641_v14  ;;  %v4250_v43 = vsel %vm4243_vm7, %v4246_v59, %v12463_v32  ;;  %vm4982_vm13 = vcmp.lt.s32.totalorder %v15657_v22, 0 }
 0x471   :  { %v5662_v12 = vadd.s32 1, %v12591_v2  ;;  %v5826_v30 = vand.u32 31, %v5824_v20  ;;  %v5053_v41 = vshll.u32 %v12362_v49, %v12505_v21  ;;  %v5059_v15 = vor.u32 4788187, %v5058_v45 }
 0x472   :  { %v5147_v34 = vshll.u32 %v12625_v10, 30  ;;  %vm5661_vm0 = vc.u32 %v12608_v60, %v12590_v37  ;;  %v4345_v40 = vadd.s32 3, %v4341_v54  ;;  %v4857_v8 = vsel %vm4774_vm14, %v4856_v0, %v4855_v16 }
 0x473   :  { %v4865_v56 = vadd.s32 3, %v4861_v57  ;;  %v5643_v32 = vsel %vm5637_vm8, %v5640_v62, %v5642_v11  ;;  %v4142_v59 = vsel %vm4140_vm9, %v12535_v55, %v4141_v27  ;;  %v4145_v49 = vsel %vm4143_vm10, %v4144_v3, %v12545_v28  ;;  %v12660_v53 = vpop.eup %8190 }
 0x474   :  { %v5055_v21 = vor.u32 %v5054_v19, %v5053_v41  ;;  %vm7653_vm1 = vcmp.lt.s32.totalorder %v7652_v50, 0  ;;  %v12664_v54 = vsel %vm4240_vm11, nan, %v4250_v43  ;;  %v5066_v16 = vsub.s32 4, %v12314_v58 }
 0x475   :  { %15658 = vst [vmem:[#allocation10_spill] sm:$0xff] %v12664_v54  ;;  %v5663_v42 = vsel %vm5661_vm0, %v5662_v12, %v12591_v2  ;;  %v12668_v24 = vsub.s32 32, %v5826_v30  ;;  %v4860_v55 = vsel %vm12556_vm4, %v15648_v44, %v4857_v8  ;;  %v5060_v14 = vand.u32 2147483647, %v5059_v15 }
 0x476   :  { %v12674_v28 = vsub.s32 %v12561_v23, %v5147_v34  ;;  %v5659_v45 = vmul.u32 %v12574_v1, %v5643_v32  ;;  %v12679_v25 = vsel %vm4139_vm15, %v4142_v59, %v4145_v49  ;;  %v12681_v38 = vand.u32 3, %v4345_v40 }
 0x477   :  { %v12683_v27 = vand.u32 3, %v4865_v56  ;;  %v12685_v2 = vsel %vm7653_vm1, 0, %v7652_v50  ;;  %v4349_v3 = vxor.u32 2147483648, %v12660_v53  ;;  %v4352_v51 = vxor.u32 2147483648, %v12622_v7 }
 0x478   :  { %v5062_v0 = vcvt.s32.f32 %v5055_v21  ;;  %v12689_v57 = vadd.s32 %v5663_v42, %v5659_v45  ;;  %8192 = vcosq.f32 %v4860_v55  ;;  %v12694_v29 = vsel %vm4982_vm13, %v5066_v16, %v12314_v58 }
 0x479   :  { %v4932_v23 = vadd.s32 %v12289_v48, %v12303_v39  ;;  %v5839_v1 = vshrl.u32 %v15512_v13, %v12668_v24  ;;  %v4952_v50 = vsub.s32 4294967266, %v12685_v2  ;;  %v5150_v62 = vsub.s32 0, %v12674_v28 }
 0x47a   :  { %v5063_v19 = vmul.f32 %v5062_v0, %v5060_v14  ;;  %v15459_v11 = vand.u32 2147483647, %v12168_v47  ;;  %v5830_v43 = vshrl.u32 %v15520_v31, %v12668_v24  ;;  %v5838_v12 = vshll.u32 %v15511_v5, %v5826_v30 }
 0x47b   :  { %v5842_v58 = vshrl.u32 %v15513_v18, %v12668_v24  ;;  %v5711_v48 = vand.u32 2139095040, %v12282_v52  ;;  %vm4348_vm14 = vcmp.eq.s32.totalorder %v12681_v38, 0  ;;  %vm4351_vm2 = vcmp.eq.s32.totalorder %v12681_v38, 2 }
 0x47c   :  { %v15659_v39 = vand.u32 2147483647, %v15657_v22  ;;  %v5665_v15 = vadd.s32 536870912, %v12689_v57  ;;  %v12718_v34 = vshrl.u32 %v5824_v20, 5  ;;  %v5833_v40 = vshrl.u32 %v15510_v36, %v12668_v24 }
 0x47d   :  { %v5836_v8 = vshrl.u32 %v15511_v5, %v12668_v24  ;;  %v4948_v56 = vsub.s32 32, %v12685_v2  ;;  %v5829_v32 = vshll.u32 %v15514_v63, %v5826_v30  ;;  %v5840_v59 = vor.u32 %v5839_v1, %v5838_v12 }
 0x47e   :  { %vm12713_vm3 = vcmp.le.f32.partialorder %v15659_v39, 0.7853982  ;;  %v5841_v49 = vshll.u32 %v15512_v13, %v5826_v30  ;;  %v4953_v21 = vadd.s32 127, %v4952_v50  ;;  %v5819_v16 = vand.u32 8388607, %v15459_v11 }
 0x47f   :  { %v5832_v20 = vshll.u32 %v15520_v31, %v5826_v30  ;;  %v5835_v42 = vshll.u32 %v15510_v36, %v5826_v30  ;;  %vm4347_vm4 = vcmp.lt.s32.totalorder %v12681_v38, 2  ;;  %v7659_v14 = vmin.u32 %v5150_v62, %v12674_v28 }
 0x480   :  { %v5831_v45 = vor.u32 %v5830_v43, %v5829_v32  ;;  %v5843_v0 = vor.u32 %v5842_v58, %v5841_v49  ;;  %v5712_v39 = vshrl.u32 %v5711_v48, 23  ;;  %v12733_v54 = vshrl.u32 %v5665_v15, 30 }
 0x481   :  { %v5834_v1 = vor.u32 %v5833_v40, %v5832_v20  ;;  %v5837_v12 = vor.u32 %v5836_v8, %v5835_v42  ;;  %vm5847_vm5 = vcmp.lt.s32.totalorder %v12718_v34, 4  ;;  %8194 = vsinq.f32 %v4860_v55 }
 0x482   :  { %v5064_v50 = vxor.u32 2147483648, %v5063_v19  ;;  %v4949_v11 = vshll.u32 %v12485_v17, %v12685_v2  ;;  %v5853_v30 = vsel %vm5847_vm5, %v5840_v59, 920167782  ;;  %v4950_v6 = vshrl.u32 %v4932_v23, %v4948_v56  ;;  %v12742_v48 = vpop.eup %8192 }
 0x483   :  { %v4954_v47 = vshll.u32 %v4953_v21, 23  ;;  %v5820_v62 = vor.u32 8388608, %v5819_v16  ;;  %v7682_v43 = vadd.s32 4294967169, %v5712_v39  ;;  %v5152_v15 = vclz %v7659_v14 }
 0x484   :  { %vm5844_vm6 = vcmp.lt.s32.totalorder %v12718_v34, 1  ;;  %vm5846_vm7 = vcmp.lt.s32.totalorder %v12718_v34, 3  ;;  %v5857_v55 = vsel %vm5847_vm5, %v5843_v0, 1326507024  ;;  %v5667_v17 = vshll.u32 %v12733_v54, 30 }
 0x485   :  { %v5852_v2 = vsel %vm5844_vm6, %v5831_v45, %v5834_v1  ;;  %v5854_v23 = vsel %vm5846_vm7, %v5837_v12, %v5853_v30  ;;  %v5718_v40 = vadd.s32 1, %v7682_v43  ;;  %v4350_v8 = vsel %vm4348_vm14, %v12622_v7, %v4349_v3 }
 0x486   :  { %v4353_v56 = vsel %vm4351_vm2, %v4352_v51, %v12660_v53  ;;  %v5065_v32 = vsel %vm4982_vm13, %v5064_v50, %v5063_v19  ;;  %v5069_v49 = vsel %vm12713_vm3, 0, %v12694_v29  ;;  %v4951_v21 = vor.u32 %v4950_v6, %v4949_v11 }
 0x487   :  { %v12740_v58 = vpop.f32.mrb[8].mxu0  ;;  %vm5845_vm8 = vcmp.lt.s32.totalorder %v12718_v34, 2  ;;  %v5856_v16 = vsel %vm5844_vm6, %v5834_v1, %v5837_v12  ;;  %v5858_v7 = vsel %vm5846_vm7, %v5840_v59, %v5857_v55  ;;  %v4955_v3 = vor.u32 4788187, %v4954_v47 }
 0x488   :  { %15662 = vst [vmem:[#allocation12_spill] sm:$0xff] %v12740_v58  ;;  %v7660_v20 = vadd.s32 4294967294, %v5152_v15  ;;  %v5855_v53 = vsel %vm5845_vm8, %v5852_v2, %v5854_v23  ;;  %vm5719_vm9 = vcmp.gt.s32.totalorder %v5718_v40, 0  ;;  %v12773_v51 = vsel %vm4347_vm4, %v4350_v8, %v4353_v56 }
 0x489   :  { %v12775_v29 = vadd.s32 3, %v5069_v49  ;;  %v12778_v6 = vsub.s32 %v12689_v57, %v5667_v17  ;;  %v12780_v19 = vshll.u32 %v5820_v62, 8  ;;  %v5068_v47 = vsel %vm12713_vm3, %v15657_v22, %v5065_v32 }
 0x48a   :  { %v5859_v11 = vsel %vm5845_vm8, %v5856_v16, %v5858_v7  ;;  %v15463_v59 = vand.u32 2147483647, %v12282_v52  ;;  %v5720_v42 = vsel %vm5719_vm9, %v5718_v40, 0  ;;  %v5828_v38 = vshrl.u32 %v15514_v63, %v12668_v24 }
 0x48b   :  { %v5849_v14 = vsel %vm5847_vm5, %v5837_v12, 2102212464  ;;  %v12793_v57 = vmul.u32.u64.low %v12780_v19, %v5855_v53  ;;  %v12794_v0 = vmul.u32.u64.high %v12780_v19, %v5855_v53, %v12793_v57  ;;  %v12797_v39 = vpop.eup %8194  ;;  %v4956_v41 = vand.u32 2147483647, %v4955_v3 }
 0x48c   :  { %v4958_v50 = vcvt.s32.f32 %v4951_v21  ;;  %vm7661_vm10 = vcmp.lt.s32.totalorder %v7660_v20, 0  ;;  %v5722_v30 = vand.u32 31, %v5720_v42  ;;  %v5670_v62 = vsub.s32 0, %v12778_v6 }
 0x48d   :  { %v5848_v43 = vsel %vm5844_vm6, %v5828_v38, %v5831_v45  ;;  %v12803_v24 = vmul.u32.u64.low %v12780_v19, %v5859_v11  ;;  %v12804_v15 = vmul.u32.u64.high %v12780_v19, %v5859_v11, %v12803_v24  ;;  %v5850_v12 = vsel %vm5846_vm7, %v5834_v1, %v5849_v14 }
 0x48e   :  { %v5715_v55 = vand.u32 8388607, %v15463_v59  ;;  %v5723_v17 = vsub.s32 32, %v5722_v30  ;;  %v5919_v2 = vand.u32 2139095040, %v12284_v33  ;;  %8196 = vcosq.f32 %v5068_v47 }
 0x48f   :  { %v4962_v45 = vsub.s32 4, %v12427_v46  ;;  %v4959_v8 = vmul.f32 %v4958_v50, %v4956_v41  ;;  %v12814_v56 = vsel %vm7661_vm10, 0, %v7660_v20  ;;  %v7679_v49 = vmin.u32 %v5670_v62, %v12778_v6  ;;  %v15663_v62 = vld [vmem:[#allocation22_spill] sm:$0xff] }
 0x490   :  { %v5726_v32 = vshrl.u32 %v15520_v31, %v5723_v17  ;;  %v5729_v1 = vshrl.u32 %v15510_v36, %v5723_v17  ;;  %v5851_v21 = vsel %vm5845_vm8, %v5848_v43, %v5850_v12  ;;  %v5732_v16 = vshrl.u32 %v15511_v5, %v5723_v17 }
 0x491   :  { %v5735_v7 = vshrl.u32 %v15512_v13, %v5723_v17  ;;  %v5716_v3 = vor.u32 8388608, %v5715_v55  ;;  %v5725_v53 = vshll.u32 %v15514_v63, %v5722_v30  ;;  %v5728_v11 = vshll.u32 %v15520_v31, %v5722_v30 }
 0x492   :  { %v5920_v20 = vshrl.u32 %v5919_v2, 23  ;;  %v5870_v38 = vadd.s32 1, %v12794_v0  ;;  %v5721_v14 = vshrl.u32 %v5720_v42, 5  ;;  %v5731_v41 = vshll.u32 %v15510_v36, %v5722_v30 }
 0x493   :  { %v5734_v50 = vshll.u32 %v15511_v5, %v5722_v30  ;;  %vm4878_vm12 = vcmp.lt.s32.totalorder %v15663_v62, 0  ;;  %v5727_v34 = vor.u32 %v5726_v32, %v5725_v53  ;;  %v5730_v43 = vor.u32 %v5729_v1, %v5728_v11 }
 0x494   :  { %v5737_v24 = vshll.u32 %v15512_v13, %v5722_v30  ;;  %v5738_v12 = vshrl.u32 %v15513_v18, %v5723_v17  ;;  %8198 = vsinq.f32 %v5068_v47  ;;  %vm5869_vm11 = vc.u32 %v12804_v15, %v12793_v57 }
 0x495   :  { %v5733_v55 = vor.u32 %v5732_v16, %v5731_v41  ;;  %v5736_v2 = vor.u32 %v5735_v7, %v5734_v50  ;;  %v4960_v59 = vxor.u32 2147483648, %v4959_v8  ;;  %v5160_v42 = vsub.s32 4294967266, %v12814_v56 }
 0x496   :  { %v5739_v40 = vor.u32 %v5738_v12, %v5737_v24  ;;  %v7690_v23 = vadd.s32 4294967169, %v5920_v20  ;;  %vm4868_vm15 = vcmp.eq.s32.totalorder %v12683_v27, 0  ;;  %vm4871_vm13 = vcmp.eq.s32.totalorder %v12683_v27, 2 }
 0x497   :  { %v15664_v32 = vand.u32 2147483647, %v15663_v62  ;;  %v5672_v47 = vclz %v7679_v49  ;;  %v5867_v1 = vmul.u32 %v12780_v19, %v5851_v21  ;;  %vm5740_vm1 = vcmp.lt.s32.totalorder %v5721_v14, 1 }
 0x498   :  { %v5756_v16 = vshll.u32 %v5716_v3, 8  ;;  %v5871_v7 = vsel %vm5869_vm11, %v5870_v38, %v12794_v0  ;;  %v5724_v53 = vshrl.u32 %v15514_v63, %v5723_v17  ;;  %vm5743_vm14 = vcmp.lt.s32.totalorder %v5721_v14, 4  ;;  %v12846_v20 = vpop.eup %8196 }
 0x499   :  { %vm12838_vm0 = vcmp.le.f32.partialorder %v15664_v32, 0.7853982  ;;  %v5748_v11 = vsel %vm5740_vm1, %v5727_v34, %v5730_v43  ;;  %vm5742_vm2 = vcmp.lt.s32.totalorder %v5721_v14, 3  ;;  %v5745_v41 = vsel %vm5743_vm14, %v5733_v55, 2102212464 }
 0x49a   :  { %v5749_v50 = vsel %vm5743_vm14, %v5736_v2, 920167782  ;;  %v5752_v24 = vsel %vm5740_vm1, %v5730_v43, %v5733_v55  ;;  %vm5741_vm3 = vcmp.lt.s32.totalorder %v5721_v14, 2  ;;  %v5753_v12 = vsel %vm5743_vm14, %v5739_v40, 1326507024 }
 0x49b   :  { %v5750_v49 = vsel %vm5742_vm2, %v5733_v55, %v5749_v50  ;;  %v5926_v19 = vadd.s32 1, %v7690_v23  ;;  %v12849_v21 = vadd.s32 %v5871_v7, %v5867_v1  ;;  %v5744_v0 = vsel %vm5740_vm1, %v5724_v53, %v5727_v34 }
 0x49c   :  { %v5751_v17 = vsel %vm5741_vm3, %v5748_v11, %v5750_v49  ;;  %v5754_v3 = vsel %vm5742_vm2, %v5736_v2, %v5753_v12  ;;  %vm5086_vm4 = vcmp.lt.s32.totalorder %v11961_v9, 0  ;;  %v5746_v38 = vsel %vm5742_vm2, %v5730_v43, %v5745_v41 }
 0x49d   :  { %v5755_v32 = vsel %vm5741_vm3, %v5752_v24, %v5754_v3  ;;  %v12855_v58 = vmul.u32.u64.low %v5756_v16, %v5751_v17  ;;  %v12856_v52 = vmul.u32.u64.high %v5756_v16, %v5751_v17, %v12855_v58  ;;  %v4961_v40 = vsel %vm4878_vm12, %v4960_v59, %v4959_v8 }
 0x49e   :  { %v4963_v23 = vsel %vm4878_vm12, %v4962_v45, %v12427_v46  ;;  %v7680_v34 = vadd.s32 4294967294, %v5672_v47  ;;  %vm5927_vm5 = vcmp.gt.s32.totalorder %v5926_v19, 0  ;;  %v5161_v55 = vadd.s32 127, %v5160_v42  ;;  %v12869_v53 = vpop.eup %8198 }
 0x49f   :  { %v12864_v2 = vmul.u32.u64.low %v5756_v16, %v5755_v32  ;;  %v12865_v1 = vmul.u32.u64.high %v5756_v16, %v5755_v32, %v12864_v2  ;;  %v5928_v43 = vsel %vm5927_vm5, %v5926_v19, 0  ;;  %v12872_v11 = vand.u32 3, %v12775_v29 }
 0x4a0   :  { %v5873_v59 = vadd.s32 536870912, %v12849_v21  ;;  %v5747_v8 = vsel %vm5741_vm3, %v5744_v0, %v5746_v38  ;;  %v5930_v41 = vand.u32 31, %v5928_v43  ;;  %v15668_v46 = vxor.u32 2147483648, %v12797_v39 }
 0x4a1   :  { %v15669_v42 = vxor.u32 2147483648, %v12742_v48  ;;  %v4965_v29 = vsel %vm12838_vm0, 0, %v4963_v23  ;;  %v5766_v14 = vadd.s32 1, %v12856_v52  ;;  %v4964_v50 = vsel %vm12838_vm0, %v15663_v62, %v4961_v40 }
 0x4a2   :  { %v12881_v45 = vsel %vm4868_vm15, %v12742_v48, %v15668_v46  ;;  %v5156_v24 = vsub.s32 32, %v12814_v56  ;;  %v5170_v49 = vsub.s32 4, %v12625_v10  ;;  %vm7681_vm6 = vcmp.lt.s32.totalorder %v7680_v34, 0 }
 0x4a3   :  { %v12888_v47 = vsel %vm4871_vm13, %v15669_v42, %v12797_v39  ;;  %v5162_v12 = vshll.u32 %v5161_v55, 23  ;;  %v5763_v48 = vmul.u32 %v5756_v16, %v5747_v8  ;;  %vm5765_vm7 = vc.u32 %v12865_v1, %v12855_v58 }
 0x4a4   :  { %v5931_v39 = vsub.s32 32, %v5930_v41  ;;  %v5140_v19 = vadd.s32 %v12471_v35, %v12477_v26  ;;  %v12902_v0 = vshrl.u32 %v5873_v59, 30  ;;  %v5767_v17 = vsel %vm5765_vm7, %v5766_v14, %v12856_v52 }
 0x4a5   :  { %v15467_v30 = vand.u32 2147483647, %v12284_v33  ;;  %v12907_v38 = vadd.s32 3, %v4965_v29  ;;  %v12909_v32 = vsel %vm7681_vm6, 0, %v7680_v34  ;;  %v5768_v16 = vadd.s32 %v5767_v17, %v5763_v48 }
 0x4a6   :  { %8200 = vcosq.f32 %v4964_v50  ;;  %v5158_v23 = vshrl.u32 %v5140_v19, %v5156_v24  ;;  %v12915_v35 = vsel %vm5086_vm4, %v5170_v49, %v12625_v10  ;;  %v12917_v26 = vor.u32 4788187, %v5162_v12 }
 0x4a7   :  { %v5769_v52 = vadd.s32 536870912, %v5768_v16  ;;  %v5934_v55 = vshrl.u32 %v15520_v31, %v5931_v39  ;;  %v5937_v2 = vshrl.u32 %v15510_v36, %v5931_v39  ;;  %v5680_v34 = vsub.s32 4294967266, %v12909_v32 }
 0x4a8   :  { %v5875_v59 = vshll.u32 %v12902_v0, 30  ;;  %v5923_v8 = vand.u32 8388607, %v15467_v30  ;;  %v5940_v46 = vshrl.u32 %v15511_v5, %v5931_v39  ;;  %v12926_v42 = vshrl.u32 %v5928_v43, 5 }
 0x4a9   :  { %v5933_v10 = vshll.u32 %v15514_v63, %v5930_v41  ;;  %v5936_v29 = vshll.u32 %v15520_v31, %v5930_v41  ;;  %v5943_v14 = vshrl.u32 %v15512_v13, %v5931_v39  ;;  %v5939_v24 = vshll.u32 %v15510_v36, %v5930_v41 }
 0x4aa   :  { %v5942_v49 = vshll.u32 %v15511_v5, %v5930_v41  ;;  %v5945_v12 = vshll.u32 %v15512_v13, %v5930_v41  ;;  %v5946_v48 = vshrl.u32 %v15513_v18, %v5931_v39  ;;  %v5157_v19 = vshll.u32 %v12674_v28, %v12814_v56 }
 0x4ab   :  { %v12937_v17 = vshrl.u32 %v5769_v52, 30  ;;  %v5935_v43 = vor.u32 %v5934_v55, %v5933_v10  ;;  %v5938_v30 = vor.u32 %v5937_v2, %v5936_v29  ;;  %vm5076_vm8 = vcmp.eq.s32.totalorder %v12872_v11, 0 }
 0x4ac   :  { %vm5079_vm9 = vcmp.eq.s32.totalorder %v12872_v11, 2  ;;  %8202 = vsinq.f32 %v4964_v50  ;;  %v5941_v3 = vor.u32 %v5940_v46, %v5939_v24  ;;  %v5944_v40 = vor.u32 %v5943_v14, %v5942_v49 }
 0x4ad   :  { %v15670_v33 = vand.u32 2147483647, %v11961_v9  ;;  %v5159_v62 = vor.u32 %v5158_v23, %v5157_v19  ;;  %v5164_v28 = vand.u32 2147483647, %v12917_v26  ;;  %v5676_v56 = vsub.s32 32, %v12909_v32  ;;  %v15673_v19 = vld [vmem:[#allocation20_spill] sm:$0xff] }
 0x4ae   :  { %v5681_v52 = vadd.s32 127, %v5680_v34  ;;  %v12950_v55 = vsub.s32 %v12849_v21, %v5875_v59  ;;  %v5924_v2 = vor.u32 8388608, %v5923_v8  ;;  %vm5948_vm12 = vcmp.lt.s32.totalorder %v12926_v42, 1 }
 0x4af   :  { %vm12943_vm10 = vcmp.le.f32.partialorder %v15670_v33, 0.7853982  ;;  %v6439_v50 = vand.u32 2139095040, %v12305_v4  ;;  %vm4867_vm11 = vcmp.lt.s32.totalorder %v12683_v27, 2  ;;  %v5771_v33 = vshll.u32 %v12937_v17, 30 }
 0x4b0   :  { %vm5950_vm15 = vcmp.lt.s32.totalorder %v12926_v42, 3  ;;  %vm5951_vm13 = vcmp.lt.s32.totalorder %v12926_v42, 4  ;;  %v5956_v23 = vsel %vm5948_vm12, %v5935_v43, %v5938_v30  ;;  %v12960_v26 = vpop.eup %8200  ;;  %vm5075_vm0 = vcmp.lt.s32.totalorder %v12872_v11, 2 }
 0x4b1   :  { %v5953_v21 = vsel %vm5951_vm13, %v5941_v3, 2102212464  ;;  %v5957_v34 = vsel %vm5951_vm13, %v5944_v40, 920167782  ;;  %v5960_v59 = vsel %vm5948_vm12, %v5938_v30, %v5941_v3  ;;  %v5932_v46 = vshrl.u32 %v15514_v63, %v5931_v39 }
 0x4b2   :  { %vm5949_vm1 = vcmp.lt.s32.totalorder %v12926_v42, 2  ;;  %v5958_v10 = vsel %vm5950_vm15, %v5941_v3, %v5957_v34  ;;  %v5964_v49 = vshll.u32 %v5924_v2, 8  ;;  %vm4136_vm14 = vweird.f32 %v11570_v61 }
 0x4b3   :  { %v12867_v7 = vpop.f32.mrb[8].mxu1  ;;  %v5959_v14 = vsel %vm5949_vm1, %v5956_v23, %v5958_v10  ;;  %v12977_v39 = vsub.s32 %v5768_v16, %v5771_v33  ;;  %v5952_v3 = vsel %vm5948_vm12, %v5932_v46, %v5935_v43  ;;  %vm4344_vm2 = vweird.f32 %v15673_v19 }
 0x4b4   :  { %15667 = vst [vmem:[#allocation11_spill] sm:$0xff] %v12867_v7  ;;  %v5947_v7 = vor.u32 %v5946_v48, %v5945_v12  ;;  %v6440_v12 = vshrl.u32 %v6439_v50, 23  ;;  %v12983_v48 = vpop.f32.mrb[9].mxu0  ;;  %vm4864_vm3 = vweird.f32 %v15648_v44  ;;  %vm5072_vm5 = vweird.f32 %v15657_v22 }
 0x4b5   :  { %v12990_v23 = vmul.u32.u64.low %v5964_v49, %v5959_v14  ;;  %v12991_v34 = vmul.u32.u64.high %v5964_v49, %v5959_v14, %v12990_v23  ;;  %v15674_v16 = vxor.u32 2147483648, %v12869_v53  ;;  %v15675_v43 = vxor.u32 2147483648, %v12846_v20 }
 0x4b6   :  { %v5961_v8 = vsel %vm5951_vm13, %v5947_v7, 1326507024  ;;  %v5878_v7 = vsub.s32 0, %v12950_v55  ;;  %v5173_v46 = vsel %vm12943_vm10, 0, %v12915_v35  ;;  %v5660_v10 = vadd.s32 %v12590_v37, %v12608_v60 }
 0x4b7   :  { %v5962_v29 = vsel %vm5950_vm15, %v5944_v40, %v5961_v8  ;;  %v5954_v40 = vsel %vm5950_vm15, %v5938_v30, %v5953_v21  ;;  %v5078_v30 = vsel %vm5076_vm8, %v12846_v20, %v15674_v16  ;;  %v5081_v33 = vsel %vm5079_vm9, %v15675_v43, %v12869_v53  ;;  %v13005_v8 = vpop.eup %8202 }
 0x4b8   :  { %v5963_v24 = vsel %vm5949_vm1, %v5960_v59, %v5962_v29  ;;  %v5166_v21 = vcvt.s32.f32 %v5159_v62  ;;  %v7710_v59 = vadd.s32 4294967169, %v6440_v12  ;;  %v5682_v29 = vshll.u32 %v5681_v52, 23 }
 0x4b9   :  { %v12987_v2 = vmul.u32.u64.low %v5964_v49, %v5963_v24  ;;  %v12988_v50 = vmul.u32.u64.high %v5964_v49, %v5963_v24, %v12987_v2  ;;  %v5955_v14 = vsel %vm5949_vm1, %v5952_v3, %v5954_v40  ;;  %v7687_v20 = vmin.u32 %v5878_v7, %v12950_v55 }
 0x4ba   :  { %v5167_v24 = vmul.f32 %v5166_v21, %v5164_v28  ;;  %v5774_v53 = vsub.s32 0, %v12977_v39  ;;  %v6446_v62 = vadd.s32 1, %v7710_v59  ;;  %v4874_v12 = vsel %vm4867_vm11, %v12881_v45, %v12888_v47 }
 0x4bb   :  { %v5678_v2 = vshrl.u32 %v5660_v10, %v5676_v56  ;;  %vm5973_vm6 = vc.u32 %v12988_v50, %v12990_v23  ;;  %v5974_v37 = vadd.s32 1, %v12991_v34  ;;  %v5082_v60 = vsel %vm5075_vm0, %v5078_v30, %v5081_v33  ;;  %v15680_v33 = vld [vmem:[#allocation8_spill] sm:$0xff] }
 0x4bc   :  { %v13026_v35 = vand.u32 3, %v12907_v38  ;;  %v5177_v42 = vadd.s32 3, %v5173_v46  ;;  %v5971_v28 = vmul.u32 %v5964_v49, %v5955_v14  ;;  %v5677_v52 = vshll.u32 %v12778_v6, %v12909_v32  ;;  %v15681_v46 = vld [vmem:[#allocation15_spill] sm:$0xff] }
 0x4bd   :  { %v5683_v7 = vor.u32 4788187, %v5682_v29  ;;  %v5975_v27 = vsel %vm5973_vm6, %v5974_v37, %v12991_v34  ;;  %vm6447_vm7 = vcmp.gt.s32.totalorder %v6446_v62, 0  ;;  %v5168_v45 = vxor.u32 2147483648, %v5167_v24 }
 0x4be   :  { %v5880_v47 = vclz %v7687_v20  ;;  %v7683_v56 = vmin.u32 %v5774_v53, %v12977_v39  ;;  %v5976_v3 = vadd.s32 %v5975_v27, %v5971_v28  ;;  %v13035_v11 = vsel %vm4136_vm14, nan, %v12679_v25 }
 0x4bf   :  { %15676 = vst [vmem:[#allocation14_spill] sm:$0xff] %v13035_v11  ;;  %v5679_v38 = vor.u32 %v5678_v2, %v5677_v52  ;;  %v15472_v49 = vand.u32 2147483647, %v12305_v4  ;;  %v6448_v40 = vsel %vm6447_vm7, %v6446_v62, 0  ;;  %v13041_v6 = vsel %vm4344_vm2, nan, %v12773_v51 }
 0x4c0   :  { %15677 = vst [vmem:[#allocation19_spill] sm:$0xff] %v13041_v6  ;;  %v13045_v32 = vsel %vm4864_vm3, nan, %v4874_v12  ;;  %v4976_v34 = vxor.u32 2147483648, %v12960_v26  ;;  %v5977_v16 = vadd.s32 536870912, %v5976_v3  ;;  %v13050_v61 = vsel %vm5072_vm5, nan, %v5082_v60 }
 0x4c1   :  { %15678 = vst [vmem:[#allocation6_spill] sm:$0xff] %v13045_v32  ;;  %15679 = vst [vmem:[#allocation23_spill] sm:$0xff] %v13050_v61  ;;  %vm4975_vm8 = vcmp.eq.s32.totalorder %v13026_v35, 2  ;;  %v5684_v25 = vand.u32 2147483647, %v5683_v7  ;;  %v6450_v30 = vand.u32 31, %v6448_v40  ;;  %v5169_v19 = vsel %vm5086_vm4, %v5168_v45, %v5167_v24 }
 0x4c2   :  { %v13055_v51 = vand.u32 3, %v5177_v42  ;;  %v7688_v43 = vadd.s32 4294967294, %v5880_v47  ;;  %v5776_v44 = vclz %v7683_v56  ;;  %vm5606_vm9 = vcmp.lt.s32.totalorder %v15680_v33, 0 }
 0x4c3   :  { %v5686_v21 = vcvt.s32.f32 %v5679_v38  ;;  %v6443_v59 = vand.u32 8388607, %v15472_v49  ;;  %v13060_v22 = vsub.s32 32, %v6450_v30  ;;  %v6647_v10 = vand.u32 2139095040, %v15681_v46 }
 0x4c4   :  { %v4973_v29 = vxor.u32 2147483648, %v13005_v8  ;;  %v13065_v14 = vsel %vm4975_vm8, %v4976_v34, %v13005_v8  ;;  %v5690_v24 = vsub.s32 4, %v12733_v54  ;;  %v13068_v20 = vshrl.u32 %v5977_v16, 30 }
 0x4c5   :  { %v5172_v53 = vsel %vm12943_vm10, %v11961_v9, %v5169_v19  ;;  %v5687_v62 = vmul.f32 %v5686_v21, %v5684_v25  ;;  %v6454_v12 = vshrl.u32 %v15520_v31, %v13060_v22  ;;  %v6457_v2 = vshrl.u32 %v15510_v36, %v13060_v22 }
 0x4c6   :  { %vm7689_vm4 = vcmp.lt.s32.totalorder %v7688_v43, 0  ;;  %v7684_v37 = vadd.s32 4294967294, %v5776_v44  ;;  %v6460_v60 = vshrl.u32 %v15511_v5, %v13060_v22  ;;  %v6463_v42 = vshrl.u32 %v15512_v13, %v13060_v22 }
 0x4c7   :  { %v15682_v28 = vand.u32 2147483647, %v15680_v33  ;;  %v6444_v52 = vor.u32 8388608, %v6443_v59  ;;  %v6453_v7 = vshll.u32 %v15514_v63, %v6450_v30  ;;  %v6456_v27 = vshll.u32 %v15520_v31, %v6450_v30 }
 0x4c8   :  { %v6648_v45 = vshrl.u32 %v6647_v10, 23  ;;  %v5979_v47 = vshll.u32 %v13068_v20, 30  ;;  %v13090_v56 = vshrl.u32 %v6448_v40, 5  ;;  %v6459_v38 = vshll.u32 %v15510_v36, %v6450_v30 }
 0x4c9   :  { %vm13083_vm12 = vcmp.le.f32.partialorder %v15682_v28, 0.7853982  ;;  %v6462_v34 = vshll.u32 %v15511_v5, %v6450_v30  ;;  %v6455_v16 = vor.u32 %v6454_v12, %v6453_v7  ;;  %v6458_v25 = vor.u32 %v6457_v2, %v6456_v27  ;;  %v15685_v7 = vld [vmem:[#allocation9_spill] sm:$0xff] }
 0x4ca   :  { %v6465_v19 = vshll.u32 %v15512_v13, %v6450_v30  ;;  %v6466_v44 = vshrl.u32 %v15513_v18, %v13060_v22  ;;  %8204 = vcosq.f32 %v5172_v53  ;;  %v13098_v21 = vsel %vm7689_vm4, 0, %v7688_v43 }
 0x4cb   :  { %v6461_v59 = vor.u32 %v6460_v60, %v6459_v38  ;;  %v6464_v10 = vor.u32 %v6463_v42, %v6462_v34  ;;  %8206 = vsinq.f32 %v5172_v53  ;;  %vm7685_vm10 = vcmp.lt.s32.totalorder %v7684_v37, 0 }
 0x4cc   :  { %v6467_v40 = vor.u32 %v6466_v44, %v6465_v19  ;;  %v7718_v28 = vadd.s32 4294967169, %v6648_v45  ;;  %vm4972_vm11 = vcmp.eq.s32.totalorder %v13026_v35, 0  ;;  %v5688_v49 = vxor.u32 2147483648, %v5687_v62 }
 0x4cd   :  { %v5691_v30 = vsel %vm5606_vm9, %v5690_v24, %v12733_v54  ;;  %v13104_v12 = vsub.s32 %v5976_v3, %v5979_v47  ;;  %vm6468_vm15 = vcmp.lt.s32.totalorder %v13090_v56, 1  ;;  %v5888_v43 = vsub.s32 4294967266, %v13098_v21 }
 0x4ce   :  { %vm6471_vm13 = vcmp.lt.s32.totalorder %v13090_v56, 4  ;;  %v6476_v53 = vsel %vm6468_vm15, %v6455_v16, %v6458_v25  ;;  %v13111_v2 = vshll.u32 %v6444_v52, 8  ;;  %v13113_v60 = vsel %vm7685_vm10, 0, %v7684_v37 }
 0x4cf   :  { %vm6470_vm0 = vcmp.lt.s32.totalorder %v13090_v56, 3  ;;  %v6477_v54 = vsel %vm6471_vm13, %v6464_v10, 920167782  ;;  %v6480_v3 = vsel %vm6468_vm15, %v6458_v25, %v6461_v59  ;;  %vm6469_vm1 = vcmp.lt.s32.totalorder %v13090_v56, 2 }
 0x4d0   :  { %v6478_v24 = vsel %vm6470_vm0, %v6461_v59, %v6477_v54  ;;  %v6481_v42 = vsel %vm6471_vm13, %v6467_v40, 1326507024  ;;  %v6654_v52 = vadd.s32 1, %v7718_v28  ;;  %v5693_v37 = vsel %vm13083_vm12, 0, %v5691_v30  ;;  %v13142_v40 = vpop.f32.mrb[9].mxu1 }
 0x4d1   :  { %vm5814_vm14 = vcmp.lt.s32.totalorder %v15685_v7, 0  ;;  %v5982_v27 = vsub.s32 0, %v13104_v12  ;;  %v6479_v45 = vsel %vm6469_vm1, %v6476_v53, %v6478_v24  ;;  %v6482_v47 = vsel %vm6470_vm0, %v6464_v10, %v6481_v42 }
 0x4d2   :  { %v5689_v38 = vsel %vm5606_vm9, %v5688_v49, %v5687_v62  ;;  %v6483_v34 = vsel %vm6469_vm1, %v6480_v3, %v6482_v47  ;;  %v13138_v19 = vmul.u32.u64.low %v13111_v2, %v6479_v45  ;;  %v13139_v44 = vmul.u32.u64.high %v13111_v2, %v6479_v45, %v13138_v19 }
 0x4d3   :  { %v5884_v28 = vsub.s32 32, %v13098_v21  ;;  %v5889_v30 = vadd.s32 127, %v5888_v43  ;;  %v5784_v53 = vsub.s32 4294967266, %v13113_v60  ;;  %vm6655_vm2 = vcmp.gt.s32.totalorder %v6654_v52, 0 }
 0x4d4   :  { %v6473_v10 = vsel %vm6471_vm13, %v6461_v59, 2102212464  ;;  %v13149_v49 = vmul.u32.u64.low %v13111_v2, %v6483_v34  ;;  %v13150_v62 = vmul.u32.u64.high %v13111_v2, %v6483_v34, %v13149_v49  ;;  %v6656_v54 = vsel %vm6655_vm2, %v6654_v52, 0  ;;  %v13152_v3 = vpop.eup %8204 }
 0x4d5   :  { %v5868_v24 = vadd.s32 %v12793_v57, %v12804_v15  ;;  %v7691_v42 = vmin.u32 %v5982_v27, %v13104_v12  ;;  %v6452_v43 = vshrl.u32 %v15514_v63, %v13060_v22  ;;  %v6658_v45 = vand.u32 31, %v6656_v54  ;;  %v13159_v47 = vpop.eup %8206 }
 0x4d6   :  { %v13166_v59 = vsel %vm4972_vm11, %v12960_v26, %v4973_v29  ;;  %v5692_v52 = vsel %vm13083_vm12, %v15680_v33, %v5689_v38  ;;  %v13171_v57 = vadd.s32 3, %v5693_v37  ;;  %v5898_v15 = vsub.s32 4, %v12902_v0 }
 0x4d7   :  { %v5886_v27 = vshrl.u32 %v5868_v24, %v5884_v28  ;;  %v5890_v22 = vshll.u32 %v5889_v30, 23  ;;  %v6472_v34 = vsel %vm6468_vm15, %v6452_v43, %v6455_v16  ;;  %v6474_v8 = vsel %vm6470_vm0, %v6458_v25, %v6473_v10 }
 0x4d8   :  { %v5785_v26 = vadd.s32 127, %v5784_v53  ;;  %v15473_v29 = vand.u32 2147483647, %v15681_v46  ;;  %v13180_v61 = vsub.s32 32, %v6658_v45  ;;  %v5885_v37 = vshll.u32 %v12950_v55, %v13098_v21 }
 0x4d9   :  { %v5984_v38 = vclz %v7691_v42  ;;  %v6494_v28 = vadd.s32 1, %v13139_v44  ;;  %8208 = vcosq.f32 %v5692_v52  ;;  %v13189_v16 = vsel %vm5814_vm14, %v5898_v15, %v12902_v0 }
 0x4da   :  { %v6475_v25 = vsel %vm6469_vm1, %v6472_v34, %v6474_v8  ;;  %vm6493_vm3 = vc.u32 %v13150_v62, %v13138_v19  ;;  %8210 = vsinq.f32 %v5692_v52  ;;  %v13195_v30 = vor.u32 %v5886_v27, %v5885_v37 }
 0x4db   :  { %v13197_v53 = vor.u32 4788187, %v5890_v22  ;;  %v5780_v55 = vsub.s32 32, %v13113_v60  ;;  %v5786_v21 = vshll.u32 %v5785_v26, 23  ;;  %v6651_v10 = vand.u32 8388607, %v15473_v29 }
 0x4dc   :  { %v6662_v0 = vshrl.u32 %v15520_v31, %v13180_v61  ;;  %v6665_v56 = vshrl.u32 %v15510_v36, %v13180_v61  ;;  %v7692_v24 = vadd.s32 4294967294, %v5984_v38  ;;  %v6491_v42 = vmul.u32 %v13111_v2, %v6475_v25 }
 0x4dd   :  { %v6495_v43 = vsel %vm6493_vm3, %v6494_v28, %v13139_v44  ;;  %v6668_v52 = vshrl.u32 %v15511_v5, %v13180_v61  ;;  %v13210_v15 = vshrl.u32 %v6656_v54, 5  ;;  %v6661_v27 = vshll.u32 %v15514_v63, %v6658_v45 }
 0x4de   :  { %v6664_v22 = vshll.u32 %v15520_v31, %v6658_v45  ;;  %v6671_v34 = vshrl.u32 %v15512_v13, %v13180_v61  ;;  %v6667_v8 = vshll.u32 %v15510_v36, %v6658_v45  ;;  %v6670_v26 = vshll.u32 %v15511_v5, %v6658_v45 }
 0x4df   :  { %v6673_v2 = vshll.u32 %v15512_v13, %v6658_v45  ;;  %v6674_v44 = vshrl.u32 %v15513_v18, %v13180_v61  ;;  %v5764_v54 = vadd.s32 %v12855_v58, %v12865_v1  ;;  %v13223_v37 = vadd.s32 %v6495_v43, %v6491_v42  ;;  %v15689_v42 = vld [vmem:[#allocation17_spill] sm:$0xff] }
 0x4e0   :  { %v6663_v38 = vor.u32 %v6662_v0, %v6661_v27  ;;  %v6666_v28 = vor.u32 %v6665_v56, %v6664_v22  ;;  %vm7693_vm5 = vcmp.lt.s32.totalorder %v7692_v24, 0  ;;  %v6669_v25 = vor.u32 %v6668_v52, %v6667_v8 }
 0x4e1   :  { %v6672_v29 = vor.u32 %v6671_v34, %v6670_v26  ;;  %v6675_v49 = vor.u32 %v6674_v44, %v6673_v2  ;;  %vm4971_vm6 = vcmp.lt.s32.totalorder %v13026_v35, 2  ;;  %v5892_v41 = vand.u32 2147483647, %v13197_v53 }
 0x4e2   :  { %v5894_v45 = vcvt.s32.f32 %v13195_v30  ;;  %v5781_v32 = vshll.u32 %v12977_v39, %v13113_v60  ;;  %v6652_v6 = vor.u32 8388608, %v6651_v10  ;;  %v15686_v58 = vand.u32 2147483647, %v15685_v7  ;;  %v15690_v10 = vld [vmem:[#allocation22_spill] sm:$0xff] }
 0x4e3   :  { %v5782_v0 = vshrl.u32 %v5764_v54, %v5780_v55  ;;  %v5787_v56 = vor.u32 4788187, %v5786_v21  ;;  %vm6676_vm8 = vcmp.lt.s32.totalorder %v13210_v15, 1  ;;  %v6543_v43 = vand.u32 2139095040, %v15689_v42  ;;  %v13238_v52 = vpop.eup %8208 }
 0x4e4   :  { %vm13232_vm7 = vcmp.le.f32.partialorder %v15686_v58, 0.7853982  ;;  %v13240_v53 = vsel %vm7693_vm5, 0, %v7692_v24  ;;  %v6497_v30 = vadd.s32 536870912, %v13223_v37  ;;  %vm6679_vm9 = vcmp.lt.s32.totalorder %v13210_v15, 4  ;;  %v13246_v60 = vpop.eup %8210 }
 0x4e5   :  { %v6684_v39 = vsel %vm6676_vm8, %v6663_v38, %v6666_v28  ;;  %vm4968_vm4 = vweird.f32 %v15690_v10  ;;  %vm5180_vm12 = vcmp.eq.s32.totalorder %v13055_v51, 0  ;;  %vm6678_vm10 = vcmp.lt.s32.totalorder %v13210_v15, 3 }
 0x4e6   :  { %v6685_v55 = vsel %vm6679_vm9, %v6672_v29, 920167782  ;;  %v6688_v21 = vsel %vm6676_vm8, %v6666_v28, %v6669_v25  ;;  %v6689_v24 = vsel %vm6679_vm9, %v6675_v49, 1326507024  ;;  %vm6677_vm11 = vcmp.lt.s32.totalorder %v13210_v15, 2 }
 0x4e7   :  { %v6686_v27 = vsel %vm6678_vm10, %v6669_v25, %v6685_v55  ;;  %v6690_v22 = vsel %vm6678_vm10, %v6672_v29, %v6689_v24  ;;  %v6692_v34 = vshll.u32 %v6652_v6, 8  ;;  %v6681_v8 = vsel %vm6679_vm9, %v6669_v25, 2102212464 }
 0x4e8   :  { %v6687_v26 = vsel %vm6677_vm11, %v6684_v39, %v6686_v27  ;;  %v6691_v2 = vsel %vm6677_vm11, %v6688_v21, %v6690_v22  ;;  %v6544_v44 = vshrl.u32 %v6543_v43, 23  ;;  %v5783_v54 = vor.u32 %v5782_v0, %v5781_v32  ;;  %v15692_v22 = vld [vmem:[#allocation24_spill] sm:$0xff] }
 0x4e9   :  { %v5992_v49 = vsub.s32 4294967266, %v13240_v53  ;;  %v13263_v58 = vshrl.u32 %v6497_v30, 30  ;;  %v6660_v55 = vshrl.u32 %v15514_v63, %v13180_v61  ;;  %vm5179_vm15 = vcmp.lt.s32.totalorder %v13055_v51, 2  ;;  %v13279_v30 = vpop.f32.mrb[10].mxu0 }
 0x4ea   :  { %v13268_v29 = vmul.u32.u64.low %v6692_v34, %v6691_v2  ;;  %v13269_v6 = vmul.u32.u64.high %v6692_v34, %v6691_v2, %v13268_v29  ;;  %v13271_v25 = vmul.u32.u64.low %v6692_v34, %v6687_v26  ;;  %v13272_v24 = vmul.u32.u64.high %v6692_v34, %v6687_v26, %v13271_v25  ;;  %15691 = vst [vmem:[#allocation13_spill] sm:$0xff] %v13279_v30 }
 0x4eb   :  { %v5895_v39 = vmul.f32 %v5894_v45, %v5892_v41  ;;  %v6680_v32 = vsel %vm6676_vm8, %v6660_v55, %v6663_v38  ;;  %v6682_v0 = vsel %vm6678_vm10, %v6666_v28, %v6681_v8  ;;  %v7714_v43 = vadd.s32 4294967169, %v6544_v44 }
 0x4ec   :  { %v4978_v61 = vsel %vm4971_vm6, %v13166_v59, %v13065_v14  ;;  %vm5183_vm13 = vcmp.eq.s32.totalorder %v13055_v51, 2  ;;  %v13287_v21 = vand.u32 3, %v13171_v57  ;;  %v5788_v41 = vand.u32 2147483647, %v5787_v56 }
 0x4ed   :  { %v5901_v38 = vsel %vm13232_vm7, 0, %v13189_v16  ;;  %v5993_v45 = vadd.s32 127, %v5992_v49  ;;  %v6499_v28 = vshll.u32 %v13263_v58, 30  ;;  %v6550_v27 = vadd.s32 1, %v7714_v43 }
 0x4ee   :  { %vm5710_vm0 = vcmp.lt.s32.totalorder %v15692_v22, 0  ;;  %v5790_v8 = vcvt.s32.f32 %v5783_v54  ;;  %v6683_v35 = vsel %vm6677_vm11, %v6680_v32, %v6682_v0  ;;  %vm6701_vm1 = vc.u32 %v13269_v6, %v13271_v25 }
 0x4ef   :  { %v6702_v14 = vadd.s32 1, %v13272_v24  ;;  %v13301_v59 = vsel %vm4968_vm4, nan, %v4978_v61  ;;  %v15694_v57 = vxor.u32 2147483648, %v13159_v47  ;;  %v15695_v56 = vxor.u32 2147483648, %v13152_v3 }
 0x4f0   :  { %15693 = vst [vmem:[#allocation21_spill] sm:$0xff] %v13301_v59  ;;  %v5896_v26 = vxor.u32 2147483648, %v5895_v39  ;;  %v5791_v2 = vmul.f32 %v5790_v8, %v5788_v41  ;;  %v5988_v44 = vsub.s32 32, %v13240_v53  ;;  %vm6551_vm2 = vcmp.gt.s32.totalorder %v6550_v27, 0 }
 0x4f1   :  { %v5182_v16 = vsel %vm5180_vm12, %v13152_v3, %v15694_v57  ;;  %v5185_v15 = vsel %vm5183_vm13, %v15695_v56, %v13159_v47  ;;  %v6703_v10 = vsel %vm6701_vm1, %v6702_v14, %v13272_v24  ;;  %v5905_v54 = vadd.s32 3, %v5901_v38  ;;  %v15699_v14 = vld [vmem:[#allocation18_spill] sm:$0xff] }
 0x4f2   :  { %v5994_v49 = vshll.u32 %v5993_v45, 23  ;;  %v13316_v55 = vsub.s32 %v13223_v37, %v6499_v28  ;;  %v6699_v29 = vmul.u32 %v6692_v34, %v6683_v35  ;;  %vm5703_vm3 = vcmp.eq.s32.totalorder %v13287_v21, 2 }
 0x4f3   :  { %v5972_v3 = vadd.s32 %v12990_v23, %v12988_v50  ;;  %v15474_v47 = vand.u32 2147483647, %v15689_v42  ;;  %v6552_v32 = vsel %vm6551_vm2, %v6550_v27, 0  ;;  %v13324_v0 = vsel %vm5179_vm15, %v5182_v16, %v5185_v15 }
 0x4f4   :  { %v5704_v24 = vxor.u32 2147483648, %v13238_v52  ;;  %v5794_v43 = vsub.s32 4, %v12937_v17  ;;  %v13328_v61 = vadd.s32 %v6703_v10, %v6699_v29  ;;  %v5897_v37 = vsel %vm5814_vm14, %v5896_v26, %v5895_v39 }
 0x4f5   :  { %v5792_v34 = vxor.u32 2147483648, %v5791_v2  ;;  %v5990_v41 = vshrl.u32 %v5972_v3, %v5988_v44  ;;  %v6554_v38 = vand.u32 31, %v6552_v32  ;;  %v13333_v23 = vand.u32 3, %v5905_v54 }
 0x4f6   :  { %v15696_v51 = vand.u32 2147483647, %v15692_v22  ;;  %v5995_v28 = vor.u32 4788187, %v5994_v49  ;;  %v6502_v27 = vsub.s32 0, %v13316_v55  ;;  %v5989_v8 = vshll.u32 %v13104_v12, %v13240_v53 }
 0x4f7   :  { %v6547_v39 = vand.u32 8388607, %v15474_v47  ;;  %v6555_v35 = vsub.s32 32, %v6554_v38  ;;  %v6751_v57 = vand.u32 2139095040, %v15699_v14  ;;  %v13350_v16 = vsel %vm5703_vm3, %v5704_v24, %v13246_v60 }
 0x4f8   :  { %vm13337_vm5 = vcmp.le.f32.partialorder %v15696_v51, 0.7853982  ;;  %v5900_v56 = vsel %vm13232_vm7, %v15685_v7, %v5897_v37  ;;  %v13358_v15 = vsel %vm5710_vm0, %v5794_v43, %v12937_v17  ;;  %v6705_v12 = vadd.s32 536870912, %v13328_v61 }
 0x4f9   :  { %v5793_v53 = vsel %vm5710_vm0, %v5792_v34, %v5791_v2  ;;  %v5991_v26 = vor.u32 %v5990_v41, %v5989_v8  ;;  %v6558_v44 = vshrl.u32 %v15520_v31, %v6555_v35  ;;  %v6561_v10 = vshrl.u32 %v15510_v36, %v6555_v35 }
 0x4fa   :  { %v5996_v54 = vand.u32 2147483647, %v5995_v28  ;;  %v7711_v49 = vmin.u32 %v6502_v27, %v13316_v55  ;;  %v6564_v1 = vshrl.u32 %v15511_v5, %v6555_v35  ;;  %v6567_v29 = vshrl.u32 %v15512_v13, %v6555_v35 }
 0x4fb   :  { %v6548_v3 = vor.u32 8388608, %v6547_v39  ;;  %v6557_v17 = vshll.u32 %v15514_v63, %v6554_v38  ;;  %v6560_v24 = vshll.u32 %v15520_v31, %v6554_v38  ;;  %v6752_v43 = vshrl.u32 %v6751_v57, 23 }
 0x4fc   :  { %v13370_v37 = vshrl.u32 %v6705_v12, 30  ;;  %v6553_v2 = vshrl.u32 %v6552_v32, 5  ;;  %v6563_v34 = vshll.u32 %v15510_v36, %v6554_v38  ;;  %v6566_v41 = vshll.u32 %v15511_v5, %v6554_v38 }
 0x4fd   :  { %vm5700_vm14 = vcmp.eq.s32.totalorder %v13287_v21, 0  ;;  %v6559_v51 = vor.u32 %v6558_v44, %v6557_v17  ;;  %v6562_v28 = vor.u32 %v6561_v10, %v6560_v24  ;;  %v6569_v27 = vshll.u32 %v15512_v13, %v6554_v38 }
 0x4fe   :  { %v6570_v8 = vshrl.u32 %v15513_v18, %v6555_v35  ;;  %8212 = vcosq.f32 %v5900_v56  ;;  %v5998_v39 = vcvt.s32.f32 %v5991_v26  ;;  %v6565_v47 = vor.u32 %v6564_v1, %v6563_v34 }
 0x4ff   :  { %v6568_v50 = vor.u32 %v6567_v29, %v6566_v41  ;;  %8214 = vsinq.f32 %v5900_v56  ;;  %v13380_v32 = vsel %vm13337_vm5, %v15692_v22, %v5793_v53  ;;  %v7722_v12 = vadd.s32 4294967169, %v6752_v43 }
 0x500   :  { %v6571_v57 = vor.u32 %v6570_v8, %v6569_v27  ;;  %v5999_v59 = vmul.f32 %v5998_v39, %v5996_v54  ;;  %v6504_v11 = vclz %v7711_v49  ;;  %v6707_v44 = vshll.u32 %v13370_v37, 30 }
 0x501   :  { %vm6572_vm6 = vcmp.lt.s32.totalorder %v6553_v2, 1  ;;  %vm5176_vm7 = vweird.f32 %v11961_v9  ;;  %vm5699_vm8 = vcmp.lt.s32.totalorder %v13287_v21, 2  ;;  %v6556_v38 = vshrl.u32 %v15514_v63, %v6555_v35 }
 0x502   :  { %vm6575_vm9 = vcmp.lt.s32.totalorder %v6553_v2, 4  ;;  %v6580_v56 = vsel %vm6572_vm6, %v6559_v51, %v6562_v28  ;;  %v6588_v26 = vshll.u32 %v6548_v3, 8  ;;  %vm6574_vm4 = vcmp.lt.s32.totalorder %v6553_v2, 3 }
 0x503   :  { %v6577_v53 = vsel %vm6575_vm9, %v6565_v47, 2102212464  ;;  %v6581_v10 = vsel %vm6575_vm9, %v6568_v50, 920167782  ;;  %v6584_v1 = vsel %vm6572_vm6, %v6562_v28, %v6565_v47  ;;  %vm6573_vm12 = vcmp.lt.s32.totalorder %v6553_v2, 2 }
 0x504   :  { %v6582_v54 = vsel %vm6574_vm4, %v6565_v47, %v6581_v10  ;;  %v6585_v49 = vsel %vm6575_vm9, %v6571_v57, 1326507024  ;;  %v6758_v29 = vadd.s32 1, %v7722_v12  ;;  %vm5696_vm10 = vweird.f32 %v15680_v33  ;;  %v13399_v47 = vpop.f32.mrb[10].mxu1  ;;  %v15702_v10 = vld [vmem:[#allocation16_spill] sm:$0xff] }
 0x505   :  { %v13390_v17 = vsub.s32 %v13328_v61, %v6707_v44  ;;  %v6576_v35 = vsel %vm6572_vm6, %v6556_v38, %v6559_v51  ;;  %v6583_v24 = vsel %vm6573_vm12, %v6580_v56, %v6582_v54  ;;  %v6586_v43 = vsel %vm6574_vm4, %v6568_v50, %v6585_v49  ;;  %15700 = vst [vmem:[#allocation20_spill] sm:$0xff] %v13399_v47 }
 0x506   :  { %v6578_v3 = vsel %vm6574_vm4, %v6562_v28, %v6577_v53  ;;  %v6587_v34 = vsel %vm6573_vm12, %v6584_v1, %v6586_v43  ;;  %v13395_v41 = vmul.u32.u64.low %v6588_v26, %v6583_v24  ;;  %v13396_v27 = vmul.u32.u64.high %v6588_v26, %v6583_v24, %v13395_v41 }
 0x507   :  { %v15701_v8 = vxor.u32 2147483648, %v13246_v60  ;;  %v5797_v51 = vsel %vm13337_vm5, 0, %v13358_v15  ;;  %v7712_v50 = vadd.s32 4294967294, %v6504_v11  ;;  %vm6759_vm11 = vcmp.gt.s32.totalorder %v6758_v29, 0 }
 0x508   :  { %8216 = vcosq.f32 %v13380_v32  ;;  %v13410_v28 = vmul.u32.u64.low %v6588_v26, %v6587_v34  ;;  %v13411_v39 = vmul.u32.u64.high %v6588_v26, %v6587_v34, %v13410_v28  ;;  %v6760_v57 = vsel %vm6759_vm11, %v6758_v29, 0  ;;  %v8213_v12 = vpop.eup %8212 }
 0x509   :  { %v5702_v61 = vsel %vm5700_vm14, %v13238_v52, %v15701_v8  ;;  %v6000_v44 = vxor.u32 2147483648, %v5999_v59  ;;  %v6710_v60 = vsub.s32 0, %v13390_v17  ;;  %v6579_v38 = vsel %vm6573_vm12, %v6576_v35, %v6578_v3  ;;  %v8215_v52 = vpop.eup %8214 }
 0x50a   :  { %v6762_v56 = vand.u32 31, %v6760_v57  ;;  %v5801_v53 = vadd.s32 3, %v5797_v51  ;;  %v15703_v45 = vand.u32 2147483647, %v15702_v10  ;;  %vm5918_vm13 = vcmp.lt.s32.totalorder %v15702_v10, 0 }
 0x50b   :  { %v6598_v15 = vadd.s32 1, %v13396_v27  ;;  %v13426_v1 = vsel %vm5176_vm7, nan, %v13324_v0  ;;  %v5706_v2 = vsel %vm5699_vm8, %v5702_v61, %v13350_v16  ;;  %v6002_v54 = vsub.s32 4, %v13068_v20 }
 0x50c   :  { %vm13417_vm15 = vcmp.le.f32.partialorder %v15703_v45, 0.7853982  ;;  %15706 = vst [vmem:[#allocation8_spill] sm:$0xff] %v13426_v1  ;;  %vm7713_vm0 = vcmp.lt.s32.totalorder %v7712_v50, 0  ;;  %vm5908_vm1 = vcmp.eq.s32.totalorder %v13333_v23, 0  ;;  %vm5911_vm2 = vcmp.eq.s32.totalorder %v13333_v23, 2 }
 0x50d   :  { %v6595_v49 = vmul.u32 %v6588_v26, %v6579_v38  ;;  %vm6597_vm3 = vc.u32 %v13411_v39, %v13395_v41  ;;  %v6763_v29 = vsub.s32 32, %v6762_v56  ;;  %v6001_v9 = vsel %vm5918_vm13, %v6000_v44, %v5999_v59 }
 0x50e   :  { %v7719_v0 = vmin.u32 %v6710_v60, %v13390_v17  ;;  %v6599_v21 = vsel %vm6597_vm3, %v6598_v15, %v13396_v27  ;;  %v15475_v16 = vand.u32 2147483647, %v15699_v14  ;;  %v13443_v35 = vsel %vm5696_vm10, nan, %v5706_v2  ;;  %v13504_v14 = vpop.f32.mrb[11].mxu0 }
 0x50f   :  { %15707 = vst [vmem:[#allocation15_spill] sm:$0xff] %v13443_v35  ;;  %v13445_v24 = vand.u32 3, %v5801_v53  ;;  %v13447_v26 = vsel %vm7713_vm0, 0, %v7712_v50  ;;  %v6600_v43 = vadd.s32 %v6599_v21, %v6595_v49  ;;  %v5909_v3 = vxor.u32 2147483648, %v8215_v52 }
 0x510   :  { %v5912_v34 = vxor.u32 2147483648, %v8213_v12  ;;  %8218 = vsinq.f32 %v13380_v32  ;;  %v13453_v59 = vsel %vm5918_vm13, %v6002_v54, %v13068_v20  ;;  %v13458_v33 = vsel %vm13417_vm15, %v15702_v10, %v6001_v9 }
 0x511   :  { %v6601_v27 = vadd.s32 536870912, %v6600_v43  ;;  %v6766_v8 = vshrl.u32 %v15520_v31, %v6763_v29  ;;  %v6769_v61 = vshrl.u32 %v15510_v36, %v6763_v29  ;;  %v6512_v51 = vsub.s32 4294967266, %v13447_v26 }
 0x512   :  { %v6712_v50 = vclz %v7719_v0  ;;  %v6755_v32 = vand.u32 8388607, %v15475_v16  ;;  %v6772_v28 = vshrl.u32 %v15511_v5, %v6763_v29  ;;  %v13466_v20 = vpop.eup %8216  ;;  %v6761_v44 = vshrl.u32 %v6760_v57, 5 }
 0x513   :  { %v6765_v60 = vshll.u32 %v15514_v63, %v6762_v56  ;;  %v6768_v38 = vshll.u32 %v15520_v31, %v6762_v56  ;;  %v6775_v53 = vshrl.u32 %v15512_v13, %v6763_v29  ;;  %v6771_v45 = vshll.u32 %v15510_v36, %v6762_v56 }
 0x514   :  { %v6774_v15 = vshll.u32 %v15511_v5, %v6762_v56  ;;  %v6777_v2 = vshll.u32 %v15512_v13, %v6762_v56  ;;  %v6778_v54 = vshrl.u32 %v15513_v18, %v6763_v29  ;;  %v5913_v49 = vsel %vm5911_vm2, %v5912_v34, %v8215_v52 }
 0x515   :  { %v13477_v9 = vshrl.u32 %v6601_v27, 30  ;;  %v6767_v57 = vor.u32 %v6766_v8, %v6765_v60  ;;  %v6770_v0 = vor.u32 %v6769_v61, %v6768_v38  ;;  %v5910_v21 = vsel %vm5908_vm1, %v8213_v12, %v5909_v3  ;;  %v15708_v27 = vld [vmem:[#allocation12_spill] sm:$0xff] }
 0x516   :  { %v6773_v16 = vor.u32 %v6772_v28, %v6771_v45  ;;  %v6776_v35 = vor.u32 %v6775_v53, %v6774_v15  ;;  %v6779_v1 = vor.u32 %v6778_v54, %v6777_v2  ;;  %v5808_v47 = vxor.u32 2147483648, %v13466_v20 }
 0x517   :  { %v6005_v56 = vsel %vm13417_vm15, 0, %v13453_v59  ;;  %8220 = vcosq.f32 %v13458_v33  ;;  %v6513_v30 = vadd.s32 127, %v6512_v51  ;;  %vm5907_vm5 = vcmp.lt.s32.totalorder %v13333_v23, 2 }
 0x518   :  { %v7720_v52 = vadd.s32 4294967294, %v6712_v50  ;;  %v6756_v34 = vor.u32 8388608, %v6755_v32  ;;  %vm6780_vm14 = vcmp.lt.s32.totalorder %v6761_v44, 1  ;;  %v4359_v8 = vand.u32 2139095040, %v15708_v27 }
 0x519   :  { %v6603_v12 = vshll.u32 %v13477_v9, 30  ;;  %vm6782_vm6 = vcmp.lt.s32.totalorder %v6761_v44, 3  ;;  %vm6783_vm7 = vcmp.lt.s32.totalorder %v6761_v44, 4  ;;  %v6788_v3 = vsel %vm6780_vm14, %v6767_v57, %v6770_v0 }
 0x51a   :  { %v8219_v61 = vpop.eup %8218  ;;  %v6785_v28 = vsel %vm6783_vm7, %v6773_v16, 2102212464  ;;  %v6789_v11 = vsel %vm6783_vm7, %v6776_v35, 920167782  ;;  %v6792_v59 = vsel %vm6780_vm14, %v6770_v0, %v6773_v16  ;;  %v6793_v60 = vsel %vm6783_vm7, %v6779_v1, 1326507024 }
 0x51b   :  { %vm5804_vm8 = vcmp.eq.s32.totalorder %v13445_v24, 0  ;;  %vm6438_vm9 = vcmp.lt.s32.totalorder %v12305_v4, 0  ;;  %v6764_v51 = vshrl.u32 %v15514_v63, %v6763_v29  ;;  %vm6781_vm4 = vcmp.lt.s32.totalorder %v6761_v44, 2 }
 0x51c   :  { %v6790_v50 = vsel %vm6782_vm6, %v6773_v16, %v6789_v11  ;;  %v6794_v32 = vsel %vm6782_vm6, %v6776_v35, %v6793_v60  ;;  %v6796_v45 = vshll.u32 %v6756_v34, 8  ;;  %v4360_v15 = vshrl.u32 %v4359_v8, 23 }
 0x51d   :  { %v6791_v38 = vsel %vm6781_vm4, %v6788_v3, %v6790_v50  ;;  %v6795_v53 = vsel %vm6781_vm4, %v6792_v59, %v6794_v32  ;;  %vm5904_vm12 = vweird.f32 %v15685_v7  ;;  %v6508_v1 = vsub.s32 32, %v13447_v26 }
 0x51e   :  { %v13500_v2 = vsub.s32 %v6600_v43, %v6603_v12  ;;  %v6784_v54 = vsel %vm6780_vm14, %v6764_v51, %v6767_v57  ;;  %v6786_v29 = vsel %vm6782_vm6, %v6770_v0, %v6785_v28  ;;  %v15709_v34 = vand.u32 2147483647, %v12305_v4 }
 0x51f   :  { %v13506_v16 = vmul.u32.u64.low %v6796_v45, %v6795_v53  ;;  %v13507_v35 = vmul.u32.u64.high %v6796_v45, %v6795_v53, %v13506_v16  ;;  %v13509_v3 = vmul.u32.u64.low %v6796_v45, %v6791_v38  ;;  %v13510_v11 = vmul.u32.u64.high %v6796_v45, %v6791_v38, %v13509_v3 }
 0x520   :  { %vm13515_vm10 = vcmp.le.f32.partialorder %v15709_v34, 0.7853982  ;;  %v6492_v43 = vadd.s32 %v13138_v19, %v13150_v62  ;;  %v6514_v57 = vshll.u32 %v6513_v30, 23  ;;  %vm7721_vm11 = vcmp.lt.s32.totalorder %v7720_v52, 0 }
 0x521   :  { %v7630_v0 = vadd.s32 4294967169, %v4360_v15  ;;  %v5805_v12 = vxor.u32 2147483648, %v8219_v61  ;;  %vm5807_vm15 = vcmp.eq.s32.totalorder %v13445_v24, 2  ;;  %v6522_v28 = vsub.s32 4, %v13263_v58  ;;  %v13524_v60 = vpop.eup %8220 }
 0x522   :  { %v6787_v59 = vsel %vm6781_vm4, %v6784_v54, %v6786_v29  ;;  %v5914_v51 = vsel %vm5907_vm5, %v5910_v21, %v5913_v49  ;;  %v6510_v50 = vshrl.u32 %v6492_v43, %v6508_v1  ;;  %v6606_v32 = vsub.s32 0, %v13500_v2 }
 0x523   :  { %v4366_v38 = vadd.s32 1, %v7630_v0  ;;  %v6009_v19 = vadd.s32 3, %v6005_v56  ;;  %v13529_v62 = vsel %vm7721_vm11, 0, %v7720_v52  ;;  %vm6805_vm13 = vc.u32 %v13507_v35, %v13509_v3 }
 0x524   :  { %v6806_v30 = vadd.s32 1, %v13510_v11  ;;  %v5809_v53 = vsel %vm5807_vm15, %v5808_v47, %v8219_v61  ;;  %v6509_v44 = vshll.u32 %v13316_v55, %v13447_v26  ;;  %v6515_v15 = vor.u32 4788187, %v6514_v57 }
 0x525   :  { %v6803_v54 = vmul.u32 %v6796_v45, %v6787_v59  ;;  %v5806_v23 = vsel %vm5804_vm8, %v13466_v20, %v5805_v12  ;;  %v6523_v49 = vsel %vm6438_vm9, %v6522_v28, %v13263_v58  ;;  %vm4367_vm0 = vcmp.gt.s32.totalorder %v4366_v38, 0  ;;  %v15713_v59 = vld [vmem:[#allocation11_spill] sm:$0xff] }
 0x526   :  { %v6807_v21 = vsel %vm6805_vm13, %v6806_v30, %v13510_v11  ;;  %v6511_v56 = vor.u32 %v6510_v50, %v6509_v44  ;;  %v6720_v52 = vsub.s32 4294967266, %v13529_v62  ;;  %v7715_v47 = vmin.u32 %v6606_v32, %v13500_v2 }
 0x527   :  { %v6808_v61 = vadd.s32 %v6807_v21, %v6803_v54  ;;  %v13547_v55 = vsel %vm5904_vm12, nan, %v5914_v51  ;;  %vm5803_vm1 = vcmp.lt.s32.totalorder %v13445_v24, 2  ;;  %v15479_v26 = vand.u32 2147483647, %v15708_v27 }
 0x528   :  { %15712 = vst [vmem:[#allocation9_spill] sm:$0xff] %v13547_v55  ;;  %v4368_v20 = vsel %vm4367_vm0, %v4366_v38, 0  ;;  %v13551_v45 = vsel %vm5803_vm1, %v5806_v23, %v5809_v53  ;;  %v13553_v58 = vand.u32 3, %v6009_v19  ;;  %v6516_v1 = vand.u32 2147483647, %v6515_v15 }
 0x529   :  { %v6809_v29 = vadd.s32 536870912, %v6808_v61  ;;  %8222 = vsinq.f32 %v13458_v33  ;;  %v6525_v16 = vsel %vm13515_vm10, 0, %v6523_v49  ;;  %v6716_v7 = vsub.s32 32, %v13529_v62 }
 0x52a   :  { %v4370_v11 = vand.u32 31, %v4368_v20  ;;  %v6518_v34 = vcvt.s32.f32 %v6511_v56  ;;  %v6721_v43 = vadd.s32 127, %v6720_v52  ;;  %v6608_v24 = vclz %v7715_v47 }
 0x52b   :  { %v13559_v57 = vshrl.u32 %v6809_v29, 30  ;;  %v6700_v0 = vadd.s32 %v13271_v25, %v13269_v6  ;;  %v4363_v12 = vand.u32 8388607, %v15479_v26  ;;  %v4567_v33 = vand.u32 2139095040, %v15713_v59 }
 0x52c   :  { %v4371_v28 = vsub.s32 32, %v4370_v11  ;;  %v6519_v50 = vmul.f32 %v6518_v34, %v6516_v1  ;;  %v13567_v32 = vadd.s32 3, %v6525_v16  ;;  %v6717_v19 = vshll.u32 %v13390_v17, %v13529_v62 }
 0x52d   :  { %v6811_v38 = vshll.u32 %v13559_v57, 30  ;;  %v6718_v30 = vshrl.u32 %v6700_v0, %v6716_v7  ;;  %v6722_v25 = vshll.u32 %v6721_v43, 23  ;;  %v7716_v44 = vadd.s32 4294967294, %v6608_v24 }
 0x52e   :  { %v4374_v53 = vshrl.u32 %v15520_v31, %v4371_v28  ;;  %v4377_v6 = vshrl.u32 %v15510_v36, %v4371_v28  ;;  %v4380_v15 = vshrl.u32 %v15511_v5, %v4371_v28  ;;  %v4383_v54 = vshrl.u32 %v15512_v13, %v4371_v28 }
 0x52f   :  { %v4364_v23 = vor.u32 8388608, %v4363_v12  ;;  %v4373_v49 = vshll.u32 %v15514_v63, %v4370_v11  ;;  %v4376_v21 = vshll.u32 %v15520_v31, %v4370_v11  ;;  %v4568_v56 = vshrl.u32 %v4567_v33, 23 }
 0x530   :  { %v13578_v52 = vsub.s32 %v6808_v61, %v6811_v38  ;;  %v4369_v17 = vshrl.u32 %v4368_v20, 5  ;;  %v4379_v62 = vshll.u32 %v15510_v36, %v4370_v11  ;;  %v4382_v47 = vshll.u32 %v15511_v5, %v4370_v11 }
 0x531   :  { %v4375_v1 = vor.u32 %v4374_v53, %v4373_v49  ;;  %v4378_v29 = vor.u32 %v4377_v6, %v4376_v21  ;;  %v4385_v16 = vshll.u32 %v15512_v13, %v4370_v11  ;;  %v4386_v7 = vshrl.u32 %v15513_v18, %v4371_v28 }
 0x532   :  { %v6730_v34 = vsub.s32 4, %v13370_v37  ;;  %vm7717_vm2 = vcmp.lt.s32.totalorder %v7716_v44, 0  ;;  %v4381_v43 = vor.u32 %v4380_v15, %v4379_v62  ;;  %v4384_v24 = vor.u32 %v4383_v54, %v4382_v47 }
 0x533   :  { %v13585_v0 = vpop.eup %8222  ;;  %v6520_v61 = vxor.u32 2147483648, %v6519_v50  ;;  %v6719_v12 = vor.u32 %v6718_v30, %v6717_v19  ;;  %v4387_v20 = vor.u32 %v4386_v7, %v4385_v16  ;;  %v7638_v33 = vadd.s32 4294967169, %v4568_v56 }
 0x534   :  { %vm5800_vm3 = vweird.f32 %v15692_v22  ;;  %v6723_v38 = vor.u32 4788187, %v6722_v25  ;;  %v6814_v53 = vsub.s32 0, %v13578_v52  ;;  %vm4388_vm5 = vcmp.lt.s32.totalorder %v4369_v17, 1 }
 0x535   :  { %v4404_v11 = vshll.u32 %v4364_v23, 8  ;;  %vm6646_vm14 = vcmp.lt.s32.totalorder %v15681_v46, 0  ;;  %v13590_v6 = vsel %vm7717_vm2, 0, %v7716_v44  ;;  %v4372_v15 = vshrl.u32 %v15514_v63, %v4371_v28 }
 0x536   :  { %vm4391_vm6 = vcmp.lt.s32.totalorder %v4369_v17, 4  ;;  %v4396_v54 = vsel %vm4388_vm5, %v4375_v1, %v4378_v29  ;;  %vm4390_vm7 = vcmp.lt.s32.totalorder %v4369_v17, 3  ;;  %v4400_v49 = vsel %vm4388_vm5, %v4378_v29, %v4381_v43 }
 0x537   :  { %v4393_v19 = vsel %vm4391_vm6, %v4381_v43, 2102212464  ;;  %v4397_v30 = vsel %vm4391_vm6, %v4384_v24, 920167782  ;;  %vm4389_vm8 = vcmp.lt.s32.totalorder %v4369_v17, 2  ;;  %v4574_v56 = vadd.s32 1, %v7638_v33 }
 0x538   :  { %v4398_v25 = vsel %vm4390_vm7, %v4381_v43, %v4397_v30  ;;  %v4401_v21 = vsel %vm4391_vm6, %v4387_v20, 1326507024  ;;  %vm6012_vm4 = vcmp.eq.s32.totalorder %v13553_v58, 0  ;;  %v15714_v23 = vand.u32 2147483647, %v15681_v46  ;;  %v13610_v30 = vpop.f32.mrb[11].mxu1 }
 0x539   :  { %v7723_v28 = vmin.u32 %v6814_v53, %v13578_v52  ;;  %v4392_v62 = vsel %vm4388_vm5, %v4372_v15, %v4375_v1  ;;  %v4399_v47 = vsel %vm4389_vm8, %v4396_v54, %v4398_v25  ;;  %v4402_v16 = vsel %vm4390_vm7, %v4384_v24, %v4401_v21 }
 0x53a   :  { %vm13598_vm12 = vcmp.le.f32.partialorder %v15714_v23, 0.7853982  ;;  %v4394_v7 = vsel %vm4390_vm7, %v4378_v29, %v4393_v19  ;;  %v4403_v43 = vsel %vm4389_vm8, %v4400_v49, %v4402_v16  ;;  %v6521_v23 = vsel %vm6438_vm9, %v6520_v61, %v6519_v50 }
 0x53b   :  { %v13606_v20 = vmul.u32.u64.low %v4404_v11, %v4399_v47  ;;  %v13607_v33 = vmul.u32.u64.high %v4404_v11, %v4399_v47, %v13606_v20  ;;  %v6724_v26 = vand.u32 2147483647, %v6723_v38  ;;  %v6726_v51 = vcvt.s32.f32 %v6719_v12 }
 0x53c   :  { %vm4575_vm11 = vcmp.gt.s32.totalorder %v4574_v56, 0  ;;  %v6616_v1 = vsub.s32 4294967266, %v13590_v6  ;;  %v13615_v53 = vmul.u32.u64.low %v4404_v11, %v4403_v43  ;;  %v13616_v15 = vmul.u32.u64.high %v4404_v11, %v4403_v43, %v13615_v53 }
 0x53d   :  { %v4576_v29 = vsel %vm4575_vm11, %v4574_v56, 0  ;;  %v6816_v24 = vclz %v7723_v28  ;;  %v4395_v54 = vsel %vm4389_vm8, %v4392_v62, %v4394_v7  ;;  %v15480_v19 = vand.u32 2147483647, %v15713_v59 }
 0x53e   :  { %v4578_v49 = vand.u32 31, %v4576_v29  ;;  %v13623_v25 = vsel %vm5800_vm3, nan, %v13551_v45  ;;  %v6013_v50 = vxor.u32 2147483648, %v13585_v0  ;;  %vm6015_vm9 = vcmp.eq.s32.totalorder %v13553_v58, 2 }
 0x53f   :  { %15717 = vst [vmem:[#allocation17_spill] sm:$0xff] %v13623_v25  ;;  %v4414_v61 = vadd.s32 1, %v13607_v33  ;;  %v6524_v12 = vsel %vm13515_vm10, %v12305_v4, %v6521_v23  ;;  %v13632_v17 = vand.u32 3, %v13567_v32  ;;  %v13634_v38 = vmul.f32 %v6726_v51, %v6724_v26 }
 0x540   :  { %v13639_v22 = vsel %vm6646_vm14, %v6730_v34, %v13370_v37  ;;  %v6617_v45 = vadd.s32 127, %v6616_v1  ;;  %v4411_v21 = vmul.u32 %v4404_v11, %v4395_v54  ;;  %vm4413_vm15 = vc.u32 %v13616_v15, %v13606_v20 }
 0x541   :  { %v4579_v56 = vsub.s32 32, %v4578_v49  ;;  %v15718_v8 = vxor.u32 2147483648, %v13524_v60  ;;  %v7724_v32 = vadd.s32 4294967294, %v6816_v24  ;;  %v4415_v26 = vsel %vm4413_vm15, %v4414_v61, %v13607_v33 }
 0x542   :  { %v4571_v51 = vand.u32 8388607, %v15480_v19  ;;  %v13654_v37 = vsel %vm6012_vm4, %v13524_v60, %v6013_v50  ;;  %8224 = vcosq.f32 %v6524_v12  ;;  %v4416_v11 = vadd.s32 %v4415_v26, %v4411_v21 }
 0x543   :  { %v13646_v28 = vsel %vm6015_vm9, %v15718_v8, %v13585_v0  ;;  %8226 = vsinq.f32 %v6524_v12  ;;  %v6596_v62 = vadd.s32 %v13395_v41, %v13411_v39  ;;  %v6612_v47 = vsub.s32 32, %v13590_v6 }
 0x544   :  { %v6618_v16 = vshll.u32 %v6617_v45, 23  ;;  %v4417_v7 = vadd.s32 536870912, %v4416_v11  ;;  %v4582_v43 = vshrl.u32 %v15520_v31, %v4579_v56  ;;  %v4585_v60 = vshrl.u32 %v15510_v36, %v4579_v56 }
 0x545   :  { %vm7725_vm10 = vcmp.lt.s32.totalorder %v7724_v32, 0  ;;  %v4572_v33 = vor.u32 8388608, %v4571_v51  ;;  %v13665_v23 = vshrl.u32 %v4576_v29, 5  ;;  %v4588_v1 = vshrl.u32 %v15511_v5, %v4579_v56 }
 0x546   :  { %v13668_v53 = vshrl.u32 %v4417_v7, 30  ;;  %v4581_v24 = vshll.u32 %v15514_v63, %v4578_v49  ;;  %v4584_v41 = vshll.u32 %v15520_v31, %v4578_v49  ;;  %v4591_v39 = vshrl.u32 %v15512_v13, %v4579_v56 }
 0x547   :  { %v4587_v54 = vshll.u32 %v15510_v36, %v4578_v49  ;;  %v4590_v50 = vshll.u32 %v15511_v5, %v4578_v49  ;;  %v4593_v61 = vshll.u32 %v15512_v13, %v4578_v49  ;;  %v4594_v12 = vshrl.u32 %v15513_v18, %v4579_v56 }
 0x548   :  { %v13677_v29 = vsel %vm7725_vm10, 0, %v7724_v32  ;;  %v4419_v45 = vshll.u32 %v13668_v53, 30  ;;  %v4583_v21 = vor.u32 %v4582_v43, %v4581_v24  ;;  %v4586_v8 = vor.u32 %v4585_v60, %v4584_v41 }
 0x549   :  { %v6626_v26 = vsub.s32 4, %v13477_v9  ;;  %v4589_v51 = vor.u32 %v4588_v1, %v4587_v54  ;;  %v4592_v7 = vor.u32 %v4591_v39, %v4590_v50  ;;  %v4595_v19 = vor.u32 %v4594_v12, %v4593_v61 }
 0x54a   :  { %vm6542_vm13 = vcmp.lt.s32.totalorder %v15689_v42, 0  ;;  %v6613_v0 = vshll.u32 %v13500_v2, %v13590_v6  ;;  %v6614_v34 = vshrl.u32 %v6596_v62, %v6612_v47  ;;  %v6619_v49 = vor.u32 4788187, %v6618_v16 }
 0x54b   :  { %v13684_v55 = vsub.s32 %v4416_v11, %v4419_v45  ;;  %v6824_v32 = vsub.s32 4294967266, %v13677_v29  ;;  %vm4596_vm0 = vcmp.lt.s32.totalorder %v13665_v23, 1  ;;  %v4612_v43 = vshll.u32 %v4572_v33, 8 }
 0x54c   :  { %v4463_v60 = vand.u32 2139095040, %v12983_v48  ;;  %v8225_v24 = vpop.eup %8224  ;;  %v4580_v1 = vshrl.u32 %v15514_v63, %v4579_v56  ;;  %vm4598_vm1 = vcmp.lt.s32.totalorder %v13665_v23, 3  ;;  %vm4599_vm2 = vcmp.lt.s32.totalorder %v13665_v23, 4 }
 0x54d   :  { %v4604_v2 = vsel %vm4596_vm0, %v4583_v21, %v4586_v8  ;;  %v8227_v6 = vpop.eup %8226  ;;  %v15719_v11 = vand.u32 2147483647, %v15689_v42  ;;  %v4601_v47 = vsel %vm4599_vm2, %v4589_v51, 2102212464  ;;  %v4605_v16 = vsel %vm4599_vm2, %v4592_v7, 920167782 }
 0x54e   :  { %v4608_v33 = vsel %vm4596_vm0, %v4586_v8, %v4589_v51  ;;  %v4609_v56 = vsel %vm4599_vm2, %v4595_v19, 1326507024  ;;  %v4422_v41 = vsub.s32 0, %v13684_v55  ;;  %vm4597_vm5 = vcmp.lt.s32.totalorder %v13665_v23, 2 }
 0x54f   :  { %vm13696_vm3 = vcmp.le.f32.partialorder %v15719_v11, 0.7853982  ;;  %v4606_v39 = vsel %vm4598_vm1, %v4589_v51, %v4605_v16  ;;  %v4610_v54 = vsel %vm4598_vm1, %v4592_v7, %v4609_v56  ;;  %vm6011_vm6 = vcmp.lt.s32.totalorder %v13553_v58, 2 }
 0x550   :  { %vm6535_vm7 = vcmp.eq.s32.totalorder %v13632_v17, 2  ;;  %v6825_v50 = vadd.s32 127, %v6824_v32  ;;  %v4607_v61 = vsel %vm4597_vm5, %v4604_v2, %v4606_v39  ;;  %v4611_v19 = vsel %vm4597_vm5, %v4608_v33, %v4610_v54  ;;  %v13733_v33 = vpop.f32.mrb[12].mxu0 }
 0x551   :  { %v4464_v12 = vshrl.u32 %v4463_v60, 23  ;;  %vm6532_vm8 = vcmp.eq.s32.totalorder %v13632_v17, 0  ;;  %v6615_v45 = vor.u32 %v6614_v34, %v6613_v0  ;;  %v6820_v51 = vsub.s32 32, %v13677_v29 }
 0x552   :  { %v4600_v7 = vsel %vm4596_vm0, %v4580_v1, %v4583_v21  ;;  %v4602_v11 = vsel %vm4598_vm1, %v4586_v8, %v4601_v47  ;;  %v13720_v16 = vmul.u32.u64.low %v4612_v43, %v4611_v19  ;;  %v13721_v32 = vmul.u32.u64.high %v4612_v43, %v4611_v19, %v13720_v16 }
 0x553   :  { %v13723_v56 = vmul.u32.u64.low %v4612_v43, %v4607_v61  ;;  %v13724_v2 = vmul.u32.u64.high %v4612_v43, %v4607_v61, %v13723_v56  ;;  %vm6008_vm4 = vweird.f32 %v15702_v10  ;;  %v15722_v34 = vsel %vm13598_vm12, 0, %v13639_v22 }
 0x554   :  { %v6737_v0 = vadd.s32 3, %v15722_v34  ;;  %v6620_v60 = vand.u32 2147483647, %v6619_v49  ;;  %v7631_v21 = vmin.u32 %v4422_v41, %v13684_v55  ;;  %v7634_v1 = vadd.s32 4294967169, %v4464_v12 }
 0x555   :  { %vm6531_vm11 = vcmp.lt.s32.totalorder %v13632_v17, 2  ;;  %v6627_v8 = vsel %vm6542_vm13, %v6626_v26, %v13477_v9  ;;  %v6804_v47 = vadd.s32 %v13509_v3, %v13507_v35  ;;  %v6826_v39 = vshll.u32 %v6825_v50, 23 }
 0x556   :  { %v4603_v22 = vsel %vm4597_vm5, %v4600_v7, %v4602_v11  ;;  %v6533_v54 = vxor.u32 2147483648, %v8227_v6  ;;  %v6536_v49 = vxor.u32 2147483648, %v8225_v24  ;;  %v6622_v61 = vcvt.s32.f32 %v6615_v45 }
 0x557   :  { %v4470_v41 = vadd.s32 1, %v7634_v1  ;;  %v15723_v19 = vxor.u32 2147483648, %v13634_v38  ;;  %v6822_v16 = vshrl.u32 %v6804_v47, %v6820_v51  ;;  %vm4621_vm9 = vc.u32 %v13721_v32, %v13723_v56 }
 0x558   :  { %v4622_v9 = vadd.s32 1, %v13724_v2  ;;  %v6623_v35 = vmul.f32 %v6622_v61, %v6620_v60  ;;  %v6629_v3 = vsel %vm13696_vm3, 0, %v6627_v8  ;;  %v4424_v23 = vclz %v7631_v21 }
 0x559   :  { %v6729_v12 = vsel %vm6646_vm14, %v15723_v19, %v13634_v38  ;;  %v4619_v26 = vmul.u32 %v4612_v43, %v4603_v22  ;;  %v6821_v50 = vshll.u32 %v13578_v52, %v13677_v29  ;;  %v6827_v45 = vor.u32 4788187, %v6826_v39 }
 0x55a   :  { %v4623_v7 = vsel %vm4621_vm9, %v4622_v9, %v13724_v2  ;;  %vm4471_vm15 = vcmp.gt.s32.totalorder %v4470_v41, 0  ;;  %v6018_v38 = vsel %vm6011_vm6, %v13654_v37, %v13646_v28  ;;  %v6537_v51 = vsel %vm6535_vm7, %v6536_v49, %v8227_v6 }
 0x55b   :  { %v4624_v11 = vadd.s32 %v4623_v7, %v4619_v26  ;;  %v15481_v34 = vand.u32 2147483647, %v12983_v48  ;;  %v6534_v43 = vsel %vm6532_vm8, %v8225_v24, %v6533_v54  ;;  %v6732_v52 = vsel %vm13598_vm12, %v15681_v46, %v6729_v12 }
 0x55c   :  { %v6823_v29 = vor.u32 %v6822_v16, %v6821_v50  ;;  %v4472_v2 = vsel %vm4471_vm15, %v4470_v41, 0  ;;  %v6624_v60 = vxor.u32 2147483648, %v6623_v35  ;;  %v6633_v21 = vadd.s32 3, %v6629_v3 }
 0x55d   :  { %v7632_v1 = vadd.s32 4294967294, %v4424_v23  ;;  %v4625_v58 = vadd.s32 536870912, %v4624_v11  ;;  %v13770_v28 = vsel %vm6008_vm4, nan, %v6018_v38  ;;  %v13772_v37 = vand.u32 3, %v6737_v0 }
 0x55e   :  { %15724 = vst [vmem:[#allocation22_spill] sm:$0xff] %v13770_v28  ;;  %v6828_v6 = vand.u32 2147483647, %v6827_v45  ;;  %v4474_v8 = vand.u32 31, %v4472_v2  ;;  %v13776_v24 = vsel %vm6531_vm11, %v6534_v43, %v6537_v51  ;;  %8228 = vcosq.f32 %v6732_v52 }
 0x55f   :  { %v13778_v44 = vshrl.u32 %v4625_v58, 30  ;;  %v4467_v47 = vand.u32 8388607, %v15481_v34  ;;  %8230 = vsinq.f32 %v6732_v52  ;;  %v6830_v39 = vcvt.s32.f32 %v6823_v29 }
 0x560   :  { %v4475_v22 = vsub.s32 32, %v4474_v8  ;;  %v4671_v10 = vand.u32 2139095040, %v13142_v40  ;;  %v6625_v0 = vsel %vm6542_vm13, %v6624_v60, %v6623_v35  ;;  %v13785_v54 = vand.u32 3, %v6633_v21 }
 0x561   :  { %vm7633_vm14 = vcmp.lt.s32.totalorder %v7632_v1, 0  ;;  %v4627_v17 = vshll.u32 %v13778_v44, 30  ;;  %v6831_v49 = vmul.f32 %v6830_v39, %v6828_v6  ;;  %v4468_v16 = vor.u32 8388608, %v4467_v47 }
 0x562   :  { %v4478_v61 = vshrl.u32 %v15520_v31, %v4475_v22  ;;  %v4481_v41 = vshrl.u32 %v15510_v36, %v4475_v22  ;;  %v4484_v19 = vshrl.u32 %v15511_v5, %v4475_v22  ;;  %v4477_v9 = vshll.u32 %v15514_v63, %v4474_v8 }
 0x563   :  { %v13791_v12 = vsub.s32 %v4624_v11, %v4627_v17  ;;  %v4487_v3 = vshrl.u32 %v15512_v13, %v4475_v22  ;;  %v13795_v35 = vsel %vm7633_vm14, 0, %v7632_v1  ;;  %v4480_v23 = vshll.u32 %v15520_v31, %v4474_v8  ;;  %v15725_v11 = vld [vmem:[#allocation18_spill] sm:$0xff] }
 0x564   :  { %v4483_v26 = vshll.u32 %v15510_v36, %v4474_v8  ;;  %v4672_v50 = vshrl.u32 %v4671_v10, 23  ;;  %v4473_v7 = vshrl.u32 %v4472_v2, 5  ;;  %v4479_v38 = vor.u32 %v4478_v61, %v4477_v9 }
 0x565   :  { %v4630_v45 = vsub.s32 0, %v13791_v12  ;;  %v4486_v51 = vshll.u32 %v15511_v5, %v4474_v8  ;;  %vm6750_vm12 = vcmp.lt.s32.totalorder %v15725_v11, 0  ;;  %v4482_v43 = vor.u32 %v4481_v41, %v4480_v23 }
 0x566   :  { %v4485_v52 = vor.u32 %v4484_v19, %v4483_v26  ;;  %v4489_v29 = vshll.u32 %v15512_v13, %v4474_v8  ;;  %v4490_v60 = vshrl.u32 %v15513_v18, %v4475_v22  ;;  %v6628_v21 = vsel %vm13696_vm3, %v15689_v42, %v6625_v0 }
 0x567   :  { %v6834_v1 = vsub.s32 4, %v13559_v57  ;;  %v7639_v58 = vmin.u32 %v4630_v45, %v13791_v12  ;;  %v4488_v2 = vor.u32 %v4487_v3, %v4486_v51  ;;  %v6832_v6 = vxor.u32 2147483648, %v6831_v49 }
 0x568   :  { %v4491_v47 = vor.u32 %v4490_v60, %v4489_v29  ;;  %v13809_v39 = vshll.u32 %v4468_v16, 8  ;;  %v7642_v10 = vadd.s32 4294967169, %v4672_v50  ;;  %v8229_v17 = vpop.eup %8228  ;;  %v4432_v61 = vsub.s32 4294967266, %v13795_v35 }
 0x569   :  { %v4632_v8 = vclz %v7639_v58  ;;  %vm4492_vm10 = vcmp.lt.s32.totalorder %v4473_v7, 1  ;;  %vm4495_vm13 = vcmp.lt.s32.totalorder %v4473_v7, 4  ;;  %v8231_v41 = vpop.eup %8230  ;;  %v15726_v62 = vand.u32 2147483647, %v15725_v11 }
 0x56a   :  { %v4476_v19 = vshrl.u32 %v15514_v63, %v4475_v22  ;;  %vm4493_vm1 = vcmp.lt.s32.totalorder %v4473_v7, 2  ;;  %v4497_v9 = vsel %vm4495_vm13, %v4485_v52, 2102212464  ;;  %v4500_v16 = vsel %vm4492_vm10, %v4479_v38, %v4482_v43 }
 0x56b   :  { %vm13814_vm0 = vcmp.le.f32.partialorder %v15726_v62, 0.7853982  ;;  %v7640_v3 = vadd.s32 4294967294, %v4632_v8  ;;  %vm4494_vm2 = vcmp.lt.s32.totalorder %v4473_v7, 3  ;;  %v4501_v23 = vsel %vm4495_vm13, %v4488_v2, 920167782 }
 0x56c   :  { %v4504_v26 = vsel %vm4492_vm10, %v4482_v43, %v4485_v52  ;;  %v4496_v50 = vsel %vm4492_vm10, %v4476_v19, %v4479_v38  ;;  %v4502_v45 = vsel %vm4494_vm2, %v4485_v52, %v4501_v23  ;;  %v4505_v51 = vsel %vm4495_vm13, %v4491_v47, 1326507024  ;;  %v13830_v38 = vpop.f32.mrb[12].mxu1 }
 0x56d   :  { %v4678_v29 = vadd.s32 1, %v7642_v10  ;;  %vm6740_vm3 = vcmp.eq.s32.totalorder %v13772_v37, 0  ;;  %vm6743_vm5 = vcmp.eq.s32.totalorder %v13772_v37, 2  ;;  %vm7641_vm6 = vcmp.lt.s32.totalorder %v7640_v3, 0  ;;  %15729 = vst [vmem:[#allocation24_spill] sm:$0xff] %v13830_v38 }
 0x56e   :  { %v4498_v60 = vsel %vm4494_vm2, %v4482_v43, %v4497_v9  ;;  %v4503_v58 = vsel %vm4493_vm1, %v4500_v16, %v4502_v45  ;;  %v4506_v22 = vsel %vm4494_vm2, %v4488_v2, %v4505_v51  ;;  %v13822_v62 = vsel %vm7641_vm6, 0, %v7640_v3 }
 0x56f   :  { %v4507_v8 = vsel %vm4493_vm1, %v4504_v26, %v4506_v22  ;;  %v13826_v34 = vmul.u32.u64.low %v13809_v39, %v4503_v58  ;;  %v13827_v28 = vmul.u32.u64.high %v13809_v39, %v4503_v58, %v13826_v34  ;;  %v6833_v52 = vsel %vm6750_vm12, %v6832_v6, %v6831_v49 }
 0x570   :  { %v4428_v47 = vsub.s32 32, %v13795_v35  ;;  %v4433_v43 = vadd.s32 127, %v4432_v61  ;;  %vm4679_vm7 = vcmp.gt.s32.totalorder %v4678_v29, 0  ;;  %v15482_v19 = vand.u32 2147483647, %v13142_v40 }
 0x571   :  { %v13836_v2 = vmul.u32.u64.low %v13809_v39, %v4507_v8  ;;  %v13837_v10 = vmul.u32.u64.high %v13809_v39, %v4507_v8, %v13836_v2  ;;  %v4680_v9 = vsel %vm4679_vm7, %v4678_v29, 0  ;;  %v4412_v16 = vadd.s32 %v13606_v20, %v13616_v15 }
 0x572   :  { %v4640_v3 = vsub.s32 4294967266, %v13822_v62  ;;  %v4499_v23 = vsel %vm4493_vm1, %v4496_v50, %v4498_v60  ;;  %v4682_v26 = vand.u32 31, %v4680_v9  ;;  %v6741_v49 = vxor.u32 2147483648, %v8231_v41 }
 0x573   :  { %v6744_v6 = vxor.u32 2147483648, %v8229_v17  ;;  %v13847_v61 = vsel %vm6750_vm12, %v6834_v1, %v13559_v57  ;;  %v4518_v45 = vadd.s32 1, %v13827_v28  ;;  %8232 = vcosq.f32 %v6628_v21 }
 0x574   :  { %v6836_v51 = vsel %vm13814_vm0, %v15725_v11, %v6833_v52  ;;  %v4430_v20 = vshrl.u32 %v4412_v16, %v4428_v47  ;;  %v4434_v15 = vshll.u32 %v4433_v43, 23  ;;  %v4515_v7 = vmul.u32 %v13809_v39, %v4499_v23 }
 0x575   :  { %vm4517_vm8 = vc.u32 %v13837_v10, %v13826_v34  ;;  %v4675_v50 = vand.u32 8388607, %v15482_v19  ;;  %v4683_v29 = vsub.s32 32, %v4682_v26  ;;  %8234 = vsinq.f32 %v6628_v21 }
 0x576   :  { %v4429_v57 = vshll.u32 %v13684_v55, %v13795_v35  ;;  %v4641_v1 = vadd.s32 127, %v4640_v3  ;;  %v4519_v60 = vsel %vm4517_vm8, %v4518_v45, %v13827_v28  ;;  %v13863_v58 = vsel %vm6740_vm3, %v8229_v17, %v6741_v49 }
 0x577   :  { %v13867_v39 = vsel %vm6743_vm5, %v6744_v6, %v8231_v41  ;;  %8236 = vcosq.f32 %v6836_v51  ;;  %v4520_v22 = vadd.s32 %v4519_v60, %v4515_v7  ;;  %v4435_v55 = vor.u32 4788187, %v4434_v15 }
 0x578   :  { %8238 = vsinq.f32 %v6836_v51  ;;  %v4431_v8 = vor.u32 %v4430_v20, %v4429_v57  ;;  %v4676_v52 = vor.u32 8388608, %v4675_v50  ;;  %v4686_v28 = vshrl.u32 %v15520_v31, %v4683_v29 }
 0x579   :  { %v4521_v35 = vadd.s32 536870912, %v4520_v22  ;;  %v4689_v17 = vshrl.u32 %v15510_v36, %v4683_v29  ;;  %v4636_v47 = vsub.s32 32, %v13822_v62  ;;  %v4642_v43 = vshll.u32 %v4641_v1, 23 }
 0x57a   :  { %v13875_v41 = vshrl.u32 %v4680_v9, 5  ;;  %v4692_v2 = vshrl.u32 %v15511_v5, %v4683_v29  ;;  %v4685_v3 = vshll.u32 %v15514_v63, %v4682_v26  ;;  %v4688_v23 = vshll.u32 %v15520_v31, %v4682_v26 }
 0x57b   :  { %v13878_v16 = vshrl.u32 %v4521_v35, 30  ;;  %v4695_v49 = vshrl.u32 %v15512_v13, %v4683_v29  ;;  %v4691_v6 = vshll.u32 %v15510_v36, %v4682_v26  ;;  %v4694_v45 = vshll.u32 %v15511_v5, %v4682_v26 }
 0x57c   :  { %v4697_v51 = vshll.u32 %v15512_v13, %v4682_v26  ;;  %v4698_v20 = vshrl.u32 %v15513_v18, %v4683_v29  ;;  %v4620_v9 = vadd.s32 %v13723_v56, %v13721_v32  ;;  %v4687_v7 = vor.u32 %v4686_v28, %v4685_v3 }
 0x57d   :  { %v4523_v15 = vshll.u32 %v13878_v16, 30  ;;  %v4690_v50 = vor.u32 %v4689_v17, %v4688_v23  ;;  %v13890_v57 = vpop.eup %8232  ;;  %vm6528_vm4 = vweird.f32 %v12305_v4  ;;  %v4438_v1 = vcvt.s32.f32 %v4431_v8  ;;  %v15730_v17 = vld [vmem:[#allocation13_spill] sm:$0xff] }
 0x57e   :  { %v4693_v60 = vor.u32 %v4692_v2, %v4691_v6  ;;  %v4696_v35 = vor.u32 %v4695_v49, %v4694_v45  ;;  %v4699_v19 = vor.u32 %v4698_v20, %v4697_v51  ;;  %v4436_v21 = vand.u32 2147483647, %v4435_v55 }
 0x57f   :  { %v4637_v26 = vshll.u32 %v13791_v12, %v13822_v62  ;;  %v13895_v25 = vsub.s32 %v4520_v22, %v4523_v15  ;;  %v4716_v38 = vshll.u32 %v4676_v52, 8  ;;  %v13897_v32 = vpop.eup %8234  ;;  %v4638_v56 = vshrl.u32 %v4620_v9, %v4636_v47 }
 0x580   :  { %v4643_v28 = vor.u32 4788187, %v4642_v43  ;;  %vm4700_vm11 = vcmp.lt.s32.totalorder %v13875_v41, 1  ;;  %v5191_v3 = vand.u32 2139095040, %v15730_v17  ;;  %vm4702_vm9 = vcmp.lt.s32.totalorder %v13875_v41, 3 }
 0x581   :  { %v13901_v23 = vpop.eup %8236  ;;  %v4526_v8 = vsub.s32 0, %v13895_v25  ;;  %vm4703_vm15 = vcmp.lt.s32.totalorder %v13875_v41, 4  ;;  %v4708_v12 = vsel %vm4700_vm11, %v4687_v7, %v4690_v50  ;;  %v4712_v52 = vsel %vm4700_vm11, %v4690_v50, %v4693_v60 }
 0x582   :  { %v13908_v62 = vpop.eup %8238  ;;  %v4705_v22 = vsel %vm4703_vm15, %v4693_v60, 2102212464  ;;  %v4709_v55 = vsel %vm4703_vm15, %v4696_v35, 920167782  ;;  %v4713_v47 = vsel %vm4703_vm15, %v4699_v19, 1326507024  ;;  %v4684_v43 = vshrl.u32 %v15514_v63, %v4683_v29 }
 0x583   :  { %vm4701_vm14 = vcmp.lt.s32.totalorder %v13875_v41, 2  ;;  %v4710_v2 = vsel %vm4702_vm9, %v4693_v60, %v4709_v55  ;;  %v4714_v49 = vsel %vm4702_vm9, %v4696_v35, %v4713_v47  ;;  %v7635_v6 = vmin.u32 %v4526_v8, %v13895_v25  ;;  %v13928_v60 = vpop.f32.mrb[13].mxu0 }
 0x584   :  { %v4711_v45 = vsel %vm4701_vm14, %v4708_v12, %v4710_v2  ;;  %v4715_v51 = vsel %vm4701_vm14, %v4712_v52, %v4714_v49  ;;  %v5192_v20 = vshrl.u32 %v5191_v3, 23  ;;  %vm6736_vm12 = vweird.f32 %v15681_v46  ;;  %15731 = vst [vmem:[#allocation16_spill] sm:$0xff] %v13928_v60 }
 0x585   :  { %v4439_v19 = vmul.f32 %v4438_v1, %v4436_v21  ;;  %v4639_v29 = vor.u32 %v4638_v56, %v4637_v26  ;;  %v4704_v9 = vsel %vm4700_vm11, %v4684_v43, %v4687_v7  ;;  %v4706_v15 = vsel %vm4702_vm9, %v4690_v50, %v4705_v22 }
 0x586   :  { %v13930_v35 = vmul.u32.u64.low %v4716_v38, %v4715_v51  ;;  %v13931_v8 = vmul.u32.u64.high %v4716_v38, %v4715_v51, %v13930_v35  ;;  %v13933_v12 = vmul.u32.u64.low %v4716_v38, %v4711_v45  ;;  %v13934_v55 = vmul.u32.u64.high %v4716_v38, %v4711_v45, %v13933_v12 }
 0x587   :  { %v13940_v21 = vsel %vm6528_vm4, nan, %v13776_v24  ;;  %vm6739_vm10 = vcmp.lt.s32.totalorder %v13772_v37, 2  ;;  %vm4358_vm13 = vcmp.lt.s32.totalorder %v15708_v27, 0  ;;  %v7662_v7 = vadd.s32 4294967169, %v5192_v20 }
 0x588   :  { %15732 = vst [vmem:[#allocation12_spill] sm:$0xff] %v13940_v21  ;;  %vm6636_vm1 = vcmp.eq.s32.totalorder %v13785_v54, 0  ;;  %v15733_v50 = vand.u32 2147483647, %v15708_v27  ;;  %v4644_v26 = vand.u32 2147483647, %v4643_v28  ;;  %v4528_v56 = vclz %v7635_v6 }
 0x589   :  { %v4707_v4 = vsel %vm4701_vm14, %v4704_v9, %v4706_v15  ;;  %v6746_v24 = vsel %vm6739_vm10, %v13863_v58, %v13867_v39  ;;  %vm6639_vm3 = vcmp.eq.s32.totalorder %v13785_v54, 2  ;;  %v15736_v37 = vsel %vm13814_vm0, 0, %v13847_v61 }
 0x58a   :  { %vm13947_vm2 = vcmp.le.f32.partialorder %v15733_v50, 0.7853982  ;;  %v6841_v3 = vadd.s32 3, %v15736_v37  ;;  %v5198_v22 = vadd.s32 1, %v7662_v7  ;;  %v4440_v52 = vxor.u32 2147483648, %v4439_v19  ;;  %v15741_v37 = vld [vmem:[#allocation20_spill] sm:$0xff] }
 0x58b   :  { %v4646_v47 = vcvt.s32.f32 %v4639_v29  ;;  %vm4725_vm5 = vc.u32 %v13931_v8, %v13933_v12  ;;  %v4726_v28 = vadd.s32 1, %v13934_v55  ;;  %v6640_v41 = vxor.u32 2147483648, %v13890_v57 }
 0x58c   :  { %v4442_v43 = vsub.s32 4, %v13668_v53  ;;  %v4650_v58 = vsub.s32 4, %v13778_v44  ;;  %v4723_v39 = vmul.u32 %v4716_v38, %v4707_v4  ;;  %v7636_v0 = vadd.s32 4294967294, %v4528_v56 }
 0x58d   :  { %v4647_v2 = vmul.f32 %v4646_v47, %v4644_v26  ;;  %v4727_v61 = vsel %vm4725_vm5, %v4726_v28, %v13934_v55  ;;  %vm5199_vm0 = vcmp.gt.s32.totalorder %v5198_v22, 0  ;;  %v6637_v49 = vxor.u32 2147483648, %v13897_v32 }
 0x58e   :  { %vm4566_vm6 = vcmp.lt.s32.totalorder %v15713_v59, 0  ;;  %v4728_v6 = vadd.s32 %v4727_v61, %v4723_v39  ;;  %v15484_v45 = vand.u32 2147483647, %v15730_v17  ;;  %v13972_v51 = vsel %vm6736_vm12, nan, %v6746_v24 }
 0x58f   :  { %15737 = vst [vmem:[#allocation11_spill] sm:$0xff] %v13972_v51  ;;  %v4441_v20 = vsel %vm4358_vm13, %v4440_v52, %v4439_v19  ;;  %v15738_v38 = vand.u32 2147483647, %v15713_v59  ;;  %v5200_v9 = vsel %vm5199_vm0, %v5198_v22, 0  ;;  %v13985_v15 = vsel %vm6639_vm3, %v6640_v41, %v13897_v32 }
 0x590   :  { %v13987_v35 = vand.u32 3, %v6841_v3  ;;  %v13992_v46 = vsel %vm4358_vm13, %v4442_v43, %v13668_v53  ;;  %v4729_v19 = vadd.s32 536870912, %v4728_v6  ;;  %v4648_v55 = vxor.u32 2147483648, %v4647_v2 }
 0x591   :  { %vm13978_vm7 = vcmp.le.f32.partialorder %v15738_v38, 0.7853982  ;;  %v13997_v7 = vsel %vm4566_vm6, %v4650_v58, %v13778_v44  ;;  %vm7637_vm8 = vcmp.lt.s32.totalorder %v7636_v0, 0  ;;  %v5202_v50 = vand.u32 31, %v5200_v9 }
 0x592   :  { %v14002_v32 = vsel %vm6636_vm1, %v13890_v57, %v6637_v49  ;;  %v4444_v26 = vsel %vm13947_vm2, %v15708_v27, %v4441_v20  ;;  %v14007_v53 = vshrl.u32 %v4729_v19, 30  ;;  %v5195_v56 = vand.u32 8388607, %v15484_v45 }
 0x593   :  { %v5203_v24 = vsub.s32 32, %v5202_v50  ;;  %v5399_v3 = vand.u32 2139095040, %v15741_v37  ;;  %v14020_v52 = vsel %vm7637_vm8, 0, %v7636_v0  ;;  %8240 = vcosq.f32 %v4444_v26 }
 0x594   :  { %v4731_v47 = vshll.u32 %v14007_v53, 30  ;;  %v4649_v28 = vsel %vm4566_vm6, %v4648_v55, %v4647_v2  ;;  %v5196_v39 = vor.u32 8388608, %v5195_v56  ;;  %v4536_v0 = vsub.s32 4294967266, %v14020_v52 }
 0x595   :  { %v5206_v41 = vshrl.u32 %v15520_v31, %v5203_v24  ;;  %v5209_v43 = vshrl.u32 %v15510_v36, %v5203_v24  ;;  %v5212_v61 = vshrl.u32 %v15511_v5, %v5203_v24  ;;  %v5215_v49 = vshrl.u32 %v15512_v13, %v5203_v24 }
 0x596   :  { %v14027_v58 = vsub.s32 %v4728_v6, %v4731_v47  ;;  %v5205_v20 = vshll.u32 %v15514_v63, %v5202_v50  ;;  %v5208_v38 = vshll.u32 %v15520_v31, %v5202_v50  ;;  %v5400_v19 = vshrl.u32 %v5399_v3, 23 }
 0x597   :  { %v5201_v55 = vshrl.u32 %v5200_v9, 5  ;;  %v5211_v45 = vshll.u32 %v15510_v36, %v5202_v50  ;;  %v5214_v6 = vshll.u32 %v15511_v5, %v5202_v50  ;;  %v5217_v22 = vshll.u32 %v15512_v13, %v5202_v50 }
 0x598   :  { %v4734_v2 = vsub.s32 0, %v14027_v58  ;;  %v5207_v47 = vor.u32 %v5206_v41, %v5205_v20  ;;  %v5210_v56 = vor.u32 %v5209_v43, %v5208_v38  ;;  %v5218_v57 = vshrl.u32 %v15513_v18, %v5203_v24 }
 0x599   :  { %8242 = vsinq.f32 %v4444_v26  ;;  %v5213_v4 = vor.u32 %v5212_v61, %v5211_v45  ;;  %v5216_v51 = vor.u32 %v5215_v49, %v5214_v6  ;;  %v14043_v3 = vsel %vm13978_vm7, %v15713_v59, %v4649_v28 }
 0x59a   :  { %v7643_v44 = vmin.u32 %v4734_v2, %v14027_v58  ;;  %v4516_v9 = vadd.s32 %v13826_v34, %v13837_v10  ;;  %v5219_v21 = vor.u32 %v5218_v57, %v5217_v22  ;;  %v7670_v41 = vadd.s32 4294967169, %v5400_v19 }
 0x59b   :  { %vm6635_vm4 = vcmp.lt.s32.totalorder %v13785_v54, 2  ;;  %vm6847_vm11 = vcmp.eq.s32.totalorder %v13987_v35, 2  ;;  %v4532_v50 = vsub.s32 32, %v14020_v52  ;;  %v4537_v26 = vadd.s32 127, %v4536_v0 }
 0x59c   :  { %vm5220_vm9 = vcmp.lt.s32.totalorder %v5201_v55, 1  ;;  %v5236_v45 = vshll.u32 %v5196_v39, 8  ;;  %vm6844_vm15 = vcmp.eq.s32.totalorder %v13987_v35, 0  ;;  %v5204_v43 = vshrl.u32 %v15514_v63, %v5203_v24 }
 0x59d   :  { %vm5222_vm14 = vcmp.lt.s32.totalorder %v5201_v55, 3  ;;  %vm5223_vm12 = vcmp.lt.s32.totalorder %v5201_v55, 4  ;;  %v5228_v28 = vsel %vm5220_vm9, %v5207_v47, %v5210_v56  ;;  %v4736_v34 = vclz %v7643_v44  ;;  %v14054_v61 = vpop.eup %8240 }
 0x59e   :  { %v5225_v10 = vsel %vm5223_vm12, %v5213_v4, 2102212464  ;;  %v5229_v57 = vsel %vm5223_vm12, %v5216_v51, 920167782  ;;  %v5232_v22 = vsel %vm5220_vm9, %v5210_v56, %v5213_v4  ;;  %vm6632_vm10 = vweird.f32 %v15689_v42 }
 0x59f   :  { %vm5221_vm13 = vcmp.lt.s32.totalorder %v5201_v55, 2  ;;  %v5230_v39 = vsel %vm5222_vm14, %v5213_v4, %v5229_v57  ;;  %v5233_v49 = vsel %vm5223_vm12, %v5219_v21, 1326507024  ;;  %v5406_v0 = vadd.s32 1, %v7670_v41  ;;  %v14068_v4 = vpop.f32.mrb[13].mxu1 }
 0x5a0   :  { %vm6843_vm1 = vcmp.lt.s32.totalorder %v13987_v35, 2  ;;  %v4538_v24 = vshll.u32 %v4537_v26, 23  ;;  %v5224_v20 = vsel %vm5220_vm9, %v5204_v43, %v5207_v47  ;;  %v5231_v44 = vsel %vm5221_vm13, %v5228_v28, %v5230_v39 }
 0x5a1   :  { %v5234_v38 = vsel %vm5222_vm14, %v5216_v51, %v5233_v49  ;;  %v5226_v19 = vsel %vm5222_vm14, %v5210_v56, %v5225_v10  ;;  %v14064_v6 = vmul.u32.u64.low %v5236_v45, %v5231_v44  ;;  %v14065_v60 = vmul.u32.u64.high %v5236_v45, %v5231_v44, %v14064_v6 }
 0x5a2   :  { %v5235_v2 = vsel %vm5221_vm13, %v5232_v22, %v5234_v38  ;;  %8244 = vcosq.f32 %v14043_v3  ;;  %v4534_v21 = vshrl.u32 %v4516_v9, %v4532_v50  ;;  %v7644_v41 = vadd.s32 4294967294, %v4736_v34 }
 0x5a3   :  { %vm5407_vm3 = vcmp.gt.s32.totalorder %v5406_v0, 0  ;;  %v14071_v47 = vmul.u32.u64.low %v5236_v45, %v5235_v2  ;;  %v14072_v26 = vmul.u32.u64.high %v5236_v45, %v5235_v2, %v14071_v47  ;;  %v5396_v51 = vand.u32 2147483647, %v15741_v37  ;;  %v14075_v56 = vpop.eup %8242 }
 0x5a4   :  { %v5408_v43 = vsel %vm5407_vm3, %v5406_v0, 0  ;;  %v4533_v28 = vshll.u32 %v13895_v25, %v14020_v52  ;;  %v4539_v10 = vor.u32 4788187, %v4538_v24  ;;  %v5227_v57 = vsel %vm5221_vm13, %v5224_v20, %v5226_v19 }
 0x5a5   :  { %v5410_v22 = vand.u32 31, %v5408_v43  ;;  %v6642_v9 = vsel %vm6635_vm4, %v14002_v32, %v13985_v15  ;;  %v15742_v50 = vxor.u32 2147483648, %v13901_v23  ;;  %v15743_v39 = vsel %vm13947_vm2, 0, %v13992_v46 }
 0x5a6   :  { %v4449_v25 = vadd.s32 3, %v15743_v39  ;;  %v5246_v52 = vadd.s32 1, %v14065_v60  ;;  %v15744_v55 = vxor.u32 2147483648, %v13908_v62  ;;  %v15745_v15 = vsel %vm13978_vm7, 0, %v13997_v7 }
 0x5a7   :  { %v6849_v34 = vsel %vm6847_vm11, %v15742_v50, %v13908_v62  ;;  %v4657_v32 = vadd.s32 3, %v15745_v15  ;;  %v4535_v49 = vor.u32 %v4534_v21, %v4533_v28  ;;  %vm7645_vm5 = vcmp.lt.s32.totalorder %v7644_v41, 0 }
 0x5a8   :  { %v6846_v54 = vsel %vm6844_vm15, %v13901_v23, %v15744_v55  ;;  %v5243_v0 = vmul.u32 %v5236_v45, %v5227_v57  ;;  %vm5245_vm2 = vc.u32 %v14072_v26, %v14064_v6  ;;  %v5403_v1 = vand.u32 8388607, %v5396_v51 }
 0x5a9   :  { %v5411_v46 = vsub.s32 32, %v5410_v22  ;;  %v14109_v62 = vsel %vm6632_vm10, nan, %v6642_v9  ;;  %vm4462_vm0 = vcmp.lt.s32.totalorder %v12983_v48, 0  ;;  %v4540_v23 = vand.u32 2147483647, %v4539_v10 }
 0x5aa   :  { %v5247_v29 = vsel %vm5245_vm2, %v5246_v52, %v14065_v60  ;;  %v14115_v7 = vsel %vm6843_vm1, %v6846_v54, %v6849_v34  ;;  %v14117_v45 = vand.u32 3, %v4449_v25  ;;  %v14119_v24 = vsel %vm7645_vm5, 0, %v7644_v41 }
 0x5ab   :  { %v5248_v20 = vadd.s32 %v5247_v29, %v5243_v0  ;;  %8246 = vsinq.f32 %v14043_v3  ;;  %v14122_v44 = vand.u32 3, %v4657_v32  ;;  %v4542_v42 = vcvt.s32.f32 %v4535_v49 }
 0x5ac   :  { %v4546_v38 = vsub.s32 4, %v13878_v16  ;;  %v5404_v2 = vor.u32 8388608, %v5403_v1  ;;  %v5414_v60 = vshrl.u32 %v15520_v31, %v5411_v46  ;;  %v5417_v35 = vshrl.u32 %v15510_v36, %v5411_v46  ;;  %v14127_v21 = vpop.eup %8244 }
 0x5ad   :  { %v5249_v19 = vadd.s32 536870912, %v5248_v20  ;;  %v4543_v47 = vmul.f32 %v4542_v42, %v4540_v23  ;;  %v4744_v41 = vsub.s32 4294967266, %v14119_v24  ;;  %v14130_v28 = vshrl.u32 %v5408_v43, 5 }
 0x5ae   :  { %v5420_v3 = vshrl.u32 %v15511_v5, %v5411_v46  ;;  %v5413_v57 = vshll.u32 %v15514_v63, %v5410_v22  ;;  %v5416_v9 = vshll.u32 %v15520_v31, %v5410_v22  ;;  %v5423_v50 = vshrl.u32 %v15512_v13, %v5411_v46 }
 0x5af   :  { %v14133_v10 = vshrl.u32 %v5249_v19, 30  ;;  %v5419_v34 = vshll.u32 %v15510_v36, %v5410_v22  ;;  %v5422_v39 = vshll.u32 %v15511_v5, %v5410_v22  ;;  %v5425_v25 = vshll.u32 %v15512_v13, %v5410_v22 }
 0x5b0   :  { %v5426_v52 = vshrl.u32 %v15513_v18, %v5411_v46  ;;  %v4456_v43 = vxor.u32 2147483648, %v14054_v61  ;;  %v5415_v54 = vor.u32 %v5414_v60, %v5413_v57  ;;  %v5418_v15 = vor.u32 %v5417_v35, %v5416_v9 }
 0x5b1   :  { %v5251_v55 = vshll.u32 %v14133_v10, 30  ;;  %v4453_v32 = vxor.u32 2147483648, %v14075_v56  ;;  %vm4455_vm6 = vcmp.eq.s32.totalorder %v14117_v45, 2  ;;  %v5421_v49 = vor.u32 %v5420_v3, %v5419_v34 }
 0x5b2   :  { %v5424_v0 = vor.u32 %v5423_v50, %v5422_v39  ;;  %v5427_v1 = vor.u32 %v5426_v52, %v5425_v25  ;;  %v4664_v23 = vxor.u32 2147483648, %v14127_v21  ;;  %v15746_v29 = vand.u32 2147483647, %v12983_v48 }
 0x5b3   :  { %v4544_v42 = vxor.u32 2147483648, %v4543_v47  ;;  %v14156_v19 = vsel %vm4462_vm0, %v4546_v38, %v13878_v16  ;;  %v14158_v60 = vsub.s32 %v5248_v20, %v5251_v55  ;;  %vm4452_vm8 = vcmp.eq.s32.totalorder %v14117_v45, 0 }
 0x5b4   :  { %vm14149_vm7 = vcmp.le.f32.partialorder %v15746_v29, 0.7853982  ;;  %v4745_v35 = vadd.s32 127, %v4744_v41  ;;  %vm5428_vm4 = vcmp.lt.s32.totalorder %v14130_v28, 1  ;;  %v5444_v3 = vshll.u32 %v5404_v2, 8 }
 0x5b5   :  { %v5295_v57 = vand.u32 2139095040, %v13504_v14  ;;  %vm4663_vm11 = vcmp.eq.s32.totalorder %v14122_v44, 2  ;;  %v5254_v9 = vsub.s32 0, %v14158_v60  ;;  %vm5430_vm9 = vcmp.lt.s32.totalorder %v14130_v28, 3  ;;  %v8247_v20 = vpop.eup %8246 }
 0x5b6   :  { %vm5431_vm15 = vcmp.lt.s32.totalorder %v14130_v28, 4  ;;  %v5436_v16 = vsel %vm5428_vm4, %v5415_v54, %v5418_v15  ;;  %vm4660_vm14 = vcmp.eq.s32.totalorder %v14122_v44, 0  ;;  %v5440_v2 = vsel %vm5428_vm4, %v5418_v15, %v5421_v49 }
 0x5b7   :  { %v5433_v38 = vsel %vm5431_vm15, %v5421_v49, 2102212464  ;;  %v5437_v41 = vsel %vm5431_vm15, %v5424_v0, 920167782  ;;  %v5441_v50 = vsel %vm5431_vm15, %v5427_v1, 1326507024  ;;  %v5412_v34 = vshrl.u32 %v15514_v63, %v5411_v46 }
 0x5b8   :  { %vm5429_vm12 = vcmp.lt.s32.totalorder %v14130_v28, 2  ;;  %v5438_v39 = vsel %vm5430_vm9, %v5421_v49, %v5437_v41  ;;  %v5442_v25 = vsel %vm5430_vm9, %v5424_v0, %v5441_v50  ;;  %vm4670_vm10 = vcmp.lt.s32.totalorder %v13142_v40, 0 }
 0x5b9   :  { %v7663_v52 = vmin.u32 %v5254_v9, %v14158_v60  ;;  %v5439_v55 = vsel %vm5429_vm12, %v5436_v16, %v5438_v39  ;;  %v5443_v1 = vsel %vm5429_vm12, %v5440_v2, %v5442_v25  ;;  %v5296_v29 = vshrl.u32 %v5295_v57, 23 }
 0x5ba   :  { %vm4451_vm13 = vcmp.lt.s32.totalorder %v14117_v45, 2  ;;  %v4545_v46 = vsel %vm4462_vm0, %v4544_v42, %v4543_v47  ;;  %v4740_v49 = vsub.s32 32, %v14119_v24  ;;  %v5432_v0 = vsel %vm5428_vm4, %v5412_v34, %v5415_v54  ;;  %v14205_v34 = vpop.f32.mrb[14].mxu0 }
 0x5bb   :  { %v5434_v9 = vsel %vm5430_vm9, %v5418_v15, %v5433_v38  ;;  %vm6840_vm1 = vweird.f32 %v15725_v11  ;;  %v14193_v16 = vmul.u32.u64.low %v5444_v3, %v5443_v1  ;;  %v14194_v41 = vmul.u32.u64.high %v5444_v3, %v5443_v1, %v14193_v16 }
 0x5bc   :  { %v14196_v2 = vmul.u32.u64.low %v5444_v3, %v5439_v55  ;;  %v14197_v57 = vmul.u32.u64.high %v5444_v3, %v5439_v55, %v14196_v2  ;;  %v4457_v47 = vsel %vm4455_vm6, %v4456_v43, %v14075_v56  ;;  %v4661_v42 = vxor.u32 2147483648, %v8247_v20 }
 0x5bd   :  { %v4724_v54 = vadd.s32 %v13933_v12, %v13931_v8  ;;  %v7666_v50 = vadd.s32 4294967169, %v5296_v29  ;;  %vm4448_vm3 = vweird.f32 %v15708_v27  ;;  %v4548_v15 = vsel %vm14149_vm7, %v12983_v48, %v4545_v46 }
 0x5be   :  { %v4746_v38 = vshll.u32 %v4745_v35, 23  ;;  %v5256_v39 = vclz %v7663_v52  ;;  %v5435_v25 = vsel %vm5429_vm12, %v5432_v0, %v5434_v9  ;;  %v4454_v56 = vsel %vm4452_vm8, %v14054_v61, %v4453_v32 }
 0x5bf   :  { %vm4656_vm5 = vweird.f32 %v15713_v59  ;;  %v4549_v8 = vsel %vm14149_vm7, 0, %v14156_v19  ;;  %v4754_v12 = vsub.s32 4, %v14007_v53  ;;  %v5302_v43 = vadd.s32 1, %v7666_v50 }
 0x5c0   :  { %v4665_v35 = vsel %vm4663_vm11, %v4664_v23, %v8247_v20  ;;  %v4742_v52 = vshrl.u32 %v4724_v54, %v4740_v49  ;;  %vm5453_vm2 = vc.u32 %v14194_v41, %v14196_v2  ;;  %v5454_v28 = vadd.s32 1, %v14197_v57 }
 0x5c1   :  { %v4662_v61 = vsel %vm4660_vm14, %v14127_v21, %v4661_v42  ;;  %8248 = vcosq.f32 %v4548_v15  ;;  %v4741_v32 = vshll.u32 %v14027_v58, %v14119_v24  ;;  %v5451_v22 = vmul.u32 %v5444_v3, %v5435_v25 }
 0x5c2   :  { %v4747_v19 = vor.u32 4788187, %v4746_v38  ;;  %v7664_v55 = vadd.s32 4294967294, %v5256_v39  ;;  %v5455_v1 = vsel %vm5453_vm2, %v5454_v28, %v14197_v57  ;;  %vm5303_vm0 = vcmp.gt.s32.totalorder %v5302_v43, 0 }
 0x5c3   :  { %v4553_v23 = vadd.s32 3, %v4549_v8  ;;  %v4755_v20 = vsel %vm4670_vm10, %v4754_v12, %v14007_v53  ;;  %v5456_v29 = vadd.s32 %v5455_v1, %v5451_v22  ;;  %v15487_v46 = vand.u32 2147483647, %v13504_v14 }
 0x5c4   :  { %v4458_v21 = vsel %vm4451_vm13, %v4454_v56, %v4457_v47  ;;  %vm4659_vm6 = vcmp.lt.s32.totalorder %v14122_v44, 2  ;;  %v4743_v58 = vor.u32 %v4742_v52, %v4741_v32  ;;  %v5304_v24 = vsel %vm5303_vm0, %v5302_v43, 0 }
 0x5c5   :  { %v14242_v3 = vsel %vm6840_vm1, nan, %v14115_v7  ;;  %v4666_v49 = vsel %vm4659_vm6, %v4662_v61, %v4665_v35  ;;  %v15749_v0 = vand.u32 2147483647, %v13142_v40  ;;  %v5457_v9 = vadd.s32 536870912, %v5456_v29 }
 0x5c6   :  { %v4748_v16 = vand.u32 2147483647, %v4747_v19  ;;  %vm7665_vm8 = vcmp.lt.s32.totalorder %v7664_v55, 0  ;;  %v5306_v44 = vand.u32 31, %v5304_v24  ;;  %v14254_v57 = vsel %vm4448_vm3, nan, %v4458_v21 }
 0x5c7   :  { %vm14246_vm7 = vcmp.le.f32.partialorder %v15749_v0, 0.7853982  ;;  %v14256_v11 = vand.u32 3, %v4553_v23  ;;  %v14258_v7 = vshrl.u32 %v5457_v9, 30  ;;  %v5299_v47 = vand.u32 8388607, %v15487_v46 }
 0x5c8   :  { %v4757_v45 = vsel %vm14246_vm7, 0, %v4755_v20  ;;  %v14264_v42 = vsel %vm4656_vm5, nan, %v4666_v49  ;;  %v4750_v54 = vcvt.s32.f32 %v4743_v58  ;;  %v5307_v50 = vsub.s32 32, %v5306_v44 }
 0x5c9   :  { %v5503_v38 = vand.u32 2139095040, %v13610_v30  ;;  %8250 = vsinq.f32 %v4548_v15  ;;  %v14267_v39 = vadd.s32 3, %v4757_v45  ;;  %v14269_v27 = vsel %vm7665_vm8, 0, %v7664_v55 }
 0x5ca   :  { %v5459_v25 = vshll.u32 %v14258_v7, 30  ;;  %v4751_v56 = vmul.f32 %v4750_v54, %v4748_v16  ;;  %v5310_v8 = vshrl.u32 %v15520_v31, %v5307_v50  ;;  %v5313_v12 = vshrl.u32 %v15510_v36, %v5307_v50 }
 0x5cb   :  { %v5316_v59 = vshrl.u32 %v15511_v5, %v5307_v50  ;;  %v14275_v43 = vpop.eup %8248  ;;  %v5300_v52 = vor.u32 8388608, %v5299_v47  ;;  %v5309_v15 = vshll.u32 %v15514_v63, %v5306_v44  ;;  %v5319_v28 = vshrl.u32 %v15512_v13, %v5307_v50 }
 0x5cc   :  { %v14277_v35 = vsub.s32 %v5456_v29, %v5459_v25  ;;  %v5264_v61 = vsub.s32 4294967266, %v14269_v27  ;;  %v5312_v32 = vshll.u32 %v15520_v31, %v5306_v44  ;;  %v5315_v22 = vshll.u32 %v15510_v36, %v5306_v44 }
 0x5cd   :  { %v5504_v19 = vshrl.u32 %v5503_v38, 23  ;;  %v5305_v1 = vshrl.u32 %v5304_v24, 5  ;;  %v5311_v23 = vor.u32 %v5310_v8, %v5309_v15  ;;  %v5318_v20 = vshll.u32 %v15511_v5, %v5306_v44 }
 0x5ce   :  { %v5462_v55 = vsub.s32 0, %v14277_v35  ;;  %v5314_v29 = vor.u32 %v5313_v12, %v5312_v32  ;;  %v5317_v21 = vor.u32 %v5316_v59, %v5315_v22  ;;  %v5321_v58 = vshll.u32 %v15512_v13, %v5306_v44 }
 0x5cf   :  { %v5322_v49 = vshrl.u32 %v15513_v18, %v5307_v50  ;;  %v4560_v0 = vxor.u32 2147483648, %v14275_v43  ;;  %v4752_v9 = vxor.u32 2147483648, %v4751_v56  ;;  %v5320_v45 = vor.u32 %v5319_v28, %v5318_v20 }
 0x5d0   :  { %v7671_v16 = vmin.u32 %v5462_v55, %v14277_v35  ;;  %v5274_v47 = vsub.s32 4, %v14133_v10  ;;  %v14291_v38 = vshll.u32 %v5300_v52, 8  ;;  %v7674_v24 = vadd.s32 4294967169, %v5504_v19 }
 0x5d1   :  { %v5323_v54 = vor.u32 %v5322_v49, %v5321_v58  ;;  %vm4559_vm4 = vcmp.eq.s32.totalorder %v14256_v11, 2  ;;  %v5265_v25 = vadd.s32 127, %v5264_v61  ;;  %vm5324_vm11 = vcmp.lt.s32.totalorder %v5305_v1, 1 }
 0x5d2   :  { %v5464_v8 = vclz %v7671_v16  ;;  %vm5327_vm9 = vcmp.lt.s32.totalorder %v5305_v1, 4  ;;  %vm5190_vm15 = vcmp.lt.s32.totalorder %v15730_v17, 0  ;;  %v5308_v44 = vshrl.u32 %v15514_v63, %v5307_v50 }
 0x5d3   :  { %vm5325_vm14 = vcmp.lt.s32.totalorder %v5305_v1, 2  ;;  %v5329_v12 = vsel %vm5327_vm9, %v5317_v21, 2102212464  ;;  %v5332_v59 = vsel %vm5324_vm11, %v5311_v23, %v5314_v29  ;;  %v8251_v15 = vpop.eup %8250  ;;  %vm5326_vm12 = vcmp.lt.s32.totalorder %v5305_v1, 3 }
 0x5d4   :  { %v7672_v28 = vadd.s32 4294967294, %v5464_v8  ;;  %v5333_v32 = vsel %vm5327_vm9, %v5320_v45, 920167782  ;;  %v5336_v52 = vsel %vm5324_vm11, %v5314_v29, %v5317_v21  ;;  %v5328_v22 = vsel %vm5324_vm11, %v5308_v44, %v5311_v23 }
 0x5d5   :  { %v5334_v19 = vsel %vm5326_vm12, %v5317_v21, %v5333_v32  ;;  %v5337_v55 = vsel %vm5327_vm9, %v5323_v54, 1326507024  ;;  %v5510_v20 = vadd.s32 1, %v7674_v24  ;;  %vm4556_vm13 = vcmp.eq.s32.totalorder %v14256_v11, 0  ;;  %v14312_v24 = vpop.f32.mrb[14].mxu1 }
 0x5d6   :  { %v15752_v61 = vand.u32 2147483647, %v15730_v17  ;;  %vm7673_vm3 = vcmp.lt.s32.totalorder %v7672_v28, 0  ;;  %v5330_v50 = vsel %vm5326_vm12, %v5314_v29, %v5329_v12  ;;  %v5335_v49 = vsel %vm5325_vm14, %v5332_v59, %v5334_v19 }
 0x5d7   :  { %v5338_v16 = vsel %vm5326_vm12, %v5320_v45, %v5337_v55  ;;  %v14304_v8 = vsel %vm7673_vm3, 0, %v7672_v28  ;;  %v14308_v21 = vmul.u32.u64.low %v14291_v38, %v5335_v49  ;;  %v14309_v54 = vmul.u32.u64.high %v14291_v38, %v5335_v49, %v14308_v21 }
 0x5d8   :  { %vm14299_vm1 = vcmp.le.f32.partialorder %v15752_v61, 0.7853982  ;;  %v5339_v23 = vsel %vm5325_vm14, %v5336_v52, %v5338_v16  ;;  %v4753_v44 = vsel %vm4670_vm10, %v4752_v9, %v4751_v56  ;;  %v5260_v32 = vsub.s32 32, %v14269_v27 }
 0x5d9   :  { %v15486_v29 = vand.u32 2147483647, %v13610_v30  ;;  %vm5511_vm5 = vcmp.gt.s32.totalorder %v5510_v20, 0  ;;  %v5266_v45 = vshll.u32 %v5265_v25, 23  ;;  %v5244_v52 = vadd.s32 %v14064_v6, %v14072_v26 }
 0x5da   :  { %v14319_v12 = vmul.u32.u64.low %v14291_v38, %v5339_v23  ;;  %v14320_v59 = vmul.u32.u64.high %v14291_v38, %v5339_v23, %v14319_v12  ;;  %v5512_v28 = vsel %vm5511_vm5, %v5510_v20, 0  ;;  %v5472_v19 = vsub.s32 4294967266, %v14304_v8 }
 0x5db   :  { %v5331_v55 = vsel %vm5325_vm14, %v5328_v22, %v5330_v50  ;;  %v5514_v61 = vand.u32 31, %v5512_v28  ;;  %v4557_v56 = vxor.u32 2147483648, %v8251_v15  ;;  %v14328_v9 = vsel %vm4559_vm4, %v4560_v0, %v8251_v15 }
 0x5dc   :  { %v14331_v25 = vand.u32 3, %v14267_v39  ;;  %v5350_v49 = vadd.s32 1, %v14309_v54  ;;  %v4756_v20 = vsel %vm14246_vm7, %v13142_v40, %v4753_v44  ;;  %v5262_v6 = vshrl.u32 %v5244_v52, %v5260_v32 }
 0x5dd   :  { %v14340_v26 = vsel %vm5190_vm15, %v5274_v47, %v14133_v10  ;;  %v5507_v1 = vand.u32 8388607, %v15486_v29  ;;  %v5267_v0 = vor.u32 4788187, %v5266_v45  ;;  %v5347_v15 = vmul.u32 %v14291_v38, %v5331_v55 }
 0x5de   :  { %vm5349_vm10 = vc.u32 %v14320_v59, %v14308_v21  ;;  %v5515_v39 = vsub.s32 32, %v5514_v61  ;;  %v5261_v53 = vshll.u32 %v14158_v60, %v14269_v27  ;;  %v5468_v22 = vsub.s32 32, %v14304_v8 }
 0x5df   :  { %v5473_v50 = vadd.s32 127, %v5472_v19  ;;  %v5351_v16 = vsel %vm5349_vm10, %v5350_v49, %v14309_v54  ;;  %v14354_v10 = vsel %vm4556_vm13, %v14275_v43, %v4557_v56  ;;  %8252 = vcosq.f32 %v4756_v20 }
 0x5e0   :  { %v5352_v38 = vadd.s32 %v5351_v16, %v5347_v15  ;;  %8254 = vsinq.f32 %v4756_v20  ;;  %v5263_v23 = vor.u32 %v5262_v6, %v5261_v53  ;;  %v5452_v60 = vadd.s32 %v14196_v2, %v14194_v41 }
 0x5e1   :  { %v5508_v27 = vor.u32 8388608, %v5507_v1  ;;  %v5268_v44 = vand.u32 2147483647, %v5267_v0  ;;  %v5518_v54 = vshrl.u32 %v15520_v31, %v5515_v39  ;;  %v5521_v45 = vshrl.u32 %v15510_v36, %v5515_v39 }
 0x5e2   :  { %v5353_v32 = vadd.s32 536870912, %v5352_v38  ;;  %v5470_v43 = vshrl.u32 %v5452_v60, %v5468_v22  ;;  %v5474_v12 = vshll.u32 %v5473_v50, 23  ;;  %v14363_v52 = vshrl.u32 %v5512_v28, 5 }
 0x5e3   :  { %v5524_v19 = vshrl.u32 %v15511_v5, %v5515_v39  ;;  %v5517_v56 = vshll.u32 %v15514_v63, %v5514_v61  ;;  %v5520_v49 = vshll.u32 %v15520_v31, %v5514_v61  ;;  %v5527_v41 = vshrl.u32 %v15512_v13, %v5515_v39 }
 0x5e4   :  { %v14366_v55 = vshrl.u32 %v5353_v32, 30  ;;  %v5523_v2 = vshll.u32 %v15510_v36, %v5514_v61  ;;  %v5526_v20 = vshll.u32 %v15511_v5, %v5514_v61  ;;  %v5529_v6 = vshll.u32 %v15512_v13, %v5514_v61 }
 0x5e5   :  { %v5530_v1 = vshrl.u32 %v15513_v18, %v5515_v39  ;;  %v5270_v28 = vcvt.s32.f32 %v5263_v23  ;;  %v5519_v15 = vor.u32 %v5518_v54, %v5517_v56  ;;  %v5522_v53 = vor.u32 %v5521_v45, %v5520_v49 }
 0x5e6   :  { %v5355_v0 = vshll.u32 %v14366_v55, 30  ;;  %v5469_v22 = vshll.u32 %v14277_v35, %v14304_v8  ;;  %v5525_v50 = vor.u32 %v5524_v19, %v5523_v2  ;;  %v5528_v16 = vor.u32 %v5527_v41, %v5526_v20 }
 0x5e7   :  { %v5531_v60 = vor.u32 %v5530_v1, %v5529_v6  ;;  %vm4555_vm2 = vcmp.lt.s32.totalorder %v14256_v11, 2  ;;  %v5271_v32 = vmul.f32 %v5270_v28, %v5268_v44  ;;  %v14381_v46 = vshll.u32 %v5508_v27, 8 }
 0x5e8   :  { %v14379_v29 = vsub.s32 %v5352_v38, %v5355_v0  ;;  %v6023_v61 = vand.u32 2139095040, %v13733_v33  ;;  %v5471_v23 = vor.u32 %v5470_v43, %v5469_v22  ;;  %v5475_v47 = vor.u32 4788187, %v5474_v12  ;;  %v14410_v22 = vpop.f32.mrb[15].mxu0 }
 0x5e9   :  { %v5516_v54 = vshrl.u32 %v15514_v63, %v5515_v39  ;;  %vm5532_vm0 = vcmp.lt.s32.totalorder %v14363_v52, 1  ;;  %v8253_v45 = vpop.eup %8252  ;;  %vm5534_vm6 = vcmp.lt.s32.totalorder %v14363_v52, 3  ;;  %vm5535_vm7 = vcmp.lt.s32.totalorder %v14363_v52, 4 }
 0x5ea   :  { %v5358_v35 = vsub.s32 0, %v14379_v29  ;;  %v5540_v8 = vsel %vm5532_vm0, %v5519_v15, %v5522_v53  ;;  %v8255_v38 = vpop.eup %8254  ;;  %v5537_v27 = vsel %vm5535_vm7, %v5525_v50, 2102212464  ;;  %v5541_v44 = vsel %vm5535_vm7, %v5528_v16, 920167782 }
 0x5eb   :  { %v5544_v43 = vsel %vm5532_vm0, %v5522_v53, %v5525_v50  ;;  %v5545_v12 = vsel %vm5535_vm7, %v5531_v60, 1326507024  ;;  %vm5398_vm8 = vcmp.lt.s32.totalorder %v15741_v37, 0  ;;  %vm5533_vm4 = vcmp.lt.s32.totalorder %v14363_v52, 2 }
 0x5ec   :  { %v7667_v39 = vmin.u32 %v5358_v35, %v14379_v29  ;;  %v5542_v19 = vsel %vm5534_vm6, %v5525_v50, %v5541_v44  ;;  %v5546_v56 = vsel %vm5534_vm6, %v5528_v16, %v5545_v12  ;;  %vm4552_vm11 = vweird.f32 %v12983_v48 }
 0x5ed   :  { %v5476_v49 = vand.u32 2147483647, %v5475_v47  ;;  %v5543_v41 = vsel %vm5533_vm4, %v5540_v8, %v5542_v19  ;;  %v5547_v2 = vsel %vm5533_vm4, %v5544_v43, %v5546_v56  ;;  %v6024_v20 = vshrl.u32 %v6023_v61, 23 }
 0x5ee   :  { %vm4764_vm9 = vcmp.eq.s32.totalorder %v14331_v25, 0  ;;  %v5478_v6 = vcvt.s32.f32 %v5471_v23  ;;  %v5360_v1 = vclz %v7667_v39  ;;  %v5536_v28 = vsel %vm5532_vm0, %v5516_v54, %v5519_v15 }
 0x5ef   :  { %v5538_v0 = vsel %vm5534_vm6, %v5522_v53, %v5537_v27  ;;  %vm14414_vm14 = vcmp.le.f32.partialorder %v5396_v51, 0.7853982  ;;  %v14419_v50 = vmul.u32.u64.low %v14381_v46, %v5547_v2  ;;  %v14420_v16 = vmul.u32.u64.high %v14381_v46, %v5547_v2, %v14419_v50 }
 0x5f0   :  { %v14423_v60 = vmul.u32.u64.low %v14381_v46, %v5543_v41  ;;  %v14424_v61 = vmul.u32.u64.high %v14381_v46, %v5543_v41, %v14423_v60  ;;  %vm4767_vm12 = vcmp.eq.s32.totalorder %v14331_v25, 2  ;;  %v5272_v15 = vxor.u32 2147483648, %v5271_v32 }
 0x5f1   :  { %v7668_v53 = vadd.s32 4294967294, %v5360_v1  ;;  %v7694_v23 = vadd.s32 4294967169, %v6024_v20  ;;  %v4562_v51 = vsel %vm4555_vm2, %v14354_v10, %v14328_v9  ;;  %vm4763_vm13 = vcmp.lt.s32.totalorder %v14331_v25, 2 }
 0x5f2   :  { %v5479_v54 = vmul.f32 %v5478_v6, %v5476_v49  ;;  %v5482_v35 = vsub.s32 4, %v14258_v7  ;;  %v5539_v8 = vsel %vm5533_vm4, %v5536_v28, %v5538_v0  ;;  %v4768_v27 = vxor.u32 2147483648, %v8253_v45 }
 0x5f3   :  { %v15757_v44 = vsel %vm14299_vm1, 0, %v14340_v26  ;;  %vm7669_vm3 = vcmp.lt.s32.totalorder %v7668_v53, 0  ;;  %v6030_v12 = vadd.s32 1, %v7694_v23  ;;  %v4765_v39 = vxor.u32 2147483648, %v8255_v38 }
 0x5f4   :  { %v5281_v43 = vadd.s32 3, %v15757_v44  ;;  %v5363_v19 = vsel %vm7669_vm3, 0, %v7668_v53  ;;  %vm5557_vm5 = vc.u32 %v14420_v16, %v14423_v60  ;;  %v5558_v11 = vadd.s32 1, %v14424_v61 }
 0x5f5   :  { %v5273_v9 = vsel %vm5190_vm15, %v5272_v15, %v5271_v32  ;;  %v5368_v10 = vsub.s32 4294967266, %v5363_v19  ;;  %v5555_v52 = vmul.u32 %v14381_v46, %v5539_v8  ;;  %v15489_v56 = vand.u32 2147483647, %v13733_v33 }
 0x5f6   :  { %v5480_v49 = vxor.u32 2147483648, %v5479_v54  ;;  %v5483_v26 = vsel %vm5398_vm8, %v5482_v35, %v14258_v7  ;;  %v5559_v41 = vsel %vm5557_vm5, %v5558_v11, %v14424_v61  ;;  %vm6031_vm10 = vcmp.gt.s32.totalorder %v6030_v12, 0 }
 0x5f7   :  { %v14453_v2 = vsel %vm4552_vm11, nan, %v4562_v51  ;;  %v4769_v32 = vsel %vm4767_vm12, %v4768_v27, %v8255_v38  ;;  %v5369_v20 = vadd.s32 127, %v5368_v10  ;;  %v5560_v6 = vadd.s32 %v5559_v41, %v5555_v52  ;;  %v15758_v51 = vld [vmem:[#allocation24_spill] sm:$0xff] }
 0x5f8   :  { %v4766_v46 = vsel %vm4764_vm9, %v8253_v45, %v4765_v39  ;;  %v5276_v1 = vsel %vm14299_vm1, %v15730_v17, %v5273_v9  ;;  %v5364_v7 = vsub.s32 32, %v5363_v19  ;;  %v6032_v28 = vsel %vm6031_vm10, %v6030_v12, 0 }
 0x5f9   :  { %v5485_v0 = vsel %vm14414_vm14, 0, %v5483_v26  ;;  %v5370_v48 = vshll.u32 %v5369_v20, 23  ;;  %v5561_v50 = vadd.s32 536870912, %v5560_v6  ;;  %v6027_v61 = vand.u32 8388607, %v15489_v56 }
 0x5fa   :  { %v14466_v38 = vand.u32 3, %v5281_v43  ;;  %v5481_v15 = vsel %vm5398_vm8, %v5480_v49, %v5479_v54  ;;  %v5348_v45 = vadd.s32 %v14308_v21, %v14320_v59  ;;  %v6034_v58 = vand.u32 31, %v6032_v28 }
 0x5fb   :  { %v14474_v53 = vsel %vm4763_vm13, %v4766_v46, %v4769_v32  ;;  %8256 = vcosq.f32 %v5276_v1  ;;  %v14476_v23 = vshrl.u32 %v5561_v50, 30  ;;  %v6231_v35 = vand.u32 2139095040, %v15758_v51 }
 0x5fc   :  { %8258 = vsinq.f32 %v5276_v1  ;;  %v14479_v8 = vadd.s32 3, %v5485_v0  ;;  %v5366_v27 = vshrl.u32 %v5348_v45, %v5364_v7  ;;  %v6035_v44 = vsub.s32 32, %v6034_v58 }
 0x5fd   :  { %v14484_v54 = vsel %vm14414_vm14, %v15741_v37, %v5481_v15  ;;  %v5371_v21 = vor.u32 4788187, %v5370_v48  ;;  %v5563_v59 = vshll.u32 %v14476_v23, 30  ;;  %v6028_v25 = vor.u32 8388608, %v6027_v61 }
 0x5fe   :  { %v5365_v43 = vshll.u32 %v14379_v29, %v5363_v19  ;;  %v6038_v12 = vshrl.u32 %v15520_v31, %v6035_v44  ;;  %v6041_v39 = vshrl.u32 %v15510_v36, %v6035_v44  ;;  %v6044_v11 = vshrl.u32 %v15511_v5, %v6035_v44 }
 0x5ff   :  { %v14491_v9 = vsub.s32 %v5560_v6, %v5563_v59  ;;  %v6037_v10 = vshll.u32 %v15514_v63, %v6034_v58  ;;  %v6047_v47 = vshrl.u32 %v15512_v13, %v6035_v44  ;;  %v6232_v52 = vshrl.u32 %v6231_v35, 23 }
 0x600   :  { %v5367_v49 = vor.u32 %v5366_v27, %v5365_v43  ;;  %v6033_v26 = vshrl.u32 %v6032_v28, 5  ;;  %v6040_v41 = vshll.u32 %v15520_v31, %v6034_v58  ;;  %v6043_v32 = vshll.u32 %v15510_v36, %v6034_v58 }
 0x601   :  { %v5372_v29 = vand.u32 2147483647, %v5371_v21  ;;  %v5566_v19 = vsub.s32 0, %v14491_v9  ;;  %v6039_v20 = vor.u32 %v6038_v12, %v6037_v10  ;;  %v6046_v46 = vshll.u32 %v15511_v5, %v6034_v58 }
 0x602   :  { %v6042_v1 = vor.u32 %v6041_v39, %v6040_v41  ;;  %v6045_v6 = vor.u32 %v6044_v11, %v6043_v32  ;;  %v6049_v7 = vshll.u32 %v15512_v13, %v6034_v58  ;;  %v6050_v0 = vshrl.u32 %v15513_v18, %v6035_v44 }
 0x603   :  { %8260 = vcosq.f32 %v14484_v54  ;;  %vm5294_vm15 = vcmp.lt.s32.totalorder %v13504_v14, 0  ;;  %v5378_v28 = vsub.s32 4, %v14366_v55  ;;  %v7675_v48 = vmin.u32 %v5566_v19, %v14491_v9 }
 0x604   :  { %v6048_v50 = vor.u32 %v6047_v47, %v6046_v46  ;;  %v5374_v61 = vcvt.s32.f32 %v5367_v49  ;;  %v6051_v15 = vor.u32 %v6050_v0, %v6049_v7  ;;  %v14505_v45 = vshll.u32 %v6028_v25, 8 }
 0x605   :  { %v7702_v35 = vadd.s32 4294967169, %v6232_v52  ;;  %v8257_v27 = vpop.eup %8256  ;;  %vm4760_vm1 = vweird.f32 %v13142_v40  ;;  %v5568_v58 = vclz %v7675_v48  ;;  %v6036_v21 = vshrl.u32 %v15514_v63, %v6035_v44 }
 0x606   :  { %vm6052_vm2 = vcmp.lt.s32.totalorder %v6033_v26, 1  ;;  %vm6055_vm0 = vcmp.lt.s32.totalorder %v6033_v26, 4  ;;  %v8259_v59 = vpop.eup %8258  ;;  %v15759_v43 = vand.u32 2147483647, %v13504_v14  ;;  %v5375_v39 = vmul.f32 %v5374_v61, %v5372_v29 }
 0x607   :  { %vm6053_vm7 = vcmp.lt.s32.totalorder %v6033_v26, 2  ;;  %v6057_v25 = vsel %vm6055_vm0, %v6045_v6, 2102212464  ;;  %v6060_v11 = vsel %vm6052_vm2, %v6039_v20, %v6042_v1  ;;  %v7676_v10 = vadd.s32 4294967294, %v5568_v58  ;;  %v14523_v58 = vpop.f32.mrb[15].mxu1 }
 0x608   :  { %vm14511_vm6 = vcmp.le.f32.partialorder %v15759_v43, 0.7853982  ;;  %vm6054_vm8 = vcmp.lt.s32.totalorder %v6033_v26, 3  ;;  %v6061_v47 = vsel %vm6055_vm0, %v6048_v50, 920167782  ;;  %v6064_v52 = vsel %vm6052_vm2, %v6042_v1, %v6045_v6 }
 0x609   :  { %vm5284_vm4 = vcmp.eq.s32.totalorder %v14466_v38, 0  ;;  %v6056_v44 = vsel %vm6052_vm2, %v6036_v21, %v6039_v20  ;;  %v6062_v49 = vsel %vm6054_vm8, %v6045_v6, %v6061_v47  ;;  %v6065_v41 = vsel %vm6055_vm0, %v6051_v15, 1326507024 }
 0x60a   :  { %v6238_v32 = vadd.s32 1, %v7702_v35  ;;  %vm7677_vm11 = vcmp.lt.s32.totalorder %v7676_v10, 0  ;;  %v6058_v19 = vsel %vm6054_vm8, %v6042_v1, %v6057_v25  ;;  %v6063_v46 = vsel %vm6053_vm7, %v6060_v11, %v6062_v49 }
 0x60b   :  { %v6066_v7 = vsel %vm6054_vm8, %v6048_v50, %v6065_v41  ;;  %v5571_v0 = vsel %vm7677_vm11, 0, %v7676_v10  ;;  %v14519_v48 = vmul.u32.u64.low %v14505_v45, %v6063_v46  ;;  %v14520_v61 = vmul.u32.u64.high %v14505_v45, %v6063_v46, %v14519_v48 }
 0x60c   :  { %v6067_v29 = vsel %vm6053_vm7, %v6064_v52, %v6066_v7  ;;  %v5285_v43 = vxor.u32 2147483648, %v8259_v59  ;;  %v5288_v20 = vxor.u32 2147483648, %v8257_v27  ;;  %v5576_v6 = vsub.s32 4294967266, %v5571_v0 }
 0x60d   :  { %vm6239_vm9 = vcmp.gt.s32.totalorder %v6238_v32, 0  ;;  %v5379_v1 = vsel %vm5294_vm15, %v5378_v28, %v14366_v55  ;;  %v14529_v50 = vmul.u32.u64.low %v14505_v45, %v6067_v29  ;;  %v14530_v15 = vmul.u32.u64.high %v14505_v45, %v6067_v29, %v14529_v50  ;;  %v14532_v21 = vpop.eup %8260 }
 0x60e   :  { %v6240_v35 = vsel %vm6239_vm9, %v6238_v32, 0  ;;  %v5376_v25 = vxor.u32 2147483648, %v5375_v39  ;;  %v5572_v11 = vsub.s32 32, %v5571_v0  ;;  %v6059_v10 = vsel %vm6053_vm7, %v6056_v44, %v6058_v19 }
 0x60f   :  { %v6242_v47 = vand.u32 31, %v6240_v35  ;;  %v14538_v52 = vsel %vm4760_vm1, nan, %v14474_v53  ;;  %vm5287_vm14 = vcmp.eq.s32.totalorder %v14466_v38, 2  ;;  %v5577_v55 = vadd.s32 127, %v5576_v6 }
 0x610   :  { %v6078_v28 = vadd.s32 1, %v14520_v61  ;;  %v14543_v49 = vand.u32 3, %v14479_v8  ;;  %v5381_v41 = vsel %vm14511_vm6, 0, %v5379_v1  ;;  %v5556_v26 = vadd.s32 %v14423_v60, %v14420_v16 }
 0x611   :  { %v15488_v44 = vand.u32 2147483647, %v15758_v51  ;;  %v14550_v32 = vsel %vm5287_vm14, %v5288_v20, %v8259_v59  ;;  %v6075_v40 = vmul.u32 %v14505_v45, %v6059_v10  ;;  %vm6077_vm12 = vc.u32 %v14530_v15, %v14519_v48 }
 0x612   :  { %v6243_v53 = vsub.s32 32, %v6242_v47  ;;  %v14557_v8 = vsel %vm5284_vm4, %v8257_v27, %v5285_v43  ;;  %v5377_v19 = vsel %vm5294_vm15, %v5376_v25, %v5375_v39  ;;  %vm5502_vm13 = vcmp.lt.s32.totalorder %v13610_v30, 0 }
 0x613   :  { %v5574_v16 = vshrl.u32 %v5556_v26, %v5572_v11  ;;  %v6079_v60 = vsel %vm6077_vm12, %v6078_v28, %v14520_v61  ;;  %8262 = vsinq.f32 %v14484_v54  ;;  %v14564_v59 = vadd.s32 3, %v5381_v41 }
 0x614   :  { %v5578_v45 = vshll.u32 %v5577_v55, 23  ;;  %v6080_v46 = vadd.s32 %v6079_v60, %v6075_v40  ;;  %v5496_v7 = vxor.u32 2147483648, %v14532_v21  ;;  %v5573_v29 = vshll.u32 %v14491_v9, %v5571_v0 }
 0x615   :  { %v5586_v27 = vsub.s32 4, %v14476_v23  ;;  %v6235_v39 = vand.u32 8388607, %v15488_v44  ;;  %v5380_v43 = vsel %vm14511_vm6, %v13504_v14, %v5377_v19  ;;  %v6246_v54 = vshrl.u32 %v15520_v31, %v6243_v53 }
 0x616   :  { %v6081_v61 = vadd.s32 536870912, %v6080_v46  ;;  %v6249_v20 = vshrl.u32 %v15510_v36, %v6243_v53  ;;  %v5575_v6 = vor.u32 %v5574_v16, %v5573_v29  ;;  %v14576_v1 = vshrl.u32 %v6240_v35, 5 }
 0x617   :  { %v6245_v50 = vshll.u32 %v15514_v63, %v6242_v47  ;;  %v6252_v9 = vshrl.u32 %v15511_v5, %v6243_v53  ;;  %v5579_v0 = vor.u32 4788187, %v5578_v45  ;;  %v6248_v11 = vshll.u32 %v15520_v31, %v6242_v47 }
 0x618   :  { %v14580_v25 = vshrl.u32 %v6081_v61, 30  ;;  %v6255_v12 = vshrl.u32 %v15512_v13, %v6243_v53  ;;  %v6251_v10 = vshll.u32 %v15510_v36, %v6242_v47  ;;  %v6254_v55 = vshll.u32 %v15511_v5, %v6242_v47 }
 0x619   :  { %v6257_v28 = vshll.u32 %v15512_v13, %v6242_v47  ;;  %v6258_v35 = vshrl.u32 %v15513_v18, %v6243_v53  ;;  %v6236_v26 = vor.u32 8388608, %v6235_v39  ;;  %v6247_v40 = vor.u32 %v6246_v54, %v6245_v50  ;;  %v15762_v47 = vld [vmem:[#allocation16_spill] sm:$0xff] }
 0x61a   :  { %v6083_v41 = vshll.u32 %v14580_v25, 30  ;;  %v6250_v19 = vor.u32 %v6249_v20, %v6248_v11  ;;  %vm5283_vm3 = vcmp.lt.s32.totalorder %v14466_v38, 2  ;;  %8264 = vcosq.f32 %v5380_v43 }
 0x61b   :  { %v6253_v16 = vor.u32 %v6252_v9, %v6251_v10  ;;  %v6256_v60 = vor.u32 %v6255_v12, %v6254_v55  ;;  %v6259_v45 = vor.u32 %v6258_v35, %v6257_v28  ;;  %8266 = vsinq.f32 %v5380_v43 }
 0x61c   :  { %v5587_v29 = vsel %vm5502_vm13, %v5586_v27, %v14476_v23  ;;  %v14593_v61 = vsub.s32 %v6080_v46, %v6083_v41  ;;  %v6127_v44 = vand.u32 2139095040, %v15762_v47  ;;  %v15763_v56 = vand.u32 2147483647, %v13610_v30 }
 0x61d   :  { %v5580_v54 = vand.u32 2147483647, %v5579_v0  ;;  %v5582_v20 = vcvt.s32.f32 %v5575_v6  ;;  %v6244_v50 = vshrl.u32 %v15514_v63, %v6243_v53  ;;  %vm6260_vm10 = vcmp.lt.s32.totalorder %v14576_v1, 1  ;;  %v8263_v43 = vpop.eup %8262 }
 0x61e   :  { %vm14598_vm5 = vcmp.le.f32.partialorder %v15763_v56, 0.7853982  ;;  %v6086_v9 = vsub.s32 0, %v14593_v61  ;;  %vm6262_vm15 = vcmp.lt.s32.totalorder %v14576_v1, 3  ;;  %vm6263_vm1 = vcmp.lt.s32.totalorder %v14576_v1, 4 }
 0x61f   :  { %v6268_v23 = vsel %vm6260_vm10, %v6247_v40, %v6250_v19  ;;  %v6265_v56 = vsel %vm6263_vm1, %v6253_v16, 2102212464  ;;  %v6269_v46 = vsel %vm6263_vm1, %v6256_v60, 920167782  ;;  %v6272_v27 = vsel %vm6260_vm10, %v6250_v19, %v6253_v16 }
 0x620   :  { %v6273_v6 = vsel %vm6263_vm1, %v6259_v45, 1326507024  ;;  %vm5492_vm2 = vcmp.eq.s32.totalorder %v14543_v49, 0  ;;  %v7695_v53 = vmin.u32 %v6086_v9, %v14593_v61  ;;  %vm6261_vm0 = vcmp.lt.s32.totalorder %v14576_v1, 2 }
 0x621   :  { %v6270_v0 = vsel %vm6262_vm15, %v6253_v16, %v6269_v46  ;;  %v6274_v11 = vsel %vm6262_vm15, %v6256_v60, %v6273_v6  ;;  %v6276_v55 = vshll.u32 %v6236_v26, 8  ;;  %v6128_v28 = vshrl.u32 %v6127_v44, 23 }
 0x622   :  { %v6271_v12 = vsel %vm6261_vm0, %v6268_v23, %v6270_v0  ;;  %v6275_v10 = vsel %vm6261_vm0, %v6272_v27, %v6274_v11  ;;  %vm5280_vm6 = vweird.f32 %v15730_v17  ;;  %v5583_v35 = vmul.f32 %v5582_v20, %v5580_v54 }
 0x623   :  { %v6088_v41 = vclz %v7695_v53  ;;  %v6264_v45 = vsel %vm6260_vm10, %v6244_v50, %v6247_v40  ;;  %v6266_v16 = vsel %vm6262_vm15, %v6250_v19, %v6265_v56  ;;  %v5290_v44 = vsel %vm5283_vm3, %v14557_v8, %v14550_v32 }
 0x624   :  { %v14627_v9 = vmul.u32.u64.low %v6276_v55, %v6275_v10  ;;  %v14628_v60 = vmul.u32.u64.high %v6276_v55, %v6275_v10, %v14627_v9  ;;  %v14630_v46 = vmul.u32.u64.low %v6276_v55, %v6271_v12  ;;  %v14631_v23 = vmul.u32.u64.high %v6276_v55, %v6271_v12, %v14630_v46  ;;  %v14640_v54 = vpop.eup %8264 }
 0x625   :  { %vm5491_vm7 = vcmp.lt.s32.totalorder %v14543_v49, 2  ;;  %vm5495_vm8 = vcmp.eq.s32.totalorder %v14543_v49, 2  ;;  %v7696_v26 = vadd.s32 4294967294, %v6088_v41  ;;  %v7698_v40 = vadd.s32 4294967169, %v6128_v28  ;;  %v14648_v27 = vpop.eup %8266 }
 0x626   :  { %v5493_v19 = vxor.u32 2147483648, %v8263_v43  ;;  %v14643_v20 = vand.u32 3, %v14564_v59  ;;  %v6267_v50 = vsel %vm6261_vm0, %v6264_v45, %v6266_v16  ;;  %v6124_v56 = vand.u32 2147483647, %v15762_v47 }
 0x627   :  { %v5584_v38 = vxor.u32 2147483648, %v5583_v35  ;;  %v5589_v32 = vsel %vm14598_vm5, 0, %v5587_v29  ;;  %vm7697_vm4 = vcmp.lt.s32.totalorder %v7696_v26, 0  ;;  %v6134_v8 = vadd.s32 1, %v7698_v40 }
 0x628   :  { %v5497_v6 = vsel %vm5495_vm8, %v5496_v7, %v8263_v43  ;;  %vm6022_vm11 = vcmp.lt.s32.totalorder %v13733_v33, 0  ;;  %v6091_v59 = vsel %vm7697_vm4, 0, %v7696_v26  ;;  %vm6285_vm9 = vc.u32 %v14628_v60, %v14630_v46 }
 0x629   :  { %v6286_v1 = vadd.s32 1, %v14631_v23  ;;  %v6076_v53 = vadd.s32 %v14519_v48, %v14530_v15  ;;  %v6092_v0 = vsub.s32 32, %v6091_v59  ;;  %v6096_v11 = vsub.s32 4294967266, %v6091_v59 }
 0x62a   :  { %v6283_v12 = vmul.u32 %v6276_v55, %v6267_v50  ;;  %v5494_v29 = vsel %vm5492_vm2, %v14532_v21, %v5493_v19  ;;  %v5593_v10 = vadd.s32 3, %v5589_v32  ;;  %vm6135_vm14 = vcmp.gt.s32.totalorder %v6134_v8, 0 }
 0x62b   :  { %v6287_v7 = vsel %vm6285_vm9, %v6286_v1, %v14631_v23  ;;  %v5585_v43 = vsel %vm5502_vm13, %v5584_v38, %v5583_v35  ;;  %v6094_v28 = vshrl.u32 %v6076_v53, %v6092_v0  ;;  %v6097_v41 = vadd.s32 127, %v6096_v11 }
 0x62c   :  { %v6288_v45 = vadd.s32 %v6287_v7, %v6283_v12  ;;  %v14668_v48 = vsel %vm5280_vm6, nan, %v5290_v44  ;;  %vm5391_vm12 = vcmp.eq.s32.totalorder %v14643_v20, 2  ;;  %v5392_v15 = vxor.u32 2147483648, %v14640_v54 }
 0x62d   :  { %v6136_v55 = vsel %vm6135_vm14, %v6134_v8, 0  ;;  %v6093_v21 = vshll.u32 %v14593_v61, %v6091_v59  ;;  %v6098_v16 = vshll.u32 %v6097_v41, 23  ;;  %v6106_v9 = vsub.s32 4, %v14580_v25 }
 0x62e   :  { %v6289_v23 = vadd.s32 536870912, %v6288_v45  ;;  %v14676_v35 = vsel %vm5491_vm7, %v5494_v29, %v5497_v6  ;;  %vm5388_vm13 = vcmp.eq.s32.totalorder %v14643_v20, 0  ;;  %v5588_v17 = vsel %vm14598_vm5, %v13610_v30, %v5585_v43 }
 0x62f   :  { %v15766_v44 = vand.u32 2147483647, %v13733_v33  ;;  %v6131_v61 = vand.u32 8388607, %v6124_v56  ;;  %v6138_v40 = vand.u32 31, %v6136_v55  ;;  %v14690_v19 = vand.u32 3, %v5593_v10 }
 0x630   :  { %v6095_v49 = vor.u32 %v6094_v28, %v6093_v21  ;;  %v6099_v50 = vor.u32 4788187, %v6098_v16  ;;  %v14692_v38 = vshrl.u32 %v6289_v23, 30  ;;  %v5389_v32 = vxor.u32 2147483648, %v14648_v27 }
 0x631   :  { %vm14684_vm3 = vcmp.le.f32.partialorder %v15766_v44, 0.7853982  ;;  %v14698_v39 = vsel %vm5391_vm12, %v5392_v15, %v14648_v27  ;;  %v6139_v8 = vsub.s32 32, %v6138_v40  ;;  %v6335_v6 = vand.u32 2139095040, %v14068_v4 }
 0x632   :  { %8268 = vcosq.f32 %v5588_v17  ;;  %v6100_v59 = vand.u32 2147483647, %v6099_v50  ;;  %v6107_v1 = vsel %vm6022_vm11, %v6106_v9, %v14580_v25  ;;  %v6291_v53 = vshll.u32 %v14692_v38, 30 }
 0x633   :  { %v6132_v0 = vor.u32 8388608, %v6131_v61  ;;  %v6142_v11 = vshrl.u32 %v15520_v31, %v6139_v8  ;;  %v6145_v12 = vshrl.u32 %v15510_v36, %v6139_v8  ;;  %v6148_v29 = vshrl.u32 %v15511_v5, %v6139_v8 }
 0x634   :  { %v6102_v27 = vcvt.s32.f32 %v6095_v49  ;;  %v14708_v10 = vsub.s32 %v6288_v45, %v6291_v53  ;;  %v6141_v7 = vshll.u32 %v15514_v63, %v6138_v40  ;;  %v6151_v43 = vshrl.u32 %v15512_v13, %v6139_v8 }
 0x635   :  { %v6137_v28 = vshrl.u32 %v6136_v55, 5  ;;  %v6144_v41 = vshll.u32 %v15520_v31, %v6138_v40  ;;  %v6147_v25 = vshll.u32 %v15510_v36, %v6138_v40  ;;  %v6336_v15 = vshrl.u32 %v6335_v6, 23 }
 0x636   :  { %v6103_v21 = vmul.f32 %v6102_v27, %v6100_v59  ;;  %v6294_v16 = vsub.s32 0, %v14708_v10  ;;  %v6143_v9 = vor.u32 %v6142_v11, %v6141_v7  ;;  %v6150_v23 = vshll.u32 %v15511_v5, %v6138_v40 }
 0x637   :  { %vm5488_vm5 = vweird.f32 %v15741_v37  ;;  %vm5387_vm10 = vcmp.lt.s32.totalorder %v14643_v20, 2  ;;  %v6146_v45 = vor.u32 %v6145_v12, %v6144_v41  ;;  %v6149_v44 = vor.u32 %v6148_v29, %v6147_v25 }
 0x638   :  { %v6153_v61 = vshll.u32 %v15512_v13, %v6138_v40  ;;  %v6154_v55 = vshrl.u32 %v15513_v18, %v6139_v8  ;;  %v5390_v49 = vsel %vm5388_vm13, %v14640_v54, %v5389_v32  ;;  %v6109_v50 = vsel %vm14684_vm3, 0, %v6107_v1 }
 0x639   :  { %v7703_v6 = vmin.u32 %v6294_v16, %v14708_v10  ;;  %v6152_v59 = vor.u32 %v6151_v43, %v6150_v23  ;;  %8270 = vsinq.f32 %v5588_v17  ;;  %v14726_v11 = vshll.u32 %v6132_v0, 8 }
 0x63a   :  { %v6155_v53 = vor.u32 %v6154_v55, %v6153_v61  ;;  %v7706_v12 = vadd.s32 4294967169, %v6336_v15  ;;  %v6140_v40 = vshrl.u32 %v15514_v63, %v6139_v8  ;;  %vm6156_vm15 = vcmp.lt.s32.totalorder %v6137_v28, 1 }
 0x63b   :  { %v6296_v29 = vclz %v7703_v6  ;;  %vm6159_vm1 = vcmp.lt.s32.totalorder %v6137_v28, 4  ;;  %v6104_v27 = vxor.u32 2147483648, %v6103_v21  ;;  %vm6157_vm2 = vcmp.lt.s32.totalorder %v6137_v28, 2 }
 0x63c   :  { %v6161_v7 = vsel %vm6159_vm1, %v6149_v44, 2102212464  ;;  %v6164_v54 = vsel %vm6156_vm15, %v6143_v9, %v6146_v45  ;;  %v14729_v32 = vpop.eup %8268  ;;  %vm5384_vm0 = vweird.f32 %v13504_v14  ;;  %vm6158_vm6 = vcmp.lt.s32.totalorder %v6137_v28, 3 }
 0x63d   :  { %v7704_v1 = vadd.s32 4294967294, %v6296_v29  ;;  %v6165_v17 = vsel %vm6159_vm1, %v6152_v59, 920167782  ;;  %v6168_v43 = vsel %vm6156_vm15, %v6146_v45, %v6149_v44  ;;  %v6160_v0 = vsel %vm6156_vm15, %v6140_v40, %v6143_v9 }
 0x63e   :  { %v6166_v41 = vsel %vm6158_vm6, %v6149_v44, %v6165_v17  ;;  %v6169_v25 = vsel %vm6159_vm1, %v6155_v53, 1326507024  ;;  %v6342_v15 = vadd.s32 1, %v7706_v12  ;;  %v6162_v8 = vsel %vm6158_vm6, %v6146_v45, %v6161_v7 }
 0x63f   :  { %vm7705_vm7 = vcmp.lt.s32.totalorder %v7704_v1, 0  ;;  %v6167_v16 = vsel %vm6157_vm2, %v6164_v54, %v6166_v41  ;;  %v6170_v23 = vsel %vm6158_vm6, %v6152_v59, %v6169_v25  ;;  %vm6230_vm8 = vcmp.lt.s32.totalorder %v15758_v51, 0 }
 0x640   :  { %v6299_v61 = vsel %vm7705_vm7, 0, %v7704_v1  ;;  %v6171_v55 = vsel %vm6157_vm2, %v6168_v43, %v6170_v23  ;;  %v14736_v6 = vmul.u32.u64.low %v14726_v11, %v6167_v16  ;;  %v14737_v29 = vmul.u32.u64.high %v14726_v11, %v6167_v16, %v14736_v6 }
 0x641   :  { %v14743_v9 = vsel %vm5488_vm5, nan, %v14676_v35  ;;  %v5394_v45 = vsel %vm5387_vm10, %v5390_v49, %v14698_v39  ;;  %v6304_v44 = vsub.s32 4294967266, %v6299_v61  ;;  %vm6343_vm4 = vcmp.gt.s32.totalorder %v6342_v15, 0 }
 0x642   :  { %v6113_v59 = vadd.s32 3, %v6109_v50  ;;  %v14749_v53 = vmul.u32.u64.low %v14726_v11, %v6171_v55  ;;  %v14750_v12 = vmul.u32.u64.high %v14726_v11, %v6171_v55, %v14749_v53  ;;  %v6344_v40 = vsel %vm6343_vm4, %v6342_v15, 0 }
 0x643   :  { %v6300_v7 = vsub.s32 32, %v6299_v61  ;;  %v6305_v54 = vadd.s32 127, %v6304_v44  ;;  %v6163_v1 = vsel %vm6157_vm2, %v6160_v0, %v6162_v8  ;;  %v6346_v17 = vand.u32 31, %v6344_v40  ;;  %v8271_v37 = vpop.eup %8270 }
 0x644   :  { %vm5599_vm9 = vcmp.eq.s32.totalorder %v14690_v19, 2  ;;  %v6105_v20 = vsel %vm6022_vm11, %v6104_v27, %v6103_v21  ;;  %v6182_v35 = vadd.s32 1, %v14737_v29  ;;  %v15490_v39 = vand.u32 2147483647, %v14068_v4 }
 0x645   :  { %v5600_v49 = vxor.u32 2147483648, %v14729_v32  ;;  %v6284_v50 = vadd.s32 %v14630_v46, %v14628_v60  ;;  %v6306_v43 = vshll.u32 %v6305_v54, 23  ;;  %v6314_v28 = vsub.s32 4, %v14692_v38 }
 0x646   :  { %v14764_v0 = vsel %vm5384_vm0, nan, %v5394_v45  ;;  %v6179_v41 = vmul.u32 %v14726_v11, %v6163_v1  ;;  %vm6181_vm11 = vc.u32 %v14750_v12, %v14736_v6  ;;  %v6347_v21 = vsub.s32 32, %v6346_v17 }
 0x647   :  { %vm5596_vm14 = vcmp.eq.s32.totalorder %v14690_v19, 0  ;;  %v6108_v27 = vsel %vm14684_vm3, %v13733_v33, %v6105_v20  ;;  %v14773_v60 = vand.u32 3, %v6113_v59  ;;  %v15769_v46 = vand.u32 2147483647, %v15758_v51 }
 0x648   :  { %v6302_v25 = vshrl.u32 %v6284_v50, %v6300_v7  ;;  %v6183_v11 = vsel %vm6181_vm11, %v6182_v35, %v14737_v29  ;;  %v5597_v15 = vxor.u32 2147483648, %v8271_v37  ;;  %v6307_v8 = vor.u32 4788187, %v6306_v43 }
 0x649   :  { %vm14777_vm12 = vcmp.le.f32.partialorder %v15769_v46, 0.7853982  ;;  %v6184_v16 = vadd.s32 %v6183_v11, %v6179_v41  ;;  %v15491_v23 = vand.u32 2147483647, %v14205_v34  ;;  %v14785_v26 = vsel %vm5599_vm9, %v5600_v49, %v8271_v37 }
 0x64a   :  { %v6301_v55 = vshll.u32 %v14708_v10, %v6299_v61  ;;  %v14791_v45 = vsel %vm6230_vm8, %v6314_v28, %v14692_v38  ;;  %v6339_v44 = vand.u32 8388607, %v15490_v39  ;;  %8272 = vcosq.f32 %v6108_v27 }
 0x64b   :  { %v6185_v29 = vadd.s32 536870912, %v6184_v16  ;;  %v6350_v59 = vshrl.u32 %v15520_v31, %v6347_v21  ;;  %v6353_v53 = vshrl.u32 %v15510_v36, %v6347_v21  ;;  %v14797_v54 = vshrl.u32 %v6344_v40, 5 }
 0x64c   :  { %v6303_v7 = vor.u32 %v6302_v25, %v6301_v55  ;;  %v6349_v1 = vshll.u32 %v15514_v63, %v6346_v17  ;;  %v6356_v10 = vshrl.u32 %v15511_v5, %v6347_v21  ;;  %v6308_v61 = vand.u32 2147483647, %v6307_v8 }
 0x64d   :  { %v14801_v37 = vshrl.u32 %v6185_v29, 30  ;;  %v6352_v38 = vshll.u32 %v15520_v31, %v6346_v17  ;;  %v6359_v20 = vshrl.u32 %v15512_v13, %v6347_v21  ;;  %v6355_v35 = vshll.u32 %v15510_v36, %v6346_v17 }
 0x64e   :  { %v6358_v49 = vshll.u32 %v15511_v5, %v6346_v17  ;;  %v6361_v50 = vshll.u32 %v15512_v13, %v6346_v17  ;;  %v6362_v40 = vshrl.u32 %v15513_v18, %v6347_v21  ;;  %8274 = vsinq.f32 %v6108_v27 }
 0x64f   :  { %v6187_v43 = vshll.u32 %v14801_v37, 30  ;;  %v6351_v28 = vor.u32 %v6350_v59, %v6349_v1  ;;  %v6354_v41 = vor.u32 %v6353_v53, %v6352_v38  ;;  %vm5595_vm13 = vcmp.lt.s32.totalorder %v14690_v19, 2 }
 0x650   :  { %v6310_v46 = vcvt.s32.f32 %v6303_v7  ;;  %v6357_v25 = vor.u32 %v6356_v10, %v6355_v35  ;;  %v6360_v11 = vor.u32 %v6359_v20, %v6358_v49  ;;  %v6363_v8 = vor.u32 %v6362_v40, %v6361_v50 }
 0x651   :  { %v5598_v55 = vsel %vm5596_vm14, %v14729_v32, %v5597_v15  ;;  %v6317_v17 = vsel %vm14777_vm12, 0, %v14791_v45  ;;  %v14817_v29 = vsub.s32 %v6184_v16, %v6187_v43  ;;  %v6340_v27 = vor.u32 8388608, %v6339_v44 }
 0x652   :  { %v6311_v39 = vmul.f32 %v6310_v46, %v6308_v61  ;;  %v6348_v59 = vshrl.u32 %v15514_v63, %v6347_v21  ;;  %vm6364_vm3 = vcmp.lt.s32.totalorder %v14797_v54, 1  ;;  %v6855_v53 = vand.u32 2139095040, %v14205_v34 }
 0x653   :  { %v6190_v7 = vsub.s32 0, %v14817_v29  ;;  %vm6366_vm5 = vcmp.lt.s32.totalorder %v14797_v54, 3  ;;  %vm6367_vm10 = vcmp.lt.s32.totalorder %v14797_v54, 4  ;;  %v6372_v32 = vsel %vm6364_vm3, %v6351_v28, %v6354_v41 }
 0x654   :  { %v6369_v15 = vsel %vm6367_vm10, %v6357_v25, 2102212464  ;;  %v6373_v16 = vsel %vm6367_vm10, %v6360_v11, 920167782  ;;  %v6376_v45 = vsel %vm6364_vm3, %v6354_v41, %v6357_v25  ;;  %v6377_v44 = vsel %vm6367_vm10, %v6363_v8, 1326507024  ;;  %v14829_v21 = vpop.eup %8272 }
 0x655   :  { %vm6126_vm15 = vcmp.lt.s32.totalorder %v15762_v47, 0  ;;  %v7699_v1 = vmin.u32 %v6190_v7, %v14817_v29  ;;  %vm6365_vm1 = vcmp.lt.s32.totalorder %v14797_v54, 2  ;;  %v6374_v10 = vsel %vm6366_vm5, %v6357_v25, %v6373_v16 }
 0x656   :  { %v6378_v61 = vsel %vm6366_vm5, %v6360_v11, %v6377_v44  ;;  %v6375_v38 = vsel %vm6365_vm1, %v6372_v32, %v6374_v10  ;;  %v6380_v35 = vshll.u32 %v6340_v27, 8  ;;  %v6856_v49 = vshrl.u32 %v6855_v53, 23 }
 0x657   :  { %v6379_v20 = vsel %vm6365_vm1, %v6376_v45, %v6378_v61  ;;  %vm5592_vm2 = vweird.f32 %v13610_v30  ;;  %v6312_v50 = vxor.u32 2147483648, %v6311_v39  ;;  %v6192_v40 = vclz %v7699_v1 }
 0x658   :  { %v6368_v43 = vsel %vm6364_vm3, %v6348_v59, %v6351_v28  ;;  %v6370_v46 = vsel %vm6366_vm5, %v6354_v41, %v6369_v15  ;;  %vm14849_vm0 = vcmp.le.f32.partialorder %v6124_v56, 0.7853982  ;;  %v8275_v7 = vpop.eup %8274  ;;  %v5602_v28 = vsel %vm5595_vm13, %v5598_v55, %v14785_v26 }
 0x659   :  { %v14853_v11 = vmul.u32.u64.low %v6380_v35, %v6379_v20  ;;  %v14854_v8 = vmul.u32.u64.high %v6380_v35, %v6379_v20, %v14853_v11  ;;  %v14856_v27 = vmul.u32.u64.low %v6380_v35, %v6375_v38  ;;  %v14857_v53 = vmul.u32.u64.high %v6380_v35, %v6375_v38, %v14856_v27 }
 0x65a   :  { %vm6119_vm6 = vcmp.eq.s32.totalorder %v14773_v60, 2  ;;  %v7700_v41 = vadd.s32 4294967294, %v6192_v40  ;;  %v7726_v59 = vadd.s32 4294967169, %v6856_v49  ;;  %vm6116_vm7 = vcmp.eq.s32.totalorder %v14773_v60, 0 }
 0x65b   :  { %v6120_v56 = vxor.u32 2147483648, %v14829_v21  ;;  %v6321_v32 = vadd.s32 3, %v6317_v17  ;;  %v6210_v15 = vsub.s32 4, %v14801_v37  ;;  %v6371_v16 = vsel %vm6365_vm1, %v6368_v43, %v6370_v46 }
 0x65c   :  { %v6313_v45 = vsel %vm6230_vm8, %v6312_v50, %v6311_v39  ;;  %v6180_v19 = vadd.s32 %v14736_v6, %v14750_v12  ;;  %vm7701_vm4 = vcmp.lt.s32.totalorder %v7700_v41, 0  ;;  %v6862_v26 = vadd.s32 1, %v7726_v59 }
 0x65d   :  { %v6195_v55 = vsel %vm7701_vm4, 0, %v7700_v41  ;;  %vm6389_vm9 = vc.u32 %v14854_v8, %v14856_v27  ;;  %v6390_v44 = vadd.s32 1, %v14857_v53  ;;  %v6859_v17 = vand.u32 8388607, %v15491_v23 }
 0x65e   :  { %v6117_v1 = vxor.u32 2147483648, %v8275_v7  ;;  %v6196_v54 = vsub.s32 32, %v6195_v55  ;;  %v6200_v10 = vsub.s32 4294967266, %v6195_v55  ;;  %v6387_v61 = vmul.u32 %v6380_v35, %v6371_v16 }
 0x65f   :  { %v6316_v39 = vsel %vm14777_vm12, %v15758_v51, %v6313_v45  ;;  %v6211_v6 = vsel %vm6126_vm15, %v6210_v15, %v14801_v37  ;;  %v6391_v12 = vsel %vm6389_vm9, %v6390_v44, %v14857_v53  ;;  %vm6863_vm8 = vcmp.gt.s32.totalorder %v6862_v26, 0 }
 0x660   :  { %v6197_v38 = vshll.u32 %v14817_v29, %v6195_v55  ;;  %v6198_v20 = vshrl.u32 %v6180_v19, %v6196_v54  ;;  %v6201_v49 = vadd.s32 127, %v6200_v10  ;;  %v6392_v50 = vadd.s32 %v6391_v12, %v6387_v61 }
 0x661   :  { %v14888_v40 = vsel %vm5592_vm2, nan, %v5602_v28  ;;  %v14890_v35 = vand.u32 3, %v6321_v32  ;;  %vm6334_vm11 = vcmp.lt.s32.totalorder %v14068_v4, 0  ;;  %v6860_v14 = vor.u32 8388608, %v6859_v17 }
 0x662   :  { %v6864_v43 = vsel %vm6863_vm8, %v6862_v26, 0  ;;  %v6199_v46 = vor.u32 %v6198_v20, %v6197_v38  ;;  %v6202_v37 = vshll.u32 %v6201_v49, 23  ;;  %v6213_v11 = vsel %vm14849_vm0, 0, %v6211_v6 }
 0x663   :  { %v6393_v53 = vadd.s32 536870912, %v6392_v50  ;;  %v14897_v29 = vsel %vm6119_vm6, %v6120_v56, %v8275_v7  ;;  %8276 = vcosq.f32 %v6316_v39  ;;  %v6866_v30 = vand.u32 31, %v6864_v43 }
 0x664   :  { %v7063_v28 = vand.u32 2139095040, %v14312_v24  ;;  %v14903_v41 = vsel %vm6116_vm7, %v14829_v21, %v6117_v1  ;;  %8278 = vsinq.f32 %v6316_v39  ;;  %v6203_v59 = vor.u32 4788187, %v6202_v37 }
 0x665   :  { %v6394_v32 = vshrl.u32 %v6393_v53, 30  ;;  %v14905_v15 = vadd.s32 3, %v6213_v11  ;;  %v15774_v16 = vand.u32 2147483647, %v14068_v4  ;;  %v6867_v7 = vsub.s32 32, %v6866_v30 }
 0x666   :  { %v14913_v56 = vshll.u32 %v6860_v14, 8  ;;  %v15492_v19 = vand.u32 2147483647, %v14312_v24  ;;  %v6204_v26 = vand.u32 2147483647, %v6203_v59  ;;  %v6206_v55 = vcvt.s32.f32 %v6199_v46 }
 0x667   :  { %vm14909_vm14 = vcmp.le.f32.partialorder %v15774_v16, 0.7853982  ;;  %v6395_v21 = vshll.u32 %v6394_v32, 30  ;;  %v6418_v44 = vsub.s32 4, %v6394_v32  ;;  %v6870_v17 = vshrl.u32 %v15520_v31, %v6867_v7 }
 0x668   :  { %v6873_v1 = vshrl.u32 %v15510_v36, %v6867_v7  ;;  %v6876_v54 = vshrl.u32 %v15511_v5, %v6867_v7  ;;  %v7064_v10 = vshrl.u32 %v7063_v28, 23  ;;  %v6207_v61 = vmul.f32 %v6206_v55, %v6204_v26 }
 0x669   :  { %v14919_v39 = vsub.s32 %v6392_v50, %v6395_v21  ;;  %v6869_v6 = vshll.u32 %v15514_v63, %v6866_v30  ;;  %v6879_v12 = vshrl.u32 %v15512_v13, %v6867_v7  ;;  %v6865_v38 = vshrl.u32 %v6864_v43, 5 }
 0x66a   :  { %v6872_v20 = vshll.u32 %v15520_v31, %v6866_v30  ;;  %v6875_v49 = vshll.u32 %v15510_v36, %v6866_v30  ;;  %v6878_v14 = vshll.u32 %v15511_v5, %v6866_v30  ;;  %v6208_v46 = vxor.u32 2147483648, %v6207_v61 }
 0x66b   :  { %v6398_v37 = vsub.s32 0, %v14919_v39  ;;  %v6419_v11 = vsel %vm6334_vm11, %v6418_v44, %v6394_v32  ;;  %v6871_v53 = vor.u32 %v6870_v17, %v6869_v6  ;;  %v6881_v59 = vshll.u32 %v15512_v13, %v6866_v30 }
 0x66c   :  { %v6874_v50 = vor.u32 %v6873_v1, %v6872_v20  ;;  %v6877_v28 = vor.u32 %v6876_v54, %v6875_v49  ;;  %v6882_v16 = vshrl.u32 %v15513_v18, %v6867_v7  ;;  %v6388_v43 = vadd.s32 %v14856_v27, %v14854_v8 }
 0x66d   :  { %v7707_v26 = vmin.u32 %v6398_v37, %v14919_v39  ;;  %v6880_v55 = vor.u32 %v6879_v12, %v6878_v14  ;;  %v14936_v21 = vand.u32 8388607, %v15492_v19  ;;  %v14938_v23 = vpop.eup %8276  ;;  %v6209_v32 = vsel %vm6126_vm15, %v6208_v46, %v6207_v61 }
 0x66e   :  { %v6868_v44 = vshrl.u32 %v15514_v63, %v6867_v7  ;;  %v6883_v30 = vor.u32 %v6882_v16, %v6881_v59  ;;  %v7734_v17 = vadd.s32 4294967169, %v7064_v10  ;;  %v8279_v1 = vpop.eup %8278  ;;  %vm6115_vm12 = vcmp.lt.s32.totalorder %v14773_v60, 2 }
 0x66f   :  { %v6400_v8 = vclz %v7707_v26  ;;  %v6421_v27 = vsel %vm14909_vm14, 0, %v6419_v11  ;;  %vm6884_vm13 = vcmp.lt.s32.totalorder %v6865_v38, 1  ;;  %vm6887_vm3 = vcmp.lt.s32.totalorder %v6865_v38, 4 }
 0x670   :  { %vm6885_vm5 = vcmp.lt.s32.totalorder %v6865_v38, 2  ;;  %vm6886_vm10 = vcmp.lt.s32.totalorder %v6865_v38, 3  ;;  %v6889_v54 = vsel %vm6887_vm3, %v6877_v28, 2102212464  ;;  %v6892_v6 = vsel %vm6884_vm13, %v6871_v53, %v6874_v50 }
 0x671   :  { %v6212_v61 = vsel %vm14849_vm0, %v15762_v47, %v6209_v32  ;;  %v7708_v7 = vadd.s32 4294967294, %v6400_v8  ;;  %v6893_v12 = vsel %vm6887_vm3, %v6880_v55, 920167782  ;;  %v6896_v10 = vsel %vm6884_vm13, %v6874_v50, %v6877_v28 }
 0x672   :  { %vm6112_vm15 = vweird.f32 %v13733_v33  ;;  %v6888_v20 = vsel %vm6884_vm13, %v6868_v44, %v6871_v53  ;;  %v6894_v49 = vsel %vm6886_vm10, %v6877_v28, %v6893_v12  ;;  %v6897_v14 = vsel %vm6887_vm3, %v6883_v30, 1326507024 }
 0x673   :  { %v7070_v46 = vadd.s32 1, %v7734_v17  ;;  %vm7709_vm1 = vcmp.lt.s32.totalorder %v7708_v7, 0  ;;  %v6890_v37 = vsel %vm6886_vm10, %v6874_v50, %v6889_v54  ;;  %v6895_v11 = vsel %vm6885_vm5, %v6892_v6, %v6894_v49 }
 0x674   :  { %v6898_v59 = vsel %vm6886_vm10, %v6880_v55, %v6897_v14  ;;  %vm6324_vm2 = vcmp.eq.s32.totalorder %v14890_v35, 0  ;;  %v6403_v16 = vsel %vm7709_vm1, 0, %v7708_v7  ;;  %8280 = vcosq.f32 %v6212_v61 }
 0x675   :  { %v6899_v25 = vsel %vm6885_vm5, %v6896_v10, %v6898_v59  ;;  %v14954_v26 = vmul.u32.u64.low %v14913_v56, %v6895_v11  ;;  %v14955_v32 = vmul.u32.u64.high %v14913_v56, %v6895_v11, %v14954_v26  ;;  %v6404_v53 = vsub.s32 32, %v6403_v16 }
 0x676   :  { %v6408_v28 = vsub.s32 4294967266, %v6403_v16  ;;  %vm7071_vm0 = vcmp.gt.s32.totalorder %v7070_v46, 0  ;;  %v6891_v44 = vsel %vm6885_vm5, %v6888_v20, %v6890_v37  ;;  %v6405_v17 = vshll.u32 %v14919_v39, %v6403_v16 }
 0x677   :  { %v14960_v50 = vmul.u32.u64.low %v14913_v56, %v6899_v25  ;;  %v14961_v30 = vmul.u32.u64.high %v14913_v56, %v6899_v25, %v14960_v50  ;;  %v7072_v55 = vsel %vm7071_vm0, %v7070_v46, 0  ;;  %v6406_v8 = vshrl.u32 %v6388_v43, %v6404_v53 }
 0x678   :  { %v6409_v54 = vadd.s32 127, %v6408_v28  ;;  %v7074_v6 = vand.u32 31, %v7072_v55  ;;  %v6122_v7 = vsel %vm6115_vm12, %v14903_v41, %v14897_v29  ;;  %vm6327_vm6 = vcmp.eq.s32.totalorder %v14890_v35, 2 }
 0x679   :  { %v6328_v38 = vxor.u32 2147483648, %v14938_v23  ;;  %v6910_v12 = vadd.s32 1, %v14955_v32  ;;  %v6325_v10 = vxor.u32 2147483648, %v8279_v1  ;;  %v6407_v20 = vor.u32 %v6406_v8, %v6405_v17 }
 0x67a   :  { %v6410_v49 = vshll.u32 %v6409_v54, 23  ;;  %v6425_v14 = vadd.s32 3, %v6421_v27  ;;  %v6907_v39 = vmul.u32 %v14913_v56, %v6891_v44  ;;  %vm6909_vm7 = vc.u32 %v14961_v30, %v14954_v26 }
 0x67b   :  { %v7068_v43 = vor.u32 8388608, %v14936_v21  ;;  %v7075_v46 = vsub.s32 32, %v7074_v6  ;;  %v14977_v60 = vsel %vm6112_vm15, nan, %v6122_v7  ;;  %v14980_v29 = vand.u32 3, %v14905_v15 }
 0x67c   :  { %v6411_v41 = vor.u32 4788187, %v6410_v49  ;;  %v6911_v37 = vsel %vm6909_vm7, %v6910_v12, %v14955_v32  ;;  %v14985_v27 = vsel %vm6327_vm6, %v6328_v38, %v8279_v1  ;;  %8282 = vsinq.f32 %v6212_v61 }
 0x67d   :  { %v6912_v56 = vadd.s32 %v6911_v37, %v6907_v39  ;;  %v14991_v33 = vsel %vm6324_vm2, %v14938_v23, %v6325_v10  ;;  %v6414_v59 = vcvt.s32.f32 %v6407_v20  ;;  %v14993_v15 = vand.u32 3, %v6425_v14 }
 0x67e   :  { %v6412_v21 = vand.u32 2147483647, %v6411_v41  ;;  %v7078_v25 = vshrl.u32 %v15520_v31, %v7075_v46  ;;  %v7081_v32 = vshrl.u32 %v15510_v36, %v7075_v46  ;;  %v14997_v1 = vshll.u32 %v7068_v43, 8  ;;  %v14999_v61 = vpop.eup %8280 }
 0x67f   :  { %v6913_v16 = vadd.s32 536870912, %v6912_v56  ;;  %v7073_v28 = vshrl.u32 %v7072_v55, 5  ;;  %v7077_v44 = vshll.u32 %v15514_v63, %v7074_v6  ;;  %v7084_v23 = vshrl.u32 %v15511_v5, %v7075_v46 }
 0x680   :  { %v6415_v53 = vmul.f32 %v6414_v59, %v6412_v21  ;;  %v7080_v17 = vshll.u32 %v15520_v31, %v7074_v6  ;;  %v7083_v8 = vshll.u32 %v15510_v36, %v7074_v6  ;;  %v7087_v54 = vshrl.u32 %v15512_v13, %v7075_v46 }
 0x681   :  { %v6914_v50 = vshrl.u32 %v6913_v16, 30  ;;  %vm6854_vm4 = vcmp.lt.s32.totalorder %v14205_v34, 0  ;;  %v7086_v38 = vshll.u32 %v15511_v5, %v7074_v6  ;;  %v7089_v12 = vshll.u32 %v15512_v13, %v7074_v6 }
 0x682   :  { %v6416_v7 = vxor.u32 2147483648, %v6415_v53  ;;  %v7090_v55 = vshrl.u32 %v15513_v18, %v7075_v46  ;;  %v7079_v20 = vor.u32 %v7078_v25, %v7077_v44  ;;  %v7082_v49 = vor.u32 %v7081_v32, %v7080_v17 }
 0x683   :  { %v6915_v10 = vshll.u32 %v6914_v50, 30  ;;  %v6959_v14 = vand.u32 2139095040, %v14410_v22  ;;  %v7085_v43 = vor.u32 %v7084_v23, %v7083_v8  ;;  %v7088_v41 = vor.u32 %v7087_v54, %v7086_v38 }
 0x684   :  { %v6417_v39 = vsel %vm6334_vm11, %v6416_v7, %v6415_v53  ;;  %v7091_v37 = vor.u32 %v7090_v55, %v7089_v12  ;;  %vm6323_vm9 = vcmp.lt.s32.totalorder %v14890_v35, 2  ;;  %v6224_v21 = vxor.u32 2147483648, %v14999_v61 }
 0x685   :  { %v6420_v6 = vsel %vm14909_vm14, %v14068_v4, %v6417_v39  ;;  %v15777_v59 = vand.u32 2147483647, %v14205_v34  ;;  %v15024_v25 = vsub.s32 %v6912_v56, %v6915_v10  ;;  %v7076_v32 = vshrl.u32 %v15514_v63, %v7075_v46 }
 0x686   :  { %8284 = vcosq.f32 %v6420_v6  ;;  %v6938_v53 = vsub.s32 4, %v6914_v50  ;;  %vm7092_vm11 = vcmp.lt.s32.totalorder %v7073_v28, 1  ;;  %vm7094_vm12 = vcmp.lt.s32.totalorder %v7073_v28, 3  ;;  %v8283_v44 = vpop.eup %8282 }
 0x687   :  { %vm15020_vm8 = vcmp.le.f32.partialorder %v15777_v59, 0.7853982  ;;  %8286 = vsinq.f32 %v6420_v6  ;;  %v6918_v23 = vsub.s32 0, %v15024_v25  ;;  %vm7095_vm13 = vcmp.lt.s32.totalorder %v7073_v28, 4 }
 0x688   :  { %v7100_v45 = vsel %vm7092_vm11, %v7079_v20, %v7082_v49  ;;  %v7097_v17 = vsel %vm7095_vm13, %v7085_v43, 2102212464  ;;  %v7101_v8 = vsel %vm7095_vm13, %v7088_v41, 920167782  ;;  %v7104_v54 = vsel %vm7092_vm11, %v7082_v49, %v7085_v43 }
 0x689   :  { %v7105_v7 = vsel %vm7095_vm13, %v7091_v37, 1326507024  ;;  %v7727_v56 = vmin.u32 %v6918_v23, %v15024_v25  ;;  %vm7093_vm14 = vcmp.lt.s32.totalorder %v7073_v28, 2  ;;  %v7102_v46 = vsel %vm7094_vm12, %v7085_v43, %v7101_v8 }
 0x68a   :  { %v7106_v38 = vsel %vm7094_vm12, %v7088_v41, %v7105_v7  ;;  %v6221_v12 = vxor.u32 2147483648, %v8283_v44  ;;  %v7103_v55 = vsel %vm7093_vm14, %v7100_v45, %v7102_v46  ;;  %v6960_v39 = vshrl.u32 %v6959_v14, 23 }
 0x68b   :  { %v7107_v10 = vsel %vm7093_vm14, %v7104_v54, %v7106_v38  ;;  %v6920_v6 = vclz %v7727_v56  ;;  %v6939_v59 = vsel %vm6854_vm4, %v6938_v53, %v6914_v50  ;;  %v7096_v19 = vsel %vm7092_vm11, %v7076_v32, %v7079_v20 }
 0x68c   :  { %v7098_v37 = vsel %vm7094_vm12, %v7082_v49, %v7097_v17  ;;  %v15040_v23 = vmul.u32.u64.low %v14997_v1, %v7107_v10  ;;  %v15041_v11 = vmul.u32.u64.high %v14997_v1, %v7107_v10, %v15040_v23  ;;  %vm6219_vm3 = vcmp.lt.s32.totalorder %v14980_v29, 2 }
 0x68d   :  { %v15044_v43 = vmul.u32.u64.low %v14997_v1, %v7103_v55  ;;  %v15045_v41 = vmul.u32.u64.high %v14997_v1, %v7103_v55, %v15044_v43  ;;  %vm6220_vm5 = vcmp.eq.s32.totalorder %v14980_v29, 0  ;;  %vm6223_vm10 = vcmp.eq.s32.totalorder %v14980_v29, 2 }
 0x68e   :  { %v7728_v14 = vadd.s32 4294967294, %v6920_v6  ;;  %v7730_v50 = vadd.s32 4294967169, %v6960_v39  ;;  %v15054_v20 = vsel %vm6323_vm9, %v14991_v33, %v14985_v27  ;;  %v6941_v49 = vsel %vm15020_vm8, 0, %v6939_v59 }
 0x68f   :  { %v7099_v32 = vsel %vm7093_vm14, %v7096_v19, %v7098_v37  ;;  %v15780_v53 = vand.u32 2147483647, %v14410_v22  ;;  %v6225_v17 = vsel %vm6223_vm10, %v6224_v21, %v8283_v44  ;;  %vm6428_vm15 = vcmp.eq.s32.totalorder %v14993_v15, 0 }
 0x690   :  { %v6908_v8 = vadd.s32 %v14954_v26, %v14961_v30  ;;  %vm7729_vm1 = vcmp.lt.s32.totalorder %v7728_v14, 0  ;;  %v6966_v54 = vadd.s32 1, %v7730_v50  ;;  %v8285_v7 = vpop.eup %8284  ;;  %v6222_v35 = vsel %vm6220_vm5, %v14999_v61, %v6221_v12 }
 0x691   :  { %v6963_v45 = vand.u32 8388607, %v15780_v53  ;;  %v6923_v27 = vsel %vm7729_vm1, 0, %v7728_v14  ;;  %vm7117_vm2 = vc.u32 %v15041_v11, %v15044_v43  ;;  %v7118_v19 = vadd.s32 1, %v15045_v41  ;;  %v8287_v33 = vpop.eup %8286 }
 0x692   :  { %v6924_v28 = vsub.s32 32, %v6923_v27  ;;  %v6928_v21 = vsub.s32 4294967266, %v6923_v27  ;;  %v6945_v44 = vadd.s32 3, %v6941_v49  ;;  %v7115_v56 = vmul.u32 %v14997_v1, %v7099_v32 }
 0x693   :  { %v6432_v46 = vxor.u32 2147483648, %v8285_v7  ;;  %v7119_v26 = vsel %vm7117_vm2, %v7118_v19, %v15045_v41  ;;  %v6964_v30 = vor.u32 8388608, %v6963_v45  ;;  %vm6967_vm0 = vcmp.gt.s32.totalorder %v6966_v54, 0 }
 0x694   :  { %v6925_v38 = vshll.u32 %v15024_v25, %v6923_v27  ;;  %v6926_v55 = vshrl.u32 %v6908_v8, %v6924_v28  ;;  %v6929_v61 = vadd.s32 127, %v6928_v21  ;;  %v7120_v12 = vadd.s32 %v7119_v26, %v7115_v56 }
 0x695   :  { %v6429_v10 = vxor.u32 2147483648, %v8287_v33  ;;  %vm7062_vm6 = vcmp.lt.s32.totalorder %v14312_v24, 0  ;;  %v6968_v39 = vsel %vm6967_vm0, %v6966_v54, 0  ;;  %v15493_v6 = vand.u32 2147483647, %v14523_v58 }
 0x696   :  { %v7167_v59 = vand.u32 2139095040, %v14523_v58  ;;  %vm6431_vm7 = vcmp.eq.s32.totalorder %v14993_v15, 2  ;;  %v6927_v1 = vor.u32 %v6926_v55, %v6925_v38  ;;  %v6930_v37 = vshll.u32 %v6929_v61, 23 }
 0x697   :  { %v7121_v23 = vadd.s32 536870912, %v7120_v12  ;;  %v15078_v41 = vsel %vm6219_vm3, %v6222_v35, %v6225_v17  ;;  %v15080_v25 = vand.u32 3, %v6945_v44  ;;  %v6970_v14 = vand.u32 31, %v6968_v39 }
 0x698   :  { %v15082_v50 = vshll.u32 %v6964_v30, 8  ;;  %v15084_v49 = vsel %vm6431_vm7, %v6432_v46, %v8287_v33  ;;  %v6931_v32 = vor.u32 4788187, %v6930_v37  ;;  %v15781_v53 = vand.u32 2147483647, %v14312_v24 }
 0x699   :  { %v15093_v8 = vadd.s32 %v15044_v43, %v15041_v11  ;;  %v7122_v29 = vshrl.u32 %v7121_v23, 30  ;;  %v15097_v17 = vsel %vm6428_vm15, %v8285_v7, %v6429_v10  ;;  %v6971_v54 = vsub.s32 32, %v6970_v14 }
 0x69a   :  { %vm15088_vm9 = vcmp.le.f32.partialorder %v15781_v53, 0.7853982  ;;  %v7168_v35 = vshrl.u32 %v7167_v59, 23  ;;  %v15101_v27 = vand.u32 8388607, %v15493_v6  ;;  %v6934_v33 = vcvt.s32.f32 %v6927_v1 }
 0x69b   :  { %v6932_v19 = vand.u32 2147483647, %v6931_v32  ;;  %v7123_v28 = vshll.u32 %v7122_v29, 30  ;;  %v7146_v21 = vsub.s32 4, %v7122_v29  ;;  %v6969_v44 = vshrl.u32 %v6968_v39, 5 }
 0x69c   :  { %v6974_v56 = vshrl.u32 %v15520_v31, %v6971_v54  ;;  %v6977_v11 = vshrl.u32 %v15510_v36, %v6971_v54  ;;  %v6980_v43 = vshrl.u32 %v15511_v5, %v6971_v54  ;;  %v6973_v26 = vshll.u32 %v15514_v63, %v6970_v14 }
 0x69d   :  { %v6935_v46 = vmul.f32 %v6934_v33, %v6932_v19  ;;  %v15106_v7 = vsub.s32 %v7120_v12, %v7123_v28  ;;  %v6983_v30 = vshrl.u32 %v15512_v13, %v6971_v54  ;;  %v6976_v38 = vshll.u32 %v15520_v31, %v6970_v14 }
 0x69e   :  { %v6979_v55 = vshll.u32 %v15510_v36, %v6970_v14  ;;  %v6982_v61 = vshll.u32 %v15511_v5, %v6970_v14  ;;  %v7738_v10 = vadd.s32 4294967169, %v7168_v35  ;;  %v7147_v1 = vsel %vm7062_vm6, %v7146_v21, %v7122_v29 }
 0x69f   :  { %v6936_v39 = vxor.u32 2147483648, %v6935_v46  ;;  %v7126_v59 = vsub.s32 0, %v15106_v7  ;;  %v6975_v37 = vor.u32 %v6974_v56, %v6973_v26  ;;  %v6978_v12 = vor.u32 %v6977_v11, %v6976_v38 }
 0x6a0   :  { %v6981_v23 = vor.u32 %v6980_v43, %v6979_v55  ;;  %v6985_v32 = vshll.u32 %v15512_v13, %v6970_v14  ;;  %v6986_v53 = vshrl.u32 %v15513_v18, %v6971_v54  ;;  %v6984_v28 = vor.u32 %v6983_v30, %v6982_v61 }
 0x6a1   :  { %v6937_v19 = vsel %vm6854_vm4, %v6936_v39, %v6935_v46  ;;  %v7735_v33 = vmin.u32 %v7126_v59, %v15106_v7  ;;  %v7172_v35 = vor.u32 8388608, %v15101_v27  ;;  %v7149_v29 = vsel %vm15088_vm9, 0, %v7147_v1 }
 0x6a2   :  { %v6940_v6 = vsel %vm15020_vm8, %v14205_v34, %v6937_v19  ;;  %v6972_v21 = vshrl.u32 %v15514_v63, %v6971_v54  ;;  %v6987_v14 = vor.u32 %v6986_v53, %v6985_v32  ;;  %vm6427_vm11 = vcmp.lt.s32.totalorder %v14993_v15, 2 }
 0x6a3   :  { %8288 = vcosq.f32 %v6940_v6  ;;  %v7128_v56 = vclz %v7735_v33  ;;  %vm6988_vm4 = vcmp.lt.s32.totalorder %v6969_v44, 1  ;;  %vm6991_vm12 = vcmp.lt.s32.totalorder %v6969_v44, 4 }
 0x6a4   :  { %vm6989_vm13 = vcmp.lt.s32.totalorder %v6969_v44, 2  ;;  %vm6990_vm14 = vcmp.lt.s32.totalorder %v6969_v44, 3  ;;  %v6993_v11 = vsel %vm6991_vm12, %v6981_v23, 2102212464  ;;  %v6996_v27 = vsel %vm6988_vm4, %v6975_v37, %v6978_v12 }
 0x6a5   :  { %8290 = vsinq.f32 %v6940_v6  ;;  %v7736_v43 = vadd.s32 4294967294, %v7128_v56  ;;  %v6997_v16 = vsel %vm6991_vm12, %v6984_v28, 920167782  ;;  %v7000_v46 = vsel %vm6988_vm4, %v6978_v12, %v6981_v23 }
 0x6a6   :  { %v6992_v26 = vsel %vm6988_vm4, %v6972_v21, %v6975_v37  ;;  %v6998_v30 = vsel %vm6990_vm14, %v6981_v23, %v6997_v16  ;;  %v7001_v38 = vsel %vm6991_vm12, %v6987_v14, 1326507024  ;;  %v7174_v55 = vadd.s32 1, %v7738_v10  ;;  %v15136_v37 = vpop.permute.xlu1 %7274 }
 0x6a7   :  { %vm7737_vm8 = vcmp.lt.s32.totalorder %v7736_v43, 0  ;;  %v6994_v54 = vsel %vm6990_vm14, %v6978_v12, %v6993_v11  ;;  %v6999_v61 = vsel %vm6989_vm13, %v6996_v27, %v6998_v30  ;;  %v7002_v39 = vsel %vm6990_vm14, %v6984_v28, %v7001_v38  ;;  %v15784_v27 = vld [vmem:[#allocation7_spill] sm:$0xff] }
 0x6a8   :  { %v7131_v59 = vsel %vm7737_vm8, 0, %v7736_v43  ;;  %v7003_v1 = vsel %vm6989_vm13, %v7000_v46, %v7002_v39  ;;  %v15132_v32 = vmul.u32.u64.low %v15082_v50, %v6999_v61  ;;  %v15133_v53 = vmul.u32.u64.high %v15082_v50, %v6999_v61, %v15132_v32  ;;  %v15785_v61 = vld [vmem:[#allocation14_spill] sm:$0xff] }
 0x6a9   :  { %v7132_v6 = vsub.s32 32, %v7131_v59  ;;  %v7136_v19 = vsub.s32 4294967266, %v7131_v59  ;;  %v7153_v33 = vadd.s32 3, %v7149_v29  ;;  %vm7175_vm3 = vcmp.gt.s32.totalorder %v7174_v55, 0 }
 0x6aa   :  { %v6995_v10 = vsel %vm6989_vm13, %v6992_v26, %v6994_v54  ;;  %v15140_v12 = vmul.u32.u64.low %v15082_v50, %v7003_v1  ;;  %v15141_v23 = vmul.u32.u64.high %v15082_v50, %v7003_v1, %v15140_v12  ;;  %v7176_v28 = vsel %vm7175_vm3, %v7174_v55, 0 }
 0x6ab   :  { %v7133_v21 = vshll.u32 %v15106_v7, %v7131_v59  ;;  %v7134_v14 = vshrl.u32 %v15093_v8, %v7132_v6  ;;  %v7137_v56 = vadd.s32 127, %v7136_v19  ;;  %v7178_v11 = vand.u32 31, %v7176_v28  ;;  %v15786_v6 = vld [vmem:[#allocation10_spill] sm:$0xff] }
 0x6ac   :  { %v15149_v29 = vsel %vm6427_vm11, %v15097_v17, %v15084_v49  ;;  %vm6951_vm5 = vcmp.eq.s32.totalorder %v15080_v25, 2  ;;  %v7014_v44 = vadd.s32 1, %v15133_v53  ;;  %v15155_v43 = vmul.f32 %v15136_v37, %v15784_v27 }
 0x6ad   :  { %v8289_v16 = vpop.eup %8288  ;;  %v7135_v7 = vor.u32 %v7134_v14, %v7133_v21  ;;  %v7138_v46 = vshll.u32 %v7137_v56, 23  ;;  %v15157_v8 = vand.u32 3, %v7153_v33  ;;  %v7179_v26 = vsub.s32 32, %v7178_v11 }
 0x6ae   :  { %v7011_v30 = vmul.u32 %v15082_v50, %v6995_v10  ;;  %vm7013_vm10 = vc.u32 %v15141_v23, %v15132_v32  ;;  %v15162_v15 = vshrl.u32 %v7176_v28, 5  ;;  %v15164_v49 = vshll.u32 %v7172_v35, 8 }
 0x6af   :  { %v8291_v17 = vpop.eup %8290  ;;  %v6952_v38 = vxor.u32 2147483648, %v8289_v16  ;;  %v7139_v55 = vor.u32 4788187, %v7138_v46  ;;  %v7015_v54 = vsel %vm7013_vm10, %v7014_v44, %v15133_v53  ;;  %v15169_v39 = vmul.f32 %v15136_v37, %v15785_v61 }
 0x6b0   :  { %vm6948_vm15 = vcmp.eq.s32.totalorder %v15080_v25, 0  ;;  %v7016_v59 = vadd.s32 %v7015_v54, %v7011_v30  ;;  %v7181_v50 = vshll.u32 %v15514_v63, %v7178_v11  ;;  %v7182_v1 = vshrl.u32 %v15520_v31, %v7179_v26 }
 0x6b1   :  { %v15176_v35 = vmul.f32 %v15136_v37, %v15786_v6  ;;  %v7140_v19 = vand.u32 2147483647, %v7139_v55  ;;  %v7142_v33 = vcvt.s32.f32 %v7135_v7  ;;  %vm6958_vm1 = vcmp.lt.s32.totalorder %v14410_v22, 0 }
 0x6b2   :  { %v7184_v53 = vshll.u32 %v15520_v31, %v7178_v11  ;;  %v7185_v10 = vshrl.u32 %v15510_v36, %v7179_v26  ;;  %v6949_v12 = vxor.u32 2147483648, %v8291_v17  ;;  %v7017_v28 = vadd.s32 536870912, %v7016_v59 }
 0x6b3   :  { %v7187_v21 = vshll.u32 %v15510_v36, %v7178_v11  ;;  %v7188_v14 = vshrl.u32 %v15511_v5, %v7179_v26  ;;  %v6953_v56 = vsel %vm6951_vm5, %v6952_v38, %v8291_v17  ;;  %v7143_v44 = vmul.f32 %v7142_v33, %v7140_v19 }
 0x6b4   :  { %v7180_v27 = vshrl.u32 %v15514_v63, %v7179_v26  ;;  %v7183_v46 = vor.u32 %v7182_v1, %v7181_v50  ;;  %vm6947_vm2 = vcmp.lt.s32.totalorder %v15080_v25, 2  ;;  %v7018_v7 = vshrl.u32 %v7017_v28, 30 }
 0x6b5   :  { %v7189_v30 = vor.u32 %v7188_v14, %v7187_v21  ;;  %v7190_v31 = vshll.u32 %v15511_v5, %v7178_v11  ;;  %v7191_v55 = vshrl.u32 %v15512_v13, %v7179_v26  ;;  %v7144_v54 = vxor.u32 2147483648, %v7143_v44 }
 0x6b6   :  { %v15787_v36 = vand.u32 2147483647, %v14410_v22  ;;  %v7186_v17 = vor.u32 %v7185_v10, %v7184_v53  ;;  %v7193_v38 = vshll.u32 %v15512_v13, %v7178_v11  ;;  %v7194_v63 = vshrl.u32 %v15513_v18, %v7179_v26 }
 0x6b7   :  { %v7019_v50 = vshll.u32 %v7018_v7, 30  ;;  %v7042_v1 = vsub.s32 4, %v7018_v7  ;;  %v7192_v6 = vor.u32 %v7191_v55, %v7190_v31  ;;  %vm7196_vm7 = vcmp.lt.s32.totalorder %v15162_v15, 1 }
 0x6b8   :  { %vm15191_vm0 = vcmp.le.f32.partialorder %v15787_v36, 0.7853982  ;;  %v7145_v5 = vsel %vm7062_vm6, %v7144_v54, %v7143_v44  ;;  %v7195_v19 = vor.u32 %v7194_v63, %v7193_v38  ;;  %vm7198_vm11 = vcmp.lt.s32.totalorder %v15162_v15, 3 }
 0x6b9   :  { %vm7199_vm4 = vcmp.lt.s32.totalorder %v15162_v15, 4  ;;  %v7148_v33 = vsel %vm15088_vm9, %v14312_v24, %v7145_v5  ;;  %v15205_v13 = vsub.s32 %v7016_v59, %v7019_v50  ;;  %v7200_v18 = vsel %vm7196_vm7, %v7180_v27, %v7183_v46  ;;  %v15791_v5 = vld [vmem:[#allocation6_spill] sm:$0xff] }
 0x6ba   :  { %v7201_v11 = vsel %vm7199_vm4, %v7189_v30, 2102212464  ;;  %v6950_v26 = vsel %vm6948_vm15, %v8289_v16, %v6949_v12  ;;  %8292 = vcosq.f32 %v7148_v33  ;;  %vm7197_vm6 = vcmp.lt.s32.totalorder %v15162_v15, 2 }
 0x6bb   :  { %v7202_v53 = vsel %vm7198_vm11, %v7186_v17, %v7201_v11  ;;  %8294 = vsinq.f32 %v7148_v33  ;;  %v7022_v45 = vsub.s32 0, %v15205_v13  ;;  %v15219_v59 = vsel %vm6958_vm1, %v7042_v1, %v7018_v7  ;;  %v15792_v33 = vld [vmem:[#allocation21_spill] sm:$0xff] }
 0x6bc   :  { %v7204_v10 = vsel %vm7196_vm7, %v7183_v46, %v7186_v17  ;;  %v7203_v28 = vsel %vm7197_vm6, %v7200_v18, %v7202_v53  ;;  %v7205_v16 = vsel %vm7199_vm4, %v7192_v6, 920167782  ;;  %v7208_v12 = vsel %vm7196_vm7, %v7186_v17, %v7189_v30  ;;  %v15790_v46 = vld [vmem:[#allocation19_spill] sm:$0xff]  ;;  %v7280_v17 = vpop.permute.xlu0 %7279 }
 0x6bd   :  { %v7209_v21 = vsel %vm7199_vm4, %v7195_v19, 1326507024  ;;  %v7731_v14 = vmin.u32 %v7022_v45, %v15205_v13  ;;  %v7206_v44 = vsel %vm7198_vm11, %v7189_v30, %v7205_v16  ;;  %v7295_v7 = vmul.f32 %v15136_v37, %v15790_v46  ;;  %v15793_v18 = vld [vmem:[#allocation23_spill] sm:$0xff]  ;;  %v7285_v46 = vpop.permute.xlu1 %7284 }
 0x6be   :  { %v7210_v27 = vsel %vm7198_vm11, %v7192_v6, %v7209_v21  ;;  %v15240_v31 = vsel %vm6947_vm2, %v6950_v26, %v6953_v56  ;;  %vm7159_vm9 = vcmp.eq.s32.totalorder %v15157_v8, 2  ;;  %v7012_v55 = vadd.s32 %v15132_v32, %v15141_v23  ;;  %v15794_v26 = vld [vmem:[#allocation8_spill] sm:$0xff] }
 0x6bf   :  { %v7207_v54 = vsel %vm7197_vm6, %v7204_v10, %v7206_v44  ;;  %v7211_v30 = vsel %vm7197_vm6, %v7208_v12, %v7210_v27  ;;  %vm7156_vm12 = vcmp.eq.s32.totalorder %v15157_v8, 0  ;;  %v7024_v36 = vclz %v7731_v14 }
 0x6c0   :  { %v7045_v25 = vsel %vm15191_vm0, 0, %v15219_v59  ;;  %v7219_v56 = vmul.u32 %v15164_v49, %v7203_v28  ;;  %v7296_v38 = vmul.f32 %v15136_v37, %v14254_v57  ;;  %vm7155_vm13 = vcmp.lt.s32.totalorder %v15157_v8, 2 }
 0x6c1   :  { %v15258_v32 = vmul.u32.u64.low %v15164_v49, %v7211_v30  ;;  %v15259_v23 = vmul.u32.u64.high %v15164_v49, %v7211_v30, %v15258_v32  ;;  %v15262_v15 = vmul.u32.u64.low %v15164_v49, %v7207_v54  ;;  %v15263_v63 = vmul.u32.u64.high %v15164_v49, %v7207_v54, %v15262_v15 }
 0x6c2   :  { %v7732_v50 = vadd.s32 4294967294, %v7024_v36  ;;  %v7297_v1 = vmul.f32 %v15136_v37, %v14453_v2  ;;  %v7298_v6 = vmul.f32 %v15136_v37, %v14264_v42  ;;  %v7299_v57 = vmul.f32 %v15136_v37, %v14538_v52 }
 0x6c3   :  { %vm6320_vm14 = vweird.f32 %v15758_v51  ;;  %vm6216_vm8 = vweird.f32 %v15762_v47  ;;  %v7300_v19 = vmul.f32 %v7280_v17, %v15791_v5  ;;  %v7301_v49 = vmul.f32 %v7280_v17, %v15792_v33 }
 0x6c4   :  { %v7302_v11 = vmul.f32 %v7280_v17, %v15793_v18  ;;  %v7303_v53 = vmul.f32 %v7280_v17, %v15794_v26  ;;  %vm6424_vm3 = vweird.f32 %v14068_v4  ;;  %vm6944_vm5 = vweird.f32 %v14205_v34  ;;  %v8293_v37 = vpop.eup %8292  ;;  %v15796_v4 = vld [vmem:[#allocation17_spill] sm:$0xff]  ;;  %v15798_v34 = vld [vmem:[#allocation22_spill] sm:$0xff] }
 0x6c5   :  { %vm7733_vm10 = vcmp.lt.s32.totalorder %v7732_v50, 0  ;;  %v7304_v42 = vmul.f32 %v7280_v17, %v14668_v48  ;;  %v7305_v2 = vmul.f32 %v7280_v17, %v14764_v0  ;;  %v7306_v52 = vmul.f32 %v7280_v17, %v14743_v9  ;;  %v8295_v16 = vpop.eup %8294  ;;  %v15797_v18 = vld [vmem:[#allocation9_spill] sm:$0xff] }
 0x6c6   :  { %v7027_v45 = vsel %vm7733_vm10, 0, %v7732_v50  ;;  %vm7221_vm15 = vc.u32 %v15259_v23, %v15262_v15  ;;  %v7222_v10 = vadd.s32 1, %v15263_v63  ;;  %v7307_v28 = vmul.f32 %v7280_v17, %v14888_v40 }
 0x6c7   :  { %v7160_v12 = vxor.u32 2147483648, %v8293_v37  ;;  %v7028_v21 = vsub.s32 32, %v7027_v45  ;;  %v7029_v14 = vshll.u32 %v15205_v13, %v7027_v45  ;;  %v7032_v44 = vsub.s32 4294967266, %v7027_v45  ;;  %v15800_v45 = vld [vmem:[#allocation11_spill] sm:$0xff] }
 0x6c8   :  { %v7157_v48 = vxor.u32 2147483648, %v8295_v16  ;;  %v7223_v0 = vsel %vm7221_vm15, %v7222_v10, %v15263_v63  ;;  %v7324_v9 = vadd.f32 %v7300_v19, %v15155_v43  ;;  %v7333_v27 = vadd.f32 %v7301_v49, %v15169_v39 }
 0x6c9   :  { %v7161_v54 = vsel %vm7159_vm9, %v7160_v12, %v8295_v16  ;;  %v7030_v30 = vshrl.u32 %v7012_v55, %v7028_v21  ;;  %v7033_v36 = vadd.s32 127, %v7032_v44  ;;  %v7224_v40 = vadd.s32 %v7223_v0, %v7219_v56 }
 0x6ca   :  { %v7158_v17 = vsel %vm7156_vm12, %v8293_v37, %v7157_v48  ;;  %v7342_v13 = vadd.f32 %v7302_v11, %v15176_v35  ;;  %v7351_v32 = vadd.f32 %v7303_v53, %v7295_v7  ;;  %v7360_v50 = vadd.f32 %v7304_v42, %v7296_v38 }
 0x6cb   :  { %v7162_v63 = vsel %vm7155_vm13, %v7158_v17, %v7161_v54  ;;  %v7031_v43 = vor.u32 %v7030_v30, %v7029_v14  ;;  %v7034_v5 = vshll.u32 %v7033_v36, 23  ;;  %v7225_v39 = vadd.s32 536870912, %v7224_v40 }
 0x6cc   :  { %vm7152_vm2 = vweird.f32 %v14312_v24  ;;  %v7369_v19 = vadd.f32 %v7305_v2, %v7297_v1  ;;  %v7378_v33 = vadd.f32 %v7306_v52, %v7298_v6  ;;  %v7387_v55 = vadd.f32 %v7307_v28, %v7299_v57  ;;  %v15795_v57 = vld [vmem:[#allocation15_spill] sm:$0xff] }
 0x6cd   :  { %v6331_v56 = vsel %vm6320_vm14, nan, %v15054_v20  ;;  %v6227_v35 = vsel %vm6216_vm8, nan, %v15078_v41  ;;  %v7035_v7 = vor.u32 4788187, %v7034_v5  ;;  %v15305_v38 = vshrl.u32 %v7225_v39, 30  ;;  %v15317_v20 = vpop.permute.xlu1 %7289 }
 0x6ce   :  { %v6435_v8 = vsel %vm6424_vm3, nan, %v15149_v29  ;;  %v6955_v24 = vsel %vm6944_vm5, nan, %v15240_v31  ;;  %v7163_v1 = vsel %vm7152_vm2, nan, %v7162_v63  ;;  %v7049_v51 = vadd.s32 3, %v7045_v25  ;;  %v15799_v25 = vld [vmem:[#allocation12_spill] sm:$0xff] }
 0x6cf   :  { %v7036_v47 = vand.u32 2147483647, %v7035_v7  ;;  %v7038_v41 = vcvt.s32.f32 %v7031_v43  ;;  %v7227_v6 = vshll.u32 %v15305_v38, 30  ;;  %v7308_v49 = vmul.f32 %v7285_v46, %v15795_v57 }
 0x6d0   :  { %v7309_v29 = vmul.f32 %v7285_v46, %v15796_v4  ;;  %v7310_v11 = vmul.f32 %v7285_v46, %v15797_v18  ;;  %v7311_v31 = vmul.f32 %v7285_v46, %v15798_v34  ;;  %v7312_v26 = vmul.f32 %v7285_v46, %v14977_v60 }
 0x6d1   :  { %v7039_v53 = vmul.f32 %v7038_v41, %v7036_v47  ;;  %v15325_v42 = vsub.s32 %v7224_v40, %v7227_v6  ;;  %v7313_v59 = vmul.f32 %v7285_v46, %v6227_v35  ;;  %v7316_v2 = vmul.f32 %v15317_v20, %v15799_v25 }
 0x6d2   :  { %v7314_v52 = vmul.f32 %v7285_v46, %v6331_v56  ;;  %v7317_v37 = vmul.f32 %v15317_v20, %v14109_v62  ;;  %v7318_v10 = vmul.f32 %v15317_v20, %v15800_v45  ;;  %v7319_v28 = vmul.f32 %v15317_v20, %v14242_v3 }
 0x6d3   :  { %v7040_v16 = vxor.u32 2147483648, %v7039_v53  ;;  %v7230_v60 = vsub.s32 0, %v15325_v42  ;;  %v7320_v12 = vmul.f32 %v15317_v20, %v6955_v24  ;;  %v7325_v21 = vadd.f32 %v7324_v9, %v7308_v49 }
 0x6d4   :  { %v7334_v14 = vadd.f32 %v7333_v27, %v7309_v29  ;;  %v7343_v44 = vadd.f32 %v7342_v13, %v7310_v11  ;;  %v7352_v48 = vadd.f32 %v7351_v32, %v7311_v31  ;;  %v7361_v0 = vadd.f32 %v7360_v50, %v7312_v26 }
 0x6d5   :  { %v7041_v54 = vsel %vm6958_vm1, %v7040_v16, %v7039_v53  ;;  %v7739_v62 = vmin.u32 %v7230_v60, %v15325_v42  ;;  %v7315_v30 = vmul.f32 %v7285_v46, %v6435_v8  ;;  %v7326_v36 = vadd.f32 %v7325_v21, %v7316_v2 }
 0x6d6   :  { %v7044_v3 = vsel %vm15191_vm0, %v14410_v22, %v7041_v54  ;;  %v7335_v40 = vadd.f32 %v7334_v14, %v7317_v37  ;;  %v7344_v17 = vadd.f32 %v7343_v44, %v7318_v10  ;;  %v7353_v63 = vadd.f32 %v7352_v48, %v7319_v28 }
 0x6d7   :  { %8296 = vcosq.f32 %v7044_v3  ;;  %v7232_v9 = vclz %v7739_v62  ;;  %v7322_v27 = vmul.f32 %v15317_v20, %v7163_v1  ;;  %v7050_v13 = vand.u32 3, %v7049_v51 }
 0x6d8   :  { %8298 = vsinq.f32 %v7044_v3  ;;  %v7362_v32 = vadd.f32 %v7361_v0, %v7320_v12  ;;  %v15344_v50 = vadd.f32 %v7369_v19, %v7313_v59  ;;  %v7379_v5 = vadd.f32 %v7378_v33, %v7314_v52 }
 0x6d9   :  { %v7740_v43 = vadd.s32 4294967294, %v7232_v9  ;;  %v15346_v46 = vadd.f32 %v7387_v55, %v7315_v30  ;;  %v7327_v39 = vrot.slane %v7326_v36, 4  ;;  %v7336_v56 = vrot.slane %v7335_v40, 4 }
 0x6da   :  { %v7345_v61 = vrot.slane %v7344_v17, 4  ;;  %v7354_v35 = vrot.slane %v7353_v63, 4  ;;  %v15348_v7 = vadd.f32 %v7379_v5, %v7322_v27  ;;  %vm7052_vm0 = vcmp.eq.s32.totalorder %v7050_v13, 0 }
 0x6db   :  { %vm7741_vm1 = vcmp.lt.s32.totalorder %v7740_v43, 0  ;;  %v7328_v8 = vadd.f32 %v7327_v39, %v7326_v36  ;;  %v7337_v1 = vadd.f32 %v7336_v56, %v7335_v40  ;;  %v7220_v19 = vadd.s32 %v15262_v15, %v15259_v23  ;;  %v15801_v39 = vld [vmem:[#allocation5_spill] sm:$0xff] }
 0x6dc   :  { %v7235_v24 = vsel %vm7741_vm1, 0, %v7740_v43  ;;  %v7346_v47 = vadd.f32 %v7345_v61, %v7344_v17  ;;  %v7355_v51 = vadd.f32 %v7354_v35, %v7353_v63  ;;  %vm7048_vm7 = vweird.f32 %v14410_v22 }
 0x6dd   :  { %v7236_v41 = vsub.s32 32, %v7235_v24  ;;  %v7240_v33 = vsub.s32 4294967266, %v7235_v24  ;;  %v7329_v55 = vrot.slane %v7328_v8, 2  ;;  %v7338_v6 = vrot.slane %v7337_v1, 2 }
 0x6de   :  { %v7347_v57 = vrot.slane %v7346_v47, 2  ;;  %v7356_v49 = vrot.slane %v7355_v51, 2  ;;  %v7363_v4 = vrot.slane %v7362_v32, 4  ;;  %v7237_v29 = vshll.u32 %v15325_v42, %v7235_v24 }
 0x6df   :  { %v7238_v18 = vshrl.u32 %v7220_v19, %v7236_v41  ;;  %v7241_v11 = vadd.s32 127, %v7240_v33  ;;  %v7330_v34 = vadd.f32 %v7329_v55, %v7328_v8  ;;  %vm7055_vm11 = vcmp.eq.s32.totalorder %v7050_v13, 2 }
 0x6e0   :  { %v7339_v31 = vadd.f32 %v7338_v6, %v7337_v1  ;;  %v7348_v26 = vadd.f32 %v7347_v57, %v7346_v47  ;;  %v7357_v53 = vadd.f32 %v7356_v49, %v7355_v51  ;;  %v7364_v42 = vadd.f32 %v7363_v4, %v7362_v32 }
 0x6e1   :  { %v8297_v59 = vpop.eup %8296  ;;  %v7239_v23 = vor.u32 %v7238_v18, %v7237_v29  ;;  %v7242_v15 = vshll.u32 %v7241_v11, 23  ;;  %v7331_v25 = vrot.slane %v7330_v34, 1  ;;  %vm7051_vm4 = vcmp.lt.s32.totalorder %v7050_v13, 2 }
 0x6e2   :  { %v8299_v2 = vpop.eup %8298  ;;  %v7056_v52 = vxor.u32 2147483648, %v8297_v59  ;;  %v7340_v37 = vrot.slane %v7339_v31, 1  ;;  %v7349_v45 = vrot.slane %v7348_v26, 1  ;;  %v7358_v10 = vrot.slane %v7357_v53, 1 }
 0x6e3   :  { %v7053_v28 = vxor.u32 2147483648, %v8299_v2  ;;  %v7243_v16 = vor.u32 4788187, %v7242_v15  ;;  %v7332_v60 = vadd.f32 %v7331_v25, %v7330_v34  ;;  %v7246_v54 = vcvt.s32.f32 %v7239_v23 }
 0x6e4   :  { %v7057_v12 = vsel %vm7055_vm11, %v7056_v52, %v8299_v2  ;;  %v7341_v21 = vadd.f32 %v7340_v37, %v7339_v31  ;;  %v7350_v14 = vadd.f32 %v7349_v45, %v7348_v26  ;;  %v7359_v44 = vadd.f32 %v7358_v10, %v7357_v53 }
 0x6e5   :  { %v7054_v48 = vsel %vm7052_vm0, %v8297_v59, %v7053_v28  ;;  %v7244_v0 = vand.u32 2147483647, %v7243_v16  ;;  %v8342_v3 = vmov 1966171168   ;;  %v7250_v9 = vsub.s32 4, %v15305_v38 }
 0x6e6   :  { %v7058_v62 = vsel %vm7051_vm4, %v7054_v48, %v7057_v12  ;;  %v7404_v30 = vcombine.low %v7332_v60, %v7341_v21  ;;  %v7405_v36 = vcombine.low %v7350_v14, %v7359_v44  ;;  %v7409_v40 = vunpack.c.l.s4 %v8342_v3 }
 0x6e7   :  { %v7059_v17 = vsel %vm7048_vm7, nan, %v7058_v62  ;;  %v7247_v63 = vmul.f32 %v7246_v54, %v7244_v0  ;;  %v7365_v27 = vrot.slane %v7364_v42, 2  ;;  %vm7166_vm6 = vcmp.lt.s32.totalorder %v14523_v58, 0 }
 0x6e8   :  { %v7321_v32 = vmul.f32 %v15317_v20, %v7059_v17  ;;  %v7410_v43 = vunpack.c.0.s8 %v7409_v40  ;;  %v15802_v61 = vand.u32 2147483647, %v14523_v58  ;;  %v7251_v22 = vsel %vm7166_vm6, %v7250_v9, %v15305_v38 }
 0x6e9   :  { %v7248_v5 = vxor.u32 2147483648, %v7247_v63  ;;  %v7366_v8 = vadd.f32 %v7365_v27, %v7364_v42  ;;  %v7381_v38 = vrot.slane %v15348_v7, 4  ;;  %vm7256_vm8 = vweird.f32 %v14523_v58 }
 0x6ea   :  { %v7371_v13 = vadd.f32 %v15344_v50, %v7321_v32  ;;  %v7413_v56 = vsub.s32 %v7410_v43, %v15801_v39  ;;  %vm7165_vm9 = vcmp.le.f32.partialorder %v15802_v61, 0.7853982 }
 0x6eb   :  { %v7249_v35 = vsel %vm7166_vm6, %v7248_v5, %v7247_v63  ;;  %v7253_v19 = vsel %vm7165_vm9, 0, %v7251_v22  ;;  %v7367_v50 = vrot.slane %v7366_v8, 1  ;;  %v7382_v23 = vadd.f32 %v7381_v38, %v15348_v7 }
 0x6ec   :  { %v7252_v24 = vsel %vm7165_vm9, %v14523_v58, %v7249_v35  ;;  %v7372_v1 = vrot.slane %v7371_v13, 4  ;;  %v7414_v47 = vrot.slane %v7404_v30, %v7413_v56  ;;  %v7421_v51 = vrot.slane %v7405_v36, %v7413_v56 }
 0x6ed   :  { %8300 = vcosq.f32 %v7252_v24  ;;  %v7257_v6 = vadd.s32 3, %v7253_v19  ;;  %v7368_v49 = vadd.f32 %v7367_v50, %v7366_v8  ;;  %v7383_v37 = vrot.slane %v7382_v23, 2 }
 0x6ee   :  { %8302 = vsinq.f32 %v7252_v24  ;;  %v7373_v41 = vadd.f32 %v7372_v1, %v7371_v13  ;;  %v7436_v33 = vcombine.low %v7414_v47, %v7421_v51 }
 0x6ef   :  { %v7258_v29 = vand.u32 3, %v7257_v6  ;;  %v7384_v10 = vadd.f32 %v7383_v37, %v7382_v23 }
 0x6f0   :  { %v7374_v55 = vrot.slane %v7373_v41, 2  ;;  %v7444_v54 = vrot.slane %v7436_v33, %v7413_v56 }
 0x6f1   :  { %vm7263_vm12 = vcmp.eq.s32.totalorder %v7258_v29, 2  ;;  %vm7260_vm13 = vcmp.eq.s32.totalorder %v7258_v29, 0  ;;  %vm7259_vm14 = vcmp.lt.s32.totalorder %v7258_v29, 2  ;;  %v7385_v60 = vrot.slane %v7384_v10, 1 }
 0x6f2   :  { %v7375_v57 = vadd.f32 %v7374_v55, %v7373_v41 }
 0x6f3   :  { %v7386_v21 = vadd.f32 %v7385_v60, %v7384_v10 }
 0x6f4   :  { %v7376_v4 = vrot.slane %v7375_v57, 1 }
 0x6f6   :  { %v7377_v18 = vadd.f32 %v7376_v4, %v7375_v57 }
 0x6f7   :  { %v8301_v11 = vpop.eup %8300 }
 0x6f8   :  { %v8303_v34 = vpop.eup %8302  ;;  %v7264_v31 = vxor.u32 2147483648, %v8301_v11  ;;  %v7406_v26 = vcombine.low %v7368_v49, %v7377_v18 }
 0x6f9   :  { %v7261_v53 = vxor.u32 2147483648, %v8303_v34 }
 0x6fa   :  { %v7265_v59 = vsel %vm7263_vm12, %v7264_v31, %v8303_v34  ;;  %v7428_v48 = vrot.slane %v7406_v26, %v7413_v56 }
 0x6fb   :  { %v7262_v15 = vsel %vm7260_vm13, %v8301_v11, %v7261_v53 }
 0x6fc   :  { %v7266_v25 = vsel %vm7259_vm14, %v7262_v15, %v7265_v59 }
 0x6fd   :  { %v7267_v2 = vsel %vm7256_vm8, nan, %v7266_v25 }
 0x6fe   :  { %v7323_v52 = vmul.f32 %v15317_v20, %v7267_v2 }
 0x700   :  { %v7389_v45 = vadd.f32 %v15346_v46, %v7323_v52 }
 0x702   :  { %v7390_v28 = vrot.slane %v7389_v45, 4 }
 0x704   :  { %v7391_v16 = vadd.f32 %v7390_v28, %v7389_v45 }
 0x706   :  { %v7392_v42 = vrot.slane %v7391_v16, 2 }
 0x708   :  { %v7393_v12 = vadd.f32 %v7392_v42, %v7391_v16 }
 0x70a   :  { %v7394_v14 = vrot.slane %v7393_v12, 1 }
 0x70c   :  { %v7395_v7 = vadd.f32 %v7394_v14, %v7393_v12 }
 0x70e   :  { %v7407_v44 = vcombine.low %v7386_v21, %v7395_v7 }
 0x710   :  { %v7435_v0 = vrot.slane %v7407_v44, %v7413_v56 }
 0x712   :  { %v7437_v58 = vcombine.low %v7428_v48, %v7435_v0 }
 0x714   :  { %v7451_v20 = vrot.slane %v7437_v58, %v7413_v56 }
 0x716   :  { %v7452_v62 = vcombine.low %v7444_v54, %v7451_v20 }
 0x718   :  { %7454 = vst [vmem:[#allocation2] sm:$0xff] %v7452_v62 }
 0x719   :  { %8320 = shalt.err (!%p8317_p4)
}
 0x71a   :  { %s8321_s27 = scalar_lea.hbm %s15388_s4, 128 }
 0x71b   :  { %p8322_p5 = scmp.ne.s32.totalorder %s15388_s4, %s8321_s27  ;;  %p8325_p6 = scmp.lt.u32.totalorder %s8321_s27, %s15388_s4 }
 0x71d   :  { %p8327_p7 = pnand %p8325_p6, %p8322_p5 }
 0x71f   :  { %8330 = shalt.err (!%p8327_p7)
}
 0x720   :  { %7464 = dma.vmem_to_hbm [thread:$0]  %s7462_s24, 128, %s15388_s4, [#allocation3]  }
 0x721   :  { %8331 = dma.done.wait [#allocation3], 128  }
 0x722   :  { %8332 = vsyncadd [#allocation3], 4294967168 }
 0x723   :  { %7468 = vsyncpa [#allocation3], 1 }

</bundles_post_ra>
